<compile_context>
chip_gen: v7x
topology: tpu7x:2x2x1
jax: 0.10.0
libtpu: 0.0.40
codegen_flags: <defaults>
</compile_context>

<pallas_src>
import functools
import math

import jax
import jax.numpy as jnp
from jax.experimental import pallas as pl
from jax.experimental.pallas import tpu as pltpu


def _log_sigmoid(x):
    # numerically stable log(sigmoid(x)) = min(x, 0) - log1p(exp(-|x|))
    return jnp.minimum(x, 0.0) - jnp.log1p(jnp.exp(-jnp.abs(x)))


def _cbow_kernel(
    ctx_idx_ref,   # SMEM (B*C,)      int32  scalar-prefetched context row ids
    out_idx_ref,   # SMEM (B*(T+N),)  int32  scalar-prefetched target+neg row ids
    emb_in_hbm,    # HBM  (V, D) f32         input-embedding table (pl.ANY)
    emb_out_hbm,   # HBM  (V, D) f32         output-embedding table (pl.ANY)
    loss_ref,      # SMEM (1, 1) f32         scalar loss output
    ctx_buf,       # VMEM (C*bt, D) f32      gathered context rows (position-major)
    out_buf,       # VMEM ((T+N)*bt, D) f32  gathered target+neg rows (position-major)
    sems,          # DMA semaphores, shape (2,)
    acc_ref,       # SMEM (1,) f32           running sum of log-probs
    *,
    bt, C, T, TN, B,
):
    step = pl.program_id(0)

    @pl.when(step == 0)
    def _init():
        acc_ref[0] = jnp.float32(0.0)

    ctx_base = step * (bt * C)
    out_base = step * (bt * TN)

    # ---- fused gather: one row DMA per embedding lookup of this batch tile ----
    copies = []
    for b in range(bt):
        for c in range(C):
            row = ctx_idx_ref[ctx_base + b * C + c]
            cp = pltpu.make_async_copy(
                emb_in_hbm.at[pl.ds(row, 1), :],
                ctx_buf.at[pl.ds(c * bt + b, 1), :],
                sems.at[0],
            )
            cp.start()
            copies.append(cp)
        for j in range(TN):
            row = out_idx_ref[out_base + b * TN + j]
            cp = pltpu.make_async_copy(
                emb_out_hbm.at[pl.ds(row, 1), :],
                out_buf.at[pl.ds(j * bt + b, 1), :],
                sems.at[1],
            )
            cp.start()
            copies.append(cp)
    for cp in copies:
        cp.wait()

    # ---- context mean over the C positions: (bt, D) ----
    v_sum = ctx_buf[pl.ds(0, bt), :]
    for c in range(1, C):
        v_sum = v_sum + ctx_buf[pl.ds(c * bt, bt), :]
    v_mean = v_sum * jnp.float32(1.0 / C)

    # ---- per-row scores, logsigmoid, scalar partial sum ----
    partial = jnp.float32(0.0)
    for j in range(TN):
        u_j = out_buf[pl.ds(j * bt, bt), :]                      # (bt, D)
        s_j = jnp.sum(u_j * v_mean, axis=-1, keepdims=True)      # (bt, 1)
        if j < T:
            partial = partial + jnp.sum(_log_sigmoid(s_j))
        else:
            # The reference negates the gathered neg embeddings; negating the
            # reduced score instead is D-times fewer VPU ops.  Each neg term is
            # added to all T target log-probs before the mean -> weight T.
            partial = partial + jnp.float32(T) * jnp.sum(_log_sigmoid(-s_j))
    acc_ref[0] = acc_ref[0] + partial

    @pl.when(step == pl.num_programs(0) - 1)
    def _finalize():
        loss_ref[0, 0] = acc_ref[0] * jnp.float32(-1.0 / (B * T))


def cbow_forward(emb_in, emb_out, contexts, targets, negs):
    """Replicates CBOW.forward: returns the scalar negative-sampling loss."""
    B, C = contexts.shape
    T = targets.shape[1]
    N = negs.shape[1]
    TN = T + N
    _, D = emb_in.shape

    # Batch tile: sublane-dense (8) whenever it divides B; gcd keeps it a divisor.
    bt = math.gcd(B, 8)
    nb = B // bt

    ctx_idx = contexts.reshape(-1).astype(jnp.int32)                                   # (B*C,)
    out_idx = jnp.concatenate([targets, negs], axis=1).reshape(-1).astype(jnp.int32)   # (B*TN,)

    kernel = functools.partial(_cbow_kernel, bt=bt, C=C, T=T, TN=TN, B=B)

    grid_spec = pltpu.PrefetchScalarGridSpec(
        num_scalar_prefetch=2,
        grid=(nb,),
        in_specs=[
            pl.BlockSpec(memory_space=pl.ANY),   # emb_in stays in HBM (DMA-gathered)
            pl.BlockSpec(memory_space=pl.ANY),   # emb_out stays in HBM (DMA-gathered)
        ],
        out_specs=pl.BlockSpec(memory_space=pltpu.MemorySpace.SMEM),
        scratch_shapes=[
            pltpu.VMEM((C * bt, D), jnp.float32),
            pltpu.VMEM((TN * bt, D), jnp.float32),
            pltpu.SemaphoreType.DMA((2,)),
            pltpu.SMEM((1,), jnp.float32),
        ],
    )

    loss = pl.pallas_call(
        kernel,
        out_shape=jax.ShapeDtypeStruct((1, 1), jnp.float32),
        grid_spec=grid_spec,
        compiler_params=pltpu.CompilerParams(
            # The batch axis reduces into a single shared accumulator.
            dimension_semantics=("arbitrary",),
        ),
    )(ctx_idx, out_idx, emb_in.astype(jnp.float32), emb_out.astype(jnp.float32))
    return loss[0, 0]


def cbow_forward_ref(emb_in, emb_out, contexts, targets, negs):
    """Pure-JAX reference mirroring the PyTorch module."""
    v = jnp.take(emb_in, contexts, axis=0)
    u = jnp.take(emb_out, targets, axis=0)
    u_neg = -jnp.take(emb_out, negs, axis=0)
    v = jnp.mean(v, axis=1, keepdims=True)
    target_scores = jnp.einsum("btd,bkd->bt", u, v)
    neg_scores = jnp.einsum("bnd,bkd->bn", u_neg, v)
    prob = jax.nn.log_sigmoid(target_scores) + jnp.sum(
        jax.nn.log_sigmoid(neg_scores), axis=1, keepdims=True
    )
    return -jnp.mean(prob)


if __name__ == "__main__":
    # Small, deterministic problem size.
    vocab_size = 50
    embedding_dim = 128
    batch = 8
    n_context = 4
    n_target = 1
    n_negs = 5

    key = jax.random.PRNGKey(0)
    k_in, k_out, k_ctx, k_tgt, k_neg = jax.random.split(key, 5)

    # Matches nn.Embedding(...).weight.data.uniform_(-1.0, 1.0)
    emb_in = jax.random.uniform(
        k_in, (vocab_size, embedding_dim), jnp.float32, -1.0, 1.0
    )
    emb_out = jax.random.uniform(
        k_out, (vocab_size, embedding_dim), jnp.float32, -1.0, 1.0
    )

    contexts = jax.random.randint(k_ctx, (batch, n_context), 0, vocab_size, jnp.int32)
    targets = jax.random.randint(k_tgt, (batch, n_target), 0, vocab_size, jnp.int32)
    negs = jax.random.randint(k_neg, (batch, n_negs), 0, vocab_size, jnp.int32)

    loss = jax.jit(cbow_forward)(emb_in, emb_out, contexts, targets, negs)
    loss = jax.block_until_ready(loss)

    ref = jax.block_until_ready(
        cbow_forward_ref(emb_in, emb_out, contexts, targets, negs)
    )
    assert jnp.allclose(loss, ref, rtol=1e-5, atol=1e-5), (loss, ref)

    print("KERNEL_OK")
</pallas_src>

<mosaic_0001>
module attributes {stable_mosaic.version = 11 : i64} {
  func.func @_cbow_kernel(%arg0: i32, %arg1: memref<32xi32, #tpu.memory_space<smem>>, %arg2: memref<48xi32, #tpu.memory_space<smem>>, %arg3: memref<50x128xf32, #tpu.memory_space<any>>, %arg4: memref<50x128xf32, #tpu.memory_space<any>>, %arg5: memref<1x1xf32, #tpu.memory_space<smem>>, %arg6: memref<32x128xf32, #tpu.memory_space<vmem>>, %arg7: memref<48x128xf32, #tpu.memory_space<vmem>>, %arg8: memref<2x!tpu.dma_semaphore, #tpu.memory_space<semaphore_mem>>, %arg9: memref<1xf32, #tpu.memory_space<smem>>) attributes {dimension_semantics = [#tpu.dimension_semantics<arbitrary>], iteration_bounds = array<i64: 1>, scalar_prefetch = 2 : i64, scratch_operands = 4 : i64, tpu.core_type = #tpu.core_type<tc>, window_params = [{}, {}, {transform_indices = @transform_2, window_bounds = array<i64: 1, 1>}]} {
    %c0_i32 = arith.constant 0 : i32
    %0 = arith.cmpi eq, %arg0, %c0_i32 : i32
    %1 = arith.extui %0 : i1 to i32
    %c0_i32_0 = arith.constant 0 : i32
    %2 = arith.cmpi ne, %1, %c0_i32_0 : i32
    scf.if %2 {
      %cst_808 = arith.constant 0.000000e+00 : f32
      %c0_809 = arith.constant 0 : index
      %1097 = memref.load %arg9[%c0_809] : memref<1xf32, #tpu.memory_space<smem>>
      memref.store %cst_808, %arg9[%c0_809] : memref<1xf32, #tpu.memory_space<smem>>
    } else {
    }
    %c32_i32 = arith.constant 32 : i32
    %3 = arith.muli %arg0, %c32_i32 : i32
    %c48_i32 = arith.constant 48 : i32
    %4 = arith.muli %arg0, %c48_i32 : i32
    %c0_i32_1 = arith.constant 0 : i32
    %5 = arith.addi %3, %c0_i32_1 : i32
    %c0_i32_2 = arith.constant 0 : i32
    %6 = arith.addi %5, %c0_i32_2 : i32
    %7 = arith.index_cast %6 : i32 to index
    %8 = memref.load %arg1[%7] : memref<32xi32, #tpu.memory_space<smem>>
    %c0_i32_3 = arith.constant 0 : i32
    %c0_i32_4 = arith.constant 0 : i32
    %9 = tpu.memref_slice %arg3[%8, %c0_i32_4] : memref<50x128xf32, #tpu.memory_space<any>> -> memref<1x128xf32, #tpu.memory_space<any>>
    %c0_i32_5 = arith.constant 0 : i32
    %c0_i32_6 = arith.constant 0 : i32
    %10 = tpu.memref_slice %arg6[%c0_i32_5, %c0_i32_6] : memref<32x128xf32, #tpu.memory_space<vmem>> -> memref<1x128xf32, #tpu.memory_space<vmem>>
    %11 = tpu.memref_slice %arg8[%c0_i32_3] : memref<2x!tpu.dma_semaphore, #tpu.memory_space<semaphore_mem>> -> memref<1x!tpu.dma_semaphore, #tpu.memory_space<semaphore_mem>>
    %12 = tpu.memref_squeeze %11 : memref<1x!tpu.dma_semaphore, #tpu.memory_space<semaphore_mem>> -> memref<!tpu.dma_semaphore, #tpu.memory_space<semaphore_mem>>
    tpu.enqueue_dma source(%9 : memref<1x128xf32, #tpu.memory_space<any>>) target(%10 : memref<1x128xf32, #tpu.memory_space<vmem>>) target_semaphore(%12 : memref<!tpu.dma_semaphore, #tpu.memory_space<semaphore_mem>>)
    %c0_i32_7 = arith.constant 0 : i32
    %13 = arith.addi %3, %c0_i32_7 : i32
    %c1_i32 = arith.constant 1 : i32
    %14 = arith.addi %13, %c1_i32 : i32
    %15 = arith.index_cast %14 : i32 to index
    %16 = memref.load %arg1[%15] : memref<32xi32, #tpu.memory_space<smem>>
    %c0_i32_8 = arith.constant 0 : i32
    %c0_i32_9 = arith.constant 0 : i32
    %17 = tpu.memref_slice %arg3[%16, %c0_i32_9] : memref<50x128xf32, #tpu.memory_space<any>> -> memref<1x128xf32, #tpu.memory_space<any>>
    %c8_i32 = arith.constant 8 : i32
    %c0_i32_10 = arith.constant 0 : i32
    %18 = tpu.memref_slice %arg6[%c8_i32, %c0_i32_10] : memref<32x128xf32, #tpu.memory_space<vmem>> -> memref<1x128xf32, #tpu.memory_space<vmem>>
    %19 = tpu.memref_slice %arg8[%c0_i32_8] : memref<2x!tpu.dma_semaphore, #tpu.memory_space<semaphore_mem>> -> memref<1x!tpu.dma_semaphore, #tpu.memory_space<semaphore_mem>>
    %20 = tpu.memref_squeeze %19 : memref<1x!tpu.dma_semaphore, #tpu.memory_space<semaphore_mem>> -> memref<!tpu.dma_semaphore, #tpu.memory_space<semaphore_mem>>
    tpu.enqueue_dma source(%17 : memref<1x128xf32, #tpu.memory_space<any>>) target(%18 : memref<1x128xf32, #tpu.memory_space<vmem>>) target_semaphore(%20 : memref<!tpu.dma_semaphore, #tpu.memory_space<semaphore_mem>>)
    %c0_i32_11 = arith.constant 0 : i32
    %21 = arith.addi %3, %c0_i32_11 : i32
    %c2_i32 = arith.constant 2 : i32
    %22 = arith.addi %21, %c2_i32 : i32
    %23 = arith.index_cast %22 : i32 to index
    %24 = memref.load %arg1[%23] : memref<32xi32, #tpu.memory_space<smem>>
    %c0_i32_12 = arith.constant 0 : i32
    %c0_i32_13 = arith.constant 0 : i32
    %25 = tpu.memref_slice %arg3[%24, %c0_i32_13] : memref<50x128xf32, #tpu.memory_space<any>> -> memref<1x128xf32, #tpu.memory_space<any>>
    %c16_i32 = arith.constant 16 : i32
    %c0_i32_14 = arith.constant 0 : i32
    %26 = tpu.memref_slice %arg6[%c16_i32, %c0_i32_14] : memref<32x128xf32, #tpu.memory_space<vmem>> -> memref<1x128xf32, #tpu.memory_space<vmem>>
    %27 = tpu.memref_slice %arg8[%c0_i32_12] : memref<2x!tpu.dma_semaphore, #tpu.memory_space<semaphore_mem>> -> memref<1x!tpu.dma_semaphore, #tpu.memory_space<semaphore_mem>>
    %28 = tpu.memref_squeeze %27 : memref<1x!tpu.dma_semaphore, #tpu.memory_space<semaphore_mem>> -> memref<!tpu.dma_semaphore, #tpu.memory_space<semaphore_mem>>
    tpu.enqueue_dma source(%25 : memref<1x128xf32, #tpu.memory_space<any>>) target(%26 : memref<1x128xf32, #tpu.memory_space<vmem>>) target_semaphore(%28 : memref<!tpu.dma_semaphore, #tpu.memory_space<semaphore_mem>>)
    %c0_i32_15 = arith.constant 0 : i32
    %29 = arith.addi %3, %c0_i32_15 : i32
    %c3_i32 = arith.constant 3 : i32
    %30 = arith.addi %29, %c3_i32 : i32
    %31 = arith.index_cast %30 : i32 to index
    %32 = memref.load %arg1[%31] : memref<32xi32, #tpu.memory_space<smem>>
    %c0_i32_16 = arith.constant 0 : i32
    %c0_i32_17 = arith.constant 0 : i32
    %33 = tpu.memref_slice %arg3[%32, %c0_i32_17] : memref<50x128xf32, #tpu.memory_space<any>> -> memref<1x128xf32, #tpu.memory_space<any>>
    %c24_i32 = arith.constant 24 : i32
    %c0_i32_18 = arith.constant 0 : i32
    %34 = tpu.memref_slice %arg6[%c24_i32, %c0_i32_18] : memref<32x128xf32, #tpu.memory_space<vmem>> -> memref<1x128xf32, #tpu.memory_space<vmem>>
    %35 = tpu.memref_slice %arg8[%c0_i32_16] : memref<2x!tpu.dma_semaphore, #tpu.memory_space<semaphore_mem>> -> memref<1x!tpu.dma_semaphore, #tpu.memory_space<semaphore_mem>>
    %36 = tpu.memref_squeeze %35 : memref<1x!tpu.dma_semaphore, #tpu.memory_space<semaphore_mem>> -> memref<!tpu.dma_semaphore, #tpu.memory_space<semaphore_mem>>
    tpu.enqueue_dma source(%33 : memref<1x128xf32, #tpu.memory_space<any>>) target(%34 : memref<1x128xf32, #tpu.memory_space<vmem>>) target_semaphore(%36 : memref<!tpu.dma_semaphore, #tpu.memory_space<semaphore_mem>>)
    %c0_i32_19 = arith.constant 0 : i32
    %37 = arith.addi %4, %c0_i32_19 : i32
    %c0_i32_20 = arith.constant 0 : i32
    %38 = arith.addi %37, %c0_i32_20 : i32
    %39 = arith.index_cast %38 : i32 to index
    %40 = memref.load %arg2[%39] : memref<48xi32, #tpu.memory_space<smem>>
    %c1_i32_21 = arith.constant 1 : i32
    %c0_i32_22 = arith.constant 0 : i32
    %41 = tpu.memref_slice %arg4[%40, %c0_i32_22] : memref<50x128xf32, #tpu.memory_space<any>> -> memref<1x128xf32, #tpu.memory_space<any>>
    %c0_i32_23 = arith.constant 0 : i32
    %c0_i32_24 = arith.constant 0 : i32
    %42 = tpu.memref_slice %arg7[%c0_i32_23, %c0_i32_24] : memref<48x128xf32, #tpu.memory_space<vmem>> -> memref<1x128xf32, #tpu.memory_space<vmem>>
    %43 = tpu.memref_slice %arg8[%c1_i32_21] : memref<2x!tpu.dma_semaphore, #tpu.memory_space<semaphore_mem>> -> memref<1x!tpu.dma_semaphore, #tpu.memory_space<semaphore_mem>>
    %44 = tpu.memref_squeeze %43 : memref<1x!tpu.dma_semaphore, #tpu.memory_space<semaphore_mem>> -> memref<!tpu.dma_semaphore, #tpu.memory_space<semaphore_mem>>
    tpu.enqueue_dma source(%41 : memref<1x128xf32, #tpu.memory_space<any>>) target(%42 : memref<1x128xf32, #tpu.memory_space<vmem>>) target_semaphore(%44 : memref<!tpu.dma_semaphore, #tpu.memory_space<semaphore_mem>>)
    %c0_i32_25 = arith.constant 0 : i32
    %45 = arith.addi %4, %c0_i32_25 : i32
    %c1_i32_26 = arith.constant 1 : i32
    %46 = arith.addi %45, %c1_i32_26 : i32
    %47 = arith.index_cast %46 : i32 to index
    %48 = memref.load %arg2[%47] : memref<48xi32, #tpu.memory_space<smem>>
    %c1_i32_27 = arith.constant 1 : i32
    %c0_i32_28 = arith.constant 0 : i32
    %49 = tpu.memref_slice %arg4[%48, %c0_i32_28] : memref<50x128xf32, #tpu.memory_space<any>> -> memref<1x128xf32, #tpu.memory_space<any>>
    %c8_i32_29 = arith.constant 8 : i32
    %c0_i32_30 = arith.constant 0 : i32
    %50 = tpu.memref_slice %arg7[%c8_i32_29, %c0_i32_30] : memref<48x128xf32, #tpu.memory_space<vmem>> -> memref<1x128xf32, #tpu.memory_space<vmem>>
    %51 = tpu.memref_slice %arg8[%c1_i32_27] : memref<2x!tpu.dma_semaphore, #tpu.memory_space<semaphore_mem>> -> memref<1x!tpu.dma_semaphore, #tpu.memory_space<semaphore_mem>>
    %52 = tpu.memref_squeeze %51 : memref<1x!tpu.dma_semaphore, #tpu.memory_space<semaphore_mem>> -> memref<!tpu.dma_semaphore, #tpu.memory_space<semaphore_mem>>
    tpu.enqueue_dma source(%49 : memref<1x128xf32, #tpu.memory_space<any>>) target(%50 : memref<1x128xf32, #tpu.memory_space<vmem>>) target_semaphore(%52 : memref<!tpu.dma_semaphore, #tpu.memory_space<semaphore_mem>>)
    %c0_i32_31 = arith.constant 0 : i32
    %53 = arith.addi %4, %c0_i32_31 : i32
    %c2_i32_32 = arith.constant 2 : i32
    %54 = arith.addi %53, %c2_i32_32 : i32
    %55 = arith.index_cast %54 : i32 to index
    %56 = memref.load %arg2[%55] : memref<48xi32, #tpu.memory_space<smem>>
    %c1_i32_33 = arith.constant 1 : i32
    %c0_i32_34 = arith.constant 0 : i32
    %57 = tpu.memref_slice %arg4[%56, %c0_i32_34] : memref<50x128xf32, #tpu.memory_space<any>> -> memref<1x128xf32, #tpu.memory_space<any>>
    %c16_i32_35 = arith.constant 16 : i32
    %c0_i32_36 = arith.constant 0 : i32
    %58 = tpu.memref_slice %arg7[%c16_i32_35, %c0_i32_36] : memref<48x128xf32, #tpu.memory_space<vmem>> -> memref<1x128xf32, #tpu.memory_space<vmem>>
    %59 = tpu.memref_slice %arg8[%c1_i32_33] : memref<2x!tpu.dma_semaphore, #tpu.memory_space<semaphore_mem>> -> memref<1x!tpu.dma_semaphore, #tpu.memory_space<semaphore_mem>>
    %60 = tpu.memref_squeeze %59 : memref<1x!tpu.dma_semaphore, #tpu.memory_space<semaphore_mem>> -> memref<!tpu.dma_semaphore, #tpu.memory_space<semaphore_mem>>
    tpu.enqueue_dma source(%57 : memref<1x128xf32, #tpu.memory_space<any>>) target(%58 : memref<1x128xf32, #tpu.memory_space<vmem>>) target_semaphore(%60 : memref<!tpu.dma_semaphore, #tpu.memory_space<semaphore_mem>>)
    %c0_i32_37 = arith.constant 0 : i32
    %61 = arith.addi %4, %c0_i32_37 : i32
    %c3_i32_38 = arith.constant 3 : i32
    %62 = arith.addi %61, %c3_i32_38 : i32
    %63 = arith.index_cast %62 : i32 to index
    %64 = memref.load %arg2[%63] : memref<48xi32, #tpu.memory_space<smem>>
    %c1_i32_39 = arith.constant 1 : i32
    %c0_i32_40 = arith.constant 0 : i32
    %65 = tpu.memref_slice %arg4[%64, %c0_i32_40] : memref<50x128xf32, #tpu.memory_space<any>> -> memref<1x128xf32, #tpu.memory_space<any>>
    %c24_i32_41 = arith.constant 24 : i32
    %c0_i32_42 = arith.constant 0 : i32
    %66 = tpu.memref_slice %arg7[%c24_i32_41, %c0_i32_42] : memref<48x128xf32, #tpu.memory_space<vmem>> -> memref<1x128xf32, #tpu.memory_space<vmem>>
    %67 = tpu.memref_slice %arg8[%c1_i32_39] : memref<2x!tpu.dma_semaphore, #tpu.memory_space<semaphore_mem>> -> memref<1x!tpu.dma_semaphore, #tpu.memory_space<semaphore_mem>>
    %68 = tpu.memref_squeeze %67 : memref<1x!tpu.dma_semaphore, #tpu.memory_space<semaphore_mem>> -> memref<!tpu.dma_semaphore, #tpu.memory_space<semaphore_mem>>
    tpu.enqueue_dma source(%65 : memref<1x128xf32, #tpu.memory_space<any>>) target(%66 : memref<1x128xf32, #tpu.memory_space<vmem>>) target_semaphore(%68 : memref<!tpu.dma_semaphore, #tpu.memory_space<semaphore_mem>>)
    %c0_i32_43 = arith.constant 0 : i32
    %69 = arith.addi %4, %c0_i32_43 : i32
    %c4_i32 = arith.constant 4 : i32
    %70 = arith.addi %69, %c4_i32 : i32
    %71 = arith.index_cast %70 : i32 to index
    %72 = memref.load %arg2[%71] : memref<48xi32, #tpu.memory_space<smem>>
    %c1_i32_44 = arith.constant 1 : i32
    %c0_i32_45 = arith.constant 0 : i32
    %73 = tpu.memref_slice %arg4[%72, %c0_i32_45] : memref<50x128xf32, #tpu.memory_space<any>> -> memref<1x128xf32, #tpu.memory_space<any>>
    %c32_i32_46 = arith.constant 32 : i32
    %c0_i32_47 = arith.constant 0 : i32
    %74 = tpu.memref_slice %arg7[%c32_i32_46, %c0_i32_47] : memref<48x128xf32, #tpu.memory_space<vmem>> -> memref<1x128xf32, #tpu.memory_space<vmem>>
    %75 = tpu.memref_slice %arg8[%c1_i32_44] : memref<2x!tpu.dma_semaphore, #tpu.memory_space<semaphore_mem>> -> memref<1x!tpu.dma_semaphore, #tpu.memory_space<semaphore_mem>>
    %76 = tpu.memref_squeeze %75 : memref<1x!tpu.dma_semaphore, #tpu.memory_space<semaphore_mem>> -> memref<!tpu.dma_semaphore, #tpu.memory_space<semaphore_mem>>
    tpu.enqueue_dma source(%73 : memref<1x128xf32, #tpu.memory_space<any>>) target(%74 : memref<1x128xf32, #tpu.memory_space<vmem>>) target_semaphore(%76 : memref<!tpu.dma_semaphore, #tpu.memory_space<semaphore_mem>>)
    %c0_i32_48 = arith.constant 0 : i32
    %77 = arith.addi %4, %c0_i32_48 : i32
    %c5_i32 = arith.constant 5 : i32
    %78 = arith.addi %77, %c5_i32 : i32
    %79 = arith.index_cast %78 : i32 to index
    %80 = memref.load %arg2[%79] : memref<48xi32, #tpu.memory_space<smem>>
    %c1_i32_49 = arith.constant 1 : i32
    %c0_i32_50 = arith.constant 0 : i32
    %81 = tpu.memref_slice %arg4[%80, %c0_i32_50] : memref<50x128xf32, #tpu.memory_space<any>> -> memref<1x128xf32, #tpu.memory_space<any>>
    %c40_i32 = arith.constant 40 : i32
    %c0_i32_51 = arith.constant 0 : i32
    %82 = tpu.memref_slice %arg7[%c40_i32, %c0_i32_51] : memref<48x128xf32, #tpu.memory_space<vmem>> -> memref<1x128xf32, #tpu.memory_space<vmem>>
    %83 = tpu.memref_slice %arg8[%c1_i32_49] : memref<2x!tpu.dma_semaphore, #tpu.memory_space<semaphore_mem>> -> memref<1x!tpu.dma_semaphore, #tpu.memory_space<semaphore_mem>>
    %84 = tpu.memref_squeeze %83 : memref<1x!tpu.dma_semaphore, #tpu.memory_space<semaphore_mem>> -> memref<!tpu.dma_semaphore, #tpu.memory_space<semaphore_mem>>
    tpu.enqueue_dma source(%81 : memref<1x128xf32, #tpu.memory_space<any>>) target(%82 : memref<1x128xf32, #tpu.memory_space<vmem>>) target_semaphore(%84 : memref<!tpu.dma_semaphore, #tpu.memory_space<semaphore_mem>>)
    %c4_i32_52 = arith.constant 4 : i32
    %85 = arith.addi %3, %c4_i32_52 : i32
    %c0_i32_53 = arith.constant 0 : i32
    %86 = arith.addi %85, %c0_i32_53 : i32
    %87 = arith.index_cast %86 : i32 to index
    %88 = memref.load %arg1[%87] : memref<32xi32, #tpu.memory_space<smem>>
    %c0_i32_54 = arith.constant 0 : i32
    %c0_i32_55 = arith.constant 0 : i32
    %89 = tpu.memref_slice %arg3[%88, %c0_i32_55] : memref<50x128xf32, #tpu.memory_space<any>> -> memref<1x128xf32, #tpu.memory_space<any>>
    %c1_i32_56 = arith.constant 1 : i32
    %c0_i32_57 = arith.constant 0 : i32
    %90 = tpu.memref_slice %arg6[%c1_i32_56, %c0_i32_57] : memref<32x128xf32, #tpu.memory_space<vmem>> -> memref<1x128xf32, #tpu.memory_space<vmem>>
    %91 = tpu.memref_slice %arg8[%c0_i32_54] : memref<2x!tpu.dma_semaphore, #tpu.memory_space<semaphore_mem>> -> memref<1x!tpu.dma_semaphore, #tpu.memory_space<semaphore_mem>>
    %92 = tpu.memref_squeeze %91 : memref<1x!tpu.dma_semaphore, #tpu.memory_space<semaphore_mem>> -> memref<!tpu.dma_semaphore, #tpu.memory_space<semaphore_mem>>
    tpu.enqueue_dma source(%89 : memref<1x128xf32, #tpu.memory_space<any>>) target(%90 : memref<1x128xf32, #tpu.memory_space<vmem>>) target_semaphore(%92 : memref<!tpu.dma_semaphore, #tpu.memory_space<semaphore_mem>>)
    %c4_i32_58 = arith.constant 4 : i32
    %93 = arith.addi %3, %c4_i32_58 : i32
    %c1_i32_59 = arith.constant 1 : i32
    %94 = arith.addi %93, %c1_i32_59 : i32
    %95 = arith.index_cast %94 : i32 to index
    %96 = memref.load %arg1[%95] : memref<32xi32, #tpu.memory_space<smem>>
    %c0_i32_60 = arith.constant 0 : i32
    %c0_i32_61 = arith.constant 0 : i32
    %97 = tpu.memref_slice %arg3[%96, %c0_i32_61] : memref<50x128xf32, #tpu.memory_space<any>> -> memref<1x128xf32, #tpu.memory_space<any>>
    %c9_i32 = arith.constant 9 : i32
    %c0_i32_62 = arith.constant 0 : i32
    %98 = tpu.memref_slice %arg6[%c9_i32, %c0_i32_62] : memref<32x128xf32, #tpu.memory_space<vmem>> -> memref<1x128xf32, #tpu.memory_space<vmem>>
    %99 = tpu.memref_slice %arg8[%c0_i32_60] : memref<2x!tpu.dma_semaphore, #tpu.memory_space<semaphore_mem>> -> memref<1x!tpu.dma_semaphore, #tpu.memory_space<semaphore_mem>>
    %100 = tpu.memref_squeeze %99 : memref<1x!tpu.dma_semaphore, #tpu.memory_space<semaphore_mem>> -> memref<!tpu.dma_semaphore, #tpu.memory_space<semaphore_mem>>
    tpu.enqueue_dma source(%97 : memref<1x128xf32, #tpu.memory_space<any>>) target(%98 : memref<1x128xf32, #tpu.memory_space<vmem>>) target_semaphore(%100 : memref<!tpu.dma_semaphore, #tpu.memory_space<semaphore_mem>>)
    %c4_i32_63 = arith.constant 4 : i32
    %101 = arith.addi %3, %c4_i32_63 : i32
    %c2_i32_64 = arith.constant 2 : i32
    %102 = arith.addi %101, %c2_i32_64 : i32
    %103 = arith.index_cast %102 : i32 to index
    %104 = memref.load %arg1[%103] : memref<32xi32, #tpu.memory_space<smem>>
    %c0_i32_65 = arith.constant 0 : i32
    %c0_i32_66 = arith.constant 0 : i32
    %105 = tpu.memref_slice %arg3[%104, %c0_i32_66] : memref<50x128xf32, #tpu.memory_space<any>> -> memref<1x128xf32, #tpu.memory_space<any>>
    %c17_i32 = arith.constant 17 : i32
    %c0_i32_67 = arith.constant 0 : i32
    %106 = tpu.memref_slice %arg6[%c17_i32, %c0_i32_67] : memref<32x128xf32, #tpu.memory_space<vmem>> -> memref<1x128xf32, #tpu.memory_space<vmem>>
    %107 = tpu.memref_slice %arg8[%c0_i32_65] : memref<2x!tpu.dma_semaphore, #tpu.memory_space<semaphore_mem>> -> memref<1x!tpu.dma_semaphore, #tpu.memory_space<semaphore_mem>>
    %108 = tpu.memref_squeeze %107 : memref<1x!tpu.dma_semaphore, #tpu.memory_space<semaphore_mem>> -> memref<!tpu.dma_semaphore, #tpu.memory_space<semaphore_mem>>
    tpu.enqueue_dma source(%105 : memref<1x128xf32, #tpu.memory_space<any>>) target(%106 : memref<1x128xf32, #tpu.memory_space<vmem>>) target_semaphore(%108 : memref<!tpu.dma_semaphore, #tpu.memory_space<semaphore_mem>>)
    %c4_i32_68 = arith.constant 4 : i32
    %109 = arith.addi %3, %c4_i32_68 : i32
    %c3_i32_69 = arith.constant 3 : i32
    %110 = arith.addi %109, %c3_i32_69 : i32
    %111 = arith.index_cast %110 : i32 to index
    %112 = memref.load %arg1[%111] : memref<32xi32, #tpu.memory_space<smem>>
    %c0_i32_70 = arith.constant 0 : i32
    %c0_i32_71 = arith.constant 0 : i32
    %113 = tpu.memref_slice %arg3[%112, %c0_i32_71] : memref<50x128xf32, #tpu.memory_space<any>> -> memref<1x128xf32, #tpu.memory_space<any>>
    %c25_i32 = arith.constant 25 : i32
    %c0_i32_72 = arith.constant 0 : i32
    %114 = tpu.memref_slice %arg6[%c25_i32, %c0_i32_72] : memref<32x128xf32, #tpu.memory_space<vmem>> -> memref<1x128xf32, #tpu.memory_space<vmem>>
    %115 = tpu.memref_slice %arg8[%c0_i32_70] : memref<2x!tpu.dma_semaphore, #tpu.memory_space<semaphore_mem>> -> memref<1x!tpu.dma_semaphore, #tpu.memory_space<semaphore_mem>>
    %116 = tpu.memref_squeeze %115 : memref<1x!tpu.dma_semaphore, #tpu.memory_space<semaphore_mem>> -> memref<!tpu.dma_semaphore, #tpu.memory_space<semaphore_mem>>
    tpu.enqueue_dma source(%113 : memref<1x128xf32, #tpu.memory_space<any>>) target(%114 : memref<1x128xf32, #tpu.memory_space<vmem>>) target_semaphore(%116 : memref<!tpu.dma_semaphore, #tpu.memory_space<semaphore_mem>>)
    %c6_i32 = arith.constant 6 : i32
    %117 = arith.addi %4, %c6_i32 : i32
    %c0_i32_73 = arith.constant 0 : i32
    %118 = arith.addi %117, %c0_i32_73 : i32
    %119 = arith.index_cast %118 : i32 to index
    %120 = memref.load %arg2[%119] : memref<48xi32, #tpu.memory_space<smem>>
    %c1_i32_74 = arith.constant 1 : i32
    %c0_i32_75 = arith.constant 0 : i32
    %121 = tpu.memref_slice %arg4[%120, %c0_i32_75] : memref<50x128xf32, #tpu.memory_space<any>> -> memref<1x128xf32, #tpu.memory_space<any>>
    %c1_i32_76 = arith.constant 1 : i32
    %c0_i32_77 = arith.constant 0 : i32
    %122 = tpu.memref_slice %arg7[%c1_i32_76, %c0_i32_77] : memref<48x128xf32, #tpu.memory_space<vmem>> -> memref<1x128xf32, #tpu.memory_space<vmem>>
    %123 = tpu.memref_slice %arg8[%c1_i32_74] : memref<2x!tpu.dma_semaphore, #tpu.memory_space<semaphore_mem>> -> memref<1x!tpu.dma_semaphore, #tpu.memory_space<semaphore_mem>>
    %124 = tpu.memref_squeeze %123 : memref<1x!tpu.dma_semaphore, #tpu.memory_space<semaphore_mem>> -> memref<!tpu.dma_semaphore, #tpu.memory_space<semaphore_mem>>
    tpu.enqueue_dma source(%121 : memref<1x128xf32, #tpu.memory_space<any>>) target(%122 : memref<1x128xf32, #tpu.memory_space<vmem>>) target_semaphore(%124 : memref<!tpu.dma_semaphore, #tpu.memory_space<semaphore_mem>>)
    %c6_i32_78 = arith.constant 6 : i32
    %125 = arith.addi %4, %c6_i32_78 : i32
    %c1_i32_79 = arith.constant 1 : i32
    %126 = arith.addi %125, %c1_i32_79 : i32
    %127 = arith.index_cast %126 : i32 to index
    %128 = memref.load %arg2[%127] : memref<48xi32, #tpu.memory_space<smem>>
    %c1_i32_80 = arith.constant 1 : i32
    %c0_i32_81 = arith.constant 0 : i32
    %129 = tpu.memref_slice %arg4[%128, %c0_i32_81] : memref<50x128xf32, #tpu.memory_space<any>> -> memref<1x128xf32, #tpu.memory_space<any>>
    %c9_i32_82 = arith.constant 9 : i32
    %c0_i32_83 = arith.constant 0 : i32
    %130 = tpu.memref_slice %arg7[%c9_i32_82, %c0_i32_83] : memref<48x128xf32, #tpu.memory_space<vmem>> -> memref<1x128xf32, #tpu.memory_space<vmem>>
    %131 = tpu.memref_slice %arg8[%c1_i32_80] : memref<2x!tpu.dma_semaphore, #tpu.memory_space<semaphore_mem>> -> memref<1x!tpu.dma_semaphore, #tpu.memory_space<semaphore_mem>>
    %132 = tpu.memref_squeeze %131 : memref<1x!tpu.dma_semaphore, #tpu.memory_space<semaphore_mem>> -> memref<!tpu.dma_semaphore, #tpu.memory_space<semaphore_mem>>
    tpu.enqueue_dma source(%129 : memref<1x128xf32, #tpu.memory_space<any>>) target(%130 : memref<1x128xf32, #tpu.memory_space<vmem>>) target_semaphore(%132 : memref<!tpu.dma_semaphore, #tpu.memory_space<semaphore_mem>>)
    %c6_i32_84 = arith.constant 6 : i32
    %133 = arith.addi %4, %c6_i32_84 : i32
    %c2_i32_85 = arith.constant 2 : i32
    %134 = arith.addi %133, %c2_i32_85 : i32
    %135 = arith.index_cast %134 : i32 to index
    %136 = memref.load %arg2[%135] : memref<48xi32, #tpu.memory_space<smem>>
    %c1_i32_86 = arith.constant 1 : i32
    %c0_i32_87 = arith.constant 0 : i32
    %137 = tpu.memref_slice %arg4[%136, %c0_i32_87] : memref<50x128xf32, #tpu.memory_space<any>> -> memref<1x128xf32, #tpu.memory_space<any>>
    %c17_i32_88 = arith.constant 17 : i32
    %c0_i32_89 = arith.constant 0 : i32
    %138 = tpu.memref_slice %arg7[%c17_i32_88, %c0_i32_89] : memref<48x128xf32, #tpu.memory_space<vmem>> -> memref<1x128xf32, #tpu.memory_space<vmem>>
    %139 = tpu.memref_slice %arg8[%c1_i32_86] : memref<2x!tpu.dma_semaphore, #tpu.memory_space<semaphore_mem>> -> memref<1x!tpu.dma_semaphore, #tpu.memory_space<semaphore_mem>>
    %140 = tpu.memref_squeeze %139 : memref<1x!tpu.dma_semaphore, #tpu.memory_space<semaphore_mem>> -> memref<!tpu.dma_semaphore, #tpu.memory_space<semaphore_mem>>
    tpu.enqueue_dma source(%137 : memref<1x128xf32, #tpu.memory_space<any>>) target(%138 : memref<1x128xf32, #tpu.memory_space<vmem>>) target_semaphore(%140 : memref<!tpu.dma_semaphore, #tpu.memory_space<semaphore_mem>>)
    %c6_i32_90 = arith.constant 6 : i32
    %141 = arith.addi %4, %c6_i32_90 : i32
    %c3_i32_91 = arith.constant 3 : i32
    %142 = arith.addi %141, %c3_i32_91 : i32
    %143 = arith.index_cast %142 : i32 to index
    %144 = memref.load %arg2[%143] : memref<48xi32, #tpu.memory_space<smem>>
    %c1_i32_92 = arith.constant 1 : i32
    %c0_i32_93 = arith.constant 0 : i32
    %145 = tpu.memref_slice %arg4[%144, %c0_i32_93] : memref<50x128xf32, #tpu.memory_space<any>> -> memref<1x128xf32, #tpu.memory_space<any>>
    %c25_i32_94 = arith.constant 25 : i32
    %c0_i32_95 = arith.constant 0 : i32
    %146 = tpu.memref_slice %arg7[%c25_i32_94, %c0_i32_95] : memref<48x128xf32, #tpu.memory_space<vmem>> -> memref<1x128xf32, #tpu.memory_space<vmem>>
    %147 = tpu.memref_slice %arg8[%c1_i32_92] : memref<2x!tpu.dma_semaphore, #tpu.memory_space<semaphore_mem>> -> memref<1x!tpu.dma_semaphore, #tpu.memory_space<semaphore_mem>>
    %148 = tpu.memref_squeeze %147 : memref<1x!tpu.dma_semaphore, #tpu.memory_space<semaphore_mem>> -> memref<!tpu.dma_semaphore, #tpu.memory_space<semaphore_mem>>
    tpu.enqueue_dma source(%145 : memref<1x128xf32, #tpu.memory_space<any>>) target(%146 : memref<1x128xf32, #tpu.memory_space<vmem>>) target_semaphore(%148 : memref<!tpu.dma_semaphore, #tpu.memory_space<semaphore_mem>>)
    %c6_i32_96 = arith.constant 6 : i32
    %149 = arith.addi %4, %c6_i32_96 : i32
    %c4_i32_97 = arith.constant 4 : i32
    %150 = arith.addi %149, %c4_i32_97 : i32
    %151 = arith.index_cast %150 : i32 to index
    %152 = memref.load %arg2[%151] : memref<48xi32, #tpu.memory_space<smem>>
    %c1_i32_98 = arith.constant 1 : i32
    %c0_i32_99 = arith.constant 0 : i32
    %153 = tpu.memref_slice %arg4[%152, %c0_i32_99] : memref<50x128xf32, #tpu.memory_space<any>> -> memref<1x128xf32, #tpu.memory_space<any>>
    %c33_i32 = arith.constant 33 : i32
    %c0_i32_100 = arith.constant 0 : i32
    %154 = tpu.memref_slice %arg7[%c33_i32, %c0_i32_100] : memref<48x128xf32, #tpu.memory_space<vmem>> -> memref<1x128xf32, #tpu.memory_space<vmem>>
    %155 = tpu.memref_slice %arg8[%c1_i32_98] : memref<2x!tpu.dma_semaphore, #tpu.memory_space<semaphore_mem>> -> memref<1x!tpu.dma_semaphore, #tpu.memory_space<semaphore_mem>>
    %156 = tpu.memref_squeeze %155 : memref<1x!tpu.dma_semaphore, #tpu.memory_space<semaphore_mem>> -> memref<!tpu.dma_semaphore, #tpu.memory_space<semaphore_mem>>
    tpu.enqueue_dma source(%153 : memref<1x128xf32, #tpu.memory_space<any>>) target(%154 : memref<1x128xf32, #tpu.memory_space<vmem>>) target_semaphore(%156 : memref<!tpu.dma_semaphore, #tpu.memory_space<semaphore_mem>>)
    %c6_i32_101 = arith.constant 6 : i32
    %157 = arith.addi %4, %c6_i32_101 : i32
    %c5_i32_102 = arith.constant 5 : i32
    %158 = arith.addi %157, %c5_i32_102 : i32
    %159 = arith.index_cast %158 : i32 to index
    %160 = memref.load %arg2[%159] : memref<48xi32, #tpu.memory_space<smem>>
    %c1_i32_103 = arith.constant 1 : i32
    %c0_i32_104 = arith.constant 0 : i32
    %161 = tpu.memref_slice %arg4[%160, %c0_i32_104] : memref<50x128xf32, #tpu.memory_space<any>> -> memref<1x128xf32, #tpu.memory_space<any>>
    %c41_i32 = arith.constant 41 : i32
    %c0_i32_105 = arith.constant 0 : i32
    %162 = tpu.memref_slice %arg7[%c41_i32, %c0_i32_105] : memref<48x128xf32, #tpu.memory_space<vmem>> -> memref<1x128xf32, #tpu.memory_space<vmem>>
    %163 = tpu.memref_slice %arg8[%c1_i32_103] : memref<2x!tpu.dma_semaphore, #tpu.memory_space<semaphore_mem>> -> memref<1x!tpu.dma_semaphore, #tpu.memory_space<semaphore_mem>>
    %164 = tpu.memref_squeeze %163 : memref<1x!tpu.dma_semaphore, #tpu.memory_space<semaphore_mem>> -> memref<!tpu.dma_semaphore, #tpu.memory_space<semaphore_mem>>
    tpu.enqueue_dma source(%161 : memref<1x128xf32, #tpu.memory_space<any>>) target(%162 : memref<1x128xf32, #tpu.memory_space<vmem>>) target_semaphore(%164 : memref<!tpu.dma_semaphore, #tpu.memory_space<semaphore_mem>>)
    %c8_i32_106 = arith.constant 8 : i32
    %165 = arith.addi %3, %c8_i32_106 : i32
    %c0_i32_107 = arith.constant 0 : i32
    %166 = arith.addi %165, %c0_i32_107 : i32
    %167 = arith.index_cast %166 : i32 to index
    %168 = memref.load %arg1[%167] : memref<32xi32, #tpu.memory_space<smem>>
    %c0_i32_108 = arith.constant 0 : i32
    %c0_i32_109 = arith.constant 0 : i32
    %169 = tpu.memref_slice %arg3[%168, %c0_i32_109] : memref<50x128xf32, #tpu.memory_space<any>> -> memref<1x128xf32, #tpu.memory_space<any>>
    %c2_i32_110 = arith.constant 2 : i32
    %c0_i32_111 = arith.constant 0 : i32
    %170 = tpu.memref_slice %arg6[%c2_i32_110, %c0_i32_111] : memref<32x128xf32, #tpu.memory_space<vmem>> -> memref<1x128xf32, #tpu.memory_space<vmem>>
    %171 = tpu.memref_slice %arg8[%c0_i32_108] : memref<2x!tpu.dma_semaphore, #tpu.memory_space<semaphore_mem>> -> memref<1x!tpu.dma_semaphore, #tpu.memory_space<semaphore_mem>>
    %172 = tpu.memref_squeeze %171 : memref<1x!tpu.dma_semaphore, #tpu.memory_space<semaphore_mem>> -> memref<!tpu.dma_semaphore, #tpu.memory_space<semaphore_mem>>
    tpu.enqueue_dma source(%169 : memref<1x128xf32, #tpu.memory_space<any>>) target(%170 : memref<1x128xf32, #tpu.memory_space<vmem>>) target_semaphore(%172 : memref<!tpu.dma_semaphore, #tpu.memory_space<semaphore_mem>>)
    %c8_i32_112 = arith.constant 8 : i32
    %173 = arith.addi %3, %c8_i32_112 : i32
    %c1_i32_113 = arith.constant 1 : i32
    %174 = arith.addi %173, %c1_i32_113 : i32
    %175 = arith.index_cast %174 : i32 to index
    %176 = memref.load %arg1[%175] : memref<32xi32, #tpu.memory_space<smem>>
    %c0_i32_114 = arith.constant 0 : i32
    %c0_i32_115 = arith.constant 0 : i32
    %177 = tpu.memref_slice %arg3[%176, %c0_i32_115] : memref<50x128xf32, #tpu.memory_space<any>> -> memref<1x128xf32, #tpu.memory_space<any>>
    %c10_i32 = arith.constant 10 : i32
    %c0_i32_116 = arith.constant 0 : i32
    %178 = tpu.memref_slice %arg6[%c10_i32, %c0_i32_116] : memref<32x128xf32, #tpu.memory_space<vmem>> -> memref<1x128xf32, #tpu.memory_space<vmem>>
    %179 = tpu.memref_slice %arg8[%c0_i32_114] : memref<2x!tpu.dma_semaphore, #tpu.memory_space<semaphore_mem>> -> memref<1x!tpu.dma_semaphore, #tpu.memory_space<semaphore_mem>>
    %180 = tpu.memref_squeeze %179 : memref<1x!tpu.dma_semaphore, #tpu.memory_space<semaphore_mem>> -> memref<!tpu.dma_semaphore, #tpu.memory_space<semaphore_mem>>
    tpu.enqueue_dma source(%177 : memref<1x128xf32, #tpu.memory_space<any>>) target(%178 : memref<1x128xf32, #tpu.memory_space<vmem>>) target_semaphore(%180 : memref<!tpu.dma_semaphore, #tpu.memory_space<semaphore_mem>>)
    %c8_i32_117 = arith.constant 8 : i32
    %181 = arith.addi %3, %c8_i32_117 : i32
    %c2_i32_118 = arith.constant 2 : i32
    %182 = arith.addi %181, %c2_i32_118 : i32
    %183 = arith.index_cast %182 : i32 to index
    %184 = memref.load %arg1[%183] : memref<32xi32, #tpu.memory_space<smem>>
    %c0_i32_119 = arith.constant 0 : i32
    %c0_i32_120 = arith.constant 0 : i32
    %185 = tpu.memref_slice %arg3[%184, %c0_i32_120] : memref<50x128xf32, #tpu.memory_space<any>> -> memref<1x128xf32, #tpu.memory_space<any>>
    %c18_i32 = arith.constant 18 : i32
    %c0_i32_121 = arith.constant 0 : i32
    %186 = tpu.memref_slice %arg6[%c18_i32, %c0_i32_121] : memref<32x128xf32, #tpu.memory_space<vmem>> -> memref<1x128xf32, #tpu.memory_space<vmem>>
    %187 = tpu.memref_slice %arg8[%c0_i32_119] : memref<2x!tpu.dma_semaphore, #tpu.memory_space<semaphore_mem>> -> memref<1x!tpu.dma_semaphore, #tpu.memory_space<semaphore_mem>>
    %188 = tpu.memref_squeeze %187 : memref<1x!tpu.dma_semaphore, #tpu.memory_space<semaphore_mem>> -> memref<!tpu.dma_semaphore, #tpu.memory_space<semaphore_mem>>
    tpu.enqueue_dma source(%185 : memref<1x128xf32, #tpu.memory_space<any>>) target(%186 : memref<1x128xf32, #tpu.memory_space<vmem>>) target_semaphore(%188 : memref<!tpu.dma_semaphore, #tpu.memory_space<semaphore_mem>>)
    %c8_i32_122 = arith.constant 8 : i32
    %189 = arith.addi %3, %c8_i32_122 : i32
    %c3_i32_123 = arith.constant 3 : i32
    %190 = arith.addi %189, %c3_i32_123 : i32
    %191 = arith.index_cast %190 : i32 to index
    %192 = memref.load %arg1[%191] : memref<32xi32, #tpu.memory_space<smem>>
    %c0_i32_124 = arith.constant 0 : i32
    %c0_i32_125 = arith.constant 0 : i32
    %193 = tpu.memref_slice %arg3[%192, %c0_i32_125] : memref<50x128xf32, #tpu.memory_space<any>> -> memref<1x128xf32, #tpu.memory_space<any>>
    %c26_i32 = arith.constant 26 : i32
    %c0_i32_126 = arith.constant 0 : i32
    %194 = tpu.memref_slice %arg6[%c26_i32, %c0_i32_126] : memref<32x128xf32, #tpu.memory_space<vmem>> -> memref<1x128xf32, #tpu.memory_space<vmem>>
    %195 = tpu.memref_slice %arg8[%c0_i32_124] : memref<2x!tpu.dma_semaphore, #tpu.memory_space<semaphore_mem>> -> memref<1x!tpu.dma_semaphore, #tpu.memory_space<semaphore_mem>>
    %196 = tpu.memref_squeeze %195 : memref<1x!tpu.dma_semaphore, #tpu.memory_space<semaphore_mem>> -> memref<!tpu.dma_semaphore, #tpu.memory_space<semaphore_mem>>
    tpu.enqueue_dma source(%193 : memref<1x128xf32, #tpu.memory_space<any>>) target(%194 : memref<1x128xf32, #tpu.memory_space<vmem>>) target_semaphore(%196 : memref<!tpu.dma_semaphore, #tpu.memory_space<semaphore_mem>>)
    %c12_i32 = arith.constant 12 : i32
    %197 = arith.addi %4, %c12_i32 : i32
    %c0_i32_127 = arith.constant 0 : i32
    %198 = arith.addi %197, %c0_i32_127 : i32
    %199 = arith.index_cast %198 : i32 to index
    %200 = memref.load %arg2[%199] : memref<48xi32, #tpu.memory_space<smem>>
    %c1_i32_128 = arith.constant 1 : i32
    %c0_i32_129 = arith.constant 0 : i32
    %201 = tpu.memref_slice %arg4[%200, %c0_i32_129] : memref<50x128xf32, #tpu.memory_space<any>> -> memref<1x128xf32, #tpu.memory_space<any>>
    %c2_i32_130 = arith.constant 2 : i32
    %c0_i32_131 = arith.constant 0 : i32
    %202 = tpu.memref_slice %arg7[%c2_i32_130, %c0_i32_131] : memref<48x128xf32, #tpu.memory_space<vmem>> -> memref<1x128xf32, #tpu.memory_space<vmem>>
    %203 = tpu.memref_slice %arg8[%c1_i32_128] : memref<2x!tpu.dma_semaphore, #tpu.memory_space<semaphore_mem>> -> memref<1x!tpu.dma_semaphore, #tpu.memory_space<semaphore_mem>>
    %204 = tpu.memref_squeeze %203 : memref<1x!tpu.dma_semaphore, #tpu.memory_space<semaphore_mem>> -> memref<!tpu.dma_semaphore, #tpu.memory_space<semaphore_mem>>
    tpu.enqueue_dma source(%201 : memref<1x128xf32, #tpu.memory_space<any>>) target(%202 : memref<1x128xf32, #tpu.memory_space<vmem>>) target_semaphore(%204 : memref<!tpu.dma_semaphore, #tpu.memory_space<semaphore_mem>>)
    %c12_i32_132 = arith.constant 12 : i32
    %205 = arith.addi %4, %c12_i32_132 : i32
    %c1_i32_133 = arith.constant 1 : i32
    %206 = arith.addi %205, %c1_i32_133 : i32
    %207 = arith.index_cast %206 : i32 to index
    %208 = memref.load %arg2[%207] : memref<48xi32, #tpu.memory_space<smem>>
    %c1_i32_134 = arith.constant 1 : i32
    %c0_i32_135 = arith.constant 0 : i32
    %209 = tpu.memref_slice %arg4[%208, %c0_i32_135] : memref<50x128xf32, #tpu.memory_space<any>> -> memref<1x128xf32, #tpu.memory_space<any>>
    %c10_i32_136 = arith.constant 10 : i32
    %c0_i32_137 = arith.constant 0 : i32
    %210 = tpu.memref_slice %arg7[%c10_i32_136, %c0_i32_137] : memref<48x128xf32, #tpu.memory_space<vmem>> -> memref<1x128xf32, #tpu.memory_space<vmem>>
    %211 = tpu.memref_slice %arg8[%c1_i32_134] : memref<2x!tpu.dma_semaphore, #tpu.memory_space<semaphore_mem>> -> memref<1x!tpu.dma_semaphore, #tpu.memory_space<semaphore_mem>>
    %212 = tpu.memref_squeeze %211 : memref<1x!tpu.dma_semaphore, #tpu.memory_space<semaphore_mem>> -> memref<!tpu.dma_semaphore, #tpu.memory_space<semaphore_mem>>
    tpu.enqueue_dma source(%209 : memref<1x128xf32, #tpu.memory_space<any>>) target(%210 : memref<1x128xf32, #tpu.memory_space<vmem>>) target_semaphore(%212 : memref<!tpu.dma_semaphore, #tpu.memory_space<semaphore_mem>>)
    %c12_i32_138 = arith.constant 12 : i32
    %213 = arith.addi %4, %c12_i32_138 : i32
    %c2_i32_139 = arith.constant 2 : i32
    %214 = arith.addi %213, %c2_i32_139 : i32
    %215 = arith.index_cast %214 : i32 to index
    %216 = memref.load %arg2[%215] : memref<48xi32, #tpu.memory_space<smem>>
    %c1_i32_140 = arith.constant 1 : i32
    %c0_i32_141 = arith.constant 0 : i32
    %217 = tpu.memref_slice %arg4[%216, %c0_i32_141] : memref<50x128xf32, #tpu.memory_space<any>> -> memref<1x128xf32, #tpu.memory_space<any>>
    %c18_i32_142 = arith.constant 18 : i32
    %c0_i32_143 = arith.constant 0 : i32
    %218 = tpu.memref_slice %arg7[%c18_i32_142, %c0_i32_143] : memref<48x128xf32, #tpu.memory_space<vmem>> -> memref<1x128xf32, #tpu.memory_space<vmem>>
    %219 = tpu.memref_slice %arg8[%c1_i32_140] : memref<2x!tpu.dma_semaphore, #tpu.memory_space<semaphore_mem>> -> memref<1x!tpu.dma_semaphore, #tpu.memory_space<semaphore_mem>>
    %220 = tpu.memref_squeeze %219 : memref<1x!tpu.dma_semaphore, #tpu.memory_space<semaphore_mem>> -> memref<!tpu.dma_semaphore, #tpu.memory_space<semaphore_mem>>
    tpu.enqueue_dma source(%217 : memref<1x128xf32, #tpu.memory_space<any>>) target(%218 : memref<1x128xf32, #tpu.memory_space<vmem>>) target_semaphore(%220 : memref<!tpu.dma_semaphore, #tpu.memory_space<semaphore_mem>>)
    %c12_i32_144 = arith.constant 12 : i32
    %221 = arith.addi %4, %c12_i32_144 : i32
    %c3_i32_145 = arith.constant 3 : i32
    %222 = arith.addi %221, %c3_i32_145 : i32
    %223 = arith.index_cast %222 : i32 to index
    %224 = memref.load %arg2[%223] : memref<48xi32, #tpu.memory_space<smem>>
    %c1_i32_146 = arith.constant 1 : i32
    %c0_i32_147 = arith.constant 0 : i32
    %225 = tpu.memref_slice %arg4[%224, %c0_i32_147] : memref<50x128xf32, #tpu.memory_space<any>> -> memref<1x128xf32, #tpu.memory_space<any>>
    %c26_i32_148 = arith.constant 26 : i32
    %c0_i32_149 = arith.constant 0 : i32
    %226 = tpu.memref_slice %arg7[%c26_i32_148, %c0_i32_149] : memref<48x128xf32, #tpu.memory_space<vmem>> -> memref<1x128xf32, #tpu.memory_space<vmem>>
    %227 = tpu.memref_slice %arg8[%c1_i32_146] : memref<2x!tpu.dma_semaphore, #tpu.memory_space<semaphore_mem>> -> memref<1x!tpu.dma_semaphore, #tpu.memory_space<semaphore_mem>>
    %228 = tpu.memref_squeeze %227 : memref<1x!tpu.dma_semaphore, #tpu.memory_space<semaphore_mem>> -> memref<!tpu.dma_semaphore, #tpu.memory_space<semaphore_mem>>
    tpu.enqueue_dma source(%225 : memref<1x128xf32, #tpu.memory_space<any>>) target(%226 : memref<1x128xf32, #tpu.memory_space<vmem>>) target_semaphore(%228 : memref<!tpu.dma_semaphore, #tpu.memory_space<semaphore_mem>>)
    %c12_i32_150 = arith.constant 12 : i32
    %229 = arith.addi %4, %c12_i32_150 : i32
    %c4_i32_151 = arith.constant 4 : i32
    %230 = arith.addi %229, %c4_i32_151 : i32
    %231 = arith.index_cast %230 : i32 to index
    %232 = memref.load %arg2[%231] : memref<48xi32, #tpu.memory_space<smem>>
    %c1_i32_152 = arith.constant 1 : i32
    %c0_i32_153 = arith.constant 0 : i32
    %233 = tpu.memref_slice %arg4[%232, %c0_i32_153] : memref<50x128xf32, #tpu.memory_space<any>> -> memref<1x128xf32, #tpu.memory_space<any>>
    %c34_i32 = arith.constant 34 : i32
    %c0_i32_154 = arith.constant 0 : i32
    %234 = tpu.memref_slice %arg7[%c34_i32, %c0_i32_154] : memref<48x128xf32, #tpu.memory_space<vmem>> -> memref<1x128xf32, #tpu.memory_space<vmem>>
    %235 = tpu.memref_slice %arg8[%c1_i32_152] : memref<2x!tpu.dma_semaphore, #tpu.memory_space<semaphore_mem>> -> memref<1x!tpu.dma_semaphore, #tpu.memory_space<semaphore_mem>>
    %236 = tpu.memref_squeeze %235 : memref<1x!tpu.dma_semaphore, #tpu.memory_space<semaphore_mem>> -> memref<!tpu.dma_semaphore, #tpu.memory_space<semaphore_mem>>
    tpu.enqueue_dma source(%233 : memref<1x128xf32, #tpu.memory_space<any>>) target(%234 : memref<1x128xf32, #tpu.memory_space<vmem>>) target_semaphore(%236 : memref<!tpu.dma_semaphore, #tpu.memory_space<semaphore_mem>>)
    %c12_i32_155 = arith.constant 12 : i32
    %237 = arith.addi %4, %c12_i32_155 : i32
    %c5_i32_156 = arith.constant 5 : i32
    %238 = arith.addi %237, %c5_i32_156 : i32
    %239 = arith.index_cast %238 : i32 to index
    %240 = memref.load %arg2[%239] : memref<48xi32, #tpu.memory_space<smem>>
    %c1_i32_157 = arith.constant 1 : i32
    %c0_i32_158 = arith.constant 0 : i32
    %241 = tpu.memref_slice %arg4[%240, %c0_i32_158] : memref<50x128xf32, #tpu.memory_space<any>> -> memref<1x128xf32, #tpu.memory_space<any>>
    %c42_i32 = arith.constant 42 : i32
    %c0_i32_159 = arith.constant 0 : i32
    %242 = tpu.memref_slice %arg7[%c42_i32, %c0_i32_159] : memref<48x128xf32, #tpu.memory_space<vmem>> -> memref<1x128xf32, #tpu.memory_space<vmem>>
    %243 = tpu.memref_slice %arg8[%c1_i32_157] : memref<2x!tpu.dma_semaphore, #tpu.memory_space<semaphore_mem>> -> memref<1x!tpu.dma_semaphore, #tpu.memory_space<semaphore_mem>>
    %244 = tpu.memref_squeeze %243 : memref<1x!tpu.dma_semaphore, #tpu.memory_space<semaphore_mem>> -> memref<!tpu.dma_semaphore, #tpu.memory_space<semaphore_mem>>
    tpu.enqueue_dma source(%241 : memref<1x128xf32, #tpu.memory_space<any>>) target(%242 : memref<1x128xf32, #tpu.memory_space<vmem>>) target_semaphore(%244 : memref<!tpu.dma_semaphore, #tpu.memory_space<semaphore_mem>>)
    %c12_i32_160 = arith.constant 12 : i32
    %245 = arith.addi %3, %c12_i32_160 : i32
    %c0_i32_161 = arith.constant 0 : i32
    %246 = arith.addi %245, %c0_i32_161 : i32
    %247 = arith.index_cast %246 : i32 to index
    %248 = memref.load %arg1[%247] : memref<32xi32, #tpu.memory_space<smem>>
    %c0_i32_162 = arith.constant 0 : i32
    %c0_i32_163 = arith.constant 0 : i32
    %249 = tpu.memref_slice %arg3[%248, %c0_i32_163] : memref<50x128xf32, #tpu.memory_space<any>> -> memref<1x128xf32, #tpu.memory_space<any>>
    %c3_i32_164 = arith.constant 3 : i32
    %c0_i32_165 = arith.constant 0 : i32
    %250 = tpu.memref_slice %arg6[%c3_i32_164, %c0_i32_165] : memref<32x128xf32, #tpu.memory_space<vmem>> -> memref<1x128xf32, #tpu.memory_space<vmem>>
    %251 = tpu.memref_slice %arg8[%c0_i32_162] : memref<2x!tpu.dma_semaphore, #tpu.memory_space<semaphore_mem>> -> memref<1x!tpu.dma_semaphore, #tpu.memory_space<semaphore_mem>>
    %252 = tpu.memref_squeeze %251 : memref<1x!tpu.dma_semaphore, #tpu.memory_space<semaphore_mem>> -> memref<!tpu.dma_semaphore, #tpu.memory_space<semaphore_mem>>
    tpu.enqueue_dma source(%249 : memref<1x128xf32, #tpu.memory_space<any>>) target(%250 : memref<1x128xf32, #tpu.memory_space<vmem>>) target_semaphore(%252 : memref<!tpu.dma_semaphore, #tpu.memory_space<semaphore_mem>>)
    %c12_i32_166 = arith.constant 12 : i32
    %253 = arith.addi %3, %c12_i32_166 : i32
    %c1_i32_167 = arith.constant 1 : i32
    %254 = arith.addi %253, %c1_i32_167 : i32
    %255 = arith.index_cast %254 : i32 to index
    %256 = memref.load %arg1[%255] : memref<32xi32, #tpu.memory_space<smem>>
    %c0_i32_168 = arith.constant 0 : i32
    %c0_i32_169 = arith.constant 0 : i32
    %257 = tpu.memref_slice %arg3[%256, %c0_i32_169] : memref<50x128xf32, #tpu.memory_space<any>> -> memref<1x128xf32, #tpu.memory_space<any>>
    %c11_i32 = arith.constant 11 : i32
    %c0_i32_170 = arith.constant 0 : i32
    %258 = tpu.memref_slice %arg6[%c11_i32, %c0_i32_170] : memref<32x128xf32, #tpu.memory_space<vmem>> -> memref<1x128xf32, #tpu.memory_space<vmem>>
    %259 = tpu.memref_slice %arg8[%c0_i32_168] : memref<2x!tpu.dma_semaphore, #tpu.memory_space<semaphore_mem>> -> memref<1x!tpu.dma_semaphore, #tpu.memory_space<semaphore_mem>>
    %260 = tpu.memref_squeeze %259 : memref<1x!tpu.dma_semaphore, #tpu.memory_space<semaphore_mem>> -> memref<!tpu.dma_semaphore, #tpu.memory_space<semaphore_mem>>
    tpu.enqueue_dma source(%257 : memref<1x128xf32, #tpu.memory_space<any>>) target(%258 : memref<1x128xf32, #tpu.memory_space<vmem>>) target_semaphore(%260 : memref<!tpu.dma_semaphore, #tpu.memory_space<semaphore_mem>>)
    %c12_i32_171 = arith.constant 12 : i32
    %261 = arith.addi %3, %c12_i32_171 : i32
    %c2_i32_172 = arith.constant 2 : i32
    %262 = arith.addi %261, %c2_i32_172 : i32
    %263 = arith.index_cast %262 : i32 to index
    %264 = memref.load %arg1[%263] : memref<32xi32, #tpu.memory_space<smem>>
    %c0_i32_173 = arith.constant 0 : i32
    %c0_i32_174 = arith.constant 0 : i32
    %265 = tpu.memref_slice %arg3[%264, %c0_i32_174] : memref<50x128xf32, #tpu.memory_space<any>> -> memref<1x128xf32, #tpu.memory_space<any>>
    %c19_i32 = arith.constant 19 : i32
    %c0_i32_175 = arith.constant 0 : i32
    %266 = tpu.memref_slice %arg6[%c19_i32, %c0_i32_175] : memref<32x128xf32, #tpu.memory_space<vmem>> -> memref<1x128xf32, #tpu.memory_space<vmem>>
    %267 = tpu.memref_slice %arg8[%c0_i32_173] : memref<2x!tpu.dma_semaphore, #tpu.memory_space<semaphore_mem>> -> memref<1x!tpu.dma_semaphore, #tpu.memory_space<semaphore_mem>>
    %268 = tpu.memref_squeeze %267 : memref<1x!tpu.dma_semaphore, #tpu.memory_space<semaphore_mem>> -> memref<!tpu.dma_semaphore, #tpu.memory_space<semaphore_mem>>
    tpu.enqueue_dma source(%265 : memref<1x128xf32, #tpu.memory_space<any>>) target(%266 : memref<1x128xf32, #tpu.memory_space<vmem>>) target_semaphore(%268 : memref<!tpu.dma_semaphore, #tpu.memory_space<semaphore_mem>>)
    %c12_i32_176 = arith.constant 12 : i32
    %269 = arith.addi %3, %c12_i32_176 : i32
    %c3_i32_177 = arith.constant 3 : i32
    %270 = arith.addi %269, %c3_i32_177 : i32
    %271 = arith.index_cast %270 : i32 to index
    %272 = memref.load %arg1[%271] : memref<32xi32, #tpu.memory_space<smem>>
    %c0_i32_178 = arith.constant 0 : i32
    %c0_i32_179 = arith.constant 0 : i32
    %273 = tpu.memref_slice %arg3[%272, %c0_i32_179] : memref<50x128xf32, #tpu.memory_space<any>> -> memref<1x128xf32, #tpu.memory_space<any>>
    %c27_i32 = arith.constant 27 : i32
    %c0_i32_180 = arith.constant 0 : i32
    %274 = tpu.memref_slice %arg6[%c27_i32, %c0_i32_180] : memref<32x128xf32, #tpu.memory_space<vmem>> -> memref<1x128xf32, #tpu.memory_space<vmem>>
    %275 = tpu.memref_slice %arg8[%c0_i32_178] : memref<2x!tpu.dma_semaphore, #tpu.memory_space<semaphore_mem>> -> memref<1x!tpu.dma_semaphore, #tpu.memory_space<semaphore_mem>>
    %276 = tpu.memref_squeeze %275 : memref<1x!tpu.dma_semaphore, #tpu.memory_space<semaphore_mem>> -> memref<!tpu.dma_semaphore, #tpu.memory_space<semaphore_mem>>
    tpu.enqueue_dma source(%273 : memref<1x128xf32, #tpu.memory_space<any>>) target(%274 : memref<1x128xf32, #tpu.memory_space<vmem>>) target_semaphore(%276 : memref<!tpu.dma_semaphore, #tpu.memory_space<semaphore_mem>>)
    %c18_i32_181 = arith.constant 18 : i32
    %277 = arith.addi %4, %c18_i32_181 : i32
    %c0_i32_182 = arith.constant 0 : i32
    %278 = arith.addi %277, %c0_i32_182 : i32
    %279 = arith.index_cast %278 : i32 to index
    %280 = memref.load %arg2[%279] : memref<48xi32, #tpu.memory_space<smem>>
    %c1_i32_183 = arith.constant 1 : i32
    %c0_i32_184 = arith.constant 0 : i32
    %281 = tpu.memref_slice %arg4[%280, %c0_i32_184] : memref<50x128xf32, #tpu.memory_space<any>> -> memref<1x128xf32, #tpu.memory_space<any>>
    %c3_i32_185 = arith.constant 3 : i32
    %c0_i32_186 = arith.constant 0 : i32
    %282 = tpu.memref_slice %arg7[%c3_i32_185, %c0_i32_186] : memref<48x128xf32, #tpu.memory_space<vmem>> -> memref<1x128xf32, #tpu.memory_space<vmem>>
    %283 = tpu.memref_slice %arg8[%c1_i32_183] : memref<2x!tpu.dma_semaphore, #tpu.memory_space<semaphore_mem>> -> memref<1x!tpu.dma_semaphore, #tpu.memory_space<semaphore_mem>>
    %284 = tpu.memref_squeeze %283 : memref<1x!tpu.dma_semaphore, #tpu.memory_space<semaphore_mem>> -> memref<!tpu.dma_semaphore, #tpu.memory_space<semaphore_mem>>
    tpu.enqueue_dma source(%281 : memref<1x128xf32, #tpu.memory_space<any>>) target(%282 : memref<1x128xf32, #tpu.memory_space<vmem>>) target_semaphore(%284 : memref<!tpu.dma_semaphore, #tpu.memory_space<semaphore_mem>>)
    %c18_i32_187 = arith.constant 18 : i32
    %285 = arith.addi %4, %c18_i32_187 : i32
    %c1_i32_188 = arith.constant 1 : i32
    %286 = arith.addi %285, %c1_i32_188 : i32
    %287 = arith.index_cast %286 : i32 to index
    %288 = memref.load %arg2[%287] : memref<48xi32, #tpu.memory_space<smem>>
    %c1_i32_189 = arith.constant 1 : i32
    %c0_i32_190 = arith.constant 0 : i32
    %289 = tpu.memref_slice %arg4[%288, %c0_i32_190] : memref<50x128xf32, #tpu.memory_space<any>> -> memref<1x128xf32, #tpu.memory_space<any>>
    %c11_i32_191 = arith.constant 11 : i32
    %c0_i32_192 = arith.constant 0 : i32
    %290 = tpu.memref_slice %arg7[%c11_i32_191, %c0_i32_192] : memref<48x128xf32, #tpu.memory_space<vmem>> -> memref<1x128xf32, #tpu.memory_space<vmem>>
    %291 = tpu.memref_slice %arg8[%c1_i32_189] : memref<2x!tpu.dma_semaphore, #tpu.memory_space<semaphore_mem>> -> memref<1x!tpu.dma_semaphore, #tpu.memory_space<semaphore_mem>>
    %292 = tpu.memref_squeeze %291 : memref<1x!tpu.dma_semaphore, #tpu.memory_space<semaphore_mem>> -> memref<!tpu.dma_semaphore, #tpu.memory_space<semaphore_mem>>
    tpu.enqueue_dma source(%289 : memref<1x128xf32, #tpu.memory_space<any>>) target(%290 : memref<1x128xf32, #tpu.memory_space<vmem>>) target_semaphore(%292 : memref<!tpu.dma_semaphore, #tpu.memory_space<semaphore_mem>>)
    %c18_i32_193 = arith.constant 18 : i32
    %293 = arith.addi %4, %c18_i32_193 : i32
    %c2_i32_194 = arith.constant 2 : i32
    %294 = arith.addi %293, %c2_i32_194 : i32
    %295 = arith.index_cast %294 : i32 to index
    %296 = memref.load %arg2[%295] : memref<48xi32, #tpu.memory_space<smem>>
    %c1_i32_195 = arith.constant 1 : i32
    %c0_i32_196 = arith.constant 0 : i32
    %297 = tpu.memref_slice %arg4[%296, %c0_i32_196] : memref<50x128xf32, #tpu.memory_space<any>> -> memref<1x128xf32, #tpu.memory_space<any>>
    %c19_i32_197 = arith.constant 19 : i32
    %c0_i32_198 = arith.constant 0 : i32
    %298 = tpu.memref_slice %arg7[%c19_i32_197, %c0_i32_198] : memref<48x128xf32, #tpu.memory_space<vmem>> -> memref<1x128xf32, #tpu.memory_space<vmem>>
    %299 = tpu.memref_slice %arg8[%c1_i32_195] : memref<2x!tpu.dma_semaphore, #tpu.memory_space<semaphore_mem>> -> memref<1x!tpu.dma_semaphore, #tpu.memory_space<semaphore_mem>>
    %300 = tpu.memref_squeeze %299 : memref<1x!tpu.dma_semaphore, #tpu.memory_space<semaphore_mem>> -> memref<!tpu.dma_semaphore, #tpu.memory_space<semaphore_mem>>
    tpu.enqueue_dma source(%297 : memref<1x128xf32, #tpu.memory_space<any>>) target(%298 : memref<1x128xf32, #tpu.memory_space<vmem>>) target_semaphore(%300 : memref<!tpu.dma_semaphore, #tpu.memory_space<semaphore_mem>>)
    %c18_i32_199 = arith.constant 18 : i32
    %301 = arith.addi %4, %c18_i32_199 : i32
    %c3_i32_200 = arith.constant 3 : i32
    %302 = arith.addi %301, %c3_i32_200 : i32
    %303 = arith.index_cast %302 : i32 to index
    %304 = memref.load %arg2[%303] : memref<48xi32, #tpu.memory_space<smem>>
    %c1_i32_201 = arith.constant 1 : i32
    %c0_i32_202 = arith.constant 0 : i32
    %305 = tpu.memref_slice %arg4[%304, %c0_i32_202] : memref<50x128xf32, #tpu.memory_space<any>> -> memref<1x128xf32, #tpu.memory_space<any>>
    %c27_i32_203 = arith.constant 27 : i32
    %c0_i32_204 = arith.constant 0 : i32
    %306 = tpu.memref_slice %arg7[%c27_i32_203, %c0_i32_204] : memref<48x128xf32, #tpu.memory_space<vmem>> -> memref<1x128xf32, #tpu.memory_space<vmem>>
    %307 = tpu.memref_slice %arg8[%c1_i32_201] : memref<2x!tpu.dma_semaphore, #tpu.memory_space<semaphore_mem>> -> memref<1x!tpu.dma_semaphore, #tpu.memory_space<semaphore_mem>>
    %308 = tpu.memref_squeeze %307 : memref<1x!tpu.dma_semaphore, #tpu.memory_space<semaphore_mem>> -> memref<!tpu.dma_semaphore, #tpu.memory_space<semaphore_mem>>
    tpu.enqueue_dma source(%305 : memref<1x128xf32, #tpu.memory_space<any>>) target(%306 : memref<1x128xf32, #tpu.memory_space<vmem>>) target_semaphore(%308 : memref<!tpu.dma_semaphore, #tpu.memory_space<semaphore_mem>>)
    %c18_i32_205 = arith.constant 18 : i32
    %309 = arith.addi %4, %c18_i32_205 : i32
    %c4_i32_206 = arith.constant 4 : i32
    %310 = arith.addi %309, %c4_i32_206 : i32
    %311 = arith.index_cast %310 : i32 to index
    %312 = memref.load %arg2[%311] : memref<48xi32, #tpu.memory_space<smem>>
    %c1_i32_207 = arith.constant 1 : i32
    %c0_i32_208 = arith.constant 0 : i32
    %313 = tpu.memref_slice %arg4[%312, %c0_i32_208] : memref<50x128xf32, #tpu.memory_space<any>> -> memref<1x128xf32, #tpu.memory_space<any>>
    %c35_i32 = arith.constant 35 : i32
    %c0_i32_209 = arith.constant 0 : i32
    %314 = tpu.memref_slice %arg7[%c35_i32, %c0_i32_209] : memref<48x128xf32, #tpu.memory_space<vmem>> -> memref<1x128xf32, #tpu.memory_space<vmem>>
    %315 = tpu.memref_slice %arg8[%c1_i32_207] : memref<2x!tpu.dma_semaphore, #tpu.memory_space<semaphore_mem>> -> memref<1x!tpu.dma_semaphore, #tpu.memory_space<semaphore_mem>>
    %316 = tpu.memref_squeeze %315 : memref<1x!tpu.dma_semaphore, #tpu.memory_space<semaphore_mem>> -> memref<!tpu.dma_semaphore, #tpu.memory_space<semaphore_mem>>
    tpu.enqueue_dma source(%313 : memref<1x128xf32, #tpu.memory_space<any>>) target(%314 : memref<1x128xf32, #tpu.memory_space<vmem>>) target_semaphore(%316 : memref<!tpu.dma_semaphore, #tpu.memory_space<semaphore_mem>>)
    %c18_i32_210 = arith.constant 18 : i32
    %317 = arith.addi %4, %c18_i32_210 : i32
    %c5_i32_211 = arith.constant 5 : i32
    %318 = arith.addi %317, %c5_i32_211 : i32
    %319 = arith.index_cast %318 : i32 to index
    %320 = memref.load %arg2[%319] : memref<48xi32, #tpu.memory_space<smem>>
    %c1_i32_212 = arith.constant 1 : i32
    %c0_i32_213 = arith.constant 0 : i32
    %321 = tpu.memref_slice %arg4[%320, %c0_i32_213] : memref<50x128xf32, #tpu.memory_space<any>> -> memref<1x128xf32, #tpu.memory_space<any>>
    %c43_i32 = arith.constant 43 : i32
    %c0_i32_214 = arith.constant 0 : i32
    %322 = tpu.memref_slice %arg7[%c43_i32, %c0_i32_214] : memref<48x128xf32, #tpu.memory_space<vmem>> -> memref<1x128xf32, #tpu.memory_space<vmem>>
    %323 = tpu.memref_slice %arg8[%c1_i32_212] : memref<2x!tpu.dma_semaphore, #tpu.memory_space<semaphore_mem>> -> memref<1x!tpu.dma_semaphore, #tpu.memory_space<semaphore_mem>>
    %324 = tpu.memref_squeeze %323 : memref<1x!tpu.dma_semaphore, #tpu.memory_space<semaphore_mem>> -> memref<!tpu.dma_semaphore, #tpu.memory_space<semaphore_mem>>
    tpu.enqueue_dma source(%321 : memref<1x128xf32, #tpu.memory_space<any>>) target(%322 : memref<1x128xf32, #tpu.memory_space<vmem>>) target_semaphore(%324 : memref<!tpu.dma_semaphore, #tpu.memory_space<semaphore_mem>>)
    %c16_i32_215 = arith.constant 16 : i32
    %325 = arith.addi %3, %c16_i32_215 : i32
    %c0_i32_216 = arith.constant 0 : i32
    %326 = arith.addi %325, %c0_i32_216 : i32
    %327 = arith.index_cast %326 : i32 to index
    %328 = memref.load %arg1[%327] : memref<32xi32, #tpu.memory_space<smem>>
    %c0_i32_217 = arith.constant 0 : i32
    %c0_i32_218 = arith.constant 0 : i32
    %329 = tpu.memref_slice %arg3[%328, %c0_i32_218] : memref<50x128xf32, #tpu.memory_space<any>> -> memref<1x128xf32, #tpu.memory_space<any>>
    %c4_i32_219 = arith.constant 4 : i32
    %c0_i32_220 = arith.constant 0 : i32
    %330 = tpu.memref_slice %arg6[%c4_i32_219, %c0_i32_220] : memref<32x128xf32, #tpu.memory_space<vmem>> -> memref<1x128xf32, #tpu.memory_space<vmem>>
    %331 = tpu.memref_slice %arg8[%c0_i32_217] : memref<2x!tpu.dma_semaphore, #tpu.memory_space<semaphore_mem>> -> memref<1x!tpu.dma_semaphore, #tpu.memory_space<semaphore_mem>>
    %332 = tpu.memref_squeeze %331 : memref<1x!tpu.dma_semaphore, #tpu.memory_space<semaphore_mem>> -> memref<!tpu.dma_semaphore, #tpu.memory_space<semaphore_mem>>
    tpu.enqueue_dma source(%329 : memref<1x128xf32, #tpu.memory_space<any>>) target(%330 : memref<1x128xf32, #tpu.memory_space<vmem>>) target_semaphore(%332 : memref<!tpu.dma_semaphore, #tpu.memory_space<semaphore_mem>>)
    %c16_i32_221 = arith.constant 16 : i32
    %333 = arith.addi %3, %c16_i32_221 : i32
    %c1_i32_222 = arith.constant 1 : i32
    %334 = arith.addi %333, %c1_i32_222 : i32
    %335 = arith.index_cast %334 : i32 to index
    %336 = memref.load %arg1[%335] : memref<32xi32, #tpu.memory_space<smem>>
    %c0_i32_223 = arith.constant 0 : i32
    %c0_i32_224 = arith.constant 0 : i32
    %337 = tpu.memref_slice %arg3[%336, %c0_i32_224] : memref<50x128xf32, #tpu.memory_space<any>> -> memref<1x128xf32, #tpu.memory_space<any>>
    %c12_i32_225 = arith.constant 12 : i32
    %c0_i32_226 = arith.constant 0 : i32
    %338 = tpu.memref_slice %arg6[%c12_i32_225, %c0_i32_226] : memref<32x128xf32, #tpu.memory_space<vmem>> -> memref<1x128xf32, #tpu.memory_space<vmem>>
    %339 = tpu.memref_slice %arg8[%c0_i32_223] : memref<2x!tpu.dma_semaphore, #tpu.memory_space<semaphore_mem>> -> memref<1x!tpu.dma_semaphore, #tpu.memory_space<semaphore_mem>>
    %340 = tpu.memref_squeeze %339 : memref<1x!tpu.dma_semaphore, #tpu.memory_space<semaphore_mem>> -> memref<!tpu.dma_semaphore, #tpu.memory_space<semaphore_mem>>
    tpu.enqueue_dma source(%337 : memref<1x128xf32, #tpu.memory_space<any>>) target(%338 : memref<1x128xf32, #tpu.memory_space<vmem>>) target_semaphore(%340 : memref<!tpu.dma_semaphore, #tpu.memory_space<semaphore_mem>>)
    %c16_i32_227 = arith.constant 16 : i32
    %341 = arith.addi %3, %c16_i32_227 : i32
    %c2_i32_228 = arith.constant 2 : i32
    %342 = arith.addi %341, %c2_i32_228 : i32
    %343 = arith.index_cast %342 : i32 to index
    %344 = memref.load %arg1[%343] : memref<32xi32, #tpu.memory_space<smem>>
    %c0_i32_229 = arith.constant 0 : i32
    %c0_i32_230 = arith.constant 0 : i32
    %345 = tpu.memref_slice %arg3[%344, %c0_i32_230] : memref<50x128xf32, #tpu.memory_space<any>> -> memref<1x128xf32, #tpu.memory_space<any>>
    %c20_i32 = arith.constant 20 : i32
    %c0_i32_231 = arith.constant 0 : i32
    %346 = tpu.memref_slice %arg6[%c20_i32, %c0_i32_231] : memref<32x128xf32, #tpu.memory_space<vmem>> -> memref<1x128xf32, #tpu.memory_space<vmem>>
    %347 = tpu.memref_slice %arg8[%c0_i32_229] : memref<2x!tpu.dma_semaphore, #tpu.memory_space<semaphore_mem>> -> memref<1x!tpu.dma_semaphore, #tpu.memory_space<semaphore_mem>>
    %348 = tpu.memref_squeeze %347 : memref<1x!tpu.dma_semaphore, #tpu.memory_space<semaphore_mem>> -> memref<!tpu.dma_semaphore, #tpu.memory_space<semaphore_mem>>
    tpu.enqueue_dma source(%345 : memref<1x128xf32, #tpu.memory_space<any>>) target(%346 : memref<1x128xf32, #tpu.memory_space<vmem>>) target_semaphore(%348 : memref<!tpu.dma_semaphore, #tpu.memory_space<semaphore_mem>>)
    %c16_i32_232 = arith.constant 16 : i32
    %349 = arith.addi %3, %c16_i32_232 : i32
    %c3_i32_233 = arith.constant 3 : i32
    %350 = arith.addi %349, %c3_i32_233 : i32
    %351 = arith.index_cast %350 : i32 to index
    %352 = memref.load %arg1[%351] : memref<32xi32, #tpu.memory_space<smem>>
    %c0_i32_234 = arith.constant 0 : i32
    %c0_i32_235 = arith.constant 0 : i32
    %353 = tpu.memref_slice %arg3[%352, %c0_i32_235] : memref<50x128xf32, #tpu.memory_space<any>> -> memref<1x128xf32, #tpu.memory_space<any>>
    %c28_i32 = arith.constant 28 : i32
    %c0_i32_236 = arith.constant 0 : i32
    %354 = tpu.memref_slice %arg6[%c28_i32, %c0_i32_236] : memref<32x128xf32, #tpu.memory_space<vmem>> -> memref<1x128xf32, #tpu.memory_space<vmem>>
    %355 = tpu.memref_slice %arg8[%c0_i32_234] : memref<2x!tpu.dma_semaphore, #tpu.memory_space<semaphore_mem>> -> memref<1x!tpu.dma_semaphore, #tpu.memory_space<semaphore_mem>>
    %356 = tpu.memref_squeeze %355 : memref<1x!tpu.dma_semaphore, #tpu.memory_space<semaphore_mem>> -> memref<!tpu.dma_semaphore, #tpu.memory_space<semaphore_mem>>
    tpu.enqueue_dma source(%353 : memref<1x128xf32, #tpu.memory_space<any>>) target(%354 : memref<1x128xf32, #tpu.memory_space<vmem>>) target_semaphore(%356 : memref<!tpu.dma_semaphore, #tpu.memory_space<semaphore_mem>>)
    %c24_i32_237 = arith.constant 24 : i32
    %357 = arith.addi %4, %c24_i32_237 : i32
    %c0_i32_238 = arith.constant 0 : i32
    %358 = arith.addi %357, %c0_i32_238 : i32
    %359 = arith.index_cast %358 : i32 to index
    %360 = memref.load %arg2[%359] : memref<48xi32, #tpu.memory_space<smem>>
    %c1_i32_239 = arith.constant 1 : i32
    %c0_i32_240 = arith.constant 0 : i32
    %361 = tpu.memref_slice %arg4[%360, %c0_i32_240] : memref<50x128xf32, #tpu.memory_space<any>> -> memref<1x128xf32, #tpu.memory_space<any>>
    %c4_i32_241 = arith.constant 4 : i32
    %c0_i32_242 = arith.constant 0 : i32
    %362 = tpu.memref_slice %arg7[%c4_i32_241, %c0_i32_242] : memref<48x128xf32, #tpu.memory_space<vmem>> -> memref<1x128xf32, #tpu.memory_space<vmem>>
    %363 = tpu.memref_slice %arg8[%c1_i32_239] : memref<2x!tpu.dma_semaphore, #tpu.memory_space<semaphore_mem>> -> memref<1x!tpu.dma_semaphore, #tpu.memory_space<semaphore_mem>>
    %364 = tpu.memref_squeeze %363 : memref<1x!tpu.dma_semaphore, #tpu.memory_space<semaphore_mem>> -> memref<!tpu.dma_semaphore, #tpu.memory_space<semaphore_mem>>
    tpu.enqueue_dma source(%361 : memref<1x128xf32, #tpu.memory_space<any>>) target(%362 : memref<1x128xf32, #tpu.memory_space<vmem>>) target_semaphore(%364 : memref<!tpu.dma_semaphore, #tpu.memory_space<semaphore_mem>>)
    %c24_i32_243 = arith.constant 24 : i32
    %365 = arith.addi %4, %c24_i32_243 : i32
    %c1_i32_244 = arith.constant 1 : i32
    %366 = arith.addi %365, %c1_i32_244 : i32
    %367 = arith.index_cast %366 : i32 to index
    %368 = memref.load %arg2[%367] : memref<48xi32, #tpu.memory_space<smem>>
    %c1_i32_245 = arith.constant 1 : i32
    %c0_i32_246 = arith.constant 0 : i32
    %369 = tpu.memref_slice %arg4[%368, %c0_i32_246] : memref<50x128xf32, #tpu.memory_space<any>> -> memref<1x128xf32, #tpu.memory_space<any>>
    %c12_i32_247 = arith.constant 12 : i32
    %c0_i32_248 = arith.constant 0 : i32
    %370 = tpu.memref_slice %arg7[%c12_i32_247, %c0_i32_248] : memref<48x128xf32, #tpu.memory_space<vmem>> -> memref<1x128xf32, #tpu.memory_space<vmem>>
    %371 = tpu.memref_slice %arg8[%c1_i32_245] : memref<2x!tpu.dma_semaphore, #tpu.memory_space<semaphore_mem>> -> memref<1x!tpu.dma_semaphore, #tpu.memory_space<semaphore_mem>>
    %372 = tpu.memref_squeeze %371 : memref<1x!tpu.dma_semaphore, #tpu.memory_space<semaphore_mem>> -> memref<!tpu.dma_semaphore, #tpu.memory_space<semaphore_mem>>
    tpu.enqueue_dma source(%369 : memref<1x128xf32, #tpu.memory_space<any>>) target(%370 : memref<1x128xf32, #tpu.memory_space<vmem>>) target_semaphore(%372 : memref<!tpu.dma_semaphore, #tpu.memory_space<semaphore_mem>>)
    %c24_i32_249 = arith.constant 24 : i32
    %373 = arith.addi %4, %c24_i32_249 : i32
    %c2_i32_250 = arith.constant 2 : i32
    %374 = arith.addi %373, %c2_i32_250 : i32
    %375 = arith.index_cast %374 : i32 to index
    %376 = memref.load %arg2[%375] : memref<48xi32, #tpu.memory_space<smem>>
    %c1_i32_251 = arith.constant 1 : i32
    %c0_i32_252 = arith.constant 0 : i32
    %377 = tpu.memref_slice %arg4[%376, %c0_i32_252] : memref<50x128xf32, #tpu.memory_space<any>> -> memref<1x128xf32, #tpu.memory_space<any>>
    %c20_i32_253 = arith.constant 20 : i32
    %c0_i32_254 = arith.constant 0 : i32
    %378 = tpu.memref_slice %arg7[%c20_i32_253, %c0_i32_254] : memref<48x128xf32, #tpu.memory_space<vmem>> -> memref<1x128xf32, #tpu.memory_space<vmem>>
    %379 = tpu.memref_slice %arg8[%c1_i32_251] : memref<2x!tpu.dma_semaphore, #tpu.memory_space<semaphore_mem>> -> memref<1x!tpu.dma_semaphore, #tpu.memory_space<semaphore_mem>>
    %380 = tpu.memref_squeeze %379 : memref<1x!tpu.dma_semaphore, #tpu.memory_space<semaphore_mem>> -> memref<!tpu.dma_semaphore, #tpu.memory_space<semaphore_mem>>
    tpu.enqueue_dma source(%377 : memref<1x128xf32, #tpu.memory_space<any>>) target(%378 : memref<1x128xf32, #tpu.memory_space<vmem>>) target_semaphore(%380 : memref<!tpu.dma_semaphore, #tpu.memory_space<semaphore_mem>>)
    %c24_i32_255 = arith.constant 24 : i32
    %381 = arith.addi %4, %c24_i32_255 : i32
    %c3_i32_256 = arith.constant 3 : i32
    %382 = arith.addi %381, %c3_i32_256 : i32
    %383 = arith.index_cast %382 : i32 to index
    %384 = memref.load %arg2[%383] : memref<48xi32, #tpu.memory_space<smem>>
    %c1_i32_257 = arith.constant 1 : i32
    %c0_i32_258 = arith.constant 0 : i32
    %385 = tpu.memref_slice %arg4[%384, %c0_i32_258] : memref<50x128xf32, #tpu.memory_space<any>> -> memref<1x128xf32, #tpu.memory_space<any>>
    %c28_i32_259 = arith.constant 28 : i32
    %c0_i32_260 = arith.constant 0 : i32
    %386 = tpu.memref_slice %arg7[%c28_i32_259, %c0_i32_260] : memref<48x128xf32, #tpu.memory_space<vmem>> -> memref<1x128xf32, #tpu.memory_space<vmem>>
    %387 = tpu.memref_slice %arg8[%c1_i32_257] : memref<2x!tpu.dma_semaphore, #tpu.memory_space<semaphore_mem>> -> memref<1x!tpu.dma_semaphore, #tpu.memory_space<semaphore_mem>>
    %388 = tpu.memref_squeeze %387 : memref<1x!tpu.dma_semaphore, #tpu.memory_space<semaphore_mem>> -> memref<!tpu.dma_semaphore, #tpu.memory_space<semaphore_mem>>
    tpu.enqueue_dma source(%385 : memref<1x128xf32, #tpu.memory_space<any>>) target(%386 : memref<1x128xf32, #tpu.memory_space<vmem>>) target_semaphore(%388 : memref<!tpu.dma_semaphore, #tpu.memory_space<semaphore_mem>>)
    %c24_i32_261 = arith.constant 24 : i32
    %389 = arith.addi %4, %c24_i32_261 : i32
    %c4_i32_262 = arith.constant 4 : i32
    %390 = arith.addi %389, %c4_i32_262 : i32
    %391 = arith.index_cast %390 : i32 to index
    %392 = memref.load %arg2[%391] : memref<48xi32, #tpu.memory_space<smem>>
    %c1_i32_263 = arith.constant 1 : i32
    %c0_i32_264 = arith.constant 0 : i32
    %393 = tpu.memref_slice %arg4[%392, %c0_i32_264] : memref<50x128xf32, #tpu.memory_space<any>> -> memref<1x128xf32, #tpu.memory_space<any>>
    %c36_i32 = arith.constant 36 : i32
    %c0_i32_265 = arith.constant 0 : i32
    %394 = tpu.memref_slice %arg7[%c36_i32, %c0_i32_265] : memref<48x128xf32, #tpu.memory_space<vmem>> -> memref<1x128xf32, #tpu.memory_space<vmem>>
    %395 = tpu.memref_slice %arg8[%c1_i32_263] : memref<2x!tpu.dma_semaphore, #tpu.memory_space<semaphore_mem>> -> memref<1x!tpu.dma_semaphore, #tpu.memory_space<semaphore_mem>>
    %396 = tpu.memref_squeeze %395 : memref<1x!tpu.dma_semaphore, #tpu.memory_space<semaphore_mem>> -> memref<!tpu.dma_semaphore, #tpu.memory_space<semaphore_mem>>
    tpu.enqueue_dma source(%393 : memref<1x128xf32, #tpu.memory_space<any>>) target(%394 : memref<1x128xf32, #tpu.memory_space<vmem>>) target_semaphore(%396 : memref<!tpu.dma_semaphore, #tpu.memory_space<semaphore_mem>>)
    %c24_i32_266 = arith.constant 24 : i32
    %397 = arith.addi %4, %c24_i32_266 : i32
    %c5_i32_267 = arith.constant 5 : i32
    %398 = arith.addi %397, %c5_i32_267 : i32
    %399 = arith.index_cast %398 : i32 to index
    %400 = memref.load %arg2[%399] : memref<48xi32, #tpu.memory_space<smem>>
    %c1_i32_268 = arith.constant 1 : i32
    %c0_i32_269 = arith.constant 0 : i32
    %401 = tpu.memref_slice %arg4[%400, %c0_i32_269] : memref<50x128xf32, #tpu.memory_space<any>> -> memref<1x128xf32, #tpu.memory_space<any>>
    %c44_i32 = arith.constant 44 : i32
    %c0_i32_270 = arith.constant 0 : i32
    %402 = tpu.memref_slice %arg7[%c44_i32, %c0_i32_270] : memref<48x128xf32, #tpu.memory_space<vmem>> -> memref<1x128xf32, #tpu.memory_space<vmem>>
    %403 = tpu.memref_slice %arg8[%c1_i32_268] : memref<2x!tpu.dma_semaphore, #tpu.memory_space<semaphore_mem>> -> memref<1x!tpu.dma_semaphore, #tpu.memory_space<semaphore_mem>>
    %404 = tpu.memref_squeeze %403 : memref<1x!tpu.dma_semaphore, #tpu.memory_space<semaphore_mem>> -> memref<!tpu.dma_semaphore, #tpu.memory_space<semaphore_mem>>
    tpu.enqueue_dma source(%401 : memref<1x128xf32, #tpu.memory_space<any>>) target(%402 : memref<1x128xf32, #tpu.memory_space<vmem>>) target_semaphore(%404 : memref<!tpu.dma_semaphore, #tpu.memory_space<semaphore_mem>>)
    %c20_i32_271 = arith.constant 20 : i32
    %405 = arith.addi %3, %c20_i32_271 : i32
    %c0_i32_272 = arith.constant 0 : i32
    %406 = arith.addi %405, %c0_i32_272 : i32
    %407 = arith.index_cast %406 : i32 to index
    %408 = memref.load %arg1[%407] : memref<32xi32, #tpu.memory_space<smem>>
    %c0_i32_273 = arith.constant 0 : i32
    %c0_i32_274 = arith.constant 0 : i32
    %409 = tpu.memref_slice %arg3[%408, %c0_i32_274] : memref<50x128xf32, #tpu.memory_space<any>> -> memref<1x128xf32, #tpu.memory_space<any>>
    %c5_i32_275 = arith.constant 5 : i32
    %c0_i32_276 = arith.constant 0 : i32
    %410 = tpu.memref_slice %arg6[%c5_i32_275, %c0_i32_276] : memref<32x128xf32, #tpu.memory_space<vmem>> -> memref<1x128xf32, #tpu.memory_space<vmem>>
    %411 = tpu.memref_slice %arg8[%c0_i32_273] : memref<2x!tpu.dma_semaphore, #tpu.memory_space<semaphore_mem>> -> memref<1x!tpu.dma_semaphore, #tpu.memory_space<semaphore_mem>>
    %412 = tpu.memref_squeeze %411 : memref<1x!tpu.dma_semaphore, #tpu.memory_space<semaphore_mem>> -> memref<!tpu.dma_semaphore, #tpu.memory_space<semaphore_mem>>
    tpu.enqueue_dma source(%409 : memref<1x128xf32, #tpu.memory_space<any>>) target(%410 : memref<1x128xf32, #tpu.memory_space<vmem>>) target_semaphore(%412 : memref<!tpu.dma_semaphore, #tpu.memory_space<semaphore_mem>>)
    %c20_i32_277 = arith.constant 20 : i32
    %413 = arith.addi %3, %c20_i32_277 : i32
    %c1_i32_278 = arith.constant 1 : i32
    %414 = arith.addi %413, %c1_i32_278 : i32
    %415 = arith.index_cast %414 : i32 to index
    %416 = memref.load %arg1[%415] : memref<32xi32, #tpu.memory_space<smem>>
    %c0_i32_279 = arith.constant 0 : i32
    %c0_i32_280 = arith.constant 0 : i32
    %417 = tpu.memref_slice %arg3[%416, %c0_i32_280] : memref<50x128xf32, #tpu.memory_space<any>> -> memref<1x128xf32, #tpu.memory_space<any>>
    %c13_i32 = arith.constant 13 : i32
    %c0_i32_281 = arith.constant 0 : i32
    %418 = tpu.memref_slice %arg6[%c13_i32, %c0_i32_281] : memref<32x128xf32, #tpu.memory_space<vmem>> -> memref<1x128xf32, #tpu.memory_space<vmem>>
    %419 = tpu.memref_slice %arg8[%c0_i32_279] : memref<2x!tpu.dma_semaphore, #tpu.memory_space<semaphore_mem>> -> memref<1x!tpu.dma_semaphore, #tpu.memory_space<semaphore_mem>>
    %420 = tpu.memref_squeeze %419 : memref<1x!tpu.dma_semaphore, #tpu.memory_space<semaphore_mem>> -> memref<!tpu.dma_semaphore, #tpu.memory_space<semaphore_mem>>
    tpu.enqueue_dma source(%417 : memref<1x128xf32, #tpu.memory_space<any>>) target(%418 : memref<1x128xf32, #tpu.memory_space<vmem>>) target_semaphore(%420 : memref<!tpu.dma_semaphore, #tpu.memory_space<semaphore_mem>>)
    %c20_i32_282 = arith.constant 20 : i32
    %421 = arith.addi %3, %c20_i32_282 : i32
    %c2_i32_283 = arith.constant 2 : i32
    %422 = arith.addi %421, %c2_i32_283 : i32
    %423 = arith.index_cast %422 : i32 to index
    %424 = memref.load %arg1[%423] : memref<32xi32, #tpu.memory_space<smem>>
    %c0_i32_284 = arith.constant 0 : i32
    %c0_i32_285 = arith.constant 0 : i32
    %425 = tpu.memref_slice %arg3[%424, %c0_i32_285] : memref<50x128xf32, #tpu.memory_space<any>> -> memref<1x128xf32, #tpu.memory_space<any>>
    %c21_i32 = arith.constant 21 : i32
    %c0_i32_286 = arith.constant 0 : i32
    %426 = tpu.memref_slice %arg6[%c21_i32, %c0_i32_286] : memref<32x128xf32, #tpu.memory_space<vmem>> -> memref<1x128xf32, #tpu.memory_space<vmem>>
    %427 = tpu.memref_slice %arg8[%c0_i32_284] : memref<2x!tpu.dma_semaphore, #tpu.memory_space<semaphore_mem>> -> memref<1x!tpu.dma_semaphore, #tpu.memory_space<semaphore_mem>>
    %428 = tpu.memref_squeeze %427 : memref<1x!tpu.dma_semaphore, #tpu.memory_space<semaphore_mem>> -> memref<!tpu.dma_semaphore, #tpu.memory_space<semaphore_mem>>
    tpu.enqueue_dma source(%425 : memref<1x128xf32, #tpu.memory_space<any>>) target(%426 : memref<1x128xf32, #tpu.memory_space<vmem>>) target_semaphore(%428 : memref<!tpu.dma_semaphore, #tpu.memory_space<semaphore_mem>>)
    %c20_i32_287 = arith.constant 20 : i32
    %429 = arith.addi %3, %c20_i32_287 : i32
    %c3_i32_288 = arith.constant 3 : i32
    %430 = arith.addi %429, %c3_i32_288 : i32
    %431 = arith.index_cast %430 : i32 to index
    %432 = memref.load %arg1[%431] : memref<32xi32, #tpu.memory_space<smem>>
    %c0_i32_289 = arith.constant 0 : i32
    %c0_i32_290 = arith.constant 0 : i32
    %433 = tpu.memref_slice %arg3[%432, %c0_i32_290] : memref<50x128xf32, #tpu.memory_space<any>> -> memref<1x128xf32, #tpu.memory_space<any>>
    %c29_i32 = arith.constant 29 : i32
    %c0_i32_291 = arith.constant 0 : i32
    %434 = tpu.memref_slice %arg6[%c29_i32, %c0_i32_291] : memref<32x128xf32, #tpu.memory_space<vmem>> -> memref<1x128xf32, #tpu.memory_space<vmem>>
    %435 = tpu.memref_slice %arg8[%c0_i32_289] : memref<2x!tpu.dma_semaphore, #tpu.memory_space<semaphore_mem>> -> memref<1x!tpu.dma_semaphore, #tpu.memory_space<semaphore_mem>>
    %436 = tpu.memref_squeeze %435 : memref<1x!tpu.dma_semaphore, #tpu.memory_space<semaphore_mem>> -> memref<!tpu.dma_semaphore, #tpu.memory_space<semaphore_mem>>
    tpu.enqueue_dma source(%433 : memref<1x128xf32, #tpu.memory_space<any>>) target(%434 : memref<1x128xf32, #tpu.memory_space<vmem>>) target_semaphore(%436 : memref<!tpu.dma_semaphore, #tpu.memory_space<semaphore_mem>>)
    %c30_i32 = arith.constant 30 : i32
    %437 = arith.addi %4, %c30_i32 : i32
    %c0_i32_292 = arith.constant 0 : i32
    %438 = arith.addi %437, %c0_i32_292 : i32
    %439 = arith.index_cast %438 : i32 to index
    %440 = memref.load %arg2[%439] : memref<48xi32, #tpu.memory_space<smem>>
    %c1_i32_293 = arith.constant 1 : i32
    %c0_i32_294 = arith.constant 0 : i32
    %441 = tpu.memref_slice %arg4[%440, %c0_i32_294] : memref<50x128xf32, #tpu.memory_space<any>> -> memref<1x128xf32, #tpu.memory_space<any>>
    %c5_i32_295 = arith.constant 5 : i32
    %c0_i32_296 = arith.constant 0 : i32
    %442 = tpu.memref_slice %arg7[%c5_i32_295, %c0_i32_296] : memref<48x128xf32, #tpu.memory_space<vmem>> -> memref<1x128xf32, #tpu.memory_space<vmem>>
    %443 = tpu.memref_slice %arg8[%c1_i32_293] : memref<2x!tpu.dma_semaphore, #tpu.memory_space<semaphore_mem>> -> memref<1x!tpu.dma_semaphore, #tpu.memory_space<semaphore_mem>>
    %444 = tpu.memref_squeeze %443 : memref<1x!tpu.dma_semaphore, #tpu.memory_space<semaphore_mem>> -> memref<!tpu.dma_semaphore, #tpu.memory_space<semaphore_mem>>
    tpu.enqueue_dma source(%441 : memref<1x128xf32, #tpu.memory_space<any>>) target(%442 : memref<1x128xf32, #tpu.memory_space<vmem>>) target_semaphore(%444 : memref<!tpu.dma_semaphore, #tpu.memory_space<semaphore_mem>>)
    %c30_i32_297 = arith.constant 30 : i32
    %445 = arith.addi %4, %c30_i32_297 : i32
    %c1_i32_298 = arith.constant 1 : i32
    %446 = arith.addi %445, %c1_i32_298 : i32
    %447 = arith.index_cast %446 : i32 to index
    %448 = memref.load %arg2[%447] : memref<48xi32, #tpu.memory_space<smem>>
    %c1_i32_299 = arith.constant 1 : i32
    %c0_i32_300 = arith.constant 0 : i32
    %449 = tpu.memref_slice %arg4[%448, %c0_i32_300] : memref<50x128xf32, #tpu.memory_space<any>> -> memref<1x128xf32, #tpu.memory_space<any>>
    %c13_i32_301 = arith.constant 13 : i32
    %c0_i32_302 = arith.constant 0 : i32
    %450 = tpu.memref_slice %arg7[%c13_i32_301, %c0_i32_302] : memref<48x128xf32, #tpu.memory_space<vmem>> -> memref<1x128xf32, #tpu.memory_space<vmem>>
    %451 = tpu.memref_slice %arg8[%c1_i32_299] : memref<2x!tpu.dma_semaphore, #tpu.memory_space<semaphore_mem>> -> memref<1x!tpu.dma_semaphore, #tpu.memory_space<semaphore_mem>>
    %452 = tpu.memref_squeeze %451 : memref<1x!tpu.dma_semaphore, #tpu.memory_space<semaphore_mem>> -> memref<!tpu.dma_semaphore, #tpu.memory_space<semaphore_mem>>
    tpu.enqueue_dma source(%449 : memref<1x128xf32, #tpu.memory_space<any>>) target(%450 : memref<1x128xf32, #tpu.memory_space<vmem>>) target_semaphore(%452 : memref<!tpu.dma_semaphore, #tpu.memory_space<semaphore_mem>>)
    %c30_i32_303 = arith.constant 30 : i32
    %453 = arith.addi %4, %c30_i32_303 : i32
    %c2_i32_304 = arith.constant 2 : i32
    %454 = arith.addi %453, %c2_i32_304 : i32
    %455 = arith.index_cast %454 : i32 to index
    %456 = memref.load %arg2[%455] : memref<48xi32, #tpu.memory_space<smem>>
    %c1_i32_305 = arith.constant 1 : i32
    %c0_i32_306 = arith.constant 0 : i32
    %457 = tpu.memref_slice %arg4[%456, %c0_i32_306] : memref<50x128xf32, #tpu.memory_space<any>> -> memref<1x128xf32, #tpu.memory_space<any>>
    %c21_i32_307 = arith.constant 21 : i32
    %c0_i32_308 = arith.constant 0 : i32
    %458 = tpu.memref_slice %arg7[%c21_i32_307, %c0_i32_308] : memref<48x128xf32, #tpu.memory_space<vmem>> -> memref<1x128xf32, #tpu.memory_space<vmem>>
    %459 = tpu.memref_slice %arg8[%c1_i32_305] : memref<2x!tpu.dma_semaphore, #tpu.memory_space<semaphore_mem>> -> memref<1x!tpu.dma_semaphore, #tpu.memory_space<semaphore_mem>>
    %460 = tpu.memref_squeeze %459 : memref<1x!tpu.dma_semaphore, #tpu.memory_space<semaphore_mem>> -> memref<!tpu.dma_semaphore, #tpu.memory_space<semaphore_mem>>
    tpu.enqueue_dma source(%457 : memref<1x128xf32, #tpu.memory_space<any>>) target(%458 : memref<1x128xf32, #tpu.memory_space<vmem>>) target_semaphore(%460 : memref<!tpu.dma_semaphore, #tpu.memory_space<semaphore_mem>>)
    %c30_i32_309 = arith.constant 30 : i32
    %461 = arith.addi %4, %c30_i32_309 : i32
    %c3_i32_310 = arith.constant 3 : i32
    %462 = arith.addi %461, %c3_i32_310 : i32
    %463 = arith.index_cast %462 : i32 to index
    %464 = memref.load %arg2[%463] : memref<48xi32, #tpu.memory_space<smem>>
    %c1_i32_311 = arith.constant 1 : i32
    %c0_i32_312 = arith.constant 0 : i32
    %465 = tpu.memref_slice %arg4[%464, %c0_i32_312] : memref<50x128xf32, #tpu.memory_space<any>> -> memref<1x128xf32, #tpu.memory_space<any>>
    %c29_i32_313 = arith.constant 29 : i32
    %c0_i32_314 = arith.constant 0 : i32
    %466 = tpu.memref_slice %arg7[%c29_i32_313, %c0_i32_314] : memref<48x128xf32, #tpu.memory_space<vmem>> -> memref<1x128xf32, #tpu.memory_space<vmem>>
    %467 = tpu.memref_slice %arg8[%c1_i32_311] : memref<2x!tpu.dma_semaphore, #tpu.memory_space<semaphore_mem>> -> memref<1x!tpu.dma_semaphore, #tpu.memory_space<semaphore_mem>>
    %468 = tpu.memref_squeeze %467 : memref<1x!tpu.dma_semaphore, #tpu.memory_space<semaphore_mem>> -> memref<!tpu.dma_semaphore, #tpu.memory_space<semaphore_mem>>
    tpu.enqueue_dma source(%465 : memref<1x128xf32, #tpu.memory_space<any>>) target(%466 : memref<1x128xf32, #tpu.memory_space<vmem>>) target_semaphore(%468 : memref<!tpu.dma_semaphore, #tpu.memory_space<semaphore_mem>>)
    %c30_i32_315 = arith.constant 30 : i32
    %469 = arith.addi %4, %c30_i32_315 : i32
    %c4_i32_316 = arith.constant 4 : i32
    %470 = arith.addi %469, %c4_i32_316 : i32
    %471 = arith.index_cast %470 : i32 to index
    %472 = memref.load %arg2[%471] : memref<48xi32, #tpu.memory_space<smem>>
    %c1_i32_317 = arith.constant 1 : i32
    %c0_i32_318 = arith.constant 0 : i32
    %473 = tpu.memref_slice %arg4[%472, %c0_i32_318] : memref<50x128xf32, #tpu.memory_space<any>> -> memref<1x128xf32, #tpu.memory_space<any>>
    %c37_i32 = arith.constant 37 : i32
    %c0_i32_319 = arith.constant 0 : i32
    %474 = tpu.memref_slice %arg7[%c37_i32, %c0_i32_319] : memref<48x128xf32, #tpu.memory_space<vmem>> -> memref<1x128xf32, #tpu.memory_space<vmem>>
    %475 = tpu.memref_slice %arg8[%c1_i32_317] : memref<2x!tpu.dma_semaphore, #tpu.memory_space<semaphore_mem>> -> memref<1x!tpu.dma_semaphore, #tpu.memory_space<semaphore_mem>>
    %476 = tpu.memref_squeeze %475 : memref<1x!tpu.dma_semaphore, #tpu.memory_space<semaphore_mem>> -> memref<!tpu.dma_semaphore, #tpu.memory_space<semaphore_mem>>
    tpu.enqueue_dma source(%473 : memref<1x128xf32, #tpu.memory_space<any>>) target(%474 : memref<1x128xf32, #tpu.memory_space<vmem>>) target_semaphore(%476 : memref<!tpu.dma_semaphore, #tpu.memory_space<semaphore_mem>>)
    %c30_i32_320 = arith.constant 30 : i32
    %477 = arith.addi %4, %c30_i32_320 : i32
    %c5_i32_321 = arith.constant 5 : i32
    %478 = arith.addi %477, %c5_i32_321 : i32
    %479 = arith.index_cast %478 : i32 to index
    %480 = memref.load %arg2[%479] : memref<48xi32, #tpu.memory_space<smem>>
    %c1_i32_322 = arith.constant 1 : i32
    %c0_i32_323 = arith.constant 0 : i32
    %481 = tpu.memref_slice %arg4[%480, %c0_i32_323] : memref<50x128xf32, #tpu.memory_space<any>> -> memref<1x128xf32, #tpu.memory_space<any>>
    %c45_i32 = arith.constant 45 : i32
    %c0_i32_324 = arith.constant 0 : i32
    %482 = tpu.memref_slice %arg7[%c45_i32, %c0_i32_324] : memref<48x128xf32, #tpu.memory_space<vmem>> -> memref<1x128xf32, #tpu.memory_space<vmem>>
    %483 = tpu.memref_slice %arg8[%c1_i32_322] : memref<2x!tpu.dma_semaphore, #tpu.memory_space<semaphore_mem>> -> memref<1x!tpu.dma_semaphore, #tpu.memory_space<semaphore_mem>>
    %484 = tpu.memref_squeeze %483 : memref<1x!tpu.dma_semaphore, #tpu.memory_space<semaphore_mem>> -> memref<!tpu.dma_semaphore, #tpu.memory_space<semaphore_mem>>
    tpu.enqueue_dma source(%481 : memref<1x128xf32, #tpu.memory_space<any>>) target(%482 : memref<1x128xf32, #tpu.memory_space<vmem>>) target_semaphore(%484 : memref<!tpu.dma_semaphore, #tpu.memory_space<semaphore_mem>>)
    %c24_i32_325 = arith.constant 24 : i32
    %485 = arith.addi %3, %c24_i32_325 : i32
    %c0_i32_326 = arith.constant 0 : i32
    %486 = arith.addi %485, %c0_i32_326 : i32
    %487 = arith.index_cast %486 : i32 to index
    %488 = memref.load %arg1[%487] : memref<32xi32, #tpu.memory_space<smem>>
    %c0_i32_327 = arith.constant 0 : i32
    %c0_i32_328 = arith.constant 0 : i32
    %489 = tpu.memref_slice %arg3[%488, %c0_i32_328] : memref<50x128xf32, #tpu.memory_space<any>> -> memref<1x128xf32, #tpu.memory_space<any>>
    %c6_i32_329 = arith.constant 6 : i32
    %c0_i32_330 = arith.constant 0 : i32
    %490 = tpu.memref_slice %arg6[%c6_i32_329, %c0_i32_330] : memref<32x128xf32, #tpu.memory_space<vmem>> -> memref<1x128xf32, #tpu.memory_space<vmem>>
    %491 = tpu.memref_slice %arg8[%c0_i32_327] : memref<2x!tpu.dma_semaphore, #tpu.memory_space<semaphore_mem>> -> memref<1x!tpu.dma_semaphore, #tpu.memory_space<semaphore_mem>>
    %492 = tpu.memref_squeeze %491 : memref<1x!tpu.dma_semaphore, #tpu.memory_space<semaphore_mem>> -> memref<!tpu.dma_semaphore, #tpu.memory_space<semaphore_mem>>
    tpu.enqueue_dma source(%489 : memref<1x128xf32, #tpu.memory_space<any>>) target(%490 : memref<1x128xf32, #tpu.memory_space<vmem>>) target_semaphore(%492 : memref<!tpu.dma_semaphore, #tpu.memory_space<semaphore_mem>>)
    %c24_i32_331 = arith.constant 24 : i32
    %493 = arith.addi %3, %c24_i32_331 : i32
    %c1_i32_332 = arith.constant 1 : i32
    %494 = arith.addi %493, %c1_i32_332 : i32
    %495 = arith.index_cast %494 : i32 to index
    %496 = memref.load %arg1[%495] : memref<32xi32, #tpu.memory_space<smem>>
    %c0_i32_333 = arith.constant 0 : i32
    %c0_i32_334 = arith.constant 0 : i32
    %497 = tpu.memref_slice %arg3[%496, %c0_i32_334] : memref<50x128xf32, #tpu.memory_space<any>> -> memref<1x128xf32, #tpu.memory_space<any>>
    %c14_i32 = arith.constant 14 : i32
    %c0_i32_335 = arith.constant 0 : i32
    %498 = tpu.memref_slice %arg6[%c14_i32, %c0_i32_335] : memref<32x128xf32, #tpu.memory_space<vmem>> -> memref<1x128xf32, #tpu.memory_space<vmem>>
    %499 = tpu.memref_slice %arg8[%c0_i32_333] : memref<2x!tpu.dma_semaphore, #tpu.memory_space<semaphore_mem>> -> memref<1x!tpu.dma_semaphore, #tpu.memory_space<semaphore_mem>>
    %500 = tpu.memref_squeeze %499 : memref<1x!tpu.dma_semaphore, #tpu.memory_space<semaphore_mem>> -> memref<!tpu.dma_semaphore, #tpu.memory_space<semaphore_mem>>
    tpu.enqueue_dma source(%497 : memref<1x128xf32, #tpu.memory_space<any>>) target(%498 : memref<1x128xf32, #tpu.memory_space<vmem>>) target_semaphore(%500 : memref<!tpu.dma_semaphore, #tpu.memory_space<semaphore_mem>>)
    %c24_i32_336 = arith.constant 24 : i32
    %501 = arith.addi %3, %c24_i32_336 : i32
    %c2_i32_337 = arith.constant 2 : i32
    %502 = arith.addi %501, %c2_i32_337 : i32
    %503 = arith.index_cast %502 : i32 to index
    %504 = memref.load %arg1[%503] : memref<32xi32, #tpu.memory_space<smem>>
    %c0_i32_338 = arith.constant 0 : i32
    %c0_i32_339 = arith.constant 0 : i32
    %505 = tpu.memref_slice %arg3[%504, %c0_i32_339] : memref<50x128xf32, #tpu.memory_space<any>> -> memref<1x128xf32, #tpu.memory_space<any>>
    %c22_i32 = arith.constant 22 : i32
    %c0_i32_340 = arith.constant 0 : i32
    %506 = tpu.memref_slice %arg6[%c22_i32, %c0_i32_340] : memref<32x128xf32, #tpu.memory_space<vmem>> -> memref<1x128xf32, #tpu.memory_space<vmem>>
    %507 = tpu.memref_slice %arg8[%c0_i32_338] : memref<2x!tpu.dma_semaphore, #tpu.memory_space<semaphore_mem>> -> memref<1x!tpu.dma_semaphore, #tpu.memory_space<semaphore_mem>>
    %508 = tpu.memref_squeeze %507 : memref<1x!tpu.dma_semaphore, #tpu.memory_space<semaphore_mem>> -> memref<!tpu.dma_semaphore, #tpu.memory_space<semaphore_mem>>
    tpu.enqueue_dma source(%505 : memref<1x128xf32, #tpu.memory_space<any>>) target(%506 : memref<1x128xf32, #tpu.memory_space<vmem>>) target_semaphore(%508 : memref<!tpu.dma_semaphore, #tpu.memory_space<semaphore_mem>>)
    %c24_i32_341 = arith.constant 24 : i32
    %509 = arith.addi %3, %c24_i32_341 : i32
    %c3_i32_342 = arith.constant 3 : i32
    %510 = arith.addi %509, %c3_i32_342 : i32
    %511 = arith.index_cast %510 : i32 to index
    %512 = memref.load %arg1[%511] : memref<32xi32, #tpu.memory_space<smem>>
    %c0_i32_343 = arith.constant 0 : i32
    %c0_i32_344 = arith.constant 0 : i32
    %513 = tpu.memref_slice %arg3[%512, %c0_i32_344] : memref<50x128xf32, #tpu.memory_space<any>> -> memref<1x128xf32, #tpu.memory_space<any>>
    %c30_i32_345 = arith.constant 30 : i32
    %c0_i32_346 = arith.constant 0 : i32
    %514 = tpu.memref_slice %arg6[%c30_i32_345, %c0_i32_346] : memref<32x128xf32, #tpu.memory_space<vmem>> -> memref<1x128xf32, #tpu.memory_space<vmem>>
    %515 = tpu.memref_slice %arg8[%c0_i32_343] : memref<2x!tpu.dma_semaphore, #tpu.memory_space<semaphore_mem>> -> memref<1x!tpu.dma_semaphore, #tpu.memory_space<semaphore_mem>>
    %516 = tpu.memref_squeeze %515 : memref<1x!tpu.dma_semaphore, #tpu.memory_space<semaphore_mem>> -> memref<!tpu.dma_semaphore, #tpu.memory_space<semaphore_mem>>
    tpu.enqueue_dma source(%513 : memref<1x128xf32, #tpu.memory_space<any>>) target(%514 : memref<1x128xf32, #tpu.memory_space<vmem>>) target_semaphore(%516 : memref<!tpu.dma_semaphore, #tpu.memory_space<semaphore_mem>>)
    %c36_i32_347 = arith.constant 36 : i32
    %517 = arith.addi %4, %c36_i32_347 : i32
    %c0_i32_348 = arith.constant 0 : i32
    %518 = arith.addi %517, %c0_i32_348 : i32
    %519 = arith.index_cast %518 : i32 to index
    %520 = memref.load %arg2[%519] : memref<48xi32, #tpu.memory_space<smem>>
    %c1_i32_349 = arith.constant 1 : i32
    %c0_i32_350 = arith.constant 0 : i32
    %521 = tpu.memref_slice %arg4[%520, %c0_i32_350] : memref<50x128xf32, #tpu.memory_space<any>> -> memref<1x128xf32, #tpu.memory_space<any>>
    %c6_i32_351 = arith.constant 6 : i32
    %c0_i32_352 = arith.constant 0 : i32
    %522 = tpu.memref_slice %arg7[%c6_i32_351, %c0_i32_352] : memref<48x128xf32, #tpu.memory_space<vmem>> -> memref<1x128xf32, #tpu.memory_space<vmem>>
    %523 = tpu.memref_slice %arg8[%c1_i32_349] : memref<2x!tpu.dma_semaphore, #tpu.memory_space<semaphore_mem>> -> memref<1x!tpu.dma_semaphore, #tpu.memory_space<semaphore_mem>>
    %524 = tpu.memref_squeeze %523 : memref<1x!tpu.dma_semaphore, #tpu.memory_space<semaphore_mem>> -> memref<!tpu.dma_semaphore, #tpu.memory_space<semaphore_mem>>
    tpu.enqueue_dma source(%521 : memref<1x128xf32, #tpu.memory_space<any>>) target(%522 : memref<1x128xf32, #tpu.memory_space<vmem>>) target_semaphore(%524 : memref<!tpu.dma_semaphore, #tpu.memory_space<semaphore_mem>>)
    %c36_i32_353 = arith.constant 36 : i32
    %525 = arith.addi %4, %c36_i32_353 : i32
    %c1_i32_354 = arith.constant 1 : i32
    %526 = arith.addi %525, %c1_i32_354 : i32
    %527 = arith.index_cast %526 : i32 to index
    %528 = memref.load %arg2[%527] : memref<48xi32, #tpu.memory_space<smem>>
    %c1_i32_355 = arith.constant 1 : i32
    %c0_i32_356 = arith.constant 0 : i32
    %529 = tpu.memref_slice %arg4[%528, %c0_i32_356] : memref<50x128xf32, #tpu.memory_space<any>> -> memref<1x128xf32, #tpu.memory_space<any>>
    %c14_i32_357 = arith.constant 14 : i32
    %c0_i32_358 = arith.constant 0 : i32
    %530 = tpu.memref_slice %arg7[%c14_i32_357, %c0_i32_358] : memref<48x128xf32, #tpu.memory_space<vmem>> -> memref<1x128xf32, #tpu.memory_space<vmem>>
    %531 = tpu.memref_slice %arg8[%c1_i32_355] : memref<2x!tpu.dma_semaphore, #tpu.memory_space<semaphore_mem>> -> memref<1x!tpu.dma_semaphore, #tpu.memory_space<semaphore_mem>>
    %532 = tpu.memref_squeeze %531 : memref<1x!tpu.dma_semaphore, #tpu.memory_space<semaphore_mem>> -> memref<!tpu.dma_semaphore, #tpu.memory_space<semaphore_mem>>
    tpu.enqueue_dma source(%529 : memref<1x128xf32, #tpu.memory_space<any>>) target(%530 : memref<1x128xf32, #tpu.memory_space<vmem>>) target_semaphore(%532 : memref<!tpu.dma_semaphore, #tpu.memory_space<semaphore_mem>>)
    %c36_i32_359 = arith.constant 36 : i32
    %533 = arith.addi %4, %c36_i32_359 : i32
    %c2_i32_360 = arith.constant 2 : i32
    %534 = arith.addi %533, %c2_i32_360 : i32
    %535 = arith.index_cast %534 : i32 to index
    %536 = memref.load %arg2[%535] : memref<48xi32, #tpu.memory_space<smem>>
    %c1_i32_361 = arith.constant 1 : i32
    %c0_i32_362 = arith.constant 0 : i32
    %537 = tpu.memref_slice %arg4[%536, %c0_i32_362] : memref<50x128xf32, #tpu.memory_space<any>> -> memref<1x128xf32, #tpu.memory_space<any>>
    %c22_i32_363 = arith.constant 22 : i32
    %c0_i32_364 = arith.constant 0 : i32
    %538 = tpu.memref_slice %arg7[%c22_i32_363, %c0_i32_364] : memref<48x128xf32, #tpu.memory_space<vmem>> -> memref<1x128xf32, #tpu.memory_space<vmem>>
    %539 = tpu.memref_slice %arg8[%c1_i32_361] : memref<2x!tpu.dma_semaphore, #tpu.memory_space<semaphore_mem>> -> memref<1x!tpu.dma_semaphore, #tpu.memory_space<semaphore_mem>>
    %540 = tpu.memref_squeeze %539 : memref<1x!tpu.dma_semaphore, #tpu.memory_space<semaphore_mem>> -> memref<!tpu.dma_semaphore, #tpu.memory_space<semaphore_mem>>
    tpu.enqueue_dma source(%537 : memref<1x128xf32, #tpu.memory_space<any>>) target(%538 : memref<1x128xf32, #tpu.memory_space<vmem>>) target_semaphore(%540 : memref<!tpu.dma_semaphore, #tpu.memory_space<semaphore_mem>>)
    %c36_i32_365 = arith.constant 36 : i32
    %541 = arith.addi %4, %c36_i32_365 : i32
    %c3_i32_366 = arith.constant 3 : i32
    %542 = arith.addi %541, %c3_i32_366 : i32
    %543 = arith.index_cast %542 : i32 to index
    %544 = memref.load %arg2[%543] : memref<48xi32, #tpu.memory_space<smem>>
    %c1_i32_367 = arith.constant 1 : i32
    %c0_i32_368 = arith.constant 0 : i32
    %545 = tpu.memref_slice %arg4[%544, %c0_i32_368] : memref<50x128xf32, #tpu.memory_space<any>> -> memref<1x128xf32, #tpu.memory_space<any>>
    %c30_i32_369 = arith.constant 30 : i32
    %c0_i32_370 = arith.constant 0 : i32
    %546 = tpu.memref_slice %arg7[%c30_i32_369, %c0_i32_370] : memref<48x128xf32, #tpu.memory_space<vmem>> -> memref<1x128xf32, #tpu.memory_space<vmem>>
    %547 = tpu.memref_slice %arg8[%c1_i32_367] : memref<2x!tpu.dma_semaphore, #tpu.memory_space<semaphore_mem>> -> memref<1x!tpu.dma_semaphore, #tpu.memory_space<semaphore_mem>>
    %548 = tpu.memref_squeeze %547 : memref<1x!tpu.dma_semaphore, #tpu.memory_space<semaphore_mem>> -> memref<!tpu.dma_semaphore, #tpu.memory_space<semaphore_mem>>
    tpu.enqueue_dma source(%545 : memref<1x128xf32, #tpu.memory_space<any>>) target(%546 : memref<1x128xf32, #tpu.memory_space<vmem>>) target_semaphore(%548 : memref<!tpu.dma_semaphore, #tpu.memory_space<semaphore_mem>>)
    %c36_i32_371 = arith.constant 36 : i32
    %549 = arith.addi %4, %c36_i32_371 : i32
    %c4_i32_372 = arith.constant 4 : i32
    %550 = arith.addi %549, %c4_i32_372 : i32
    %551 = arith.index_cast %550 : i32 to index
    %552 = memref.load %arg2[%551] : memref<48xi32, #tpu.memory_space<smem>>
    %c1_i32_373 = arith.constant 1 : i32
    %c0_i32_374 = arith.constant 0 : i32
    %553 = tpu.memref_slice %arg4[%552, %c0_i32_374] : memref<50x128xf32, #tpu.memory_space<any>> -> memref<1x128xf32, #tpu.memory_space<any>>
    %c38_i32 = arith.constant 38 : i32
    %c0_i32_375 = arith.constant 0 : i32
    %554 = tpu.memref_slice %arg7[%c38_i32, %c0_i32_375] : memref<48x128xf32, #tpu.memory_space<vmem>> -> memref<1x128xf32, #tpu.memory_space<vmem>>
    %555 = tpu.memref_slice %arg8[%c1_i32_373] : memref<2x!tpu.dma_semaphore, #tpu.memory_space<semaphore_mem>> -> memref<1x!tpu.dma_semaphore, #tpu.memory_space<semaphore_mem>>
    %556 = tpu.memref_squeeze %555 : memref<1x!tpu.dma_semaphore, #tpu.memory_space<semaphore_mem>> -> memref<!tpu.dma_semaphore, #tpu.memory_space<semaphore_mem>>
    tpu.enqueue_dma source(%553 : memref<1x128xf32, #tpu.memory_space<any>>) target(%554 : memref<1x128xf32, #tpu.memory_space<vmem>>) target_semaphore(%556 : memref<!tpu.dma_semaphore, #tpu.memory_space<semaphore_mem>>)
    %c36_i32_376 = arith.constant 36 : i32
    %557 = arith.addi %4, %c36_i32_376 : i32
    %c5_i32_377 = arith.constant 5 : i32
    %558 = arith.addi %557, %c5_i32_377 : i32
    %559 = arith.index_cast %558 : i32 to index
    %560 = memref.load %arg2[%559] : memref<48xi32, #tpu.memory_space<smem>>
    %c1_i32_378 = arith.constant 1 : i32
    %c0_i32_379 = arith.constant 0 : i32
    %561 = tpu.memref_slice %arg4[%560, %c0_i32_379] : memref<50x128xf32, #tpu.memory_space<any>> -> memref<1x128xf32, #tpu.memory_space<any>>
    %c46_i32 = arith.constant 46 : i32
    %c0_i32_380 = arith.constant 0 : i32
    %562 = tpu.memref_slice %arg7[%c46_i32, %c0_i32_380] : memref<48x128xf32, #tpu.memory_space<vmem>> -> memref<1x128xf32, #tpu.memory_space<vmem>>
    %563 = tpu.memref_slice %arg8[%c1_i32_378] : memref<2x!tpu.dma_semaphore, #tpu.memory_space<semaphore_mem>> -> memref<1x!tpu.dma_semaphore, #tpu.memory_space<semaphore_mem>>
    %564 = tpu.memref_squeeze %563 : memref<1x!tpu.dma_semaphore, #tpu.memory_space<semaphore_mem>> -> memref<!tpu.dma_semaphore, #tpu.memory_space<semaphore_mem>>
    tpu.enqueue_dma source(%561 : memref<1x128xf32, #tpu.memory_space<any>>) target(%562 : memref<1x128xf32, #tpu.memory_space<vmem>>) target_semaphore(%564 : memref<!tpu.dma_semaphore, #tpu.memory_space<semaphore_mem>>)
    %c28_i32_381 = arith.constant 28 : i32
    %565 = arith.addi %3, %c28_i32_381 : i32
    %c0_i32_382 = arith.constant 0 : i32
    %566 = arith.addi %565, %c0_i32_382 : i32
    %567 = arith.index_cast %566 : i32 to index
    %568 = memref.load %arg1[%567] : memref<32xi32, #tpu.memory_space<smem>>
    %c0_i32_383 = arith.constant 0 : i32
    %c0_i32_384 = arith.constant 0 : i32
    %569 = tpu.memref_slice %arg3[%568, %c0_i32_384] : memref<50x128xf32, #tpu.memory_space<any>> -> memref<1x128xf32, #tpu.memory_space<any>>
    %c7_i32 = arith.constant 7 : i32
    %c0_i32_385 = arith.constant 0 : i32
    %570 = tpu.memref_slice %arg6[%c7_i32, %c0_i32_385] : memref<32x128xf32, #tpu.memory_space<vmem>> -> memref<1x128xf32, #tpu.memory_space<vmem>>
    %571 = tpu.memref_slice %arg8[%c0_i32_383] : memref<2x!tpu.dma_semaphore, #tpu.memory_space<semaphore_mem>> -> memref<1x!tpu.dma_semaphore, #tpu.memory_space<semaphore_mem>>
    %572 = tpu.memref_squeeze %571 : memref<1x!tpu.dma_semaphore, #tpu.memory_space<semaphore_mem>> -> memref<!tpu.dma_semaphore, #tpu.memory_space<semaphore_mem>>
    tpu.enqueue_dma source(%569 : memref<1x128xf32, #tpu.memory_space<any>>) target(%570 : memref<1x128xf32, #tpu.memory_space<vmem>>) target_semaphore(%572 : memref<!tpu.dma_semaphore, #tpu.memory_space<semaphore_mem>>)
    %c28_i32_386 = arith.constant 28 : i32
    %573 = arith.addi %3, %c28_i32_386 : i32
    %c1_i32_387 = arith.constant 1 : i32
    %574 = arith.addi %573, %c1_i32_387 : i32
    %575 = arith.index_cast %574 : i32 to index
    %576 = memref.load %arg1[%575] : memref<32xi32, #tpu.memory_space<smem>>
    %c0_i32_388 = arith.constant 0 : i32
    %c0_i32_389 = arith.constant 0 : i32
    %577 = tpu.memref_slice %arg3[%576, %c0_i32_389] : memref<50x128xf32, #tpu.memory_space<any>> -> memref<1x128xf32, #tpu.memory_space<any>>
    %c15_i32 = arith.constant 15 : i32
    %c0_i32_390 = arith.constant 0 : i32
    %578 = tpu.memref_slice %arg6[%c15_i32, %c0_i32_390] : memref<32x128xf32, #tpu.memory_space<vmem>> -> memref<1x128xf32, #tpu.memory_space<vmem>>
    %579 = tpu.memref_slice %arg8[%c0_i32_388] : memref<2x!tpu.dma_semaphore, #tpu.memory_space<semaphore_mem>> -> memref<1x!tpu.dma_semaphore, #tpu.memory_space<semaphore_mem>>
    %580 = tpu.memref_squeeze %579 : memref<1x!tpu.dma_semaphore, #tpu.memory_space<semaphore_mem>> -> memref<!tpu.dma_semaphore, #tpu.memory_space<semaphore_mem>>
    tpu.enqueue_dma source(%577 : memref<1x128xf32, #tpu.memory_space<any>>) target(%578 : memref<1x128xf32, #tpu.memory_space<vmem>>) target_semaphore(%580 : memref<!tpu.dma_semaphore, #tpu.memory_space<semaphore_mem>>)
    %c28_i32_391 = arith.constant 28 : i32
    %581 = arith.addi %3, %c28_i32_391 : i32
    %c2_i32_392 = arith.constant 2 : i32
    %582 = arith.addi %581, %c2_i32_392 : i32
    %583 = arith.index_cast %582 : i32 to index
    %584 = memref.load %arg1[%583] : memref<32xi32, #tpu.memory_space<smem>>
    %c0_i32_393 = arith.constant 0 : i32
    %c0_i32_394 = arith.constant 0 : i32
    %585 = tpu.memref_slice %arg3[%584, %c0_i32_394] : memref<50x128xf32, #tpu.memory_space<any>> -> memref<1x128xf32, #tpu.memory_space<any>>
    %c23_i32 = arith.constant 23 : i32
    %c0_i32_395 = arith.constant 0 : i32
    %586 = tpu.memref_slice %arg6[%c23_i32, %c0_i32_395] : memref<32x128xf32, #tpu.memory_space<vmem>> -> memref<1x128xf32, #tpu.memory_space<vmem>>
    %587 = tpu.memref_slice %arg8[%c0_i32_393] : memref<2x!tpu.dma_semaphore, #tpu.memory_space<semaphore_mem>> -> memref<1x!tpu.dma_semaphore, #tpu.memory_space<semaphore_mem>>
    %588 = tpu.memref_squeeze %587 : memref<1x!tpu.dma_semaphore, #tpu.memory_space<semaphore_mem>> -> memref<!tpu.dma_semaphore, #tpu.memory_space<semaphore_mem>>
    tpu.enqueue_dma source(%585 : memref<1x128xf32, #tpu.memory_space<any>>) target(%586 : memref<1x128xf32, #tpu.memory_space<vmem>>) target_semaphore(%588 : memref<!tpu.dma_semaphore, #tpu.memory_space<semaphore_mem>>)
    %c28_i32_396 = arith.constant 28 : i32
    %589 = arith.addi %3, %c28_i32_396 : i32
    %c3_i32_397 = arith.constant 3 : i32
    %590 = arith.addi %589, %c3_i32_397 : i32
    %591 = arith.index_cast %590 : i32 to index
    %592 = memref.load %arg1[%591] : memref<32xi32, #tpu.memory_space<smem>>
    %c0_i32_398 = arith.constant 0 : i32
    %c0_i32_399 = arith.constant 0 : i32
    %593 = tpu.memref_slice %arg3[%592, %c0_i32_399] : memref<50x128xf32, #tpu.memory_space<any>> -> memref<1x128xf32, #tpu.memory_space<any>>
    %c31_i32 = arith.constant 31 : i32
    %c0_i32_400 = arith.constant 0 : i32
    %594 = tpu.memref_slice %arg6[%c31_i32, %c0_i32_400] : memref<32x128xf32, #tpu.memory_space<vmem>> -> memref<1x128xf32, #tpu.memory_space<vmem>>
    %595 = tpu.memref_slice %arg8[%c0_i32_398] : memref<2x!tpu.dma_semaphore, #tpu.memory_space<semaphore_mem>> -> memref<1x!tpu.dma_semaphore, #tpu.memory_space<semaphore_mem>>
    %596 = tpu.memref_squeeze %595 : memref<1x!tpu.dma_semaphore, #tpu.memory_space<semaphore_mem>> -> memref<!tpu.dma_semaphore, #tpu.memory_space<semaphore_mem>>
    tpu.enqueue_dma source(%593 : memref<1x128xf32, #tpu.memory_space<any>>) target(%594 : memref<1x128xf32, #tpu.memory_space<vmem>>) target_semaphore(%596 : memref<!tpu.dma_semaphore, #tpu.memory_space<semaphore_mem>>)
    %c42_i32_401 = arith.constant 42 : i32
    %597 = arith.addi %4, %c42_i32_401 : i32
    %c0_i32_402 = arith.constant 0 : i32
    %598 = arith.addi %597, %c0_i32_402 : i32
    %599 = arith.index_cast %598 : i32 to index
    %600 = memref.load %arg2[%599] : memref<48xi32, #tpu.memory_space<smem>>
    %c1_i32_403 = arith.constant 1 : i32
    %c0_i32_404 = arith.constant 0 : i32
    %601 = tpu.memref_slice %arg4[%600, %c0_i32_404] : memref<50x128xf32, #tpu.memory_space<any>> -> memref<1x128xf32, #tpu.memory_space<any>>
    %c7_i32_405 = arith.constant 7 : i32
    %c0_i32_406 = arith.constant 0 : i32
    %602 = tpu.memref_slice %arg7[%c7_i32_405, %c0_i32_406] : memref<48x128xf32, #tpu.memory_space<vmem>> -> memref<1x128xf32, #tpu.memory_space<vmem>>
    %603 = tpu.memref_slice %arg8[%c1_i32_403] : memref<2x!tpu.dma_semaphore, #tpu.memory_space<semaphore_mem>> -> memref<1x!tpu.dma_semaphore, #tpu.memory_space<semaphore_mem>>
    %604 = tpu.memref_squeeze %603 : memref<1x!tpu.dma_semaphore, #tpu.memory_space<semaphore_mem>> -> memref<!tpu.dma_semaphore, #tpu.memory_space<semaphore_mem>>
    tpu.enqueue_dma source(%601 : memref<1x128xf32, #tpu.memory_space<any>>) target(%602 : memref<1x128xf32, #tpu.memory_space<vmem>>) target_semaphore(%604 : memref<!tpu.dma_semaphore, #tpu.memory_space<semaphore_mem>>)
    %c42_i32_407 = arith.constant 42 : i32
    %605 = arith.addi %4, %c42_i32_407 : i32
    %c1_i32_408 = arith.constant 1 : i32
    %606 = arith.addi %605, %c1_i32_408 : i32
    %607 = arith.index_cast %606 : i32 to index
    %608 = memref.load %arg2[%607] : memref<48xi32, #tpu.memory_space<smem>>
    %c1_i32_409 = arith.constant 1 : i32
    %c0_i32_410 = arith.constant 0 : i32
    %609 = tpu.memref_slice %arg4[%608, %c0_i32_410] : memref<50x128xf32, #tpu.memory_space<any>> -> memref<1x128xf32, #tpu.memory_space<any>>
    %c15_i32_411 = arith.constant 15 : i32
    %c0_i32_412 = arith.constant 0 : i32
    %610 = tpu.memref_slice %arg7[%c15_i32_411, %c0_i32_412] : memref<48x128xf32, #tpu.memory_space<vmem>> -> memref<1x128xf32, #tpu.memory_space<vmem>>
    %611 = tpu.memref_slice %arg8[%c1_i32_409] : memref<2x!tpu.dma_semaphore, #tpu.memory_space<semaphore_mem>> -> memref<1x!tpu.dma_semaphore, #tpu.memory_space<semaphore_mem>>
    %612 = tpu.memref_squeeze %611 : memref<1x!tpu.dma_semaphore, #tpu.memory_space<semaphore_mem>> -> memref<!tpu.dma_semaphore, #tpu.memory_space<semaphore_mem>>
    tpu.enqueue_dma source(%609 : memref<1x128xf32, #tpu.memory_space<any>>) target(%610 : memref<1x128xf32, #tpu.memory_space<vmem>>) target_semaphore(%612 : memref<!tpu.dma_semaphore, #tpu.memory_space<semaphore_mem>>)
    %c42_i32_413 = arith.constant 42 : i32
    %613 = arith.addi %4, %c42_i32_413 : i32
    %c2_i32_414 = arith.constant 2 : i32
    %614 = arith.addi %613, %c2_i32_414 : i32
    %615 = arith.index_cast %614 : i32 to index
    %616 = memref.load %arg2[%615] : memref<48xi32, #tpu.memory_space<smem>>
    %c1_i32_415 = arith.constant 1 : i32
    %c0_i32_416 = arith.constant 0 : i32
    %617 = tpu.memref_slice %arg4[%616, %c0_i32_416] : memref<50x128xf32, #tpu.memory_space<any>> -> memref<1x128xf32, #tpu.memory_space<any>>
    %c23_i32_417 = arith.constant 23 : i32
    %c0_i32_418 = arith.constant 0 : i32
    %618 = tpu.memref_slice %arg7[%c23_i32_417, %c0_i32_418] : memref<48x128xf32, #tpu.memory_space<vmem>> -> memref<1x128xf32, #tpu.memory_space<vmem>>
    %619 = tpu.memref_slice %arg8[%c1_i32_415] : memref<2x!tpu.dma_semaphore, #tpu.memory_space<semaphore_mem>> -> memref<1x!tpu.dma_semaphore, #tpu.memory_space<semaphore_mem>>
    %620 = tpu.memref_squeeze %619 : memref<1x!tpu.dma_semaphore, #tpu.memory_space<semaphore_mem>> -> memref<!tpu.dma_semaphore, #tpu.memory_space<semaphore_mem>>
    tpu.enqueue_dma source(%617 : memref<1x128xf32, #tpu.memory_space<any>>) target(%618 : memref<1x128xf32, #tpu.memory_space<vmem>>) target_semaphore(%620 : memref<!tpu.dma_semaphore, #tpu.memory_space<semaphore_mem>>)
    %c42_i32_419 = arith.constant 42 : i32
    %621 = arith.addi %4, %c42_i32_419 : i32
    %c3_i32_420 = arith.constant 3 : i32
    %622 = arith.addi %621, %c3_i32_420 : i32
    %623 = arith.index_cast %622 : i32 to index
    %624 = memref.load %arg2[%623] : memref<48xi32, #tpu.memory_space<smem>>
    %c1_i32_421 = arith.constant 1 : i32
    %c0_i32_422 = arith.constant 0 : i32
    %625 = tpu.memref_slice %arg4[%624, %c0_i32_422] : memref<50x128xf32, #tpu.memory_space<any>> -> memref<1x128xf32, #tpu.memory_space<any>>
    %c31_i32_423 = arith.constant 31 : i32
    %c0_i32_424 = arith.constant 0 : i32
    %626 = tpu.memref_slice %arg7[%c31_i32_423, %c0_i32_424] : memref<48x128xf32, #tpu.memory_space<vmem>> -> memref<1x128xf32, #tpu.memory_space<vmem>>
    %627 = tpu.memref_slice %arg8[%c1_i32_421] : memref<2x!tpu.dma_semaphore, #tpu.memory_space<semaphore_mem>> -> memref<1x!tpu.dma_semaphore, #tpu.memory_space<semaphore_mem>>
    %628 = tpu.memref_squeeze %627 : memref<1x!tpu.dma_semaphore, #tpu.memory_space<semaphore_mem>> -> memref<!tpu.dma_semaphore, #tpu.memory_space<semaphore_mem>>
    tpu.enqueue_dma source(%625 : memref<1x128xf32, #tpu.memory_space<any>>) target(%626 : memref<1x128xf32, #tpu.memory_space<vmem>>) target_semaphore(%628 : memref<!tpu.dma_semaphore, #tpu.memory_space<semaphore_mem>>)
    %c42_i32_425 = arith.constant 42 : i32
    %629 = arith.addi %4, %c42_i32_425 : i32
    %c4_i32_426 = arith.constant 4 : i32
    %630 = arith.addi %629, %c4_i32_426 : i32
    %631 = arith.index_cast %630 : i32 to index
    %632 = memref.load %arg2[%631] : memref<48xi32, #tpu.memory_space<smem>>
    %c1_i32_427 = arith.constant 1 : i32
    %c0_i32_428 = arith.constant 0 : i32
    %633 = tpu.memref_slice %arg4[%632, %c0_i32_428] : memref<50x128xf32, #tpu.memory_space<any>> -> memref<1x128xf32, #tpu.memory_space<any>>
    %c39_i32 = arith.constant 39 : i32
    %c0_i32_429 = arith.constant 0 : i32
    %634 = tpu.memref_slice %arg7[%c39_i32, %c0_i32_429] : memref<48x128xf32, #tpu.memory_space<vmem>> -> memref<1x128xf32, #tpu.memory_space<vmem>>
    %635 = tpu.memref_slice %arg8[%c1_i32_427] : memref<2x!tpu.dma_semaphore, #tpu.memory_space<semaphore_mem>> -> memref<1x!tpu.dma_semaphore, #tpu.memory_space<semaphore_mem>>
    %636 = tpu.memref_squeeze %635 : memref<1x!tpu.dma_semaphore, #tpu.memory_space<semaphore_mem>> -> memref<!tpu.dma_semaphore, #tpu.memory_space<semaphore_mem>>
    tpu.enqueue_dma source(%633 : memref<1x128xf32, #tpu.memory_space<any>>) target(%634 : memref<1x128xf32, #tpu.memory_space<vmem>>) target_semaphore(%636 : memref<!tpu.dma_semaphore, #tpu.memory_space<semaphore_mem>>)
    %c42_i32_430 = arith.constant 42 : i32
    %637 = arith.addi %4, %c42_i32_430 : i32
    %c5_i32_431 = arith.constant 5 : i32
    %638 = arith.addi %637, %c5_i32_431 : i32
    %639 = arith.index_cast %638 : i32 to index
    %640 = memref.load %arg2[%639] : memref<48xi32, #tpu.memory_space<smem>>
    %c1_i32_432 = arith.constant 1 : i32
    %c0_i32_433 = arith.constant 0 : i32
    %641 = tpu.memref_slice %arg4[%640, %c0_i32_433] : memref<50x128xf32, #tpu.memory_space<any>> -> memref<1x128xf32, #tpu.memory_space<any>>
    %c47_i32 = arith.constant 47 : i32
    %c0_i32_434 = arith.constant 0 : i32
    %642 = tpu.memref_slice %arg7[%c47_i32, %c0_i32_434] : memref<48x128xf32, #tpu.memory_space<vmem>> -> memref<1x128xf32, #tpu.memory_space<vmem>>
    %643 = tpu.memref_slice %arg8[%c1_i32_432] : memref<2x!tpu.dma_semaphore, #tpu.memory_space<semaphore_mem>> -> memref<1x!tpu.dma_semaphore, #tpu.memory_space<semaphore_mem>>
    %644 = tpu.memref_squeeze %643 : memref<1x!tpu.dma_semaphore, #tpu.memory_space<semaphore_mem>> -> memref<!tpu.dma_semaphore, #tpu.memory_space<semaphore_mem>>
    tpu.enqueue_dma source(%641 : memref<1x128xf32, #tpu.memory_space<any>>) target(%642 : memref<1x128xf32, #tpu.memory_space<vmem>>) target_semaphore(%644 : memref<!tpu.dma_semaphore, #tpu.memory_space<semaphore_mem>>)
    %c0_i32_435 = arith.constant 0 : i32
    %c0_i32_436 = arith.constant 0 : i32
    %645 = tpu.memref_slice %arg3[%8, %c0_i32_436] : memref<50x128xf32, #tpu.memory_space<any>> -> memref<1x128xf32, #tpu.memory_space<any>>
    %c0_i32_437 = arith.constant 0 : i32
    %c0_i32_438 = arith.constant 0 : i32
    %646 = tpu.memref_slice %arg6[%c0_i32_437, %c0_i32_438] : memref<32x128xf32, #tpu.memory_space<vmem>> -> memref<1x128xf32, #tpu.memory_space<vmem>>
    %647 = tpu.memref_slice %arg8[%c0_i32_435] : memref<2x!tpu.dma_semaphore, #tpu.memory_space<semaphore_mem>> -> memref<1x!tpu.dma_semaphore, #tpu.memory_space<semaphore_mem>>
    %648 = tpu.memref_squeeze %647 : memref<1x!tpu.dma_semaphore, #tpu.memory_space<semaphore_mem>> -> memref<!tpu.dma_semaphore, #tpu.memory_space<semaphore_mem>>
    tpu.wait_dma2 semaphore(%648 : memref<!tpu.dma_semaphore, #tpu.memory_space<semaphore_mem>>) src(%645 : memref<1x128xf32, #tpu.memory_space<any>>) dst(%646 : memref<1x128xf32, #tpu.memory_space<vmem>>)
    %c0_i32_439 = arith.constant 0 : i32
    %c0_i32_440 = arith.constant 0 : i32
    %649 = tpu.memref_slice %arg3[%16, %c0_i32_440] : memref<50x128xf32, #tpu.memory_space<any>> -> memref<1x128xf32, #tpu.memory_space<any>>
    %c8_i32_441 = arith.constant 8 : i32
    %c0_i32_442 = arith.constant 0 : i32
    %650 = tpu.memref_slice %arg6[%c8_i32_441, %c0_i32_442] : memref<32x128xf32, #tpu.memory_space<vmem>> -> memref<1x128xf32, #tpu.memory_space<vmem>>
    %651 = tpu.memref_slice %arg8[%c0_i32_439] : memref<2x!tpu.dma_semaphore, #tpu.memory_space<semaphore_mem>> -> memref<1x!tpu.dma_semaphore, #tpu.memory_space<semaphore_mem>>
    %652 = tpu.memref_squeeze %651 : memref<1x!tpu.dma_semaphore, #tpu.memory_space<semaphore_mem>> -> memref<!tpu.dma_semaphore, #tpu.memory_space<semaphore_mem>>
    tpu.wait_dma2 semaphore(%652 : memref<!tpu.dma_semaphore, #tpu.memory_space<semaphore_mem>>) src(%649 : memref<1x128xf32, #tpu.memory_space<any>>) dst(%650 : memref<1x128xf32, #tpu.memory_space<vmem>>)
    %c0_i32_443 = arith.constant 0 : i32
    %c0_i32_444 = arith.constant 0 : i32
    %653 = tpu.memref_slice %arg3[%24, %c0_i32_444] : memref<50x128xf32, #tpu.memory_space<any>> -> memref<1x128xf32, #tpu.memory_space<any>>
    %c16_i32_445 = arith.constant 16 : i32
    %c0_i32_446 = arith.constant 0 : i32
    %654 = tpu.memref_slice %arg6[%c16_i32_445, %c0_i32_446] : memref<32x128xf32, #tpu.memory_space<vmem>> -> memref<1x128xf32, #tpu.memory_space<vmem>>
    %655 = tpu.memref_slice %arg8[%c0_i32_443] : memref<2x!tpu.dma_semaphore, #tpu.memory_space<semaphore_mem>> -> memref<1x!tpu.dma_semaphore, #tpu.memory_space<semaphore_mem>>
    %656 = tpu.memref_squeeze %655 : memref<1x!tpu.dma_semaphore, #tpu.memory_space<semaphore_mem>> -> memref<!tpu.dma_semaphore, #tpu.memory_space<semaphore_mem>>
    tpu.wait_dma2 semaphore(%656 : memref<!tpu.dma_semaphore, #tpu.memory_space<semaphore_mem>>) src(%653 : memref<1x128xf32, #tpu.memory_space<any>>) dst(%654 : memref<1x128xf32, #tpu.memory_space<vmem>>)
    %c0_i32_447 = arith.constant 0 : i32
    %c0_i32_448 = arith.constant 0 : i32
    %657 = tpu.memref_slice %arg3[%32, %c0_i32_448] : memref<50x128xf32, #tpu.memory_space<any>> -> memref<1x128xf32, #tpu.memory_space<any>>
    %c24_i32_449 = arith.constant 24 : i32
    %c0_i32_450 = arith.constant 0 : i32
    %658 = tpu.memref_slice %arg6[%c24_i32_449, %c0_i32_450] : memref<32x128xf32, #tpu.memory_space<vmem>> -> memref<1x128xf32, #tpu.memory_space<vmem>>
    %659 = tpu.memref_slice %arg8[%c0_i32_447] : memref<2x!tpu.dma_semaphore, #tpu.memory_space<semaphore_mem>> -> memref<1x!tpu.dma_semaphore, #tpu.memory_space<semaphore_mem>>
    %660 = tpu.memref_squeeze %659 : memref<1x!tpu.dma_semaphore, #tpu.memory_space<semaphore_mem>> -> memref<!tpu.dma_semaphore, #tpu.memory_space<semaphore_mem>>
    tpu.wait_dma2 semaphore(%660 : memref<!tpu.dma_semaphore, #tpu.memory_space<semaphore_mem>>) src(%657 : memref<1x128xf32, #tpu.memory_space<any>>) dst(%658 : memref<1x128xf32, #tpu.memory_space<vmem>>)
    %c1_i32_451 = arith.constant 1 : i32
    %c0_i32_452 = arith.constant 0 : i32
    %661 = tpu.memref_slice %arg4[%40, %c0_i32_452] : memref<50x128xf32, #tpu.memory_space<any>> -> memref<1x128xf32, #tpu.memory_space<any>>
    %c0_i32_453 = arith.constant 0 : i32
    %c0_i32_454 = arith.constant 0 : i32
    %662 = tpu.memref_slice %arg7[%c0_i32_453, %c0_i32_454] : memref<48x128xf32, #tpu.memory_space<vmem>> -> memref<1x128xf32, #tpu.memory_space<vmem>>
    %663 = tpu.memref_slice %arg8[%c1_i32_451] : memref<2x!tpu.dma_semaphore, #tpu.memory_space<semaphore_mem>> -> memref<1x!tpu.dma_semaphore, #tpu.memory_space<semaphore_mem>>
    %664 = tpu.memref_squeeze %663 : memref<1x!tpu.dma_semaphore, #tpu.memory_space<semaphore_mem>> -> memref<!tpu.dma_semaphore, #tpu.memory_space<semaphore_mem>>
    tpu.wait_dma2 semaphore(%664 : memref<!tpu.dma_semaphore, #tpu.memory_space<semaphore_mem>>) src(%661 : memref<1x128xf32, #tpu.memory_space<any>>) dst(%662 : memref<1x128xf32, #tpu.memory_space<vmem>>)
    %c1_i32_455 = arith.constant 1 : i32
    %c0_i32_456 = arith.constant 0 : i32
    %665 = tpu.memref_slice %arg4[%48, %c0_i32_456] : memref<50x128xf32, #tpu.memory_space<any>> -> memref<1x128xf32, #tpu.memory_space<any>>
    %c8_i32_457 = arith.constant 8 : i32
    %c0_i32_458 = arith.constant 0 : i32
    %666 = tpu.memref_slice %arg7[%c8_i32_457, %c0_i32_458] : memref<48x128xf32, #tpu.memory_space<vmem>> -> memref<1x128xf32, #tpu.memory_space<vmem>>
    %667 = tpu.memref_slice %arg8[%c1_i32_455] : memref<2x!tpu.dma_semaphore, #tpu.memory_space<semaphore_mem>> -> memref<1x!tpu.dma_semaphore, #tpu.memory_space<semaphore_mem>>
    %668 = tpu.memref_squeeze %667 : memref<1x!tpu.dma_semaphore, #tpu.memory_space<semaphore_mem>> -> memref<!tpu.dma_semaphore, #tpu.memory_space<semaphore_mem>>
    tpu.wait_dma2 semaphore(%668 : memref<!tpu.dma_semaphore, #tpu.memory_space<semaphore_mem>>) src(%665 : memref<1x128xf32, #tpu.memory_space<any>>) dst(%666 : memref<1x128xf32, #tpu.memory_space<vmem>>)
    %c1_i32_459 = arith.constant 1 : i32
    %c0_i32_460 = arith.constant 0 : i32
    %669 = tpu.memref_slice %arg4[%56, %c0_i32_460] : memref<50x128xf32, #tpu.memory_space<any>> -> memref<1x128xf32, #tpu.memory_space<any>>
    %c16_i32_461 = arith.constant 16 : i32
    %c0_i32_462 = arith.constant 0 : i32
    %670 = tpu.memref_slice %arg7[%c16_i32_461, %c0_i32_462] : memref<48x128xf32, #tpu.memory_space<vmem>> -> memref<1x128xf32, #tpu.memory_space<vmem>>
    %671 = tpu.memref_slice %arg8[%c1_i32_459] : memref<2x!tpu.dma_semaphore, #tpu.memory_space<semaphore_mem>> -> memref<1x!tpu.dma_semaphore, #tpu.memory_space<semaphore_mem>>
    %672 = tpu.memref_squeeze %671 : memref<1x!tpu.dma_semaphore, #tpu.memory_space<semaphore_mem>> -> memref<!tpu.dma_semaphore, #tpu.memory_space<semaphore_mem>>
    tpu.wait_dma2 semaphore(%672 : memref<!tpu.dma_semaphore, #tpu.memory_space<semaphore_mem>>) src(%669 : memref<1x128xf32, #tpu.memory_space<any>>) dst(%670 : memref<1x128xf32, #tpu.memory_space<vmem>>)
    %c1_i32_463 = arith.constant 1 : i32
    %c0_i32_464 = arith.constant 0 : i32
    %673 = tpu.memref_slice %arg4[%64, %c0_i32_464] : memref<50x128xf32, #tpu.memory_space<any>> -> memref<1x128xf32, #tpu.memory_space<any>>
    %c24_i32_465 = arith.constant 24 : i32
    %c0_i32_466 = arith.constant 0 : i32
    %674 = tpu.memref_slice %arg7[%c24_i32_465, %c0_i32_466] : memref<48x128xf32, #tpu.memory_space<vmem>> -> memref<1x128xf32, #tpu.memory_space<vmem>>
    %675 = tpu.memref_slice %arg8[%c1_i32_463] : memref<2x!tpu.dma_semaphore, #tpu.memory_space<semaphore_mem>> -> memref<1x!tpu.dma_semaphore, #tpu.memory_space<semaphore_mem>>
    %676 = tpu.memref_squeeze %675 : memref<1x!tpu.dma_semaphore, #tpu.memory_space<semaphore_mem>> -> memref<!tpu.dma_semaphore, #tpu.memory_space<semaphore_mem>>
    tpu.wait_dma2 semaphore(%676 : memref<!tpu.dma_semaphore, #tpu.memory_space<semaphore_mem>>) src(%673 : memref<1x128xf32, #tpu.memory_space<any>>) dst(%674 : memref<1x128xf32, #tpu.memory_space<vmem>>)
    %c1_i32_467 = arith.constant 1 : i32
    %c0_i32_468 = arith.constant 0 : i32
    %677 = tpu.memref_slice %arg4[%72, %c0_i32_468] : memref<50x128xf32, #tpu.memory_space<any>> -> memref<1x128xf32, #tpu.memory_space<any>>
    %c32_i32_469 = arith.constant 32 : i32
    %c0_i32_470 = arith.constant 0 : i32
    %678 = tpu.memref_slice %arg7[%c32_i32_469, %c0_i32_470] : memref<48x128xf32, #tpu.memory_space<vmem>> -> memref<1x128xf32, #tpu.memory_space<vmem>>
    %679 = tpu.memref_slice %arg8[%c1_i32_467] : memref<2x!tpu.dma_semaphore, #tpu.memory_space<semaphore_mem>> -> memref<1x!tpu.dma_semaphore, #tpu.memory_space<semaphore_mem>>
    %680 = tpu.memref_squeeze %679 : memref<1x!tpu.dma_semaphore, #tpu.memory_space<semaphore_mem>> -> memref<!tpu.dma_semaphore, #tpu.memory_space<semaphore_mem>>
    tpu.wait_dma2 semaphore(%680 : memref<!tpu.dma_semaphore, #tpu.memory_space<semaphore_mem>>) src(%677 : memref<1x128xf32, #tpu.memory_space<any>>) dst(%678 : memref<1x128xf32, #tpu.memory_space<vmem>>)
    %c1_i32_471 = arith.constant 1 : i32
    %c0_i32_472 = arith.constant 0 : i32
    %681 = tpu.memref_slice %arg4[%80, %c0_i32_472] : memref<50x128xf32, #tpu.memory_space<any>> -> memref<1x128xf32, #tpu.memory_space<any>>
    %c40_i32_473 = arith.constant 40 : i32
    %c0_i32_474 = arith.constant 0 : i32
    %682 = tpu.memref_slice %arg7[%c40_i32_473, %c0_i32_474] : memref<48x128xf32, #tpu.memory_space<vmem>> -> memref<1x128xf32, #tpu.memory_space<vmem>>
    %683 = tpu.memref_slice %arg8[%c1_i32_471] : memref<2x!tpu.dma_semaphore, #tpu.memory_space<semaphore_mem>> -> memref<1x!tpu.dma_semaphore, #tpu.memory_space<semaphore_mem>>
    %684 = tpu.memref_squeeze %683 : memref<1x!tpu.dma_semaphore, #tpu.memory_space<semaphore_mem>> -> memref<!tpu.dma_semaphore, #tpu.memory_space<semaphore_mem>>
    tpu.wait_dma2 semaphore(%684 : memref<!tpu.dma_semaphore, #tpu.memory_space<semaphore_mem>>) src(%681 : memref<1x128xf32, #tpu.memory_space<any>>) dst(%682 : memref<1x128xf32, #tpu.memory_space<vmem>>)
    %c0_i32_475 = arith.constant 0 : i32
    %c0_i32_476 = arith.constant 0 : i32
    %685 = tpu.memref_slice %arg3[%88, %c0_i32_476] : memref<50x128xf32, #tpu.memory_space<any>> -> memref<1x128xf32, #tpu.memory_space<any>>
    %c1_i32_477 = arith.constant 1 : i32
    %c0_i32_478 = arith.constant 0 : i32
    %686 = tpu.memref_slice %arg6[%c1_i32_477, %c0_i32_478] : memref<32x128xf32, #tpu.memory_space<vmem>> -> memref<1x128xf32, #tpu.memory_space<vmem>>
    %687 = tpu.memref_slice %arg8[%c0_i32_475] : memref<2x!tpu.dma_semaphore, #tpu.memory_space<semaphore_mem>> -> memref<1x!tpu.dma_semaphore, #tpu.memory_space<semaphore_mem>>
    %688 = tpu.memref_squeeze %687 : memref<1x!tpu.dma_semaphore, #tpu.memory_space<semaphore_mem>> -> memref<!tpu.dma_semaphore, #tpu.memory_space<semaphore_mem>>
    tpu.wait_dma2 semaphore(%688 : memref<!tpu.dma_semaphore, #tpu.memory_space<semaphore_mem>>) src(%685 : memref<1x128xf32, #tpu.memory_space<any>>) dst(%686 : memref<1x128xf32, #tpu.memory_space<vmem>>)
    %c0_i32_479 = arith.constant 0 : i32
    %c0_i32_480 = arith.constant 0 : i32
    %689 = tpu.memref_slice %arg3[%96, %c0_i32_480] : memref<50x128xf32, #tpu.memory_space<any>> -> memref<1x128xf32, #tpu.memory_space<any>>
    %c9_i32_481 = arith.constant 9 : i32
    %c0_i32_482 = arith.constant 0 : i32
    %690 = tpu.memref_slice %arg6[%c9_i32_481, %c0_i32_482] : memref<32x128xf32, #tpu.memory_space<vmem>> -> memref<1x128xf32, #tpu.memory_space<vmem>>
    %691 = tpu.memref_slice %arg8[%c0_i32_479] : memref<2x!tpu.dma_semaphore, #tpu.memory_space<semaphore_mem>> -> memref<1x!tpu.dma_semaphore, #tpu.memory_space<semaphore_mem>>
    %692 = tpu.memref_squeeze %691 : memref<1x!tpu.dma_semaphore, #tpu.memory_space<semaphore_mem>> -> memref<!tpu.dma_semaphore, #tpu.memory_space<semaphore_mem>>
    tpu.wait_dma2 semaphore(%692 : memref<!tpu.dma_semaphore, #tpu.memory_space<semaphore_mem>>) src(%689 : memref<1x128xf32, #tpu.memory_space<any>>) dst(%690 : memref<1x128xf32, #tpu.memory_space<vmem>>)
    %c0_i32_483 = arith.constant 0 : i32
    %c0_i32_484 = arith.constant 0 : i32
    %693 = tpu.memref_slice %arg3[%104, %c0_i32_484] : memref<50x128xf32, #tpu.memory_space<any>> -> memref<1x128xf32, #tpu.memory_space<any>>
    %c17_i32_485 = arith.constant 17 : i32
    %c0_i32_486 = arith.constant 0 : i32
    %694 = tpu.memref_slice %arg6[%c17_i32_485, %c0_i32_486] : memref<32x128xf32, #tpu.memory_space<vmem>> -> memref<1x128xf32, #tpu.memory_space<vmem>>
    %695 = tpu.memref_slice %arg8[%c0_i32_483] : memref<2x!tpu.dma_semaphore, #tpu.memory_space<semaphore_mem>> -> memref<1x!tpu.dma_semaphore, #tpu.memory_space<semaphore_mem>>
    %696 = tpu.memref_squeeze %695 : memref<1x!tpu.dma_semaphore, #tpu.memory_space<semaphore_mem>> -> memref<!tpu.dma_semaphore, #tpu.memory_space<semaphore_mem>>
    tpu.wait_dma2 semaphore(%696 : memref<!tpu.dma_semaphore, #tpu.memory_space<semaphore_mem>>) src(%693 : memref<1x128xf32, #tpu.memory_space<any>>) dst(%694 : memref<1x128xf32, #tpu.memory_space<vmem>>)
    %c0_i32_487 = arith.constant 0 : i32
    %c0_i32_488 = arith.constant 0 : i32
    %697 = tpu.memref_slice %arg3[%112, %c0_i32_488] : memref<50x128xf32, #tpu.memory_space<any>> -> memref<1x128xf32, #tpu.memory_space<any>>
    %c25_i32_489 = arith.constant 25 : i32
    %c0_i32_490 = arith.constant 0 : i32
    %698 = tpu.memref_slice %arg6[%c25_i32_489, %c0_i32_490] : memref<32x128xf32, #tpu.memory_space<vmem>> -> memref<1x128xf32, #tpu.memory_space<vmem>>
    %699 = tpu.memref_slice %arg8[%c0_i32_487] : memref<2x!tpu.dma_semaphore, #tpu.memory_space<semaphore_mem>> -> memref<1x!tpu.dma_semaphore, #tpu.memory_space<semaphore_mem>>
    %700 = tpu.memref_squeeze %699 : memref<1x!tpu.dma_semaphore, #tpu.memory_space<semaphore_mem>> -> memref<!tpu.dma_semaphore, #tpu.memory_space<semaphore_mem>>
    tpu.wait_dma2 semaphore(%700 : memref<!tpu.dma_semaphore, #tpu.memory_space<semaphore_mem>>) src(%697 : memref<1x128xf32, #tpu.memory_space<any>>) dst(%698 : memref<1x128xf32, #tpu.memory_space<vmem>>)
    %c1_i32_491 = arith.constant 1 : i32
    %c0_i32_492 = arith.constant 0 : i32
    %701 = tpu.memref_slice %arg4[%120, %c0_i32_492] : memref<50x128xf32, #tpu.memory_space<any>> -> memref<1x128xf32, #tpu.memory_space<any>>
    %c1_i32_493 = arith.constant 1 : i32
    %c0_i32_494 = arith.constant 0 : i32
    %702 = tpu.memref_slice %arg7[%c1_i32_493, %c0_i32_494] : memref<48x128xf32, #tpu.memory_space<vmem>> -> memref<1x128xf32, #tpu.memory_space<vmem>>
    %703 = tpu.memref_slice %arg8[%c1_i32_491] : memref<2x!tpu.dma_semaphore, #tpu.memory_space<semaphore_mem>> -> memref<1x!tpu.dma_semaphore, #tpu.memory_space<semaphore_mem>>
    %704 = tpu.memref_squeeze %703 : memref<1x!tpu.dma_semaphore, #tpu.memory_space<semaphore_mem>> -> memref<!tpu.dma_semaphore, #tpu.memory_space<semaphore_mem>>
    tpu.wait_dma2 semaphore(%704 : memref<!tpu.dma_semaphore, #tpu.memory_space<semaphore_mem>>) src(%701 : memref<1x128xf32, #tpu.memory_space<any>>) dst(%702 : memref<1x128xf32, #tpu.memory_space<vmem>>)
    %c1_i32_495 = arith.constant 1 : i32
    %c0_i32_496 = arith.constant 0 : i32
    %705 = tpu.memref_slice %arg4[%128, %c0_i32_496] : memref<50x128xf32, #tpu.memory_space<any>> -> memref<1x128xf32, #tpu.memory_space<any>>
    %c9_i32_497 = arith.constant 9 : i32
    %c0_i32_498 = arith.constant 0 : i32
    %706 = tpu.memref_slice %arg7[%c9_i32_497, %c0_i32_498] : memref<48x128xf32, #tpu.memory_space<vmem>> -> memref<1x128xf32, #tpu.memory_space<vmem>>
    %707 = tpu.memref_slice %arg8[%c1_i32_495] : memref<2x!tpu.dma_semaphore, #tpu.memory_space<semaphore_mem>> -> memref<1x!tpu.dma_semaphore, #tpu.memory_space<semaphore_mem>>
    %708 = tpu.memref_squeeze %707 : memref<1x!tpu.dma_semaphore, #tpu.memory_space<semaphore_mem>> -> memref<!tpu.dma_semaphore, #tpu.memory_space<semaphore_mem>>
    tpu.wait_dma2 semaphore(%708 : memref<!tpu.dma_semaphore, #tpu.memory_space<semaphore_mem>>) src(%705 : memref<1x128xf32, #tpu.memory_space<any>>) dst(%706 : memref<1x128xf32, #tpu.memory_space<vmem>>)
    %c1_i32_499 = arith.constant 1 : i32
    %c0_i32_500 = arith.constant 0 : i32
    %709 = tpu.memref_slice %arg4[%136, %c0_i32_500] : memref<50x128xf32, #tpu.memory_space<any>> -> memref<1x128xf32, #tpu.memory_space<any>>
    %c17_i32_501 = arith.constant 17 : i32
    %c0_i32_502 = arith.constant 0 : i32
    %710 = tpu.memref_slice %arg7[%c17_i32_501, %c0_i32_502] : memref<48x128xf32, #tpu.memory_space<vmem>> -> memref<1x128xf32, #tpu.memory_space<vmem>>
    %711 = tpu.memref_slice %arg8[%c1_i32_499] : memref<2x!tpu.dma_semaphore, #tpu.memory_space<semaphore_mem>> -> memref<1x!tpu.dma_semaphore, #tpu.memory_space<semaphore_mem>>
    %712 = tpu.memref_squeeze %711 : memref<1x!tpu.dma_semaphore, #tpu.memory_space<semaphore_mem>> -> memref<!tpu.dma_semaphore, #tpu.memory_space<semaphore_mem>>
    tpu.wait_dma2 semaphore(%712 : memref<!tpu.dma_semaphore, #tpu.memory_space<semaphore_mem>>) src(%709 : memref<1x128xf32, #tpu.memory_space<any>>) dst(%710 : memref<1x128xf32, #tpu.memory_space<vmem>>)
    %c1_i32_503 = arith.constant 1 : i32
    %c0_i32_504 = arith.constant 0 : i32
    %713 = tpu.memref_slice %arg4[%144, %c0_i32_504] : memref<50x128xf32, #tpu.memory_space<any>> -> memref<1x128xf32, #tpu.memory_space<any>>
    %c25_i32_505 = arith.constant 25 : i32
    %c0_i32_506 = arith.constant 0 : i32
    %714 = tpu.memref_slice %arg7[%c25_i32_505, %c0_i32_506] : memref<48x128xf32, #tpu.memory_space<vmem>> -> memref<1x128xf32, #tpu.memory_space<vmem>>
    %715 = tpu.memref_slice %arg8[%c1_i32_503] : memref<2x!tpu.dma_semaphore, #tpu.memory_space<semaphore_mem>> -> memref<1x!tpu.dma_semaphore, #tpu.memory_space<semaphore_mem>>
    %716 = tpu.memref_squeeze %715 : memref<1x!tpu.dma_semaphore, #tpu.memory_space<semaphore_mem>> -> memref<!tpu.dma_semaphore, #tpu.memory_space<semaphore_mem>>
    tpu.wait_dma2 semaphore(%716 : memref<!tpu.dma_semaphore, #tpu.memory_space<semaphore_mem>>) src(%713 : memref<1x128xf32, #tpu.memory_space<any>>) dst(%714 : memref<1x128xf32, #tpu.memory_space<vmem>>)
    %c1_i32_507 = arith.constant 1 : i32
    %c0_i32_508 = arith.constant 0 : i32
    %717 = tpu.memref_slice %arg4[%152, %c0_i32_508] : memref<50x128xf32, #tpu.memory_space<any>> -> memref<1x128xf32, #tpu.memory_space<any>>
    %c33_i32_509 = arith.constant 33 : i32
    %c0_i32_510 = arith.constant 0 : i32
    %718 = tpu.memref_slice %arg7[%c33_i32_509, %c0_i32_510] : memref<48x128xf32, #tpu.memory_space<vmem>> -> memref<1x128xf32, #tpu.memory_space<vmem>>
    %719 = tpu.memref_slice %arg8[%c1_i32_507] : memref<2x!tpu.dma_semaphore, #tpu.memory_space<semaphore_mem>> -> memref<1x!tpu.dma_semaphore, #tpu.memory_space<semaphore_mem>>
    %720 = tpu.memref_squeeze %719 : memref<1x!tpu.dma_semaphore, #tpu.memory_space<semaphore_mem>> -> memref<!tpu.dma_semaphore, #tpu.memory_space<semaphore_mem>>
    tpu.wait_dma2 semaphore(%720 : memref<!tpu.dma_semaphore, #tpu.memory_space<semaphore_mem>>) src(%717 : memref<1x128xf32, #tpu.memory_space<any>>) dst(%718 : memref<1x128xf32, #tpu.memory_space<vmem>>)
    %c1_i32_511 = arith.constant 1 : i32
    %c0_i32_512 = arith.constant 0 : i32
    %721 = tpu.memref_slice %arg4[%160, %c0_i32_512] : memref<50x128xf32, #tpu.memory_space<any>> -> memref<1x128xf32, #tpu.memory_space<any>>
    %c41_i32_513 = arith.constant 41 : i32
    %c0_i32_514 = arith.constant 0 : i32
    %722 = tpu.memref_slice %arg7[%c41_i32_513, %c0_i32_514] : memref<48x128xf32, #tpu.memory_space<vmem>> -> memref<1x128xf32, #tpu.memory_space<vmem>>
    %723 = tpu.memref_slice %arg8[%c1_i32_511] : memref<2x!tpu.dma_semaphore, #tpu.memory_space<semaphore_mem>> -> memref<1x!tpu.dma_semaphore, #tpu.memory_space<semaphore_mem>>
    %724 = tpu.memref_squeeze %723 : memref<1x!tpu.dma_semaphore, #tpu.memory_space<semaphore_mem>> -> memref<!tpu.dma_semaphore, #tpu.memory_space<semaphore_mem>>
    tpu.wait_dma2 semaphore(%724 : memref<!tpu.dma_semaphore, #tpu.memory_space<semaphore_mem>>) src(%721 : memref<1x128xf32, #tpu.memory_space<any>>) dst(%722 : memref<1x128xf32, #tpu.memory_space<vmem>>)
    %c0_i32_515 = arith.constant 0 : i32
    %c0_i32_516 = arith.constant 0 : i32
    %725 = tpu.memref_slice %arg3[%168, %c0_i32_516] : memref<50x128xf32, #tpu.memory_space<any>> -> memref<1x128xf32, #tpu.memory_space<any>>
    %c2_i32_517 = arith.constant 2 : i32
    %c0_i32_518 = arith.constant 0 : i32
    %726 = tpu.memref_slice %arg6[%c2_i32_517, %c0_i32_518] : memref<32x128xf32, #tpu.memory_space<vmem>> -> memref<1x128xf32, #tpu.memory_space<vmem>>
    %727 = tpu.memref_slice %arg8[%c0_i32_515] : memref<2x!tpu.dma_semaphore, #tpu.memory_space<semaphore_mem>> -> memref<1x!tpu.dma_semaphore, #tpu.memory_space<semaphore_mem>>
    %728 = tpu.memref_squeeze %727 : memref<1x!tpu.dma_semaphore, #tpu.memory_space<semaphore_mem>> -> memref<!tpu.dma_semaphore, #tpu.memory_space<semaphore_mem>>
    tpu.wait_dma2 semaphore(%728 : memref<!tpu.dma_semaphore, #tpu.memory_space<semaphore_mem>>) src(%725 : memref<1x128xf32, #tpu.memory_space<any>>) dst(%726 : memref<1x128xf32, #tpu.memory_space<vmem>>)
    %c0_i32_519 = arith.constant 0 : i32
    %c0_i32_520 = arith.constant 0 : i32
    %729 = tpu.memref_slice %arg3[%176, %c0_i32_520] : memref<50x128xf32, #tpu.memory_space<any>> -> memref<1x128xf32, #tpu.memory_space<any>>
    %c10_i32_521 = arith.constant 10 : i32
    %c0_i32_522 = arith.constant 0 : i32
    %730 = tpu.memref_slice %arg6[%c10_i32_521, %c0_i32_522] : memref<32x128xf32, #tpu.memory_space<vmem>> -> memref<1x128xf32, #tpu.memory_space<vmem>>
    %731 = tpu.memref_slice %arg8[%c0_i32_519] : memref<2x!tpu.dma_semaphore, #tpu.memory_space<semaphore_mem>> -> memref<1x!tpu.dma_semaphore, #tpu.memory_space<semaphore_mem>>
    %732 = tpu.memref_squeeze %731 : memref<1x!tpu.dma_semaphore, #tpu.memory_space<semaphore_mem>> -> memref<!tpu.dma_semaphore, #tpu.memory_space<semaphore_mem>>
    tpu.wait_dma2 semaphore(%732 : memref<!tpu.dma_semaphore, #tpu.memory_space<semaphore_mem>>) src(%729 : memref<1x128xf32, #tpu.memory_space<any>>) dst(%730 : memref<1x128xf32, #tpu.memory_space<vmem>>)
    %c0_i32_523 = arith.constant 0 : i32
    %c0_i32_524 = arith.constant 0 : i32
    %733 = tpu.memref_slice %arg3[%184, %c0_i32_524] : memref<50x128xf32, #tpu.memory_space<any>> -> memref<1x128xf32, #tpu.memory_space<any>>
    %c18_i32_525 = arith.constant 18 : i32
    %c0_i32_526 = arith.constant 0 : i32
    %734 = tpu.memref_slice %arg6[%c18_i32_525, %c0_i32_526] : memref<32x128xf32, #tpu.memory_space<vmem>> -> memref<1x128xf32, #tpu.memory_space<vmem>>
    %735 = tpu.memref_slice %arg8[%c0_i32_523] : memref<2x!tpu.dma_semaphore, #tpu.memory_space<semaphore_mem>> -> memref<1x!tpu.dma_semaphore, #tpu.memory_space<semaphore_mem>>
    %736 = tpu.memref_squeeze %735 : memref<1x!tpu.dma_semaphore, #tpu.memory_space<semaphore_mem>> -> memref<!tpu.dma_semaphore, #tpu.memory_space<semaphore_mem>>
    tpu.wait_dma2 semaphore(%736 : memref<!tpu.dma_semaphore, #tpu.memory_space<semaphore_mem>>) src(%733 : memref<1x128xf32, #tpu.memory_space<any>>) dst(%734 : memref<1x128xf32, #tpu.memory_space<vmem>>)
    %c0_i32_527 = arith.constant 0 : i32
    %c0_i32_528 = arith.constant 0 : i32
    %737 = tpu.memref_slice %arg3[%192, %c0_i32_528] : memref<50x128xf32, #tpu.memory_space<any>> -> memref<1x128xf32, #tpu.memory_space<any>>
    %c26_i32_529 = arith.constant 26 : i32
    %c0_i32_530 = arith.constant 0 : i32
    %738 = tpu.memref_slice %arg6[%c26_i32_529, %c0_i32_530] : memref<32x128xf32, #tpu.memory_space<vmem>> -> memref<1x128xf32, #tpu.memory_space<vmem>>
    %739 = tpu.memref_slice %arg8[%c0_i32_527] : memref<2x!tpu.dma_semaphore, #tpu.memory_space<semaphore_mem>> -> memref<1x!tpu.dma_semaphore, #tpu.memory_space<semaphore_mem>>
    %740 = tpu.memref_squeeze %739 : memref<1x!tpu.dma_semaphore, #tpu.memory_space<semaphore_mem>> -> memref<!tpu.dma_semaphore, #tpu.memory_space<semaphore_mem>>
    tpu.wait_dma2 semaphore(%740 : memref<!tpu.dma_semaphore, #tpu.memory_space<semaphore_mem>>) src(%737 : memref<1x128xf32, #tpu.memory_space<any>>) dst(%738 : memref<1x128xf32, #tpu.memory_space<vmem>>)
    %c1_i32_531 = arith.constant 1 : i32
    %c0_i32_532 = arith.constant 0 : i32
    %741 = tpu.memref_slice %arg4[%200, %c0_i32_532] : memref<50x128xf32, #tpu.memory_space<any>> -> memref<1x128xf32, #tpu.memory_space<any>>
    %c2_i32_533 = arith.constant 2 : i32
    %c0_i32_534 = arith.constant 0 : i32
    %742 = tpu.memref_slice %arg7[%c2_i32_533, %c0_i32_534] : memref<48x128xf32, #tpu.memory_space<vmem>> -> memref<1x128xf32, #tpu.memory_space<vmem>>
    %743 = tpu.memref_slice %arg8[%c1_i32_531] : memref<2x!tpu.dma_semaphore, #tpu.memory_space<semaphore_mem>> -> memref<1x!tpu.dma_semaphore, #tpu.memory_space<semaphore_mem>>
    %744 = tpu.memref_squeeze %743 : memref<1x!tpu.dma_semaphore, #tpu.memory_space<semaphore_mem>> -> memref<!tpu.dma_semaphore, #tpu.memory_space<semaphore_mem>>
    tpu.wait_dma2 semaphore(%744 : memref<!tpu.dma_semaphore, #tpu.memory_space<semaphore_mem>>) src(%741 : memref<1x128xf32, #tpu.memory_space<any>>) dst(%742 : memref<1x128xf32, #tpu.memory_space<vmem>>)
    %c1_i32_535 = arith.constant 1 : i32
    %c0_i32_536 = arith.constant 0 : i32
    %745 = tpu.memref_slice %arg4[%208, %c0_i32_536] : memref<50x128xf32, #tpu.memory_space<any>> -> memref<1x128xf32, #tpu.memory_space<any>>
    %c10_i32_537 = arith.constant 10 : i32
    %c0_i32_538 = arith.constant 0 : i32
    %746 = tpu.memref_slice %arg7[%c10_i32_537, %c0_i32_538] : memref<48x128xf32, #tpu.memory_space<vmem>> -> memref<1x128xf32, #tpu.memory_space<vmem>>
    %747 = tpu.memref_slice %arg8[%c1_i32_535] : memref<2x!tpu.dma_semaphore, #tpu.memory_space<semaphore_mem>> -> memref<1x!tpu.dma_semaphore, #tpu.memory_space<semaphore_mem>>
    %748 = tpu.memref_squeeze %747 : memref<1x!tpu.dma_semaphore, #tpu.memory_space<semaphore_mem>> -> memref<!tpu.dma_semaphore, #tpu.memory_space<semaphore_mem>>
    tpu.wait_dma2 semaphore(%748 : memref<!tpu.dma_semaphore, #tpu.memory_space<semaphore_mem>>) src(%745 : memref<1x128xf32, #tpu.memory_space<any>>) dst(%746 : memref<1x128xf32, #tpu.memory_space<vmem>>)
    %c1_i32_539 = arith.constant 1 : i32
    %c0_i32_540 = arith.constant 0 : i32
    %749 = tpu.memref_slice %arg4[%216, %c0_i32_540] : memref<50x128xf32, #tpu.memory_space<any>> -> memref<1x128xf32, #tpu.memory_space<any>>
    %c18_i32_541 = arith.constant 18 : i32
    %c0_i32_542 = arith.constant 0 : i32
    %750 = tpu.memref_slice %arg7[%c18_i32_541, %c0_i32_542] : memref<48x128xf32, #tpu.memory_space<vmem>> -> memref<1x128xf32, #tpu.memory_space<vmem>>
    %751 = tpu.memref_slice %arg8[%c1_i32_539] : memref<2x!tpu.dma_semaphore, #tpu.memory_space<semaphore_mem>> -> memref<1x!tpu.dma_semaphore, #tpu.memory_space<semaphore_mem>>
    %752 = tpu.memref_squeeze %751 : memref<1x!tpu.dma_semaphore, #tpu.memory_space<semaphore_mem>> -> memref<!tpu.dma_semaphore, #tpu.memory_space<semaphore_mem>>
    tpu.wait_dma2 semaphore(%752 : memref<!tpu.dma_semaphore, #tpu.memory_space<semaphore_mem>>) src(%749 : memref<1x128xf32, #tpu.memory_space<any>>) dst(%750 : memref<1x128xf32, #tpu.memory_space<vmem>>)
    %c1_i32_543 = arith.constant 1 : i32
    %c0_i32_544 = arith.constant 0 : i32
    %753 = tpu.memref_slice %arg4[%224, %c0_i32_544] : memref<50x128xf32, #tpu.memory_space<any>> -> memref<1x128xf32, #tpu.memory_space<any>>
    %c26_i32_545 = arith.constant 26 : i32
    %c0_i32_546 = arith.constant 0 : i32
    %754 = tpu.memref_slice %arg7[%c26_i32_545, %c0_i32_546] : memref<48x128xf32, #tpu.memory_space<vmem>> -> memref<1x128xf32, #tpu.memory_space<vmem>>
    %755 = tpu.memref_slice %arg8[%c1_i32_543] : memref<2x!tpu.dma_semaphore, #tpu.memory_space<semaphore_mem>> -> memref<1x!tpu.dma_semaphore, #tpu.memory_space<semaphore_mem>>
    %756 = tpu.memref_squeeze %755 : memref<1x!tpu.dma_semaphore, #tpu.memory_space<semaphore_mem>> -> memref<!tpu.dma_semaphore, #tpu.memory_space<semaphore_mem>>
    tpu.wait_dma2 semaphore(%756 : memref<!tpu.dma_semaphore, #tpu.memory_space<semaphore_mem>>) src(%753 : memref<1x128xf32, #tpu.memory_space<any>>) dst(%754 : memref<1x128xf32, #tpu.memory_space<vmem>>)
    %c1_i32_547 = arith.constant 1 : i32
    %c0_i32_548 = arith.constant 0 : i32
    %757 = tpu.memref_slice %arg4[%232, %c0_i32_548] : memref<50x128xf32, #tpu.memory_space<any>> -> memref<1x128xf32, #tpu.memory_space<any>>
    %c34_i32_549 = arith.constant 34 : i32
    %c0_i32_550 = arith.constant 0 : i32
    %758 = tpu.memref_slice %arg7[%c34_i32_549, %c0_i32_550] : memref<48x128xf32, #tpu.memory_space<vmem>> -> memref<1x128xf32, #tpu.memory_space<vmem>>
    %759 = tpu.memref_slice %arg8[%c1_i32_547] : memref<2x!tpu.dma_semaphore, #tpu.memory_space<semaphore_mem>> -> memref<1x!tpu.dma_semaphore, #tpu.memory_space<semaphore_mem>>
    %760 = tpu.memref_squeeze %759 : memref<1x!tpu.dma_semaphore, #tpu.memory_space<semaphore_mem>> -> memref<!tpu.dma_semaphore, #tpu.memory_space<semaphore_mem>>
    tpu.wait_dma2 semaphore(%760 : memref<!tpu.dma_semaphore, #tpu.memory_space<semaphore_mem>>) src(%757 : memref<1x128xf32, #tpu.memory_space<any>>) dst(%758 : memref<1x128xf32, #tpu.memory_space<vmem>>)
    %c1_i32_551 = arith.constant 1 : i32
    %c0_i32_552 = arith.constant 0 : i32
    %761 = tpu.memref_slice %arg4[%240, %c0_i32_552] : memref<50x128xf32, #tpu.memory_space<any>> -> memref<1x128xf32, #tpu.memory_space<any>>
    %c42_i32_553 = arith.constant 42 : i32
    %c0_i32_554 = arith.constant 0 : i32
    %762 = tpu.memref_slice %arg7[%c42_i32_553, %c0_i32_554] : memref<48x128xf32, #tpu.memory_space<vmem>> -> memref<1x128xf32, #tpu.memory_space<vmem>>
    %763 = tpu.memref_slice %arg8[%c1_i32_551] : memref<2x!tpu.dma_semaphore, #tpu.memory_space<semaphore_mem>> -> memref<1x!tpu.dma_semaphore, #tpu.memory_space<semaphore_mem>>
    %764 = tpu.memref_squeeze %763 : memref<1x!tpu.dma_semaphore, #tpu.memory_space<semaphore_mem>> -> memref<!tpu.dma_semaphore, #tpu.memory_space<semaphore_mem>>
    tpu.wait_dma2 semaphore(%764 : memref<!tpu.dma_semaphore, #tpu.memory_space<semaphore_mem>>) src(%761 : memref<1x128xf32, #tpu.memory_space<any>>) dst(%762 : memref<1x128xf32, #tpu.memory_space<vmem>>)
    %c0_i32_555 = arith.constant 0 : i32
    %c0_i32_556 = arith.constant 0 : i32
    %765 = tpu.memref_slice %arg3[%248, %c0_i32_556] : memref<50x128xf32, #tpu.memory_space<any>> -> memref<1x128xf32, #tpu.memory_space<any>>
    %c3_i32_557 = arith.constant 3 : i32
    %c0_i32_558 = arith.constant 0 : i32
    %766 = tpu.memref_slice %arg6[%c3_i32_557, %c0_i32_558] : memref<32x128xf32, #tpu.memory_space<vmem>> -> memref<1x128xf32, #tpu.memory_space<vmem>>
    %767 = tpu.memref_slice %arg8[%c0_i32_555] : memref<2x!tpu.dma_semaphore, #tpu.memory_space<semaphore_mem>> -> memref<1x!tpu.dma_semaphore, #tpu.memory_space<semaphore_mem>>
    %768 = tpu.memref_squeeze %767 : memref<1x!tpu.dma_semaphore, #tpu.memory_space<semaphore_mem>> -> memref<!tpu.dma_semaphore, #tpu.memory_space<semaphore_mem>>
    tpu.wait_dma2 semaphore(%768 : memref<!tpu.dma_semaphore, #tpu.memory_space<semaphore_mem>>) src(%765 : memref<1x128xf32, #tpu.memory_space<any>>) dst(%766 : memref<1x128xf32, #tpu.memory_space<vmem>>)
    %c0_i32_559 = arith.constant 0 : i32
    %c0_i32_560 = arith.constant 0 : i32
    %769 = tpu.memref_slice %arg3[%256, %c0_i32_560] : memref<50x128xf32, #tpu.memory_space<any>> -> memref<1x128xf32, #tpu.memory_space<any>>
    %c11_i32_561 = arith.constant 11 : i32
    %c0_i32_562 = arith.constant 0 : i32
    %770 = tpu.memref_slice %arg6[%c11_i32_561, %c0_i32_562] : memref<32x128xf32, #tpu.memory_space<vmem>> -> memref<1x128xf32, #tpu.memory_space<vmem>>
    %771 = tpu.memref_slice %arg8[%c0_i32_559] : memref<2x!tpu.dma_semaphore, #tpu.memory_space<semaphore_mem>> -> memref<1x!tpu.dma_semaphore, #tpu.memory_space<semaphore_mem>>
    %772 = tpu.memref_squeeze %771 : memref<1x!tpu.dma_semaphore, #tpu.memory_space<semaphore_mem>> -> memref<!tpu.dma_semaphore, #tpu.memory_space<semaphore_mem>>
    tpu.wait_dma2 semaphore(%772 : memref<!tpu.dma_semaphore, #tpu.memory_space<semaphore_mem>>) src(%769 : memref<1x128xf32, #tpu.memory_space<any>>) dst(%770 : memref<1x128xf32, #tpu.memory_space<vmem>>)
    %c0_i32_563 = arith.constant 0 : i32
    %c0_i32_564 = arith.constant 0 : i32
    %773 = tpu.memref_slice %arg3[%264, %c0_i32_564] : memref<50x128xf32, #tpu.memory_space<any>> -> memref<1x128xf32, #tpu.memory_space<any>>
    %c19_i32_565 = arith.constant 19 : i32
    %c0_i32_566 = arith.constant 0 : i32
    %774 = tpu.memref_slice %arg6[%c19_i32_565, %c0_i32_566] : memref<32x128xf32, #tpu.memory_space<vmem>> -> memref<1x128xf32, #tpu.memory_space<vmem>>
    %775 = tpu.memref_slice %arg8[%c0_i32_563] : memref<2x!tpu.dma_semaphore, #tpu.memory_space<semaphore_mem>> -> memref<1x!tpu.dma_semaphore, #tpu.memory_space<semaphore_mem>>
    %776 = tpu.memref_squeeze %775 : memref<1x!tpu.dma_semaphore, #tpu.memory_space<semaphore_mem>> -> memref<!tpu.dma_semaphore, #tpu.memory_space<semaphore_mem>>
    tpu.wait_dma2 semaphore(%776 : memref<!tpu.dma_semaphore, #tpu.memory_space<semaphore_mem>>) src(%773 : memref<1x128xf32, #tpu.memory_space<any>>) dst(%774 : memref<1x128xf32, #tpu.memory_space<vmem>>)
    %c0_i32_567 = arith.constant 0 : i32
    %c0_i32_568 = arith.constant 0 : i32
    %777 = tpu.memref_slice %arg3[%272, %c0_i32_568] : memref<50x128xf32, #tpu.memory_space<any>> -> memref<1x128xf32, #tpu.memory_space<any>>
    %c27_i32_569 = arith.constant 27 : i32
    %c0_i32_570 = arith.constant 0 : i32
    %778 = tpu.memref_slice %arg6[%c27_i32_569, %c0_i32_570] : memref<32x128xf32, #tpu.memory_space<vmem>> -> memref<1x128xf32, #tpu.memory_space<vmem>>
    %779 = tpu.memref_slice %arg8[%c0_i32_567] : memref<2x!tpu.dma_semaphore, #tpu.memory_space<semaphore_mem>> -> memref<1x!tpu.dma_semaphore, #tpu.memory_space<semaphore_mem>>
    %780 = tpu.memref_squeeze %779 : memref<1x!tpu.dma_semaphore, #tpu.memory_space<semaphore_mem>> -> memref<!tpu.dma_semaphore, #tpu.memory_space<semaphore_mem>>
    tpu.wait_dma2 semaphore(%780 : memref<!tpu.dma_semaphore, #tpu.memory_space<semaphore_mem>>) src(%777 : memref<1x128xf32, #tpu.memory_space<any>>) dst(%778 : memref<1x128xf32, #tpu.memory_space<vmem>>)
    %c1_i32_571 = arith.constant 1 : i32
    %c0_i32_572 = arith.constant 0 : i32
    %781 = tpu.memref_slice %arg4[%280, %c0_i32_572] : memref<50x128xf32, #tpu.memory_space<any>> -> memref<1x128xf32, #tpu.memory_space<any>>
    %c3_i32_573 = arith.constant 3 : i32
    %c0_i32_574 = arith.constant 0 : i32
    %782 = tpu.memref_slice %arg7[%c3_i32_573, %c0_i32_574] : memref<48x128xf32, #tpu.memory_space<vmem>> -> memref<1x128xf32, #tpu.memory_space<vmem>>
    %783 = tpu.memref_slice %arg8[%c1_i32_571] : memref<2x!tpu.dma_semaphore, #tpu.memory_space<semaphore_mem>> -> memref<1x!tpu.dma_semaphore, #tpu.memory_space<semaphore_mem>>
    %784 = tpu.memref_squeeze %783 : memref<1x!tpu.dma_semaphore, #tpu.memory_space<semaphore_mem>> -> memref<!tpu.dma_semaphore, #tpu.memory_space<semaphore_mem>>
    tpu.wait_dma2 semaphore(%784 : memref<!tpu.dma_semaphore, #tpu.memory_space<semaphore_mem>>) src(%781 : memref<1x128xf32, #tpu.memory_space<any>>) dst(%782 : memref<1x128xf32, #tpu.memory_space<vmem>>)
    %c1_i32_575 = arith.constant 1 : i32
    %c0_i32_576 = arith.constant 0 : i32
    %785 = tpu.memref_slice %arg4[%288, %c0_i32_576] : memref<50x128xf32, #tpu.memory_space<any>> -> memref<1x128xf32, #tpu.memory_space<any>>
    %c11_i32_577 = arith.constant 11 : i32
    %c0_i32_578 = arith.constant 0 : i32
    %786 = tpu.memref_slice %arg7[%c11_i32_577, %c0_i32_578] : memref<48x128xf32, #tpu.memory_space<vmem>> -> memref<1x128xf32, #tpu.memory_space<vmem>>
    %787 = tpu.memref_slice %arg8[%c1_i32_575] : memref<2x!tpu.dma_semaphore, #tpu.memory_space<semaphore_mem>> -> memref<1x!tpu.dma_semaphore, #tpu.memory_space<semaphore_mem>>
    %788 = tpu.memref_squeeze %787 : memref<1x!tpu.dma_semaphore, #tpu.memory_space<semaphore_mem>> -> memref<!tpu.dma_semaphore, #tpu.memory_space<semaphore_mem>>
    tpu.wait_dma2 semaphore(%788 : memref<!tpu.dma_semaphore, #tpu.memory_space<semaphore_mem>>) src(%785 : memref<1x128xf32, #tpu.memory_space<any>>) dst(%786 : memref<1x128xf32, #tpu.memory_space<vmem>>)
    %c1_i32_579 = arith.constant 1 : i32
    %c0_i32_580 = arith.constant 0 : i32
    %789 = tpu.memref_slice %arg4[%296, %c0_i32_580] : memref<50x128xf32, #tpu.memory_space<any>> -> memref<1x128xf32, #tpu.memory_space<any>>
    %c19_i32_581 = arith.constant 19 : i32
    %c0_i32_582 = arith.constant 0 : i32
    %790 = tpu.memref_slice %arg7[%c19_i32_581, %c0_i32_582] : memref<48x128xf32, #tpu.memory_space<vmem>> -> memref<1x128xf32, #tpu.memory_space<vmem>>
    %791 = tpu.memref_slice %arg8[%c1_i32_579] : memref<2x!tpu.dma_semaphore, #tpu.memory_space<semaphore_mem>> -> memref<1x!tpu.dma_semaphore, #tpu.memory_space<semaphore_mem>>
    %792 = tpu.memref_squeeze %791 : memref<1x!tpu.dma_semaphore, #tpu.memory_space<semaphore_mem>> -> memref<!tpu.dma_semaphore, #tpu.memory_space<semaphore_mem>>
    tpu.wait_dma2 semaphore(%792 : memref<!tpu.dma_semaphore, #tpu.memory_space<semaphore_mem>>) src(%789 : memref<1x128xf32, #tpu.memory_space<any>>) dst(%790 : memref<1x128xf32, #tpu.memory_space<vmem>>)
    %c1_i32_583 = arith.constant 1 : i32
    %c0_i32_584 = arith.constant 0 : i32
    %793 = tpu.memref_slice %arg4[%304, %c0_i32_584] : memref<50x128xf32, #tpu.memory_space<any>> -> memref<1x128xf32, #tpu.memory_space<any>>
    %c27_i32_585 = arith.constant 27 : i32
    %c0_i32_586 = arith.constant 0 : i32
    %794 = tpu.memref_slice %arg7[%c27_i32_585, %c0_i32_586] : memref<48x128xf32, #tpu.memory_space<vmem>> -> memref<1x128xf32, #tpu.memory_space<vmem>>
    %795 = tpu.memref_slice %arg8[%c1_i32_583] : memref<2x!tpu.dma_semaphore, #tpu.memory_space<semaphore_mem>> -> memref<1x!tpu.dma_semaphore, #tpu.memory_space<semaphore_mem>>
    %796 = tpu.memref_squeeze %795 : memref<1x!tpu.dma_semaphore, #tpu.memory_space<semaphore_mem>> -> memref<!tpu.dma_semaphore, #tpu.memory_space<semaphore_mem>>
    tpu.wait_dma2 semaphore(%796 : memref<!tpu.dma_semaphore, #tpu.memory_space<semaphore_mem>>) src(%793 : memref<1x128xf32, #tpu.memory_space<any>>) dst(%794 : memref<1x128xf32, #tpu.memory_space<vmem>>)
    %c1_i32_587 = arith.constant 1 : i32
    %c0_i32_588 = arith.constant 0 : i32
    %797 = tpu.memref_slice %arg4[%312, %c0_i32_588] : memref<50x128xf32, #tpu.memory_space<any>> -> memref<1x128xf32, #tpu.memory_space<any>>
    %c35_i32_589 = arith.constant 35 : i32
    %c0_i32_590 = arith.constant 0 : i32
    %798 = tpu.memref_slice %arg7[%c35_i32_589, %c0_i32_590] : memref<48x128xf32, #tpu.memory_space<vmem>> -> memref<1x128xf32, #tpu.memory_space<vmem>>
    %799 = tpu.memref_slice %arg8[%c1_i32_587] : memref<2x!tpu.dma_semaphore, #tpu.memory_space<semaphore_mem>> -> memref<1x!tpu.dma_semaphore, #tpu.memory_space<semaphore_mem>>
    %800 = tpu.memref_squeeze %799 : memref<1x!tpu.dma_semaphore, #tpu.memory_space<semaphore_mem>> -> memref<!tpu.dma_semaphore, #tpu.memory_space<semaphore_mem>>
    tpu.wait_dma2 semaphore(%800 : memref<!tpu.dma_semaphore, #tpu.memory_space<semaphore_mem>>) src(%797 : memref<1x128xf32, #tpu.memory_space<any>>) dst(%798 : memref<1x128xf32, #tpu.memory_space<vmem>>)
    %c1_i32_591 = arith.constant 1 : i32
    %c0_i32_592 = arith.constant 0 : i32
    %801 = tpu.memref_slice %arg4[%320, %c0_i32_592] : memref<50x128xf32, #tpu.memory_space<any>> -> memref<1x128xf32, #tpu.memory_space<any>>
    %c43_i32_593 = arith.constant 43 : i32
    %c0_i32_594 = arith.constant 0 : i32
    %802 = tpu.memref_slice %arg7[%c43_i32_593, %c0_i32_594] : memref<48x128xf32, #tpu.memory_space<vmem>> -> memref<1x128xf32, #tpu.memory_space<vmem>>
    %803 = tpu.memref_slice %arg8[%c1_i32_591] : memref<2x!tpu.dma_semaphore, #tpu.memory_space<semaphore_mem>> -> memref<1x!tpu.dma_semaphore, #tpu.memory_space<semaphore_mem>>
    %804 = tpu.memref_squeeze %803 : memref<1x!tpu.dma_semaphore, #tpu.memory_space<semaphore_mem>> -> memref<!tpu.dma_semaphore, #tpu.memory_space<semaphore_mem>>
    tpu.wait_dma2 semaphore(%804 : memref<!tpu.dma_semaphore, #tpu.memory_space<semaphore_mem>>) src(%801 : memref<1x128xf32, #tpu.memory_space<any>>) dst(%802 : memref<1x128xf32, #tpu.memory_space<vmem>>)
    %c0_i32_595 = arith.constant 0 : i32
    %c0_i32_596 = arith.constant 0 : i32
    %805 = tpu.memref_slice %arg3[%328, %c0_i32_596] : memref<50x128xf32, #tpu.memory_space<any>> -> memref<1x128xf32, #tpu.memory_space<any>>
    %c4_i32_597 = arith.constant 4 : i32
    %c0_i32_598 = arith.constant 0 : i32
    %806 = tpu.memref_slice %arg6[%c4_i32_597, %c0_i32_598] : memref<32x128xf32, #tpu.memory_space<vmem>> -> memref<1x128xf32, #tpu.memory_space<vmem>>
    %807 = tpu.memref_slice %arg8[%c0_i32_595] : memref<2x!tpu.dma_semaphore, #tpu.memory_space<semaphore_mem>> -> memref<1x!tpu.dma_semaphore, #tpu.memory_space<semaphore_mem>>
    %808 = tpu.memref_squeeze %807 : memref<1x!tpu.dma_semaphore, #tpu.memory_space<semaphore_mem>> -> memref<!tpu.dma_semaphore, #tpu.memory_space<semaphore_mem>>
    tpu.wait_dma2 semaphore(%808 : memref<!tpu.dma_semaphore, #tpu.memory_space<semaphore_mem>>) src(%805 : memref<1x128xf32, #tpu.memory_space<any>>) dst(%806 : memref<1x128xf32, #tpu.memory_space<vmem>>)
    %c0_i32_599 = arith.constant 0 : i32
    %c0_i32_600 = arith.constant 0 : i32
    %809 = tpu.memref_slice %arg3[%336, %c0_i32_600] : memref<50x128xf32, #tpu.memory_space<any>> -> memref<1x128xf32, #tpu.memory_space<any>>
    %c12_i32_601 = arith.constant 12 : i32
    %c0_i32_602 = arith.constant 0 : i32
    %810 = tpu.memref_slice %arg6[%c12_i32_601, %c0_i32_602] : memref<32x128xf32, #tpu.memory_space<vmem>> -> memref<1x128xf32, #tpu.memory_space<vmem>>
    %811 = tpu.memref_slice %arg8[%c0_i32_599] : memref<2x!tpu.dma_semaphore, #tpu.memory_space<semaphore_mem>> -> memref<1x!tpu.dma_semaphore, #tpu.memory_space<semaphore_mem>>
    %812 = tpu.memref_squeeze %811 : memref<1x!tpu.dma_semaphore, #tpu.memory_space<semaphore_mem>> -> memref<!tpu.dma_semaphore, #tpu.memory_space<semaphore_mem>>
    tpu.wait_dma2 semaphore(%812 : memref<!tpu.dma_semaphore, #tpu.memory_space<semaphore_mem>>) src(%809 : memref<1x128xf32, #tpu.memory_space<any>>) dst(%810 : memref<1x128xf32, #tpu.memory_space<vmem>>)
    %c0_i32_603 = arith.constant 0 : i32
    %c0_i32_604 = arith.constant 0 : i32
    %813 = tpu.memref_slice %arg3[%344, %c0_i32_604] : memref<50x128xf32, #tpu.memory_space<any>> -> memref<1x128xf32, #tpu.memory_space<any>>
    %c20_i32_605 = arith.constant 20 : i32
    %c0_i32_606 = arith.constant 0 : i32
    %814 = tpu.memref_slice %arg6[%c20_i32_605, %c0_i32_606] : memref<32x128xf32, #tpu.memory_space<vmem>> -> memref<1x128xf32, #tpu.memory_space<vmem>>
    %815 = tpu.memref_slice %arg8[%c0_i32_603] : memref<2x!tpu.dma_semaphore, #tpu.memory_space<semaphore_mem>> -> memref<1x!tpu.dma_semaphore, #tpu.memory_space<semaphore_mem>>
    %816 = tpu.memref_squeeze %815 : memref<1x!tpu.dma_semaphore, #tpu.memory_space<semaphore_mem>> -> memref<!tpu.dma_semaphore, #tpu.memory_space<semaphore_mem>>
    tpu.wait_dma2 semaphore(%816 : memref<!tpu.dma_semaphore, #tpu.memory_space<semaphore_mem>>) src(%813 : memref<1x128xf32, #tpu.memory_space<any>>) dst(%814 : memref<1x128xf32, #tpu.memory_space<vmem>>)
    %c0_i32_607 = arith.constant 0 : i32
    %c0_i32_608 = arith.constant 0 : i32
    %817 = tpu.memref_slice %arg3[%352, %c0_i32_608] : memref<50x128xf32, #tpu.memory_space<any>> -> memref<1x128xf32, #tpu.memory_space<any>>
    %c28_i32_609 = arith.constant 28 : i32
    %c0_i32_610 = arith.constant 0 : i32
    %818 = tpu.memref_slice %arg6[%c28_i32_609, %c0_i32_610] : memref<32x128xf32, #tpu.memory_space<vmem>> -> memref<1x128xf32, #tpu.memory_space<vmem>>
    %819 = tpu.memref_slice %arg8[%c0_i32_607] : memref<2x!tpu.dma_semaphore, #tpu.memory_space<semaphore_mem>> -> memref<1x!tpu.dma_semaphore, #tpu.memory_space<semaphore_mem>>
    %820 = tpu.memref_squeeze %819 : memref<1x!tpu.dma_semaphore, #tpu.memory_space<semaphore_mem>> -> memref<!tpu.dma_semaphore, #tpu.memory_space<semaphore_mem>>
    tpu.wait_dma2 semaphore(%820 : memref<!tpu.dma_semaphore, #tpu.memory_space<semaphore_mem>>) src(%817 : memref<1x128xf32, #tpu.memory_space<any>>) dst(%818 : memref<1x128xf32, #tpu.memory_space<vmem>>)
    %c1_i32_611 = arith.constant 1 : i32
    %c0_i32_612 = arith.constant 0 : i32
    %821 = tpu.memref_slice %arg4[%360, %c0_i32_612] : memref<50x128xf32, #tpu.memory_space<any>> -> memref<1x128xf32, #tpu.memory_space<any>>
    %c4_i32_613 = arith.constant 4 : i32
    %c0_i32_614 = arith.constant 0 : i32
    %822 = tpu.memref_slice %arg7[%c4_i32_613, %c0_i32_614] : memref<48x128xf32, #tpu.memory_space<vmem>> -> memref<1x128xf32, #tpu.memory_space<vmem>>
    %823 = tpu.memref_slice %arg8[%c1_i32_611] : memref<2x!tpu.dma_semaphore, #tpu.memory_space<semaphore_mem>> -> memref<1x!tpu.dma_semaphore, #tpu.memory_space<semaphore_mem>>
    %824 = tpu.memref_squeeze %823 : memref<1x!tpu.dma_semaphore, #tpu.memory_space<semaphore_mem>> -> memref<!tpu.dma_semaphore, #tpu.memory_space<semaphore_mem>>
    tpu.wait_dma2 semaphore(%824 : memref<!tpu.dma_semaphore, #tpu.memory_space<semaphore_mem>>) src(%821 : memref<1x128xf32, #tpu.memory_space<any>>) dst(%822 : memref<1x128xf32, #tpu.memory_space<vmem>>)
    %c1_i32_615 = arith.constant 1 : i32
    %c0_i32_616 = arith.constant 0 : i32
    %825 = tpu.memref_slice %arg4[%368, %c0_i32_616] : memref<50x128xf32, #tpu.memory_space<any>> -> memref<1x128xf32, #tpu.memory_space<any>>
    %c12_i32_617 = arith.constant 12 : i32
    %c0_i32_618 = arith.constant 0 : i32
    %826 = tpu.memref_slice %arg7[%c12_i32_617, %c0_i32_618] : memref<48x128xf32, #tpu.memory_space<vmem>> -> memref<1x128xf32, #tpu.memory_space<vmem>>
    %827 = tpu.memref_slice %arg8[%c1_i32_615] : memref<2x!tpu.dma_semaphore, #tpu.memory_space<semaphore_mem>> -> memref<1x!tpu.dma_semaphore, #tpu.memory_space<semaphore_mem>>
    %828 = tpu.memref_squeeze %827 : memref<1x!tpu.dma_semaphore, #tpu.memory_space<semaphore_mem>> -> memref<!tpu.dma_semaphore, #tpu.memory_space<semaphore_mem>>
    tpu.wait_dma2 semaphore(%828 : memref<!tpu.dma_semaphore, #tpu.memory_space<semaphore_mem>>) src(%825 : memref<1x128xf32, #tpu.memory_space<any>>) dst(%826 : memref<1x128xf32, #tpu.memory_space<vmem>>)
    %c1_i32_619 = arith.constant 1 : i32
    %c0_i32_620 = arith.constant 0 : i32
    %829 = tpu.memref_slice %arg4[%376, %c0_i32_620] : memref<50x128xf32, #tpu.memory_space<any>> -> memref<1x128xf32, #tpu.memory_space<any>>
    %c20_i32_621 = arith.constant 20 : i32
    %c0_i32_622 = arith.constant 0 : i32
    %830 = tpu.memref_slice %arg7[%c20_i32_621, %c0_i32_622] : memref<48x128xf32, #tpu.memory_space<vmem>> -> memref<1x128xf32, #tpu.memory_space<vmem>>
    %831 = tpu.memref_slice %arg8[%c1_i32_619] : memref<2x!tpu.dma_semaphore, #tpu.memory_space<semaphore_mem>> -> memref<1x!tpu.dma_semaphore, #tpu.memory_space<semaphore_mem>>
    %832 = tpu.memref_squeeze %831 : memref<1x!tpu.dma_semaphore, #tpu.memory_space<semaphore_mem>> -> memref<!tpu.dma_semaphore, #tpu.memory_space<semaphore_mem>>
    tpu.wait_dma2 semaphore(%832 : memref<!tpu.dma_semaphore, #tpu.memory_space<semaphore_mem>>) src(%829 : memref<1x128xf32, #tpu.memory_space<any>>) dst(%830 : memref<1x128xf32, #tpu.memory_space<vmem>>)
    %c1_i32_623 = arith.constant 1 : i32
    %c0_i32_624 = arith.constant 0 : i32
    %833 = tpu.memref_slice %arg4[%384, %c0_i32_624] : memref<50x128xf32, #tpu.memory_space<any>> -> memref<1x128xf32, #tpu.memory_space<any>>
    %c28_i32_625 = arith.constant 28 : i32
    %c0_i32_626 = arith.constant 0 : i32
    %834 = tpu.memref_slice %arg7[%c28_i32_625, %c0_i32_626] : memref<48x128xf32, #tpu.memory_space<vmem>> -> memref<1x128xf32, #tpu.memory_space<vmem>>
    %835 = tpu.memref_slice %arg8[%c1_i32_623] : memref<2x!tpu.dma_semaphore, #tpu.memory_space<semaphore_mem>> -> memref<1x!tpu.dma_semaphore, #tpu.memory_space<semaphore_mem>>
    %836 = tpu.memref_squeeze %835 : memref<1x!tpu.dma_semaphore, #tpu.memory_space<semaphore_mem>> -> memref<!tpu.dma_semaphore, #tpu.memory_space<semaphore_mem>>
    tpu.wait_dma2 semaphore(%836 : memref<!tpu.dma_semaphore, #tpu.memory_space<semaphore_mem>>) src(%833 : memref<1x128xf32, #tpu.memory_space<any>>) dst(%834 : memref<1x128xf32, #tpu.memory_space<vmem>>)
    %c1_i32_627 = arith.constant 1 : i32
    %c0_i32_628 = arith.constant 0 : i32
    %837 = tpu.memref_slice %arg4[%392, %c0_i32_628] : memref<50x128xf32, #tpu.memory_space<any>> -> memref<1x128xf32, #tpu.memory_space<any>>
    %c36_i32_629 = arith.constant 36 : i32
    %c0_i32_630 = arith.constant 0 : i32
    %838 = tpu.memref_slice %arg7[%c36_i32_629, %c0_i32_630] : memref<48x128xf32, #tpu.memory_space<vmem>> -> memref<1x128xf32, #tpu.memory_space<vmem>>
    %839 = tpu.memref_slice %arg8[%c1_i32_627] : memref<2x!tpu.dma_semaphore, #tpu.memory_space<semaphore_mem>> -> memref<1x!tpu.dma_semaphore, #tpu.memory_space<semaphore_mem>>
    %840 = tpu.memref_squeeze %839 : memref<1x!tpu.dma_semaphore, #tpu.memory_space<semaphore_mem>> -> memref<!tpu.dma_semaphore, #tpu.memory_space<semaphore_mem>>
    tpu.wait_dma2 semaphore(%840 : memref<!tpu.dma_semaphore, #tpu.memory_space<semaphore_mem>>) src(%837 : memref<1x128xf32, #tpu.memory_space<any>>) dst(%838 : memref<1x128xf32, #tpu.memory_space<vmem>>)
    %c1_i32_631 = arith.constant 1 : i32
    %c0_i32_632 = arith.constant 0 : i32
    %841 = tpu.memref_slice %arg4[%400, %c0_i32_632] : memref<50x128xf32, #tpu.memory_space<any>> -> memref<1x128xf32, #tpu.memory_space<any>>
    %c44_i32_633 = arith.constant 44 : i32
    %c0_i32_634 = arith.constant 0 : i32
    %842 = tpu.memref_slice %arg7[%c44_i32_633, %c0_i32_634] : memref<48x128xf32, #tpu.memory_space<vmem>> -> memref<1x128xf32, #tpu.memory_space<vmem>>
    %843 = tpu.memref_slice %arg8[%c1_i32_631] : memref<2x!tpu.dma_semaphore, #tpu.memory_space<semaphore_mem>> -> memref<1x!tpu.dma_semaphore, #tpu.memory_space<semaphore_mem>>
    %844 = tpu.memref_squeeze %843 : memref<1x!tpu.dma_semaphore, #tpu.memory_space<semaphore_mem>> -> memref<!tpu.dma_semaphore, #tpu.memory_space<semaphore_mem>>
    tpu.wait_dma2 semaphore(%844 : memref<!tpu.dma_semaphore, #tpu.memory_space<semaphore_mem>>) src(%841 : memref<1x128xf32, #tpu.memory_space<any>>) dst(%842 : memref<1x128xf32, #tpu.memory_space<vmem>>)
    %c0_i32_635 = arith.constant 0 : i32
    %c0_i32_636 = arith.constant 0 : i32
    %845 = tpu.memref_slice %arg3[%408, %c0_i32_636] : memref<50x128xf32, #tpu.memory_space<any>> -> memref<1x128xf32, #tpu.memory_space<any>>
    %c5_i32_637 = arith.constant 5 : i32
    %c0_i32_638 = arith.constant 0 : i32
    %846 = tpu.memref_slice %arg6[%c5_i32_637, %c0_i32_638] : memref<32x128xf32, #tpu.memory_space<vmem>> -> memref<1x128xf32, #tpu.memory_space<vmem>>
    %847 = tpu.memref_slice %arg8[%c0_i32_635] : memref<2x!tpu.dma_semaphore, #tpu.memory_space<semaphore_mem>> -> memref<1x!tpu.dma_semaphore, #tpu.memory_space<semaphore_mem>>
    %848 = tpu.memref_squeeze %847 : memref<1x!tpu.dma_semaphore, #tpu.memory_space<semaphore_mem>> -> memref<!tpu.dma_semaphore, #tpu.memory_space<semaphore_mem>>
    tpu.wait_dma2 semaphore(%848 : memref<!tpu.dma_semaphore, #tpu.memory_space<semaphore_mem>>) src(%845 : memref<1x128xf32, #tpu.memory_space<any>>) dst(%846 : memref<1x128xf32, #tpu.memory_space<vmem>>)
    %c0_i32_639 = arith.constant 0 : i32
    %c0_i32_640 = arith.constant 0 : i32
    %849 = tpu.memref_slice %arg3[%416, %c0_i32_640] : memref<50x128xf32, #tpu.memory_space<any>> -> memref<1x128xf32, #tpu.memory_space<any>>
    %c13_i32_641 = arith.constant 13 : i32
    %c0_i32_642 = arith.constant 0 : i32
    %850 = tpu.memref_slice %arg6[%c13_i32_641, %c0_i32_642] : memref<32x128xf32, #tpu.memory_space<vmem>> -> memref<1x128xf32, #tpu.memory_space<vmem>>
    %851 = tpu.memref_slice %arg8[%c0_i32_639] : memref<2x!tpu.dma_semaphore, #tpu.memory_space<semaphore_mem>> -> memref<1x!tpu.dma_semaphore, #tpu.memory_space<semaphore_mem>>
    %852 = tpu.memref_squeeze %851 : memref<1x!tpu.dma_semaphore, #tpu.memory_space<semaphore_mem>> -> memref<!tpu.dma_semaphore, #tpu.memory_space<semaphore_mem>>
    tpu.wait_dma2 semaphore(%852 : memref<!tpu.dma_semaphore, #tpu.memory_space<semaphore_mem>>) src(%849 : memref<1x128xf32, #tpu.memory_space<any>>) dst(%850 : memref<1x128xf32, #tpu.memory_space<vmem>>)
    %c0_i32_643 = arith.constant 0 : i32
    %c0_i32_644 = arith.constant 0 : i32
    %853 = tpu.memref_slice %arg3[%424, %c0_i32_644] : memref<50x128xf32, #tpu.memory_space<any>> -> memref<1x128xf32, #tpu.memory_space<any>>
    %c21_i32_645 = arith.constant 21 : i32
    %c0_i32_646 = arith.constant 0 : i32
    %854 = tpu.memref_slice %arg6[%c21_i32_645, %c0_i32_646] : memref<32x128xf32, #tpu.memory_space<vmem>> -> memref<1x128xf32, #tpu.memory_space<vmem>>
    %855 = tpu.memref_slice %arg8[%c0_i32_643] : memref<2x!tpu.dma_semaphore, #tpu.memory_space<semaphore_mem>> -> memref<1x!tpu.dma_semaphore, #tpu.memory_space<semaphore_mem>>
    %856 = tpu.memref_squeeze %855 : memref<1x!tpu.dma_semaphore, #tpu.memory_space<semaphore_mem>> -> memref<!tpu.dma_semaphore, #tpu.memory_space<semaphore_mem>>
    tpu.wait_dma2 semaphore(%856 : memref<!tpu.dma_semaphore, #tpu.memory_space<semaphore_mem>>) src(%853 : memref<1x128xf32, #tpu.memory_space<any>>) dst(%854 : memref<1x128xf32, #tpu.memory_space<vmem>>)
    %c0_i32_647 = arith.constant 0 : i32
    %c0_i32_648 = arith.constant 0 : i32
    %857 = tpu.memref_slice %arg3[%432, %c0_i32_648] : memref<50x128xf32, #tpu.memory_space<any>> -> memref<1x128xf32, #tpu.memory_space<any>>
    %c29_i32_649 = arith.constant 29 : i32
    %c0_i32_650 = arith.constant 0 : i32
    %858 = tpu.memref_slice %arg6[%c29_i32_649, %c0_i32_650] : memref<32x128xf32, #tpu.memory_space<vmem>> -> memref<1x128xf32, #tpu.memory_space<vmem>>
    %859 = tpu.memref_slice %arg8[%c0_i32_647] : memref<2x!tpu.dma_semaphore, #tpu.memory_space<semaphore_mem>> -> memref<1x!tpu.dma_semaphore, #tpu.memory_space<semaphore_mem>>
    %860 = tpu.memref_squeeze %859 : memref<1x!tpu.dma_semaphore, #tpu.memory_space<semaphore_mem>> -> memref<!tpu.dma_semaphore, #tpu.memory_space<semaphore_mem>>
    tpu.wait_dma2 semaphore(%860 : memref<!tpu.dma_semaphore, #tpu.memory_space<semaphore_mem>>) src(%857 : memref<1x128xf32, #tpu.memory_space<any>>) dst(%858 : memref<1x128xf32, #tpu.memory_space<vmem>>)
    %c1_i32_651 = arith.constant 1 : i32
    %c0_i32_652 = arith.constant 0 : i32
    %861 = tpu.memref_slice %arg4[%440, %c0_i32_652] : memref<50x128xf32, #tpu.memory_space<any>> -> memref<1x128xf32, #tpu.memory_space<any>>
    %c5_i32_653 = arith.constant 5 : i32
    %c0_i32_654 = arith.constant 0 : i32
    %862 = tpu.memref_slice %arg7[%c5_i32_653, %c0_i32_654] : memref<48x128xf32, #tpu.memory_space<vmem>> -> memref<1x128xf32, #tpu.memory_space<vmem>>
    %863 = tpu.memref_slice %arg8[%c1_i32_651] : memref<2x!tpu.dma_semaphore, #tpu.memory_space<semaphore_mem>> -> memref<1x!tpu.dma_semaphore, #tpu.memory_space<semaphore_mem>>
    %864 = tpu.memref_squeeze %863 : memref<1x!tpu.dma_semaphore, #tpu.memory_space<semaphore_mem>> -> memref<!tpu.dma_semaphore, #tpu.memory_space<semaphore_mem>>
    tpu.wait_dma2 semaphore(%864 : memref<!tpu.dma_semaphore, #tpu.memory_space<semaphore_mem>>) src(%861 : memref<1x128xf32, #tpu.memory_space<any>>) dst(%862 : memref<1x128xf32, #tpu.memory_space<vmem>>)
    %c1_i32_655 = arith.constant 1 : i32
    %c0_i32_656 = arith.constant 0 : i32
    %865 = tpu.memref_slice %arg4[%448, %c0_i32_656] : memref<50x128xf32, #tpu.memory_space<any>> -> memref<1x128xf32, #tpu.memory_space<any>>
    %c13_i32_657 = arith.constant 13 : i32
    %c0_i32_658 = arith.constant 0 : i32
    %866 = tpu.memref_slice %arg7[%c13_i32_657, %c0_i32_658] : memref<48x128xf32, #tpu.memory_space<vmem>> -> memref<1x128xf32, #tpu.memory_space<vmem>>
    %867 = tpu.memref_slice %arg8[%c1_i32_655] : memref<2x!tpu.dma_semaphore, #tpu.memory_space<semaphore_mem>> -> memref<1x!tpu.dma_semaphore, #tpu.memory_space<semaphore_mem>>
    %868 = tpu.memref_squeeze %867 : memref<1x!tpu.dma_semaphore, #tpu.memory_space<semaphore_mem>> -> memref<!tpu.dma_semaphore, #tpu.memory_space<semaphore_mem>>
    tpu.wait_dma2 semaphore(%868 : memref<!tpu.dma_semaphore, #tpu.memory_space<semaphore_mem>>) src(%865 : memref<1x128xf32, #tpu.memory_space<any>>) dst(%866 : memref<1x128xf32, #tpu.memory_space<vmem>>)
    %c1_i32_659 = arith.constant 1 : i32
    %c0_i32_660 = arith.constant 0 : i32
    %869 = tpu.memref_slice %arg4[%456, %c0_i32_660] : memref<50x128xf32, #tpu.memory_space<any>> -> memref<1x128xf32, #tpu.memory_space<any>>
    %c21_i32_661 = arith.constant 21 : i32
    %c0_i32_662 = arith.constant 0 : i32
    %870 = tpu.memref_slice %arg7[%c21_i32_661, %c0_i32_662] : memref<48x128xf32, #tpu.memory_space<vmem>> -> memref<1x128xf32, #tpu.memory_space<vmem>>
    %871 = tpu.memref_slice %arg8[%c1_i32_659] : memref<2x!tpu.dma_semaphore, #tpu.memory_space<semaphore_mem>> -> memref<1x!tpu.dma_semaphore, #tpu.memory_space<semaphore_mem>>
    %872 = tpu.memref_squeeze %871 : memref<1x!tpu.dma_semaphore, #tpu.memory_space<semaphore_mem>> -> memref<!tpu.dma_semaphore, #tpu.memory_space<semaphore_mem>>
    tpu.wait_dma2 semaphore(%872 : memref<!tpu.dma_semaphore, #tpu.memory_space<semaphore_mem>>) src(%869 : memref<1x128xf32, #tpu.memory_space<any>>) dst(%870 : memref<1x128xf32, #tpu.memory_space<vmem>>)
    %c1_i32_663 = arith.constant 1 : i32
    %c0_i32_664 = arith.constant 0 : i32
    %873 = tpu.memref_slice %arg4[%464, %c0_i32_664] : memref<50x128xf32, #tpu.memory_space<any>> -> memref<1x128xf32, #tpu.memory_space<any>>
    %c29_i32_665 = arith.constant 29 : i32
    %c0_i32_666 = arith.constant 0 : i32
    %874 = tpu.memref_slice %arg7[%c29_i32_665, %c0_i32_666] : memref<48x128xf32, #tpu.memory_space<vmem>> -> memref<1x128xf32, #tpu.memory_space<vmem>>
    %875 = tpu.memref_slice %arg8[%c1_i32_663] : memref<2x!tpu.dma_semaphore, #tpu.memory_space<semaphore_mem>> -> memref<1x!tpu.dma_semaphore, #tpu.memory_space<semaphore_mem>>
    %876 = tpu.memref_squeeze %875 : memref<1x!tpu.dma_semaphore, #tpu.memory_space<semaphore_mem>> -> memref<!tpu.dma_semaphore, #tpu.memory_space<semaphore_mem>>
    tpu.wait_dma2 semaphore(%876 : memref<!tpu.dma_semaphore, #tpu.memory_space<semaphore_mem>>) src(%873 : memref<1x128xf32, #tpu.memory_space<any>>) dst(%874 : memref<1x128xf32, #tpu.memory_space<vmem>>)
    %c1_i32_667 = arith.constant 1 : i32
    %c0_i32_668 = arith.constant 0 : i32
    %877 = tpu.memref_slice %arg4[%472, %c0_i32_668] : memref<50x128xf32, #tpu.memory_space<any>> -> memref<1x128xf32, #tpu.memory_space<any>>
    %c37_i32_669 = arith.constant 37 : i32
    %c0_i32_670 = arith.constant 0 : i32
    %878 = tpu.memref_slice %arg7[%c37_i32_669, %c0_i32_670] : memref<48x128xf32, #tpu.memory_space<vmem>> -> memref<1x128xf32, #tpu.memory_space<vmem>>
    %879 = tpu.memref_slice %arg8[%c1_i32_667] : memref<2x!tpu.dma_semaphore, #tpu.memory_space<semaphore_mem>> -> memref<1x!tpu.dma_semaphore, #tpu.memory_space<semaphore_mem>>
    %880 = tpu.memref_squeeze %879 : memref<1x!tpu.dma_semaphore, #tpu.memory_space<semaphore_mem>> -> memref<!tpu.dma_semaphore, #tpu.memory_space<semaphore_mem>>
    tpu.wait_dma2 semaphore(%880 : memref<!tpu.dma_semaphore, #tpu.memory_space<semaphore_mem>>) src(%877 : memref<1x128xf32, #tpu.memory_space<any>>) dst(%878 : memref<1x128xf32, #tpu.memory_space<vmem>>)
    %c1_i32_671 = arith.constant 1 : i32
    %c0_i32_672 = arith.constant 0 : i32
    %881 = tpu.memref_slice %arg4[%480, %c0_i32_672] : memref<50x128xf32, #tpu.memory_space<any>> -> memref<1x128xf32, #tpu.memory_space<any>>
    %c45_i32_673 = arith.constant 45 : i32
    %c0_i32_674 = arith.constant 0 : i32
    %882 = tpu.memref_slice %arg7[%c45_i32_673, %c0_i32_674] : memref<48x128xf32, #tpu.memory_space<vmem>> -> memref<1x128xf32, #tpu.memory_space<vmem>>
    %883 = tpu.memref_slice %arg8[%c1_i32_671] : memref<2x!tpu.dma_semaphore, #tpu.memory_space<semaphore_mem>> -> memref<1x!tpu.dma_semaphore, #tpu.memory_space<semaphore_mem>>
    %884 = tpu.memref_squeeze %883 : memref<1x!tpu.dma_semaphore, #tpu.memory_space<semaphore_mem>> -> memref<!tpu.dma_semaphore, #tpu.memory_space<semaphore_mem>>
    tpu.wait_dma2 semaphore(%884 : memref<!tpu.dma_semaphore, #tpu.memory_space<semaphore_mem>>) src(%881 : memref<1x128xf32, #tpu.memory_space<any>>) dst(%882 : memref<1x128xf32, #tpu.memory_space<vmem>>)
    %c0_i32_675 = arith.constant 0 : i32
    %c0_i32_676 = arith.constant 0 : i32
    %885 = tpu.memref_slice %arg3[%488, %c0_i32_676] : memref<50x128xf32, #tpu.memory_space<any>> -> memref<1x128xf32, #tpu.memory_space<any>>
    %c6_i32_677 = arith.constant 6 : i32
    %c0_i32_678 = arith.constant 0 : i32
    %886 = tpu.memref_slice %arg6[%c6_i32_677, %c0_i32_678] : memref<32x128xf32, #tpu.memory_space<vmem>> -> memref<1x128xf32, #tpu.memory_space<vmem>>
    %887 = tpu.memref_slice %arg8[%c0_i32_675] : memref<2x!tpu.dma_semaphore, #tpu.memory_space<semaphore_mem>> -> memref<1x!tpu.dma_semaphore, #tpu.memory_space<semaphore_mem>>
    %888 = tpu.memref_squeeze %887 : memref<1x!tpu.dma_semaphore, #tpu.memory_space<semaphore_mem>> -> memref<!tpu.dma_semaphore, #tpu.memory_space<semaphore_mem>>
    tpu.wait_dma2 semaphore(%888 : memref<!tpu.dma_semaphore, #tpu.memory_space<semaphore_mem>>) src(%885 : memref<1x128xf32, #tpu.memory_space<any>>) dst(%886 : memref<1x128xf32, #tpu.memory_space<vmem>>)
    %c0_i32_679 = arith.constant 0 : i32
    %c0_i32_680 = arith.constant 0 : i32
    %889 = tpu.memref_slice %arg3[%496, %c0_i32_680] : memref<50x128xf32, #tpu.memory_space<any>> -> memref<1x128xf32, #tpu.memory_space<any>>
    %c14_i32_681 = arith.constant 14 : i32
    %c0_i32_682 = arith.constant 0 : i32
    %890 = tpu.memref_slice %arg6[%c14_i32_681, %c0_i32_682] : memref<32x128xf32, #tpu.memory_space<vmem>> -> memref<1x128xf32, #tpu.memory_space<vmem>>
    %891 = tpu.memref_slice %arg8[%c0_i32_679] : memref<2x!tpu.dma_semaphore, #tpu.memory_space<semaphore_mem>> -> memref<1x!tpu.dma_semaphore, #tpu.memory_space<semaphore_mem>>
    %892 = tpu.memref_squeeze %891 : memref<1x!tpu.dma_semaphore, #tpu.memory_space<semaphore_mem>> -> memref<!tpu.dma_semaphore, #tpu.memory_space<semaphore_mem>>
    tpu.wait_dma2 semaphore(%892 : memref<!tpu.dma_semaphore, #tpu.memory_space<semaphore_mem>>) src(%889 : memref<1x128xf32, #tpu.memory_space<any>>) dst(%890 : memref<1x128xf32, #tpu.memory_space<vmem>>)
    %c0_i32_683 = arith.constant 0 : i32
    %c0_i32_684 = arith.constant 0 : i32
    %893 = tpu.memref_slice %arg3[%504, %c0_i32_684] : memref<50x128xf32, #tpu.memory_space<any>> -> memref<1x128xf32, #tpu.memory_space<any>>
    %c22_i32_685 = arith.constant 22 : i32
    %c0_i32_686 = arith.constant 0 : i32
    %894 = tpu.memref_slice %arg6[%c22_i32_685, %c0_i32_686] : memref<32x128xf32, #tpu.memory_space<vmem>> -> memref<1x128xf32, #tpu.memory_space<vmem>>
    %895 = tpu.memref_slice %arg8[%c0_i32_683] : memref<2x!tpu.dma_semaphore, #tpu.memory_space<semaphore_mem>> -> memref<1x!tpu.dma_semaphore, #tpu.memory_space<semaphore_mem>>
    %896 = tpu.memref_squeeze %895 : memref<1x!tpu.dma_semaphore, #tpu.memory_space<semaphore_mem>> -> memref<!tpu.dma_semaphore, #tpu.memory_space<semaphore_mem>>
    tpu.wait_dma2 semaphore(%896 : memref<!tpu.dma_semaphore, #tpu.memory_space<semaphore_mem>>) src(%893 : memref<1x128xf32, #tpu.memory_space<any>>) dst(%894 : memref<1x128xf32, #tpu.memory_space<vmem>>)
    %c0_i32_687 = arith.constant 0 : i32
    %c0_i32_688 = arith.constant 0 : i32
    %897 = tpu.memref_slice %arg3[%512, %c0_i32_688] : memref<50x128xf32, #tpu.memory_space<any>> -> memref<1x128xf32, #tpu.memory_space<any>>
    %c30_i32_689 = arith.constant 30 : i32
    %c0_i32_690 = arith.constant 0 : i32
    %898 = tpu.memref_slice %arg6[%c30_i32_689, %c0_i32_690] : memref<32x128xf32, #tpu.memory_space<vmem>> -> memref<1x128xf32, #tpu.memory_space<vmem>>
    %899 = tpu.memref_slice %arg8[%c0_i32_687] : memref<2x!tpu.dma_semaphore, #tpu.memory_space<semaphore_mem>> -> memref<1x!tpu.dma_semaphore, #tpu.memory_space<semaphore_mem>>
    %900 = tpu.memref_squeeze %899 : memref<1x!tpu.dma_semaphore, #tpu.memory_space<semaphore_mem>> -> memref<!tpu.dma_semaphore, #tpu.memory_space<semaphore_mem>>
    tpu.wait_dma2 semaphore(%900 : memref<!tpu.dma_semaphore, #tpu.memory_space<semaphore_mem>>) src(%897 : memref<1x128xf32, #tpu.memory_space<any>>) dst(%898 : memref<1x128xf32, #tpu.memory_space<vmem>>)
    %c1_i32_691 = arith.constant 1 : i32
    %c0_i32_692 = arith.constant 0 : i32
    %901 = tpu.memref_slice %arg4[%520, %c0_i32_692] : memref<50x128xf32, #tpu.memory_space<any>> -> memref<1x128xf32, #tpu.memory_space<any>>
    %c6_i32_693 = arith.constant 6 : i32
    %c0_i32_694 = arith.constant 0 : i32
    %902 = tpu.memref_slice %arg7[%c6_i32_693, %c0_i32_694] : memref<48x128xf32, #tpu.memory_space<vmem>> -> memref<1x128xf32, #tpu.memory_space<vmem>>
    %903 = tpu.memref_slice %arg8[%c1_i32_691] : memref<2x!tpu.dma_semaphore, #tpu.memory_space<semaphore_mem>> -> memref<1x!tpu.dma_semaphore, #tpu.memory_space<semaphore_mem>>
    %904 = tpu.memref_squeeze %903 : memref<1x!tpu.dma_semaphore, #tpu.memory_space<semaphore_mem>> -> memref<!tpu.dma_semaphore, #tpu.memory_space<semaphore_mem>>
    tpu.wait_dma2 semaphore(%904 : memref<!tpu.dma_semaphore, #tpu.memory_space<semaphore_mem>>) src(%901 : memref<1x128xf32, #tpu.memory_space<any>>) dst(%902 : memref<1x128xf32, #tpu.memory_space<vmem>>)
    %c1_i32_695 = arith.constant 1 : i32
    %c0_i32_696 = arith.constant 0 : i32
    %905 = tpu.memref_slice %arg4[%528, %c0_i32_696] : memref<50x128xf32, #tpu.memory_space<any>> -> memref<1x128xf32, #tpu.memory_space<any>>
    %c14_i32_697 = arith.constant 14 : i32
    %c0_i32_698 = arith.constant 0 : i32
    %906 = tpu.memref_slice %arg7[%c14_i32_697, %c0_i32_698] : memref<48x128xf32, #tpu.memory_space<vmem>> -> memref<1x128xf32, #tpu.memory_space<vmem>>
    %907 = tpu.memref_slice %arg8[%c1_i32_695] : memref<2x!tpu.dma_semaphore, #tpu.memory_space<semaphore_mem>> -> memref<1x!tpu.dma_semaphore, #tpu.memory_space<semaphore_mem>>
    %908 = tpu.memref_squeeze %907 : memref<1x!tpu.dma_semaphore, #tpu.memory_space<semaphore_mem>> -> memref<!tpu.dma_semaphore, #tpu.memory_space<semaphore_mem>>
    tpu.wait_dma2 semaphore(%908 : memref<!tpu.dma_semaphore, #tpu.memory_space<semaphore_mem>>) src(%905 : memref<1x128xf32, #tpu.memory_space<any>>) dst(%906 : memref<1x128xf32, #tpu.memory_space<vmem>>)
    %c1_i32_699 = arith.constant 1 : i32
    %c0_i32_700 = arith.constant 0 : i32
    %909 = tpu.memref_slice %arg4[%536, %c0_i32_700] : memref<50x128xf32, #tpu.memory_space<any>> -> memref<1x128xf32, #tpu.memory_space<any>>
    %c22_i32_701 = arith.constant 22 : i32
    %c0_i32_702 = arith.constant 0 : i32
    %910 = tpu.memref_slice %arg7[%c22_i32_701, %c0_i32_702] : memref<48x128xf32, #tpu.memory_space<vmem>> -> memref<1x128xf32, #tpu.memory_space<vmem>>
    %911 = tpu.memref_slice %arg8[%c1_i32_699] : memref<2x!tpu.dma_semaphore, #tpu.memory_space<semaphore_mem>> -> memref<1x!tpu.dma_semaphore, #tpu.memory_space<semaphore_mem>>
    %912 = tpu.memref_squeeze %911 : memref<1x!tpu.dma_semaphore, #tpu.memory_space<semaphore_mem>> -> memref<!tpu.dma_semaphore, #tpu.memory_space<semaphore_mem>>
    tpu.wait_dma2 semaphore(%912 : memref<!tpu.dma_semaphore, #tpu.memory_space<semaphore_mem>>) src(%909 : memref<1x128xf32, #tpu.memory_space<any>>) dst(%910 : memref<1x128xf32, #tpu.memory_space<vmem>>)
    %c1_i32_703 = arith.constant 1 : i32
    %c0_i32_704 = arith.constant 0 : i32
    %913 = tpu.memref_slice %arg4[%544, %c0_i32_704] : memref<50x128xf32, #tpu.memory_space<any>> -> memref<1x128xf32, #tpu.memory_space<any>>
    %c30_i32_705 = arith.constant 30 : i32
    %c0_i32_706 = arith.constant 0 : i32
    %914 = tpu.memref_slice %arg7[%c30_i32_705, %c0_i32_706] : memref<48x128xf32, #tpu.memory_space<vmem>> -> memref<1x128xf32, #tpu.memory_space<vmem>>
    %915 = tpu.memref_slice %arg8[%c1_i32_703] : memref<2x!tpu.dma_semaphore, #tpu.memory_space<semaphore_mem>> -> memref<1x!tpu.dma_semaphore, #tpu.memory_space<semaphore_mem>>
    %916 = tpu.memref_squeeze %915 : memref<1x!tpu.dma_semaphore, #tpu.memory_space<semaphore_mem>> -> memref<!tpu.dma_semaphore, #tpu.memory_space<semaphore_mem>>
    tpu.wait_dma2 semaphore(%916 : memref<!tpu.dma_semaphore, #tpu.memory_space<semaphore_mem>>) src(%913 : memref<1x128xf32, #tpu.memory_space<any>>) dst(%914 : memref<1x128xf32, #tpu.memory_space<vmem>>)
    %c1_i32_707 = arith.constant 1 : i32
    %c0_i32_708 = arith.constant 0 : i32
    %917 = tpu.memref_slice %arg4[%552, %c0_i32_708] : memref<50x128xf32, #tpu.memory_space<any>> -> memref<1x128xf32, #tpu.memory_space<any>>
    %c38_i32_709 = arith.constant 38 : i32
    %c0_i32_710 = arith.constant 0 : i32
    %918 = tpu.memref_slice %arg7[%c38_i32_709, %c0_i32_710] : memref<48x128xf32, #tpu.memory_space<vmem>> -> memref<1x128xf32, #tpu.memory_space<vmem>>
    %919 = tpu.memref_slice %arg8[%c1_i32_707] : memref<2x!tpu.dma_semaphore, #tpu.memory_space<semaphore_mem>> -> memref<1x!tpu.dma_semaphore, #tpu.memory_space<semaphore_mem>>
    %920 = tpu.memref_squeeze %919 : memref<1x!tpu.dma_semaphore, #tpu.memory_space<semaphore_mem>> -> memref<!tpu.dma_semaphore, #tpu.memory_space<semaphore_mem>>
    tpu.wait_dma2 semaphore(%920 : memref<!tpu.dma_semaphore, #tpu.memory_space<semaphore_mem>>) src(%917 : memref<1x128xf32, #tpu.memory_space<any>>) dst(%918 : memref<1x128xf32, #tpu.memory_space<vmem>>)
    %c1_i32_711 = arith.constant 1 : i32
    %c0_i32_712 = arith.constant 0 : i32
    %921 = tpu.memref_slice %arg4[%560, %c0_i32_712] : memref<50x128xf32, #tpu.memory_space<any>> -> memref<1x128xf32, #tpu.memory_space<any>>
    %c46_i32_713 = arith.constant 46 : i32
    %c0_i32_714 = arith.constant 0 : i32
    %922 = tpu.memref_slice %arg7[%c46_i32_713, %c0_i32_714] : memref<48x128xf32, #tpu.memory_space<vmem>> -> memref<1x128xf32, #tpu.memory_space<vmem>>
    %923 = tpu.memref_slice %arg8[%c1_i32_711] : memref<2x!tpu.dma_semaphore, #tpu.memory_space<semaphore_mem>> -> memref<1x!tpu.dma_semaphore, #tpu.memory_space<semaphore_mem>>
    %924 = tpu.memref_squeeze %923 : memref<1x!tpu.dma_semaphore, #tpu.memory_space<semaphore_mem>> -> memref<!tpu.dma_semaphore, #tpu.memory_space<semaphore_mem>>
    tpu.wait_dma2 semaphore(%924 : memref<!tpu.dma_semaphore, #tpu.memory_space<semaphore_mem>>) src(%921 : memref<1x128xf32, #tpu.memory_space<any>>) dst(%922 : memref<1x128xf32, #tpu.memory_space<vmem>>)
    %c0_i32_715 = arith.constant 0 : i32
    %c0_i32_716 = arith.constant 0 : i32
    %925 = tpu.memref_slice %arg3[%568, %c0_i32_716] : memref<50x128xf32, #tpu.memory_space<any>> -> memref<1x128xf32, #tpu.memory_space<any>>
    %c7_i32_717 = arith.constant 7 : i32
    %c0_i32_718 = arith.constant 0 : i32
    %926 = tpu.memref_slice %arg6[%c7_i32_717, %c0_i32_718] : memref<32x128xf32, #tpu.memory_space<vmem>> -> memref<1x128xf32, #tpu.memory_space<vmem>>
    %927 = tpu.memref_slice %arg8[%c0_i32_715] : memref<2x!tpu.dma_semaphore, #tpu.memory_space<semaphore_mem>> -> memref<1x!tpu.dma_semaphore, #tpu.memory_space<semaphore_mem>>
    %928 = tpu.memref_squeeze %927 : memref<1x!tpu.dma_semaphore, #tpu.memory_space<semaphore_mem>> -> memref<!tpu.dma_semaphore, #tpu.memory_space<semaphore_mem>>
    tpu.wait_dma2 semaphore(%928 : memref<!tpu.dma_semaphore, #tpu.memory_space<semaphore_mem>>) src(%925 : memref<1x128xf32, #tpu.memory_space<any>>) dst(%926 : memref<1x128xf32, #tpu.memory_space<vmem>>)
    %c0_i32_719 = arith.constant 0 : i32
    %c0_i32_720 = arith.constant 0 : i32
    %929 = tpu.memref_slice %arg3[%576, %c0_i32_720] : memref<50x128xf32, #tpu.memory_space<any>> -> memref<1x128xf32, #tpu.memory_space<any>>
    %c15_i32_721 = arith.constant 15 : i32
    %c0_i32_722 = arith.constant 0 : i32
    %930 = tpu.memref_slice %arg6[%c15_i32_721, %c0_i32_722] : memref<32x128xf32, #tpu.memory_space<vmem>> -> memref<1x128xf32, #tpu.memory_space<vmem>>
    %931 = tpu.memref_slice %arg8[%c0_i32_719] : memref<2x!tpu.dma_semaphore, #tpu.memory_space<semaphore_mem>> -> memref<1x!tpu.dma_semaphore, #tpu.memory_space<semaphore_mem>>
    %932 = tpu.memref_squeeze %931 : memref<1x!tpu.dma_semaphore, #tpu.memory_space<semaphore_mem>> -> memref<!tpu.dma_semaphore, #tpu.memory_space<semaphore_mem>>
    tpu.wait_dma2 semaphore(%932 : memref<!tpu.dma_semaphore, #tpu.memory_space<semaphore_mem>>) src(%929 : memref<1x128xf32, #tpu.memory_space<any>>) dst(%930 : memref<1x128xf32, #tpu.memory_space<vmem>>)
    %c0_i32_723 = arith.constant 0 : i32
    %c0_i32_724 = arith.constant 0 : i32
    %933 = tpu.memref_slice %arg3[%584, %c0_i32_724] : memref<50x128xf32, #tpu.memory_space<any>> -> memref<1x128xf32, #tpu.memory_space<any>>
    %c23_i32_725 = arith.constant 23 : i32
    %c0_i32_726 = arith.constant 0 : i32
    %934 = tpu.memref_slice %arg6[%c23_i32_725, %c0_i32_726] : memref<32x128xf32, #tpu.memory_space<vmem>> -> memref<1x128xf32, #tpu.memory_space<vmem>>
    %935 = tpu.memref_slice %arg8[%c0_i32_723] : memref<2x!tpu.dma_semaphore, #tpu.memory_space<semaphore_mem>> -> memref<1x!tpu.dma_semaphore, #tpu.memory_space<semaphore_mem>>
    %936 = tpu.memref_squeeze %935 : memref<1x!tpu.dma_semaphore, #tpu.memory_space<semaphore_mem>> -> memref<!tpu.dma_semaphore, #tpu.memory_space<semaphore_mem>>
    tpu.wait_dma2 semaphore(%936 : memref<!tpu.dma_semaphore, #tpu.memory_space<semaphore_mem>>) src(%933 : memref<1x128xf32, #tpu.memory_space<any>>) dst(%934 : memref<1x128xf32, #tpu.memory_space<vmem>>)
    %c0_i32_727 = arith.constant 0 : i32
    %c0_i32_728 = arith.constant 0 : i32
    %937 = tpu.memref_slice %arg3[%592, %c0_i32_728] : memref<50x128xf32, #tpu.memory_space<any>> -> memref<1x128xf32, #tpu.memory_space<any>>
    %c31_i32_729 = arith.constant 31 : i32
    %c0_i32_730 = arith.constant 0 : i32
    %938 = tpu.memref_slice %arg6[%c31_i32_729, %c0_i32_730] : memref<32x128xf32, #tpu.memory_space<vmem>> -> memref<1x128xf32, #tpu.memory_space<vmem>>
    %939 = tpu.memref_slice %arg8[%c0_i32_727] : memref<2x!tpu.dma_semaphore, #tpu.memory_space<semaphore_mem>> -> memref<1x!tpu.dma_semaphore, #tpu.memory_space<semaphore_mem>>
    %940 = tpu.memref_squeeze %939 : memref<1x!tpu.dma_semaphore, #tpu.memory_space<semaphore_mem>> -> memref<!tpu.dma_semaphore, #tpu.memory_space<semaphore_mem>>
    tpu.wait_dma2 semaphore(%940 : memref<!tpu.dma_semaphore, #tpu.memory_space<semaphore_mem>>) src(%937 : memref<1x128xf32, #tpu.memory_space<any>>) dst(%938 : memref<1x128xf32, #tpu.memory_space<vmem>>)
    %c1_i32_731 = arith.constant 1 : i32
    %c0_i32_732 = arith.constant 0 : i32
    %941 = tpu.memref_slice %arg4[%600, %c0_i32_732] : memref<50x128xf32, #tpu.memory_space<any>> -> memref<1x128xf32, #tpu.memory_space<any>>
    %c7_i32_733 = arith.constant 7 : i32
    %c0_i32_734 = arith.constant 0 : i32
    %942 = tpu.memref_slice %arg7[%c7_i32_733, %c0_i32_734] : memref<48x128xf32, #tpu.memory_space<vmem>> -> memref<1x128xf32, #tpu.memory_space<vmem>>
    %943 = tpu.memref_slice %arg8[%c1_i32_731] : memref<2x!tpu.dma_semaphore, #tpu.memory_space<semaphore_mem>> -> memref<1x!tpu.dma_semaphore, #tpu.memory_space<semaphore_mem>>
    %944 = tpu.memref_squeeze %943 : memref<1x!tpu.dma_semaphore, #tpu.memory_space<semaphore_mem>> -> memref<!tpu.dma_semaphore, #tpu.memory_space<semaphore_mem>>
    tpu.wait_dma2 semaphore(%944 : memref<!tpu.dma_semaphore, #tpu.memory_space<semaphore_mem>>) src(%941 : memref<1x128xf32, #tpu.memory_space<any>>) dst(%942 : memref<1x128xf32, #tpu.memory_space<vmem>>)
    %c1_i32_735 = arith.constant 1 : i32
    %c0_i32_736 = arith.constant 0 : i32
    %945 = tpu.memref_slice %arg4[%608, %c0_i32_736] : memref<50x128xf32, #tpu.memory_space<any>> -> memref<1x128xf32, #tpu.memory_space<any>>
    %c15_i32_737 = arith.constant 15 : i32
    %c0_i32_738 = arith.constant 0 : i32
    %946 = tpu.memref_slice %arg7[%c15_i32_737, %c0_i32_738] : memref<48x128xf32, #tpu.memory_space<vmem>> -> memref<1x128xf32, #tpu.memory_space<vmem>>
    %947 = tpu.memref_slice %arg8[%c1_i32_735] : memref<2x!tpu.dma_semaphore, #tpu.memory_space<semaphore_mem>> -> memref<1x!tpu.dma_semaphore, #tpu.memory_space<semaphore_mem>>
    %948 = tpu.memref_squeeze %947 : memref<1x!tpu.dma_semaphore, #tpu.memory_space<semaphore_mem>> -> memref<!tpu.dma_semaphore, #tpu.memory_space<semaphore_mem>>
    tpu.wait_dma2 semaphore(%948 : memref<!tpu.dma_semaphore, #tpu.memory_space<semaphore_mem>>) src(%945 : memref<1x128xf32, #tpu.memory_space<any>>) dst(%946 : memref<1x128xf32, #tpu.memory_space<vmem>>)
    %c1_i32_739 = arith.constant 1 : i32
    %c0_i32_740 = arith.constant 0 : i32
    %949 = tpu.memref_slice %arg4[%616, %c0_i32_740] : memref<50x128xf32, #tpu.memory_space<any>> -> memref<1x128xf32, #tpu.memory_space<any>>
    %c23_i32_741 = arith.constant 23 : i32
    %c0_i32_742 = arith.constant 0 : i32
    %950 = tpu.memref_slice %arg7[%c23_i32_741, %c0_i32_742] : memref<48x128xf32, #tpu.memory_space<vmem>> -> memref<1x128xf32, #tpu.memory_space<vmem>>
    %951 = tpu.memref_slice %arg8[%c1_i32_739] : memref<2x!tpu.dma_semaphore, #tpu.memory_space<semaphore_mem>> -> memref<1x!tpu.dma_semaphore, #tpu.memory_space<semaphore_mem>>
    %952 = tpu.memref_squeeze %951 : memref<1x!tpu.dma_semaphore, #tpu.memory_space<semaphore_mem>> -> memref<!tpu.dma_semaphore, #tpu.memory_space<semaphore_mem>>
    tpu.wait_dma2 semaphore(%952 : memref<!tpu.dma_semaphore, #tpu.memory_space<semaphore_mem>>) src(%949 : memref<1x128xf32, #tpu.memory_space<any>>) dst(%950 : memref<1x128xf32, #tpu.memory_space<vmem>>)
    %c1_i32_743 = arith.constant 1 : i32
    %c0_i32_744 = arith.constant 0 : i32
    %953 = tpu.memref_slice %arg4[%624, %c0_i32_744] : memref<50x128xf32, #tpu.memory_space<any>> -> memref<1x128xf32, #tpu.memory_space<any>>
    %c31_i32_745 = arith.constant 31 : i32
    %c0_i32_746 = arith.constant 0 : i32
    %954 = tpu.memref_slice %arg7[%c31_i32_745, %c0_i32_746] : memref<48x128xf32, #tpu.memory_space<vmem>> -> memref<1x128xf32, #tpu.memory_space<vmem>>
    %955 = tpu.memref_slice %arg8[%c1_i32_743] : memref<2x!tpu.dma_semaphore, #tpu.memory_space<semaphore_mem>> -> memref<1x!tpu.dma_semaphore, #tpu.memory_space<semaphore_mem>>
    %956 = tpu.memref_squeeze %955 : memref<1x!tpu.dma_semaphore, #tpu.memory_space<semaphore_mem>> -> memref<!tpu.dma_semaphore, #tpu.memory_space<semaphore_mem>>
    tpu.wait_dma2 semaphore(%956 : memref<!tpu.dma_semaphore, #tpu.memory_space<semaphore_mem>>) src(%953 : memref<1x128xf32, #tpu.memory_space<any>>) dst(%954 : memref<1x128xf32, #tpu.memory_space<vmem>>)
    %c1_i32_747 = arith.constant 1 : i32
    %c0_i32_748 = arith.constant 0 : i32
    %957 = tpu.memref_slice %arg4[%632, %c0_i32_748] : memref<50x128xf32, #tpu.memory_space<any>> -> memref<1x128xf32, #tpu.memory_space<any>>
    %c39_i32_749 = arith.constant 39 : i32
    %c0_i32_750 = arith.constant 0 : i32
    %958 = tpu.memref_slice %arg7[%c39_i32_749, %c0_i32_750] : memref<48x128xf32, #tpu.memory_space<vmem>> -> memref<1x128xf32, #tpu.memory_space<vmem>>
    %959 = tpu.memref_slice %arg8[%c1_i32_747] : memref<2x!tpu.dma_semaphore, #tpu.memory_space<semaphore_mem>> -> memref<1x!tpu.dma_semaphore, #tpu.memory_space<semaphore_mem>>
    %960 = tpu.memref_squeeze %959 : memref<1x!tpu.dma_semaphore, #tpu.memory_space<semaphore_mem>> -> memref<!tpu.dma_semaphore, #tpu.memory_space<semaphore_mem>>
    tpu.wait_dma2 semaphore(%960 : memref<!tpu.dma_semaphore, #tpu.memory_space<semaphore_mem>>) src(%957 : memref<1x128xf32, #tpu.memory_space<any>>) dst(%958 : memref<1x128xf32, #tpu.memory_space<vmem>>)
    %c1_i32_751 = arith.constant 1 : i32
    %c0_i32_752 = arith.constant 0 : i32
    %961 = tpu.memref_slice %arg4[%640, %c0_i32_752] : memref<50x128xf32, #tpu.memory_space<any>> -> memref<1x128xf32, #tpu.memory_space<any>>
    %c47_i32_753 = arith.constant 47 : i32
    %c0_i32_754 = arith.constant 0 : i32
    %962 = tpu.memref_slice %arg7[%c47_i32_753, %c0_i32_754] : memref<48x128xf32, #tpu.memory_space<vmem>> -> memref<1x128xf32, #tpu.memory_space<vmem>>
    %963 = tpu.memref_slice %arg8[%c1_i32_751] : memref<2x!tpu.dma_semaphore, #tpu.memory_space<semaphore_mem>> -> memref<1x!tpu.dma_semaphore, #tpu.memory_space<semaphore_mem>>
    %964 = tpu.memref_squeeze %963 : memref<1x!tpu.dma_semaphore, #tpu.memory_space<semaphore_mem>> -> memref<!tpu.dma_semaphore, #tpu.memory_space<semaphore_mem>>
    tpu.wait_dma2 semaphore(%964 : memref<!tpu.dma_semaphore, #tpu.memory_space<semaphore_mem>>) src(%961 : memref<1x128xf32, #tpu.memory_space<any>>) dst(%962 : memref<1x128xf32, #tpu.memory_space<vmem>>)
    %c0 = arith.constant 0 : index
    %c0_755 = arith.constant 0 : index
    %965 = vector.load %arg6[%c0, %c0_755] : memref<32x128xf32, #tpu.memory_space<vmem>>, vector<8x128xf32>
    %c8 = arith.constant 8 : index
    %c0_756 = arith.constant 0 : index
    %966 = vector.load %arg6[%c8, %c0_756] : memref<32x128xf32, #tpu.memory_space<vmem>>, vector<8x128xf32>
    %967 = arith.addf %965, %966 : vector<8x128xf32>
    %c16 = arith.constant 16 : index
    %c0_757 = arith.constant 0 : index
    %968 = vector.load %arg6[%c16, %c0_757] : memref<32x128xf32, #tpu.memory_space<vmem>>, vector<8x128xf32>
    %969 = arith.addf %967, %968 : vector<8x128xf32>
    %c24 = arith.constant 24 : index
    %c0_758 = arith.constant 0 : index
    %970 = vector.load %arg6[%c24, %c0_758] : memref<32x128xf32, #tpu.memory_space<vmem>>, vector<8x128xf32>
    %971 = arith.addf %969, %970 : vector<8x128xf32>
    %cst = arith.constant 2.500000e-01 : f32
    %972 = vector.broadcast %cst : f32 to vector<8x128xf32>
    %973 = arith.mulf %971, %972 : vector<8x128xf32>
    %c0_759 = arith.constant 0 : index
    %c0_760 = arith.constant 0 : index
    %974 = vector.load %arg7[%c0_759, %c0_760] : memref<48x128xf32, #tpu.memory_space<vmem>>, vector<8x128xf32>
    %975 = arith.mulf %974, %973 : vector<8x128xf32>
    %cst_761 = arith.constant dense<0.000000e+00> : vector<8xf32>
    %976 = vector.multi_reduction <add>, %975, %cst_761 [1] : vector<8x128xf32> to vector<8xf32>
    %977 = vector.shape_cast %976 : vector<8xf32> to vector<8x1xf32>
    %cst_762 = arith.constant 0.000000e+00 : f32
    %978 = vector.broadcast %cst_762 : f32 to vector<8x1xf32>
    %979 = arith.minimumf %977, %978 : vector<8x1xf32>
    %980 = math.absf %977 : vector<8x1xf32>
    %cst_763 = arith.constant 0.000000e+00 : f32
    %981 = vector.broadcast %cst_763 : f32 to vector<8x1xf32>
    %982 = arith.subf %981, %980 : vector<8x1xf32>
    %983 = math.exp %982 : vector<8x1xf32>
    %984 = math.log1p %983 : vector<8x1xf32>
    %985 = arith.subf %979, %984 : vector<8x1xf32>
    %986 = vector.shape_cast %985 : vector<8x1xf32> to vector<1x8x1xf32>
    %cst_764 = arith.constant dense<0.000000e+00> : vector<1xf32>
    %987 = vector.multi_reduction <add>, %986, %cst_764 [1, 2] : vector<1x8x1xf32> to vector<1xf32>
    %988 = vector.shape_cast %987 : vector<1xf32> to vector<1x1x1xf32>
    %989 = vector.extract %988[0, 0, 0] : f32 from vector<1x1x1xf32>
    %cst_765 = arith.constant 0.000000e+00 : f32
    %990 = arith.addf %cst_765, %989 : f32
    %c8_766 = arith.constant 8 : index
    %c0_767 = arith.constant 0 : index
    %991 = vector.load %arg7[%c8_766, %c0_767] : memref<48x128xf32, #tpu.memory_space<vmem>>, vector<8x128xf32>
    %992 = arith.mulf %991, %973 : vector<8x128xf32>
    %cst_768 = arith.constant dense<0.000000e+00> : vector<8xf32>
    %993 = vector.multi_reduction <add>, %992, %cst_768 [1] : vector<8x128xf32> to vector<8xf32>
    %994 = vector.shape_cast %993 : vector<8xf32> to vector<8x1xf32>
    %cst_769 = arith.constant 0.000000e+00 : f32
    %995 = vector.broadcast %cst_769 : f32 to vector<8x1xf32>
    %996 = arith.subf %995, %994 : vector<8x1xf32>
    %cst_770 = arith.constant 0.000000e+00 : f32
    %997 = vector.broadcast %cst_770 : f32 to vector<8x1xf32>
    %998 = arith.minimumf %996, %997 : vector<8x1xf32>
    %999 = math.absf %996 : vector<8x1xf32>
    %cst_771 = arith.constant 0.000000e+00 : f32
    %1000 = vector.broadcast %cst_771 : f32 to vector<8x1xf32>
    %1001 = arith.subf %1000, %999 : vector<8x1xf32>
    %1002 = math.exp %1001 : vector<8x1xf32>
    %1003 = math.log1p %1002 : vector<8x1xf32>
    %1004 = arith.subf %998, %1003 : vector<8x1xf32>
    %1005 = vector.shape_cast %1004 : vector<8x1xf32> to vector<1x8x1xf32>
    %cst_772 = arith.constant dense<0.000000e+00> : vector<1xf32>
    %1006 = vector.multi_reduction <add>, %1005, %cst_772 [1, 2] : vector<1x8x1xf32> to vector<1xf32>
    %1007 = vector.shape_cast %1006 : vector<1xf32> to vector<1x1x1xf32>
    %1008 = vector.extract %1007[0, 0, 0] : f32 from vector<1x1x1xf32>
    %cst_773 = arith.constant 1.000000e+00 : f32
    %1009 = arith.mulf %cst_773, %1008 : f32
    %1010 = arith.addf %990, %1009 : f32
    %c16_774 = arith.constant 16 : index
    %c0_775 = arith.constant 0 : index
    %1011 = vector.load %arg7[%c16_774, %c0_775] : memref<48x128xf32, #tpu.memory_space<vmem>>, vector<8x128xf32>
    %1012 = arith.mulf %1011, %973 : vector<8x128xf32>
    %cst_776 = arith.constant dense<0.000000e+00> : vector<8xf32>
    %1013 = vector.multi_reduction <add>, %1012, %cst_776 [1] : vector<8x128xf32> to vector<8xf32>
    %1014 = vector.shape_cast %1013 : vector<8xf32> to vector<8x1xf32>
    %cst_777 = arith.constant 0.000000e+00 : f32
    %1015 = vector.broadcast %cst_777 : f32 to vector<8x1xf32>
    %1016 = arith.subf %1015, %1014 : vector<8x1xf32>
    %cst_778 = arith.constant 0.000000e+00 : f32
    %1017 = vector.broadcast %cst_778 : f32 to vector<8x1xf32>
    %1018 = arith.minimumf %1016, %1017 : vector<8x1xf32>
    %1019 = math.absf %1016 : vector<8x1xf32>
    %cst_779 = arith.constant 0.000000e+00 : f32
    %1020 = vector.broadcast %cst_779 : f32 to vector<8x1xf32>
    %1021 = arith.subf %1020, %1019 : vector<8x1xf32>
    %1022 = math.exp %1021 : vector<8x1xf32>
    %1023 = math.log1p %1022 : vector<8x1xf32>
    %1024 = arith.subf %1018, %1023 : vector<8x1xf32>
    %1025 = vector.shape_cast %1024 : vector<8x1xf32> to vector<1x8x1xf32>
    %cst_780 = arith.constant dense<0.000000e+00> : vector<1xf32>
    %1026 = vector.multi_reduction <add>, %1025, %cst_780 [1, 2] : vector<1x8x1xf32> to vector<1xf32>
    %1027 = vector.shape_cast %1026 : vector<1xf32> to vector<1x1x1xf32>
    %1028 = vector.extract %1027[0, 0, 0] : f32 from vector<1x1x1xf32>
    %cst_781 = arith.constant 1.000000e+00 : f32
    %1029 = arith.mulf %cst_781, %1028 : f32
    %1030 = arith.addf %1010, %1029 : f32
    %c24_782 = arith.constant 24 : index
    %c0_783 = arith.constant 0 : index
    %1031 = vector.load %arg7[%c24_782, %c0_783] : memref<48x128xf32, #tpu.memory_space<vmem>>, vector<8x128xf32>
    %1032 = arith.mulf %1031, %973 : vector<8x128xf32>
    %cst_784 = arith.constant dense<0.000000e+00> : vector<8xf32>
    %1033 = vector.multi_reduction <add>, %1032, %cst_784 [1] : vector<8x128xf32> to vector<8xf32>
    %1034 = vector.shape_cast %1033 : vector<8xf32> to vector<8x1xf32>
    %cst_785 = arith.constant 0.000000e+00 : f32
    %1035 = vector.broadcast %cst_785 : f32 to vector<8x1xf32>
    %1036 = arith.subf %1035, %1034 : vector<8x1xf32>
    %cst_786 = arith.constant 0.000000e+00 : f32
    %1037 = vector.broadcast %cst_786 : f32 to vector<8x1xf32>
    %1038 = arith.minimumf %1036, %1037 : vector<8x1xf32>
    %1039 = math.absf %1036 : vector<8x1xf32>
    %cst_787 = arith.constant 0.000000e+00 : f32
    %1040 = vector.broadcast %cst_787 : f32 to vector<8x1xf32>
    %1041 = arith.subf %1040, %1039 : vector<8x1xf32>
    %1042 = math.exp %1041 : vector<8x1xf32>
    %1043 = math.log1p %1042 : vector<8x1xf32>
    %1044 = arith.subf %1038, %1043 : vector<8x1xf32>
    %1045 = vector.shape_cast %1044 : vector<8x1xf32> to vector<1x8x1xf32>
    %cst_788 = arith.constant dense<0.000000e+00> : vector<1xf32>
    %1046 = vector.multi_reduction <add>, %1045, %cst_788 [1, 2] : vector<1x8x1xf32> to vector<1xf32>
    %1047 = vector.shape_cast %1046 : vector<1xf32> to vector<1x1x1xf32>
    %1048 = vector.extract %1047[0, 0, 0] : f32 from vector<1x1x1xf32>
    %cst_789 = arith.constant 1.000000e+00 : f32
    %1049 = arith.mulf %cst_789, %1048 : f32
    %1050 = arith.addf %1030, %1049 : f32
    %c32 = arith.constant 32 : index
    %c0_790 = arith.constant 0 : index
    %1051 = vector.load %arg7[%c32, %c0_790] : memref<48x128xf32, #tpu.memory_space<vmem>>, vector<8x128xf32>
    %1052 = arith.mulf %1051, %973 : vector<8x128xf32>
    %cst_791 = arith.constant dense<0.000000e+00> : vector<8xf32>
    %1053 = vector.multi_reduction <add>, %1052, %cst_791 [1] : vector<8x128xf32> to vector<8xf32>
    %1054 = vector.shape_cast %1053 : vector<8xf32> to vector<8x1xf32>
    %cst_792 = arith.constant 0.000000e+00 : f32
    %1055 = vector.broadcast %cst_792 : f32 to vector<8x1xf32>
    %1056 = arith.subf %1055, %1054 : vector<8x1xf32>
    %cst_793 = arith.constant 0.000000e+00 : f32
    %1057 = vector.broadcast %cst_793 : f32 to vector<8x1xf32>
    %1058 = arith.minimumf %1056, %1057 : vector<8x1xf32>
    %1059 = math.absf %1056 : vector<8x1xf32>
    %cst_794 = arith.constant 0.000000e+00 : f32
    %1060 = vector.broadcast %cst_794 : f32 to vector<8x1xf32>
    %1061 = arith.subf %1060, %1059 : vector<8x1xf32>
    %1062 = math.exp %1061 : vector<8x1xf32>
    %1063 = math.log1p %1062 : vector<8x1xf32>
    %1064 = arith.subf %1058, %1063 : vector<8x1xf32>
    %1065 = vector.shape_cast %1064 : vector<8x1xf32> to vector<1x8x1xf32>
    %cst_795 = arith.constant dense<0.000000e+00> : vector<1xf32>
    %1066 = vector.multi_reduction <add>, %1065, %cst_795 [1, 2] : vector<1x8x1xf32> to vector<1xf32>
    %1067 = vector.shape_cast %1066 : vector<1xf32> to vector<1x1x1xf32>
    %1068 = vector.extract %1067[0, 0, 0] : f32 from vector<1x1x1xf32>
    %cst_796 = arith.constant 1.000000e+00 : f32
    %1069 = arith.mulf %cst_796, %1068 : f32
    %1070 = arith.addf %1050, %1069 : f32
    %c40 = arith.constant 40 : index
    %c0_797 = arith.constant 0 : index
    %1071 = vector.load %arg7[%c40, %c0_797] : memref<48x128xf32, #tpu.memory_space<vmem>>, vector<8x128xf32>
    %1072 = arith.mulf %1071, %973 : vector<8x128xf32>
    %cst_798 = arith.constant dense<0.000000e+00> : vector<8xf32>
    %1073 = vector.multi_reduction <add>, %1072, %cst_798 [1] : vector<8x128xf32> to vector<8xf32>
    %1074 = vector.shape_cast %1073 : vector<8xf32> to vector<8x1xf32>
    %cst_799 = arith.constant 0.000000e+00 : f32
    %1075 = vector.broadcast %cst_799 : f32 to vector<8x1xf32>
    %1076 = arith.subf %1075, %1074 : vector<8x1xf32>
    %cst_800 = arith.constant 0.000000e+00 : f32
    %1077 = vector.broadcast %cst_800 : f32 to vector<8x1xf32>
    %1078 = arith.minimumf %1076, %1077 : vector<8x1xf32>
    %1079 = math.absf %1076 : vector<8x1xf32>
    %cst_801 = arith.constant 0.000000e+00 : f32
    %1080 = vector.broadcast %cst_801 : f32 to vector<8x1xf32>
    %1081 = arith.subf %1080, %1079 : vector<8x1xf32>
    %1082 = math.exp %1081 : vector<8x1xf32>
    %1083 = math.log1p %1082 : vector<8x1xf32>
    %1084 = arith.subf %1078, %1083 : vector<8x1xf32>
    %1085 = vector.shape_cast %1084 : vector<8x1xf32> to vector<1x8x1xf32>
    %cst_802 = arith.constant dense<0.000000e+00> : vector<1xf32>
    %1086 = vector.multi_reduction <add>, %1085, %cst_802 [1, 2] : vector<1x8x1xf32> to vector<1xf32>
    %1087 = vector.shape_cast %1086 : vector<1xf32> to vector<1x1x1xf32>
    %1088 = vector.extract %1087[0, 0, 0] : f32 from vector<1x1x1xf32>
    %cst_803 = arith.constant 1.000000e+00 : f32
    %1089 = arith.mulf %cst_803, %1088 : f32
    %1090 = arith.addf %1070, %1089 : f32
    %c0_804 = arith.constant 0 : index
    %1091 = memref.load %arg9[%c0_804] : memref<1xf32, #tpu.memory_space<smem>>
    %1092 = arith.addf %1091, %1090 : f32
    %c0_805 = arith.constant 0 : index
    %1093 = memref.load %arg9[%c0_805] : memref<1xf32, #tpu.memory_space<smem>>
    memref.store %1092, %arg9[%c0_805] : memref<1xf32, #tpu.memory_space<smem>>
    %c0_i32_806 = arith.constant 0 : i32
    %1094 = arith.cmpi eq, %arg0, %c0_i32_806 : i32
    %1095 = arith.extui %1094 : i1 to i32
    %c0_i32_807 = arith.constant 0 : i32
    %1096 = arith.cmpi ne, %1095, %c0_i32_807 : i32
    scf.if %1096 {
      %c0_808 = arith.constant 0 : index
      %1097 = memref.load %arg9[%c0_808] : memref<1xf32, #tpu.memory_space<smem>>
      %cst_809 = arith.constant -1.250000e-01 : f32
      %1098 = arith.mulf %1097, %cst_809 : f32
      %c0_810 = arith.constant 0 : index
      %c0_811 = arith.constant 0 : index
      %1099 = memref.load %arg5[%c0_810, %c0_811] : memref<1x1xf32, #tpu.memory_space<smem>>
      memref.store %1098, %arg5[%c0_810, %c0_811] : memref<1x1xf32, #tpu.memory_space<smem>>
    } else {
    }
    return
  }
  func.func @transform_2(%arg0: i32, %arg1: memref<32xi32, #tpu.memory_space<smem>>, %arg2: memref<48xi32, #tpu.memory_space<smem>>) -> (i32, i32) {
    %c0_i32 = arith.constant 0 : i32
    %c0_i32_0 = arith.constant 0 : i32
    %c0_i32_1 = arith.constant 0 : i32
    return %c0_i32, %c0_i32_0 : i32, i32
  }
}

</mosaic_0001>

<bundles_post_ra>
// kernel: cbow_forward.1
= control target key start
LH: loop header
LB: loop body
LE: loop exit
PB: predicated region body
PF: predicated region fallthrough
CT: control target
= control target key end

     0   :  { %s5552_s0 = inlined_call_operand.vmem [shape: s32[32], index: 0, kind: input, shape index: {}]   ;;  %s5553_s2 = inlined_call_operand.vmem [shape: f32[50,128], index: 2, kind: input, shape index: {}]   ;;  %s5554_s3 = inlined_call_operand.hbm [shape: f32[50,128], index: 3, kind: input, shape index: {}]   ;;  %s5555_s4 = inlined_call_operand.hbm [shape: f32[1,1], index: 4, kind: output, shape index: {}]   ;;  %s5556_s1 = inlined_call_operand.vmem [shape: s32[48], index: 1, kind: input, shape index: {}]  }
   0x1   :  { %s9_s17 = sshll.u32 %s5552_s0, 4  ;;  %s13_s20 = sshll.u32 %s5556_s1, 4  ;;  %s10_s17 = int_to_ptr.vmem [resolvable:$true] %s9_s17  ;;  %s14_s20 = int_to_ptr.vmem [resolvable:$true] %s13_s20 }
   0x2   :  { %s3415_s21 = scalar_lea.vmem %s10_s17, 16  ;;  %p3420_p1 = scmp.lt.s32.totalorder %s10_s17, %s10_s17 }
   0x3   :  { %p3416_p0 = scmp.ne.s32.totalorder %s10_s17, %s3415_s21  ;;  %p3421_p2 = scmp.lt.s32.totalorder %s3415_s21, %s3415_s21 }
   0x5   :  { %p3422_p3 = por %p3421_p2, %p3420_p1 }
   0x7   :  { %p3423_p4 = pnand %p3422_p3, %p3416_p0 }
   0x9   :  { %3426 = shalt.err (!%p3423_p4)  }
   0xa   :  { %s4637_s22 = smov [#allocation7]   ;;  %s3427_s23 = scalar_lea.vmem %s14_s20, 16 }
   0xb   :  { %12 = dma.vmem_to_smem %s10_s17, 16, %s4637_s22, [#allocation6] }
   0xc   :  { %p3428_p5 = scmp.ne.s32.totalorder %s14_s20, %s3427_s23  ;;  %p3432_p6 = scmp.lt.s32.totalorder %s14_s20, %s14_s20 }
   0xd   :  { %p3433_p7 = scmp.lt.s32.totalorder %s3427_s23, %s3427_s23 }
   0xf   :  { %p3434_p8 = por %p3433_p7, %p3432_p6 }
  0x11   :  { %p3435_p9 = pnand %p3434_p8, %p3428_p5 }
  0x13   :  { %3438 = shalt.err (!%p3435_p9)  }
  0x14   :  { %s4638_s0 = smov [#allocation8]  }
  0x15   :  { %16 = dma.vmem_to_smem %s14_s20, 16, %s4638_s0, [#allocation6] }
  0x16   :  { %4601 = dma.done.wait [#allocation6], 32 }
  0x17   :  { %4602 = vsyncadd [#allocation6], 4294967264 }
  0x18   :  { %18 = sfence }
  0x19   :  { %19 = vsyncpa [#allocation10], 0  ;;  %s28_s1 = sld [smem:[#allocation7]] }
  0x1f   :  { %s29_s26 = scalar_lea.vmem %s5553_s2, %s28_s1 }
  0x20   :  { %v47_v0 = vld [vmem:[%s29_s26] sm:$0x1] }
  0x21   :  { %48 = vst [vmem:[#allocation2] sm:$0x1] %v47_v0 }
  0x22   :  { %73 = vsyncadd [#allocation4], 16  ;;  %s3200_s27 = sld [smem:[#allocation7 + $0x1]] }
  0x28   :  { %s76_s30 = scalar_lea.vmem %s5553_s2, %s3200_s27 }
  0x29   :  { %v95_v1 = vld [vmem:[%s76_s30] sm:$0x1] }
  0x2a   :  { %96 = vst [vmem:[#allocation2 + $0x8] sm:$0x1] %v95_v1 }
  0x2b   :  { %121 = vsyncadd [#allocation4], 16  ;;  %s3201_s5 = sld [smem:[#allocation7 + $0x2]] }
  0x31   :  { %s124_s8 = scalar_lea.vmem %s5553_s2, %s3201_s5 }
  0x32   :  { %v143_v2 = vld [vmem:[%s124_s8] sm:$0x1] }
  0x33   :  { %144 = vst [vmem:[#allocation2 + $0x10] sm:$0x1] %v143_v2 }
  0x34   :  { %169 = vsyncadd [#allocation4], 16  ;;  %s3202_s9 = sld [smem:[#allocation7 + $0x3]] }
  0x3a   :  { %s172_s12 = scalar_lea.vmem %s5553_s2, %s3202_s9 }
  0x3b   :  { %v191_v3 = vld [vmem:[%s172_s12] sm:$0x1] }
  0x3c   :  { %192 = vst [vmem:[#allocation2 + $0x18] sm:$0x1] %v191_v3 }
  0x3d   :  { %217 = vsyncadd [#allocation4], 16  ;;  %s218_s13 = sld [smem:[#allocation8]]  ;;  %s4639_s14 = smov [#allocation3]  }
  0x3e   :  { %s229_s15 = sshll.u32 %s4639_s14, 4  ;;  %s4731_s16 = sld [smem:[#allocation8 + $0x1]]  ;;  %s4733_s15 = int_to_ptr.vmem [resolvable:$true] %s229_s15 }
  0x3f   :  { %s4640_s17 = smov [#allocation3 + $0x8]   ;;  %s4735_s19 = sld [smem:[#allocation8 + $0x2]] }
  0x40   :  { %s245_s18 = sshll.u32 %s4640_s17, 4  ;;  %s4641_s20 = smov [#allocation3 + $0x10]   ;;  %s4737_s18 = int_to_ptr.vmem [resolvable:$true] %s245_s18 }
  0x41   :  { %s261_s21 = sshll.u32 %s4641_s20, 4  ;;  %s4739_s22 = sld [smem:[#allocation8 + $0x3]]  ;;  %s4741_s21 = int_to_ptr.vmem [resolvable:$true] %s261_s21 }
  0x42   :  { %s4750_s29 = scalar_lea.hbm %s5554_s3, 896 }
  0x43   :  { %s3203_s23 = sshll.u32 %s218_s13, 4 }
  0x44   :  { %s220_s24 = scalar_lea.hbm %s5554_s3, %s3203_s23  ;;  %s3205_s25 = sshll.u32 %s4731_s16, 4 }
  0x45   :  { %s3439_s26 = scalar_lea.hbm %s220_s24, 16  ;;  %p3442_p11 = scmp.lt.u32.totalorder %s220_s24, %s5554_s3 }
  0x46   :  { %p3440_p10 = scmp.ne.s32.totalorder %s220_s24, %s3439_s26  ;;  %p3443_p12 = scmp.lt.u32.totalorder %s4750_s29, %s3439_s26 }
  0x47   :  { %p3445_p0 = scmp.lt.u32.totalorder %s3439_s26, %s220_s24 }
  0x48   :  { %p3444_p13 = por %p3443_p12, %p3442_p11 }
  0x4a   :  { %p3446_p1 = por %p3445_p0, %p3444_p13 }
  0x4c   :  { %p3447_p2 = pnand %p3446_p1, %p3440_p10 }
  0x4e   :  { %3450 = shalt.err (!%p3447_p2)  }
  0x4f   :  { %s3451_s6 = scalar_lea.vmem %s4733_s15, 16  ;;  %s4759_s7 = scalar_lea.vmem %s4733_s15, 768 }
  0x50   :  { %p3452_p3 = scmp.ne.s32.totalorder %s4733_s15, %s3451_s6  ;;  %p3456_p4 = scmp.lt.s32.totalorder %s4733_s15, %s4733_s15 }
  0x51   :  { %p3457_p5 = scmp.lt.s32.totalorder %s4759_s7, %s3451_s6 }
  0x53   :  { %p3458_p6 = por %p3457_p5, %p3456_p4 }
  0x55   :  { %p3459_p7 = pnand %p3458_p6, %p3452_p3 }
  0x57   :  { %3462 = shalt.err (!%p3459_p7)  }
  0x58   :  { %232 = dma.hbm_to_vmem [thread:$0]  %s220_s24, 16, %s4733_s15, [#allocation4 + $0x1] }
  0x59   :  { %s236_s10 = scalar_lea.hbm %s5554_s3, %s3205_s25  ;;  %s3207_s11 = sshll.u32 %s4735_s19, 4 }
  0x5a   :  { %s3463_s12 = scalar_lea.hbm %s236_s10, 16  ;;  %p3466_p9 = scmp.lt.u32.totalorder %s236_s10, %s5554_s3 }
  0x5b   :  { %p3464_p8 = scmp.ne.s32.totalorder %s236_s10, %s3463_s12  ;;  %p3467_p10 = scmp.lt.u32.totalorder %s4750_s29, %s3463_s12 }
  0x5c   :  { %p3469_p12 = scmp.lt.u32.totalorder %s3463_s12, %s236_s10 }
  0x5d   :  { %p3468_p11 = por %p3467_p10, %p3466_p9 }
  0x5f   :  { %p3470_p13 = por %p3469_p12, %p3468_p11 }
  0x61   :  { %p3471_p0 = pnand %p3470_p13, %p3464_p8 }
  0x63   :  { %3474 = shalt.err (!%p3471_p0)  }
  0x64   :  { %s3475_s16 = scalar_lea.vmem %s4737_s18, 16  ;;  %p3480_p2 = scmp.lt.s32.totalorder %s4737_s18, %s4733_s15 }
  0x65   :  { %p3476_p1 = scmp.ne.s32.totalorder %s4737_s18, %s3475_s16  ;;  %p3481_p3 = scmp.lt.s32.totalorder %s4759_s7, %s3475_s16 }
  0x67   :  { %p3482_p4 = por %p3481_p3, %p3480_p2 }
  0x69   :  { %p3483_p5 = pnand %p3482_p4, %p3476_p1 }
  0x6b   :  { %3486 = shalt.err (!%p3483_p5)  }
  0x6c   :  { %248 = dma.hbm_to_vmem [thread:$0]  %s236_s10, 16, %s4737_s18, [#allocation4 + $0x1] }
  0x6d   :  { %s252_s20 = scalar_lea.hbm %s5554_s3, %s3207_s11  ;;  %s3209_s23 = sshll.u32 %s4739_s22, 4 }
  0x6e   :  { %s3487_s0 = scalar_lea.hbm %s252_s20, 16  ;;  %p3490_p7 = scmp.lt.u32.totalorder %s252_s20, %s5554_s3 }
  0x6f   :  { %p3488_p6 = scmp.ne.s32.totalorder %s252_s20, %s3487_s0  ;;  %p3491_p8 = scmp.lt.u32.totalorder %s4750_s29, %s3487_s0 }
  0x70   :  { %p3493_p10 = scmp.lt.u32.totalorder %s3487_s0, %s252_s20 }
  0x71   :  { %p3492_p9 = por %p3491_p8, %p3490_p7 }
  0x73   :  { %p3494_p11 = por %p3493_p10, %p3492_p9 }
  0x75   :  { %p3495_p12 = pnand %p3494_p11, %p3488_p6 }
  0x77   :  { %3498 = shalt.err (!%p3495_p12)  }
  0x78   :  { %s3499_s18 = scalar_lea.vmem %s4741_s21, 16  ;;  %p3504_p0 = scmp.lt.s32.totalorder %s4741_s21, %s4733_s15 }
  0x79   :  { %p3500_p13 = scmp.ne.s32.totalorder %s4741_s21, %s3499_s18  ;;  %p3505_p1 = scmp.lt.s32.totalorder %s4759_s7, %s3499_s18 }
  0x7b   :  { %p3506_p2 = por %p3505_p1, %p3504_p0 }
  0x7d   :  { %p3507_p3 = pnand %p3506_p2, %p3500_p13 }
  0x7f   :  { %3510 = shalt.err (!%p3507_p3)  }
  0x80   :  { %264 = dma.hbm_to_vmem [thread:$0]  %s252_s20, 16, %s4741_s21, [#allocation4 + $0x1] }
  0x81   :  { %s268_s26 = scalar_lea.hbm %s5554_s3, %s3209_s23  ;;  %s4642_s27 = smov [#allocation3 + $0x18]  }
  0x82   :  { %s277_s28 = sshll.u32 %s4642_s27, 4  ;;  %s3210_s30 = sld [smem:[#allocation8 + $0x4]]  ;;  %s278_s28 = int_to_ptr.vmem [resolvable:$true] %s277_s28 }
  0x83   :  { %s3511_s5 = scalar_lea.hbm %s268_s26, 16  ;;  %p3514_p5 = scmp.lt.u32.totalorder %s268_s26, %s5554_s3 }
  0x84   :  { %p3512_p4 = scmp.ne.s32.totalorder %s268_s26, %s3511_s5  ;;  %p3515_p6 = scmp.lt.u32.totalorder %s4750_s29, %s3511_s5 }
  0x85   :  { %p3517_p8 = scmp.lt.u32.totalorder %s3511_s5, %s268_s26 }
  0x86   :  { %p3516_p7 = por %p3515_p6, %p3514_p5 }
  0x88   :  { %p3518_p9 = por %p3517_p8, %p3516_p7 }
  0x8a   :  { %p3519_p10 = pnand %p3518_p9, %p3512_p4 }
  0x8c   :  { %3522 = shalt.err (!%p3519_p10)  }
  0x8d   :  { %s3523_s21 = scalar_lea.vmem %s278_s28, 16  ;;  %p3528_p12 = scmp.lt.s32.totalorder %s278_s28, %s4733_s15 }
  0x8e   :  { %p3524_p11 = scmp.ne.s32.totalorder %s278_s28, %s3523_s21  ;;  %p3529_p13 = scmp.lt.s32.totalorder %s4759_s7, %s3523_s21 }
  0x90   :  { %p3530_p0 = por %p3529_p13, %p3528_p12 }
  0x92   :  { %p3531_p1 = pnand %p3530_p0, %p3524_p11 }
  0x94   :  { %3534 = shalt.err (!%p3531_p1)  }
  0x95   :  { %280 = dma.hbm_to_vmem [thread:$0]  %s268_s26, 16, %s278_s28, [#allocation4 + $0x1] }
  0x96   :  { %s4643_s9 = smov [#allocation3 + $0x20]   ;;  %s3212_s11 = sld [smem:[#allocation8 + $0x5]] }
  0x97   :  { %s293_s10 = sshll.u32 %s4643_s9, 4  ;;  %s4644_s12 = smov [#allocation3 + $0x28]   ;;  %s294_s10 = int_to_ptr.vmem [resolvable:$true] %s293_s10 }
  0x98   :  { %s309_s13 = sshll.u32 %s4644_s12, 4  ;;  %s4802_s14 = sld [smem:[#allocation7 + $0x4]]  ;;  %s4807_s13 = int_to_ptr.vmem [resolvable:$true] %s309_s13 }
  0x99   :  { %s3211_s16 = sshll.u32 %s3210_s30, 4 }
  0x9a   :  { %s284_s20 = scalar_lea.hbm %s5554_s3, %s3211_s16 }
  0x9b   :  { %s3535_s23 = scalar_lea.hbm %s284_s20, 16  ;;  %p3538_p3 = scmp.lt.u32.totalorder %s284_s20, %s5554_s3 }
  0x9c   :  { %p3536_p2 = scmp.ne.s32.totalorder %s284_s20, %s3535_s23  ;;  %p3539_p4 = scmp.lt.u32.totalorder %s4750_s29, %s3535_s23 }
  0x9d   :  { %p3541_p6 = scmp.lt.u32.totalorder %s3535_s23, %s284_s20 }
  0x9e   :  { %p3540_p5 = por %p3539_p4, %p3538_p3 }
  0xa0   :  { %p3542_p7 = por %p3541_p6, %p3540_p5 }
  0xa2   :  { %p3543_p8 = pnand %p3542_p7, %p3536_p2 }
  0xa4   :  { %3546 = shalt.err (!%p3543_p8)  }
  0xa5   :  { %s3547_s24 = scalar_lea.vmem %s294_s10, 16  ;;  %p3552_p10 = scmp.lt.s32.totalorder %s294_s10, %s4733_s15 }
  0xa6   :  { %p3548_p9 = scmp.ne.s32.totalorder %s294_s10, %s3547_s24  ;;  %p3553_p11 = scmp.lt.s32.totalorder %s4759_s7, %s3547_s24 }
  0xa8   :  { %p3554_p12 = por %p3553_p11, %p3552_p10 }
  0xaa   :  { %p3555_p13 = pnand %p3554_p12, %p3548_p9 }
  0xac   :  { %3558 = shalt.err (!%p3555_p13)  }
  0xad   :  { %296 = dma.hbm_to_vmem [thread:$0]  %s284_s20, 16, %s294_s10, [#allocation4 + $0x1] }
  0xae   :  { %s3213_s18 = sshll.u32 %s3212_s11, 4 }
  0xaf   :  { %s300_s26 = scalar_lea.hbm %s5554_s3, %s3213_s18 }
  0xb0   :  { %s3559_s27 = scalar_lea.hbm %s300_s26, 16  ;;  %p3562_p1 = scmp.lt.u32.totalorder %s300_s26, %s5554_s3 }
  0xb1   :  { %p3560_p0 = scmp.ne.s32.totalorder %s300_s26, %s3559_s27  ;;  %p3563_p2 = scmp.lt.u32.totalorder %s4750_s29, %s3559_s27 }
  0xb2   :  { %p3565_p4 = scmp.lt.u32.totalorder %s3559_s27, %s300_s26 }
  0xb3   :  { %p3564_p3 = por %p3563_p2, %p3562_p1 }
  0xb5   :  { %p3566_p5 = por %p3565_p4, %p3564_p3 }
  0xb7   :  { %p3567_p6 = pnand %p3566_p5, %p3560_p0 }
  0xb9   :  { %3570 = shalt.err (!%p3567_p6)  }
  0xba   :  { %s3571_s5 = scalar_lea.vmem %s4807_s13, 16  ;;  %p3576_p8 = scmp.lt.s32.totalorder %s4807_s13, %s4733_s15 }
  0xbb   :  { %p3572_p7 = scmp.ne.s32.totalorder %s4807_s13, %s3571_s5  ;;  %p3577_p9 = scmp.lt.s32.totalorder %s4759_s7, %s3571_s5 }
  0xbd   :  { %p3578_p10 = por %p3577_p9, %p3576_p8 }
  0xbf   :  { %p3579_p11 = pnand %p3578_p10, %p3572_p7 }
  0xc1   :  { %3582 = shalt.err (!%p3579_p11)  }
  0xc2   :  { %312 = dma.hbm_to_vmem [thread:$0]  %s300_s26, 16, %s4807_s13, [#allocation4 + $0x1] }
  0xc3   :  { %s315_s21 = scalar_lea.vmem %s5553_s2, %s4802_s14 }
  0xc4   :  { %v334_v4 = vld [vmem:[%s315_s21] sm:$0x1] }
  0xc5   :  { %335 = vst [vmem:[#allocation2 + $0x1] sm:$0x1] %v334_v4 }
  0xc6   :  { %360 = vsyncadd [#allocation4], 16  ;;  %s3215_s9 = sld [smem:[#allocation7 + $0x5]] }
  0xcc   :  { %s363_s12 = scalar_lea.vmem %s5553_s2, %s3215_s9 }
  0xcd   :  { %v382_v5 = vld [vmem:[%s363_s12] sm:$0x1] }
  0xce   :  { %383 = vst [vmem:[#allocation2 + $0x9] sm:$0x1] %v382_v5 }
  0xcf   :  { %408 = vsyncadd [#allocation4], 16  ;;  %s3216_s16 = sld [smem:[#allocation7 + $0x6]] }
  0xd5   :  { %s411_s13 = scalar_lea.vmem %s5553_s2, %s3216_s16 }
  0xd6   :  { %v430_v6 = vld [vmem:[%s411_s13] sm:$0x1] }
  0xd7   :  { %431 = vst [vmem:[#allocation2 + $0x11] sm:$0x1] %v430_v6 }
  0xd8   :  { %456 = vsyncadd [#allocation4], 16  ;;  %s3217_s14 = sld [smem:[#allocation7 + $0x7]] }
  0xde   :  { %s459_s0 = scalar_lea.vmem %s5553_s2, %s3217_s14 }
  0xdf   :  { %v478_v7 = vld [vmem:[%s459_s0] sm:$0x1] }
  0xe0   :  { %479 = vst [vmem:[#allocation2 + $0x19] sm:$0x1] %v478_v7 }
  0xe1   :  { %504 = vsyncadd [#allocation4], 16  ;;  %s3218_s1 = sld [smem:[#allocation8 + $0x6]]  ;;  %s4645_s24 = smov [#allocation3 + $0x1]  }
  0xe2   :  { %s517_s18 = sshll.u32 %s4645_s24, 4  ;;  %s4841_s22 = sld [smem:[#allocation8 + $0x7]]  ;;  %s518_s18 = int_to_ptr.vmem [resolvable:$true] %s517_s18 }
  0xe3   :  { %s4646_s25 = smov [#allocation3 + $0x9]   ;;  %s4843_s27 = sld [smem:[#allocation8 + $0x8]] }
  0xe4   :  { %s533_s26 = sshll.u32 %s4646_s25, 4  ;;  %s4647_s28 = smov [#allocation3 + $0x11]   ;;  %s4845_s26 = int_to_ptr.vmem [resolvable:$true] %s533_s26 }
  0xe5   :  { %s549_s30 = sshll.u32 %s4647_s28, 4  ;;  %s4847_s5 = sld [smem:[#allocation8 + $0x9]]  ;;  %s4849_s30 = int_to_ptr.vmem [resolvable:$true] %s549_s30 }
  0xe7   :  { %s3219_s6 = sshll.u32 %s3218_s1, 4 }
  0xe8   :  { %s508_s9 = scalar_lea.hbm %s5554_s3, %s3219_s6  ;;  %s3221_s10 = sshll.u32 %s4841_s22, 4 }
  0xe9   :  { %s3583_s11 = scalar_lea.hbm %s508_s9, 16  ;;  %p3586_p13 = scmp.lt.u32.totalorder %s508_s9, %s5554_s3 }
  0xea   :  { %p3584_p12 = scmp.ne.s32.totalorder %s508_s9, %s3583_s11  ;;  %p3587_p0 = scmp.lt.u32.totalorder %s4750_s29, %s3583_s11 }
  0xeb   :  { %p3589_p2 = scmp.lt.u32.totalorder %s3583_s11, %s508_s9 }
  0xec   :  { %p3588_p1 = por %p3587_p0, %p3586_p13 }
  0xee   :  { %p3590_p3 = por %p3589_p2, %p3588_p1 }
  0xf0   :  { %p3591_p4 = pnand %p3590_p3, %p3584_p12 }
  0xf2   :  { %3594 = shalt.err (!%p3591_p4)  }
  0xf3   :  { %s3595_s17 = scalar_lea.vmem %s518_s18, 16  ;;  %p3600_p6 = scmp.lt.s32.totalorder %s518_s18, %s4733_s15 }
  0xf4   :  { %p3596_p5 = scmp.ne.s32.totalorder %s518_s18, %s3595_s17  ;;  %p3601_p7 = scmp.lt.s32.totalorder %s4759_s7, %s3595_s17 }
  0xf6   :  { %p3602_p8 = por %p3601_p7, %p3600_p6 }
  0xf8   :  { %p3603_p9 = pnand %p3602_p8, %p3596_p5 }
  0xfa   :  { %3606 = shalt.err (!%p3603_p9)  }
  0xfb   :  { %520 = dma.hbm_to_vmem [thread:$0]  %s508_s9, 16, %s518_s18, [#allocation4 + $0x1] }
  0xfc   :  { %s524_s14 = scalar_lea.hbm %s5554_s3, %s3221_s10  ;;  %s3223_s20 = sshll.u32 %s4843_s27, 4 }
  0xfd   :  { %s3607_s23 = scalar_lea.hbm %s524_s14, 16  ;;  %p3610_p11 = scmp.lt.u32.totalorder %s524_s14, %s5554_s3 }
  0xfe   :  { %p3608_p10 = scmp.ne.s32.totalorder %s524_s14, %s3607_s23  ;;  %p3611_p12 = scmp.lt.u32.totalorder %s4750_s29, %s3607_s23 }
  0xff   :  { %p3613_p0 = scmp.lt.u32.totalorder %s3607_s23, %s524_s14 }
 0x100   :  { %p3612_p13 = por %p3611_p12, %p3610_p11 }
 0x102   :  { %p3614_p1 = por %p3613_p0, %p3612_p13 }
 0x104   :  { %p3615_p2 = pnand %p3614_p1, %p3608_p10 }
 0x106   :  { %3618 = shalt.err (!%p3615_p2)  }
 0x107   :  { %s3619_s24 = scalar_lea.vmem %s4845_s26, 16  ;;  %p3624_p4 = scmp.lt.s32.totalorder %s4845_s26, %s4733_s15 }
 0x108   :  { %p3620_p3 = scmp.ne.s32.totalorder %s4845_s26, %s3619_s24  ;;  %p3625_p5 = scmp.lt.s32.totalorder %s4759_s7, %s3619_s24 }
 0x10a   :  { %p3626_p6 = por %p3625_p5, %p3624_p4 }
 0x10c   :  { %p3627_p7 = pnand %p3626_p6, %p3620_p3 }
 0x10e   :  { %3630 = shalt.err (!%p3627_p7)  }
 0x10f   :  { %536 = dma.hbm_to_vmem [thread:$0]  %s524_s14, 16, %s4845_s26, [#allocation4 + $0x1] }
 0x110   :  { %s540_s25 = scalar_lea.hbm %s5554_s3, %s3223_s20  ;;  %s3225_s27 = sshll.u32 %s4847_s5, 4 }
 0x111   :  { %s3631_s28 = scalar_lea.hbm %s540_s25, 16  ;;  %p3634_p9 = scmp.lt.u32.totalorder %s540_s25, %s5554_s3 }
 0x112   :  { %p3632_p8 = scmp.ne.s32.totalorder %s540_s25, %s3631_s28  ;;  %p3635_p10 = scmp.lt.u32.totalorder %s4750_s29, %s3631_s28 }
 0x113   :  { %p3637_p12 = scmp.lt.u32.totalorder %s3631_s28, %s540_s25 }
 0x114   :  { %p3636_p11 = por %p3635_p10, %p3634_p9 }
 0x116   :  { %p3638_p13 = por %p3637_p12, %p3636_p11 }
 0x118   :  { %p3639_p0 = pnand %p3638_p13, %p3632_p8 }
 0x11a   :  { %3642 = shalt.err (!%p3639_p0)  }
 0x11b   :  { %s3643_s26 = scalar_lea.vmem %s4849_s30, 16  ;;  %p3648_p2 = scmp.lt.s32.totalorder %s4849_s30, %s4733_s15 }
 0x11c   :  { %p3644_p1 = scmp.ne.s32.totalorder %s4849_s30, %s3643_s26  ;;  %p3649_p3 = scmp.lt.s32.totalorder %s4759_s7, %s3643_s26 }
 0x11e   :  { %p3650_p4 = por %p3649_p3, %p3648_p2 }
 0x120   :  { %p3651_p5 = pnand %p3650_p4, %p3644_p1 }
 0x122   :  { %3654 = shalt.err (!%p3651_p5)  }
 0x123   :  { %552 = dma.hbm_to_vmem [thread:$0]  %s540_s25, 16, %s4849_s30, [#allocation4 + $0x1] }
 0x124   :  { %s556_s9 = scalar_lea.hbm %s5554_s3, %s3225_s27  ;;  %s4648_s10 = smov [#allocation3 + $0x19]  }
 0x125   :  { %s565_s11 = sshll.u32 %s4648_s10, 4  ;;  %s3226_s12 = sld [smem:[#allocation8 + $0xa]]  ;;  %s566_s11 = int_to_ptr.vmem [resolvable:$true] %s565_s11 }
 0x126   :  { %s3655_s16 = scalar_lea.hbm %s556_s9, 16  ;;  %p3658_p7 = scmp.lt.u32.totalorder %s556_s9, %s5554_s3 }
 0x127   :  { %p3656_p6 = scmp.ne.s32.totalorder %s556_s9, %s3655_s16  ;;  %p3659_p8 = scmp.lt.u32.totalorder %s4750_s29, %s3655_s16 }
 0x128   :  { %p3661_p10 = scmp.lt.u32.totalorder %s3655_s16, %s556_s9 }
 0x129   :  { %p3660_p9 = por %p3659_p8, %p3658_p7 }
 0x12b   :  { %p3662_p11 = por %p3661_p10, %p3660_p9 }
 0x12d   :  { %p3663_p12 = pnand %p3662_p11, %p3656_p6 }
 0x12f   :  { %3666 = shalt.err (!%p3663_p12)  }
 0x130   :  { %s3667_s30 = scalar_lea.vmem %s566_s11, 16  ;;  %p3672_p0 = scmp.lt.s32.totalorder %s566_s11, %s4733_s15 }
 0x131   :  { %p3668_p13 = scmp.ne.s32.totalorder %s566_s11, %s3667_s30  ;;  %p3673_p1 = scmp.lt.s32.totalorder %s4759_s7, %s3667_s30 }
 0x133   :  { %p3674_p2 = por %p3673_p1, %p3672_p0 }
 0x135   :  { %p3675_p3 = pnand %p3674_p2, %p3668_p13 }
 0x137   :  { %3678 = shalt.err (!%p3675_p3)  }
 0x138   :  { %568 = dma.hbm_to_vmem [thread:$0]  %s556_s9, 16, %s566_s11, [#allocation4 + $0x1] }
 0x139   :  { %s4649_s13 = smov [#allocation3 + $0x21]   ;;  %s3228_s20 = sld [smem:[#allocation8 + $0xb]] }
 0x13a   :  { %s581_s14 = sshll.u32 %s4649_s13, 4  ;;  %s4650_s23 = smov [#allocation3 + $0x29]   ;;  %s582_s14 = int_to_ptr.vmem [resolvable:$true] %s581_s14 }
 0x13b   :  { %s597_s0 = sshll.u32 %s4650_s23, 4  ;;  %s4898_s1 = sld [smem:[#allocation7 + $0x8]]  ;;  %s4903_s0 = int_to_ptr.vmem [resolvable:$true] %s597_s0 }
 0x13c   :  { %s3227_s24 = sshll.u32 %s3226_s12, 4 }
 0x13d   :  { %s572_s25 = scalar_lea.hbm %s5554_s3, %s3227_s24 }
 0x13e   :  { %s3679_s27 = scalar_lea.hbm %s572_s25, 16  ;;  %p3682_p5 = scmp.lt.u32.totalorder %s572_s25, %s5554_s3 }
 0x13f   :  { %p3680_p4 = scmp.ne.s32.totalorder %s572_s25, %s3679_s27  ;;  %p3683_p6 = scmp.lt.u32.totalorder %s4750_s29, %s3679_s27 }
 0x140   :  { %p3685_p8 = scmp.lt.u32.totalorder %s3679_s27, %s572_s25 }
 0x141   :  { %p3684_p7 = por %p3683_p6, %p3682_p5 }
 0x143   :  { %p3686_p9 = por %p3685_p8, %p3684_p7 }
 0x145   :  { %p3687_p10 = pnand %p3686_p9, %p3680_p4 }
 0x147   :  { %3690 = shalt.err (!%p3687_p10)  }
 0x148   :  { %s3691_s8 = scalar_lea.vmem %s582_s14, 16  ;;  %p3696_p12 = scmp.lt.s32.totalorder %s582_s14, %s4733_s15 }
 0x149   :  { %p3692_p11 = scmp.ne.s32.totalorder %s582_s14, %s3691_s8  ;;  %p3697_p13 = scmp.lt.s32.totalorder %s4759_s7, %s3691_s8 }
 0x14b   :  { %p3698_p0 = por %p3697_p13, %p3696_p12 }
 0x14d   :  { %p3699_p1 = pnand %p3698_p0, %p3692_p11 }
 0x14f   :  { %3702 = shalt.err (!%p3699_p1)  }
 0x150   :  { %584 = dma.hbm_to_vmem [thread:$0]  %s572_s25, 16, %s582_s14, [#allocation4 + $0x1] }
 0x151   :  { %s3229_s26 = sshll.u32 %s3228_s20, 4 }
 0x152   :  { %s588_s9 = scalar_lea.hbm %s5554_s3, %s3229_s26 }
 0x153   :  { %s3703_s10 = scalar_lea.hbm %s588_s9, 16  ;;  %p3706_p3 = scmp.lt.u32.totalorder %s588_s9, %s5554_s3 }
 0x154   :  { %p3704_p2 = scmp.ne.s32.totalorder %s588_s9, %s3703_s10  ;;  %p3707_p4 = scmp.lt.u32.totalorder %s4750_s29, %s3703_s10 }
 0x155   :  { %p3709_p6 = scmp.lt.u32.totalorder %s3703_s10, %s588_s9 }
 0x156   :  { %p3708_p5 = por %p3707_p4, %p3706_p3 }
 0x158   :  { %p3710_p7 = por %p3709_p6, %p3708_p5 }
 0x15a   :  { %p3711_p8 = pnand %p3710_p7, %p3704_p2 }
 0x15c   :  { %3714 = shalt.err (!%p3711_p8)  }
 0x15d   :  { %s3715_s16 = scalar_lea.vmem %s4903_s0, 16  ;;  %p3720_p10 = scmp.lt.s32.totalorder %s4903_s0, %s4733_s15 }
 0x15e   :  { %p3716_p9 = scmp.ne.s32.totalorder %s4903_s0, %s3715_s16  ;;  %p3721_p11 = scmp.lt.s32.totalorder %s4759_s7, %s3715_s16 }
 0x160   :  { %p3722_p12 = por %p3721_p11, %p3720_p10 }
 0x162   :  { %p3723_p13 = pnand %p3722_p12, %p3716_p9 }
 0x164   :  { %3726 = shalt.err (!%p3723_p13)  }
 0x165   :  { %600 = dma.hbm_to_vmem [thread:$0]  %s588_s9, 16, %s4903_s0, [#allocation4 + $0x1] }
 0x166   :  { %s603_s30 = scalar_lea.vmem %s5553_s2, %s4898_s1 }
 0x167   :  { %v622_v8 = vld [vmem:[%s603_s30] sm:$0x1] }
 0x168   :  { %623 = vst [vmem:[#allocation2 + $0x2] sm:$0x1] %v622_v8 }
 0x169   :  { %648 = vsyncadd [#allocation4], 16  ;;  %s3231_s13 = sld [smem:[#allocation7 + $0x9]] }
 0x16f   :  { %s651_s23 = scalar_lea.vmem %s5553_s2, %s3231_s13 }
 0x170   :  { %v670_v9 = vld [vmem:[%s651_s23] sm:$0x1] }
 0x171   :  { %671 = vst [vmem:[#allocation2 + $0xa] sm:$0x1] %v670_v9 }
 0x172   :  { %696 = vsyncadd [#allocation4], 16  ;;  %s3232_s24 = sld [smem:[#allocation7 + $0xa]] }
 0x178   :  { %s699_s0 = scalar_lea.vmem %s5553_s2, %s3232_s24 }
 0x179   :  { %v718_v10 = vld [vmem:[%s699_s0] sm:$0x1] }
 0x17a   :  { %719 = vst [vmem:[#allocation2 + $0x12] sm:$0x1] %v718_v10 }
 0x17b   :  { %744 = vsyncadd [#allocation4], 16  ;;  %s3233_s1 = sld [smem:[#allocation7 + $0xb]] }
 0x181   :  { %s747_s28 = scalar_lea.vmem %s5553_s2, %s3233_s1 }
 0x182   :  { %v766_v11 = vld [vmem:[%s747_s28] sm:$0x1] }
 0x183   :  { %767 = vst [vmem:[#allocation2 + $0x1a] sm:$0x1] %v766_v11 }
 0x184   :  { %792 = vsyncadd [#allocation4], 16  ;;  %s3234_s6 = sld [smem:[#allocation8 + $0xc]]  ;;  %s4651_s8 = smov [#allocation3 + $0x2]  }
 0x185   :  { %s805_s26 = sshll.u32 %s4651_s8, 4  ;;  %s4937_s5 = sld [smem:[#allocation8 + $0xd]]  ;;  %s806_s26 = int_to_ptr.vmem [resolvable:$true] %s805_s26 }
 0x186   :  { %s4652_s21 = smov [#allocation3 + $0xa]   ;;  %s4939_s10 = sld [smem:[#allocation8 + $0xe]] }
 0x187   :  { %s821_s9 = sshll.u32 %s4652_s21, 4  ;;  %s4653_s11 = smov [#allocation3 + $0x12]   ;;  %s4941_s9 = int_to_ptr.vmem [resolvable:$true] %s821_s9 }
 0x188   :  { %s837_s12 = sshll.u32 %s4653_s11, 4  ;;  %s4943_s16 = sld [smem:[#allocation8 + $0xf]]  ;;  %s4945_s12 = int_to_ptr.vmem [resolvable:$true] %s837_s12 }
 0x18a   :  { %s3235_s17 = sshll.u32 %s3234_s6, 4 }
 0x18b   :  { %s796_s13 = scalar_lea.hbm %s5554_s3, %s3235_s17  ;;  %s3237_s14 = sshll.u32 %s4937_s5, 4 }
 0x18c   :  { %s3727_s20 = scalar_lea.hbm %s796_s13, 16  ;;  %p3730_p1 = scmp.lt.u32.totalorder %s796_s13, %s5554_s3 }
 0x18d   :  { %p3728_p0 = scmp.ne.s32.totalorder %s796_s13, %s3727_s20  ;;  %p3731_p2 = scmp.lt.u32.totalorder %s4750_s29, %s3727_s20 }
 0x18e   :  { %p3733_p4 = scmp.lt.u32.totalorder %s3727_s20, %s796_s13 }
 0x18f   :  { %p3732_p3 = por %p3731_p2, %p3730_p1 }
 0x191   :  { %p3734_p5 = por %p3733_p4, %p3732_p3 }
 0x193   :  { %p3735_p6 = pnand %p3734_p5, %p3728_p0 }
 0x195   :  { %3738 = shalt.err (!%p3735_p6)  }
 0x196   :  { %s3739_s18 = scalar_lea.vmem %s806_s26, 16  ;;  %p3744_p8 = scmp.lt.s32.totalorder %s806_s26, %s4733_s15 }
 0x197   :  { %p3740_p7 = scmp.ne.s32.totalorder %s806_s26, %s3739_s18  ;;  %p3745_p9 = scmp.lt.s32.totalorder %s4759_s7, %s3739_s18 }
 0x199   :  { %p3746_p10 = por %p3745_p9, %p3744_p8 }
 0x19b   :  { %p3747_p11 = pnand %p3746_p10, %p3740_p7 }
 0x19d   :  { %3750 = shalt.err (!%p3747_p11)  }
 0x19e   :  { %808 = dma.hbm_to_vmem [thread:$0]  %s796_s13, 16, %s806_s26, [#allocation4 + $0x1] }
 0x19f   :  { %s812_s1 = scalar_lea.hbm %s5554_s3, %s3237_s14  ;;  %s3239_s25 = sshll.u32 %s4939_s10, 4 }
 0x1a0   :  { %s3751_s27 = scalar_lea.hbm %s812_s1, 16  ;;  %p3754_p13 = scmp.lt.u32.totalorder %s812_s1, %s5554_s3 }
 0x1a1   :  { %p3752_p12 = scmp.ne.s32.totalorder %s812_s1, %s3751_s27  ;;  %p3755_p0 = scmp.lt.u32.totalorder %s4750_s29, %s3751_s27 }
 0x1a2   :  { %p3757_p2 = scmp.lt.u32.totalorder %s3751_s27, %s812_s1 }
 0x1a3   :  { %p3756_p1 = por %p3755_p0, %p3754_p13 }
 0x1a5   :  { %p3758_p3 = por %p3757_p2, %p3756_p1 }
 0x1a7   :  { %p3759_p4 = pnand %p3758_p3, %p3752_p12 }
 0x1a9   :  { %3762 = shalt.err (!%p3759_p4)  }
 0x1aa   :  { %s3763_s8 = scalar_lea.vmem %s4941_s9, 16  ;;  %p3768_p6 = scmp.lt.s32.totalorder %s4941_s9, %s4733_s15 }
 0x1ab   :  { %p3764_p5 = scmp.ne.s32.totalorder %s4941_s9, %s3763_s8  ;;  %p3769_p7 = scmp.lt.s32.totalorder %s4759_s7, %s3763_s8 }
 0x1ad   :  { %p3770_p8 = por %p3769_p7, %p3768_p6 }
 0x1af   :  { %p3771_p9 = pnand %p3770_p8, %p3764_p5 }
 0x1b1   :  { %3774 = shalt.err (!%p3771_p9)  }
 0x1b2   :  { %824 = dma.hbm_to_vmem [thread:$0]  %s812_s1, 16, %s4941_s9, [#allocation4 + $0x1] }
 0x1b3   :  { %s828_s21 = scalar_lea.hbm %s5554_s3, %s3239_s25  ;;  %s3241_s10 = sshll.u32 %s4943_s16, 4 }
 0x1b4   :  { %s3775_s11 = scalar_lea.hbm %s828_s21, 16  ;;  %p3778_p11 = scmp.lt.u32.totalorder %s828_s21, %s5554_s3 }
 0x1b5   :  { %p3776_p10 = scmp.ne.s32.totalorder %s828_s21, %s3775_s11  ;;  %p3779_p12 = scmp.lt.u32.totalorder %s4750_s29, %s3775_s11 }
 0x1b6   :  { %p3781_p0 = scmp.lt.u32.totalorder %s3775_s11, %s828_s21 }
 0x1b7   :  { %p3780_p13 = por %p3779_p12, %p3778_p11 }
 0x1b9   :  { %p3782_p1 = por %p3781_p0, %p3780_p13 }
 0x1bb   :  { %p3783_p2 = pnand %p3782_p1, %p3776_p10 }
 0x1bd   :  { %3786 = shalt.err (!%p3783_p2)  }
 0x1be   :  { %s3787_s9 = scalar_lea.vmem %s4945_s12, 16  ;;  %p3792_p4 = scmp.lt.s32.totalorder %s4945_s12, %s4733_s15 }
 0x1bf   :  { %p3788_p3 = scmp.ne.s32.totalorder %s4945_s12, %s3787_s9  ;;  %p3793_p5 = scmp.lt.s32.totalorder %s4759_s7, %s3787_s9 }
 0x1c1   :  { %p3794_p6 = por %p3793_p5, %p3792_p4 }
 0x1c3   :  { %p3795_p7 = pnand %p3794_p6, %p3788_p3 }
 0x1c5   :  { %3798 = shalt.err (!%p3795_p7)  }
 0x1c6   :  { %840 = dma.hbm_to_vmem [thread:$0]  %s828_s21, 16, %s4945_s12, [#allocation4 + $0x1] }
 0x1c7   :  { %s844_s13 = scalar_lea.hbm %s5554_s3, %s3241_s10  ;;  %s4654_s14 = smov [#allocation3 + $0x1a]  }
 0x1c8   :  { %s853_s20 = sshll.u32 %s4654_s14, 4  ;;  %s3242_s23 = sld [smem:[#allocation8 + $0x10]]  ;;  %s854_s20 = int_to_ptr.vmem [resolvable:$true] %s853_s20 }
 0x1c9   :  { %s3799_s24 = scalar_lea.hbm %s844_s13, 16  ;;  %p3802_p9 = scmp.lt.u32.totalorder %s844_s13, %s5554_s3 }
 0x1ca   :  { %p3800_p8 = scmp.ne.s32.totalorder %s844_s13, %s3799_s24  ;;  %p3803_p10 = scmp.lt.u32.totalorder %s4750_s29, %s3799_s24 }
 0x1cb   :  { %p3805_p12 = scmp.lt.u32.totalorder %s3799_s24, %s844_s13 }
 0x1cc   :  { %p3804_p11 = por %p3803_p10, %p3802_p9 }
 0x1ce   :  { %p3806_p13 = por %p3805_p12, %p3804_p11 }
 0x1d0   :  { %p3807_p0 = pnand %p3806_p13, %p3800_p8 }
 0x1d2   :  { %3810 = shalt.err (!%p3807_p0)  }
 0x1d3   :  { %s3811_s12 = scalar_lea.vmem %s854_s20, 16  ;;  %p3816_p2 = scmp.lt.s32.totalorder %s854_s20, %s4733_s15 }
 0x1d4   :  { %p3812_p1 = scmp.ne.s32.totalorder %s854_s20, %s3811_s12  ;;  %p3817_p3 = scmp.lt.s32.totalorder %s4759_s7, %s3811_s12 }
 0x1d6   :  { %p3818_p4 = por %p3817_p3, %p3816_p2 }
 0x1d8   :  { %p3819_p5 = pnand %p3818_p4, %p3812_p1 }
 0x1da   :  { %3822 = shalt.err (!%p3819_p5)  }
 0x1db   :  { %856 = dma.hbm_to_vmem [thread:$0]  %s844_s13, 16, %s854_s20, [#allocation4 + $0x1] }
 0x1dc   :  { %s4655_s0 = smov [#allocation3 + $0x22]   ;;  %s3244_s25 = sld [smem:[#allocation8 + $0x11]] }
 0x1dd   :  { %s869_s1 = sshll.u32 %s4655_s0, 4  ;;  %s4656_s27 = smov [#allocation3 + $0x2a]   ;;  %s870_s1 = int_to_ptr.vmem [resolvable:$true] %s869_s1 }
 0x1de   :  { %s885_s28 = sshll.u32 %s4656_s27, 4  ;;  %s4994_s6 = sld [smem:[#allocation7 + $0xc]]  ;;  %s4999_s28 = int_to_ptr.vmem [resolvable:$true] %s885_s28 }
 0x1df   :  { %s3243_s8 = sshll.u32 %s3242_s23, 4 }
 0x1e0   :  { %s860_s21 = scalar_lea.hbm %s5554_s3, %s3243_s8 }
 0x1e1   :  { %s3823_s10 = scalar_lea.hbm %s860_s21, 16  ;;  %p3826_p7 = scmp.lt.u32.totalorder %s860_s21, %s5554_s3 }
 0x1e2   :  { %p3824_p6 = scmp.ne.s32.totalorder %s860_s21, %s3823_s10  ;;  %p3827_p8 = scmp.lt.u32.totalorder %s4750_s29, %s3823_s10 }
 0x1e3   :  { %p3829_p10 = scmp.lt.u32.totalorder %s3823_s10, %s860_s21 }
 0x1e4   :  { %p3828_p9 = por %p3827_p8, %p3826_p7 }
 0x1e6   :  { %p3830_p11 = por %p3829_p10, %p3828_p9 }
 0x1e8   :  { %p3831_p12 = pnand %p3830_p11, %p3824_p6 }
 0x1ea   :  { %3834 = shalt.err (!%p3831_p12)  }
 0x1eb   :  { %s3835_s19 = scalar_lea.vmem %s870_s1, 16  ;;  %p3840_p0 = scmp.lt.s32.totalorder %s870_s1, %s4733_s15 }
 0x1ec   :  { %p3836_p13 = scmp.ne.s32.totalorder %s870_s1, %s3835_s19  ;;  %p3841_p1 = scmp.lt.s32.totalorder %s4759_s7, %s3835_s19 }
 0x1ee   :  { %p3842_p2 = por %p3841_p1, %p3840_p0 }
 0x1f0   :  { %p3843_p3 = pnand %p3842_p2, %p3836_p13 }
 0x1f2   :  { %3846 = shalt.err (!%p3843_p3)  }
 0x1f3   :  { %872 = dma.hbm_to_vmem [thread:$0]  %s860_s21, 16, %s870_s1, [#allocation4 + $0x1] }
 0x1f4   :  { %s3245_s9 = sshll.u32 %s3244_s25, 4 }
 0x1f5   :  { %s876_s13 = scalar_lea.hbm %s5554_s3, %s3245_s9 }
 0x1f6   :  { %s3847_s14 = scalar_lea.hbm %s876_s13, 16  ;;  %p3850_p5 = scmp.lt.u32.totalorder %s876_s13, %s5554_s3 }
 0x1f7   :  { %p3848_p4 = scmp.ne.s32.totalorder %s876_s13, %s3847_s14  ;;  %p3851_p6 = scmp.lt.u32.totalorder %s4750_s29, %s3847_s14 }
 0x1f8   :  { %p3853_p8 = scmp.lt.u32.totalorder %s3847_s14, %s876_s13 }
 0x1f9   :  { %p3852_p7 = por %p3851_p6, %p3850_p5 }
 0x1fb   :  { %p3854_p9 = por %p3853_p8, %p3852_p7 }
 0x1fd   :  { %p3855_p10 = pnand %p3854_p9, %p3848_p4 }
 0x1ff   :  { %3858 = shalt.err (!%p3855_p10)  }
 0x200   :  { %s3859_s24 = scalar_lea.vmem %s4999_s28, 16  ;;  %p3864_p12 = scmp.lt.s32.totalorder %s4999_s28, %s4733_s15 }
 0x201   :  { %p3860_p11 = scmp.ne.s32.totalorder %s4999_s28, %s3859_s24  ;;  %p3865_p13 = scmp.lt.s32.totalorder %s4759_s7, %s3859_s24 }
 0x203   :  { %p3866_p0 = por %p3865_p13, %p3864_p12 }
 0x205   :  { %p3867_p1 = pnand %p3866_p0, %p3860_p11 }
 0x207   :  { %3870 = shalt.err (!%p3867_p1)  }
 0x208   :  { %888 = dma.hbm_to_vmem [thread:$0]  %s876_s13, 16, %s4999_s28, [#allocation4 + $0x1] }
 0x209   :  { %s891_s12 = scalar_lea.vmem %s5553_s2, %s4994_s6 }
 0x20a   :  { %v910_v12 = vld [vmem:[%s891_s12] sm:$0x1] }
 0x20b   :  { %911 = vst [vmem:[#allocation2 + $0x3] sm:$0x1] %v910_v12 }
 0x20c   :  { %936 = vsyncadd [#allocation4], 16  ;;  %s3247_s0 = sld [smem:[#allocation7 + $0xd]] }
 0x212   :  { %s939_s27 = scalar_lea.vmem %s5553_s2, %s3247_s0 }
 0x213   :  { %v958_v13 = vld [vmem:[%s939_s27] sm:$0x1] }
 0x214   :  { %959 = vst [vmem:[#allocation2 + $0xb] sm:$0x1] %v958_v13 }
 0x215   :  { %984 = vsyncadd [#allocation4], 16  ;;  %s3248_s8 = sld [smem:[#allocation7 + $0xe]] }
 0x21b   :  { %s987_s28 = scalar_lea.vmem %s5553_s2, %s3248_s8 }
 0x21c   :  { %v1006_v14 = vld [vmem:[%s987_s28] sm:$0x1] }
 0x21d   :  { %1007 = vst [vmem:[#allocation2 + $0x13] sm:$0x1] %v1006_v14 }
 0x21e   :  { %1032 = vsyncadd [#allocation4], 16  ;;  %s3249_s6 = sld [smem:[#allocation7 + $0xf]] }
 0x224   :  { %s1035_s11 = scalar_lea.vmem %s5553_s2, %s3249_s6 }
 0x225   :  { %v1054_v15 = vld [vmem:[%s1035_s11] sm:$0x1] }
 0x226   :  { %1055 = vst [vmem:[#allocation2 + $0x1b] sm:$0x1] %v1054_v15 }
 0x227   :  { %1080 = vsyncadd [#allocation4], 16  ;;  %s3250_s17 = sld [smem:[#allocation8 + $0x12]]  ;;  %s4657_s19 = smov [#allocation3 + $0x3]  }
 0x228   :  { %s1093_s9 = sshll.u32 %s4657_s19, 4  ;;  %s5033_s16 = sld [smem:[#allocation8 + $0x13]]  ;;  %s1094_s9 = int_to_ptr.vmem [resolvable:$true] %s1093_s9 }
 0x229   :  { %s4658_s30 = smov [#allocation3 + $0xb]   ;;  %s5035_s14 = sld [smem:[#allocation8 + $0x14]] }
 0x22a   :  { %s1109_s13 = sshll.u32 %s4658_s30, 4  ;;  %s4659_s20 = smov [#allocation3 + $0x13]   ;;  %s5037_s13 = int_to_ptr.vmem [resolvable:$true] %s1109_s13 }
 0x22b   :  { %s1125_s23 = sshll.u32 %s4659_s20, 4  ;;  %s5039_s24 = sld [smem:[#allocation8 + $0x15]]  ;;  %s5041_s23 = int_to_ptr.vmem [resolvable:$true] %s1125_s23 }
 0x22d   :  { %s3251_s18 = sshll.u32 %s3250_s17, 4 }
 0x22e   :  { %s1084_s0 = scalar_lea.hbm %s5554_s3, %s3251_s18  ;;  %s3253_s1 = sshll.u32 %s5033_s16, 4 }
 0x22f   :  { %s3871_s25 = scalar_lea.hbm %s1084_s0, 16  ;;  %p3874_p3 = scmp.lt.u32.totalorder %s1084_s0, %s5554_s3 }
 0x230   :  { %p3872_p2 = scmp.ne.s32.totalorder %s1084_s0, %s3871_s25  ;;  %p3875_p4 = scmp.lt.u32.totalorder %s4750_s29, %s3871_s25 }
 0x231   :  { %p3877_p6 = scmp.lt.u32.totalorder %s3871_s25, %s1084_s0 }
 0x232   :  { %p3876_p5 = por %p3875_p4, %p3874_p3 }
 0x234   :  { %p3878_p7 = por %p3877_p6, %p3876_p5 }
 0x236   :  { %p3879_p8 = pnand %p3878_p7, %p3872_p2 }
 0x238   :  { %3882 = shalt.err (!%p3879_p8)  }
 0x239   :  { %s3883_s26 = scalar_lea.vmem %s1094_s9, 16  ;;  %p3888_p10 = scmp.lt.s32.totalorder %s1094_s9, %s4733_s15 }
 0x23a   :  { %p3884_p9 = scmp.ne.s32.totalorder %s1094_s9, %s3883_s26  ;;  %p3889_p11 = scmp.lt.s32.totalorder %s4759_s7, %s3883_s26 }
 0x23c   :  { %p3890_p12 = por %p3889_p11, %p3888_p10 }
 0x23e   :  { %p3891_p13 = pnand %p3890_p12, %p3884_p9 }
 0x240   :  { %3894 = shalt.err (!%p3891_p13)  }
 0x241   :  { %1096 = dma.hbm_to_vmem [thread:$0]  %s1084_s0, 16, %s1094_s9, [#allocation4 + $0x1] }
 0x242   :  { %s1100_s6 = scalar_lea.hbm %s5554_s3, %s3253_s1  ;;  %s3255_s21 = sshll.u32 %s5035_s14, 4 }
 0x243   :  { %s3895_s10 = scalar_lea.hbm %s1100_s6, 16  ;;  %p3898_p1 = scmp.lt.u32.totalorder %s1100_s6, %s5554_s3 }
 0x244   :  { %p3896_p0 = scmp.ne.s32.totalorder %s1100_s6, %s3895_s10  ;;  %p3899_p2 = scmp.lt.u32.totalorder %s4750_s29, %s3895_s10 }
 0x245   :  { %p3901_p4 = scmp.lt.u32.totalorder %s3895_s10, %s1100_s6 }
 0x246   :  { %p3900_p3 = por %p3899_p2, %p3898_p1 }
 0x248   :  { %p3902_p5 = por %p3901_p4, %p3900_p3 }
 0x24a   :  { %p3903_p6 = pnand %p3902_p5, %p3896_p0 }
 0x24c   :  { %3906 = shalt.err (!%p3903_p6)  }
 0x24d   :  { %s3907_s19 = scalar_lea.vmem %s5037_s13, 16  ;;  %p3912_p8 = scmp.lt.s32.totalorder %s5037_s13, %s4733_s15 }
 0x24e   :  { %p3908_p7 = scmp.ne.s32.totalorder %s5037_s13, %s3907_s19  ;;  %p3913_p9 = scmp.lt.s32.totalorder %s4759_s7, %s3907_s19 }
 0x250   :  { %p3914_p10 = por %p3913_p9, %p3912_p8 }
 0x252   :  { %p3915_p11 = pnand %p3914_p10, %p3908_p7 }
 0x254   :  { %3918 = shalt.err (!%p3915_p11)  }
 0x255   :  { %1112 = dma.hbm_to_vmem [thread:$0]  %s1100_s6, 16, %s5037_s13, [#allocation4 + $0x1] }
 0x256   :  { %s1116_s30 = scalar_lea.hbm %s5554_s3, %s3255_s21  ;;  %s3257_s14 = sshll.u32 %s5039_s24, 4 }
 0x257   :  { %s3919_s20 = scalar_lea.hbm %s1116_s30, 16  ;;  %p3922_p13 = scmp.lt.u32.totalorder %s1116_s30, %s5554_s3 }
 0x258   :  { %p3920_p12 = scmp.ne.s32.totalorder %s1116_s30, %s3919_s20  ;;  %p3923_p0 = scmp.lt.u32.totalorder %s4750_s29, %s3919_s20 }
 0x259   :  { %p3925_p2 = scmp.lt.u32.totalorder %s3919_s20, %s1116_s30 }
 0x25a   :  { %p3924_p1 = por %p3923_p0, %p3922_p13 }
 0x25c   :  { %p3926_p3 = por %p3925_p2, %p3924_p1 }
 0x25e   :  { %p3927_p4 = pnand %p3926_p3, %p3920_p12 }
 0x260   :  { %3930 = shalt.err (!%p3927_p4)  }
 0x261   :  { %s3931_s13 = scalar_lea.vmem %s5041_s23, 16  ;;  %p3936_p6 = scmp.lt.s32.totalorder %s5041_s23, %s4733_s15 }
 0x262   :  { %p3932_p5 = scmp.ne.s32.totalorder %s5041_s23, %s3931_s13  ;;  %p3937_p7 = scmp.lt.s32.totalorder %s4759_s7, %s3931_s13 }
 0x264   :  { %p3938_p8 = por %p3937_p7, %p3936_p6 }
 0x266   :  { %p3939_p9 = pnand %p3938_p8, %p3932_p5 }
 0x268   :  { %3942 = shalt.err (!%p3939_p9)  }
 0x269   :  { %1128 = dma.hbm_to_vmem [thread:$0]  %s1116_s30, 16, %s5041_s23, [#allocation4 + $0x1] }
 0x26a   :  { %s1132_s0 = scalar_lea.hbm %s5554_s3, %s3257_s14  ;;  %s4660_s1 = smov [#allocation3 + $0x1b]  }
 0x26b   :  { %s1141_s25 = sshll.u32 %s4660_s1, 4  ;;  %s3258_s27 = sld [smem:[#allocation8 + $0x16]]  ;;  %s1142_s25 = int_to_ptr.vmem [resolvable:$true] %s1141_s25 }
 0x26c   :  { %s3943_s8 = scalar_lea.hbm %s1132_s0, 16  ;;  %p3946_p11 = scmp.lt.u32.totalorder %s1132_s0, %s5554_s3 }
 0x26d   :  { %p3944_p10 = scmp.ne.s32.totalorder %s1132_s0, %s3943_s8  ;;  %p3947_p12 = scmp.lt.u32.totalorder %s4750_s29, %s3943_s8 }
 0x26e   :  { %p3949_p0 = scmp.lt.u32.totalorder %s3943_s8, %s1132_s0 }
 0x26f   :  { %p3948_p13 = por %p3947_p12, %p3946_p11 }
 0x271   :  { %p3950_p1 = por %p3949_p0, %p3948_p13 }
 0x273   :  { %p3951_p2 = pnand %p3950_p1, %p3944_p10 }
 0x275   :  { %3954 = shalt.err (!%p3951_p2)  }
 0x276   :  { %s3955_s23 = scalar_lea.vmem %s1142_s25, 16  ;;  %p3960_p4 = scmp.lt.s32.totalorder %s1142_s25, %s4733_s15 }
 0x277   :  { %p3956_p3 = scmp.ne.s32.totalorder %s1142_s25, %s3955_s23  ;;  %p3961_p5 = scmp.lt.s32.totalorder %s4759_s7, %s3955_s23 }
 0x279   :  { %p3962_p6 = por %p3961_p5, %p3960_p4 }
 0x27b   :  { %p3963_p7 = pnand %p3962_p6, %p3956_p3 }
 0x27d   :  { %3966 = shalt.err (!%p3963_p7)  }
 0x27e   :  { %1144 = dma.hbm_to_vmem [thread:$0]  %s1132_s0, 16, %s1142_s25, [#allocation4 + $0x1] }
 0x27f   :  { %s4661_s28 = smov [#allocation3 + $0x23]   ;;  %s3260_s21 = sld [smem:[#allocation8 + $0x17]] }
 0x280   :  { %s1157_s6 = sshll.u32 %s4661_s28, 4  ;;  %s4662_s10 = smov [#allocation3 + $0x2b]   ;;  %s1158_s6 = int_to_ptr.vmem [resolvable:$true] %s1157_s6 }
 0x281   :  { %s1173_s11 = sshll.u32 %s4662_s10, 4  ;;  %s5090_s17 = sld [smem:[#allocation7 + $0x10]]  ;;  %s5095_s11 = int_to_ptr.vmem [resolvable:$true] %s1173_s11 }
 0x282   :  { %s3259_s19 = sshll.u32 %s3258_s27, 4 }
 0x283   :  { %s1148_s30 = scalar_lea.hbm %s5554_s3, %s3259_s19 }
 0x284   :  { %s3967_s14 = scalar_lea.hbm %s1148_s30, 16  ;;  %p3970_p9 = scmp.lt.u32.totalorder %s1148_s30, %s5554_s3 }
 0x285   :  { %p3968_p8 = scmp.ne.s32.totalorder %s1148_s30, %s3967_s14  ;;  %p3971_p10 = scmp.lt.u32.totalorder %s4750_s29, %s3967_s14 }
 0x286   :  { %p3973_p12 = scmp.lt.u32.totalorder %s3967_s14, %s1148_s30 }
 0x287   :  { %p3972_p11 = por %p3971_p10, %p3970_p9 }
 0x289   :  { %p3974_p13 = por %p3973_p12, %p3972_p11 }
 0x28b   :  { %p3975_p0 = pnand %p3974_p13, %p3968_p8 }
 0x28d   :  { %3978 = shalt.err (!%p3975_p0)  }
 0x28e   :  { %s3979_s22 = scalar_lea.vmem %s1158_s6, 16  ;;  %p3984_p2 = scmp.lt.s32.totalorder %s1158_s6, %s4733_s15 }
 0x28f   :  { %p3980_p1 = scmp.ne.s32.totalorder %s1158_s6, %s3979_s22  ;;  %p3985_p3 = scmp.lt.s32.totalorder %s4759_s7, %s3979_s22 }
 0x291   :  { %p3986_p4 = por %p3985_p3, %p3984_p2 }
 0x293   :  { %p3987_p5 = pnand %p3986_p4, %p3980_p1 }
 0x295   :  { %3990 = shalt.err (!%p3987_p5)  }
 0x296   :  { %1160 = dma.hbm_to_vmem [thread:$0]  %s1148_s30, 16, %s1158_s6, [#allocation4 + $0x1] }
 0x297   :  { %s3261_s13 = sshll.u32 %s3260_s21, 4 }
 0x298   :  { %s1164_s0 = scalar_lea.hbm %s5554_s3, %s3261_s13 }
 0x299   :  { %s3991_s1 = scalar_lea.hbm %s1164_s0, 16  ;;  %p3994_p7 = scmp.lt.u32.totalorder %s1164_s0, %s5554_s3 }
 0x29a   :  { %p3992_p6 = scmp.ne.s32.totalorder %s1164_s0, %s3991_s1  ;;  %p3995_p8 = scmp.lt.u32.totalorder %s4750_s29, %s3991_s1 }
 0x29b   :  { %p3997_p10 = scmp.lt.u32.totalorder %s3991_s1, %s1164_s0 }
 0x29c   :  { %p3996_p9 = por %p3995_p8, %p3994_p7 }
 0x29e   :  { %p3998_p11 = por %p3997_p10, %p3996_p9 }
 0x2a0   :  { %p3999_p12 = pnand %p3998_p11, %p3992_p6 }
 0x2a2   :  { %4002 = shalt.err (!%p3999_p12)  }
 0x2a3   :  { %s4003_s8 = scalar_lea.vmem %s5095_s11, 16  ;;  %p4008_p0 = scmp.lt.s32.totalorder %s5095_s11, %s4733_s15 }
 0x2a4   :  { %p4004_p13 = scmp.ne.s32.totalorder %s5095_s11, %s4003_s8  ;;  %p4009_p1 = scmp.lt.s32.totalorder %s4759_s7, %s4003_s8 }
 0x2a6   :  { %p4010_p2 = por %p4009_p1, %p4008_p0 }
 0x2a8   :  { %p4011_p3 = pnand %p4010_p2, %p4004_p13 }
 0x2aa   :  { %4014 = shalt.err (!%p4011_p3)  }
 0x2ab   :  { %1176 = dma.hbm_to_vmem [thread:$0]  %s1164_s0, 16, %s5095_s11, [#allocation4 + $0x1] }
 0x2ac   :  { %s1179_s23 = scalar_lea.vmem %s5553_s2, %s5090_s17 }
 0x2ad   :  { %v1198_v16 = vld [vmem:[%s1179_s23] sm:$0x1] }
 0x2ae   :  { %1199 = vst [vmem:[#allocation2 + $0x4] sm:$0x1] %v1198_v16 }
 0x2af   :  { %1224 = vsyncadd [#allocation4], 16  ;;  %s3263_s28 = sld [smem:[#allocation7 + $0x11]] }
 0x2b5   :  { %s1227_s10 = scalar_lea.vmem %s5553_s2, %s3263_s28 }
 0x2b6   :  { %v1246_v17 = vld [vmem:[%s1227_s10] sm:$0x1] }
 0x2b7   :  { %1247 = vst [vmem:[#allocation2 + $0xc] sm:$0x1] %v1246_v17 }
 0x2b8   :  { %1272 = vsyncadd [#allocation4], 16  ;;  %s3264_s19 = sld [smem:[#allocation7 + $0x12]] }
 0x2be   :  { %s1275_s11 = scalar_lea.vmem %s5553_s2, %s3264_s19 }
 0x2bf   :  { %v1294_v18 = vld [vmem:[%s1275_s11] sm:$0x1] }
 0x2c0   :  { %1295 = vst [vmem:[#allocation2 + $0x14] sm:$0x1] %v1294_v18 }
 0x2c1   :  { %1320 = vsyncadd [#allocation4], 16  ;;  %s3265_s17 = sld [smem:[#allocation7 + $0x13]] }
 0x2c7   :  { %s1323_s20 = scalar_lea.vmem %s5553_s2, %s3265_s17 }
 0x2c8   :  { %v1342_v19 = vld [vmem:[%s1323_s20] sm:$0x1] }
 0x2c9   :  { %1343 = vst [vmem:[#allocation2 + $0x1c] sm:$0x1] %v1342_v19 }
 0x2ca   :  { %1368 = vsyncadd [#allocation4], 16  ;;  %s3266_s18 = sld [smem:[#allocation8 + $0x18]]  ;;  %s4663_s22 = smov [#allocation3 + $0x4]  }
 0x2cb   :  { %s1381_s13 = sshll.u32 %s4663_s22, 4  ;;  %s5129_s24 = sld [smem:[#allocation8 + $0x19]]  ;;  %s1382_s13 = int_to_ptr.vmem [resolvable:$true] %s1381_s13 }
 0x2cc   :  { %s4664_s12 = smov [#allocation3 + $0xc]   ;;  %s5131_s1 = sld [smem:[#allocation8 + $0x1a]] }
 0x2cd   :  { %s1397_s0 = sshll.u32 %s4664_s12, 4  ;;  %s4665_s25 = smov [#allocation3 + $0x14]   ;;  %s5133_s0 = int_to_ptr.vmem [resolvable:$true] %s1397_s0 }
 0x2ce   :  { %s1413_s27 = sshll.u32 %s4665_s25, 4  ;;  %s5135_s8 = sld [smem:[#allocation8 + $0x1b]]  ;;  %s5137_s27 = int_to_ptr.vmem [resolvable:$true] %s1413_s27 }
 0x2d0   :  { %s3267_s26 = sshll.u32 %s3266_s18, 4 }
 0x2d1   :  { %s1372_s28 = scalar_lea.hbm %s5554_s3, %s3267_s26  ;;  %s3269_s6 = sshll.u32 %s5129_s24, 4 }
 0x2d2   :  { %s4015_s21 = scalar_lea.hbm %s1372_s28, 16  ;;  %p4018_p5 = scmp.lt.u32.totalorder %s1372_s28, %s5554_s3 }
 0x2d3   :  { %p4016_p4 = scmp.ne.s32.totalorder %s1372_s28, %s4015_s21  ;;  %p4019_p6 = scmp.lt.u32.totalorder %s4750_s29, %s4015_s21 }
 0x2d4   :  { %p4021_p8 = scmp.lt.u32.totalorder %s4015_s21, %s1372_s28 }
 0x2d5   :  { %p4020_p7 = por %p4019_p6, %p4018_p5 }
 0x2d7   :  { %p4022_p9 = por %p4021_p8, %p4020_p7 }
 0x2d9   :  { %p4023_p10 = pnand %p4022_p9, %p4016_p4 }
 0x2db   :  { %4026 = shalt.err (!%p4023_p10)  }
 0x2dc   :  { %s4027_s9 = scalar_lea.vmem %s1382_s13, 16  ;;  %p4032_p12 = scmp.lt.s32.totalorder %s1382_s13, %s4733_s15 }
 0x2dd   :  { %p4028_p11 = scmp.ne.s32.totalorder %s1382_s13, %s4027_s9  ;;  %p4033_p13 = scmp.lt.s32.totalorder %s4759_s7, %s4027_s9 }
 0x2df   :  { %p4034_p0 = por %p4033_p13, %p4032_p12 }
 0x2e1   :  { %p4035_p1 = pnand %p4034_p0, %p4028_p11 }
 0x2e3   :  { %4038 = shalt.err (!%p4035_p1)  }
 0x2e4   :  { %1384 = dma.hbm_to_vmem [thread:$0]  %s1372_s28, 16, %s1382_s13, [#allocation4 + $0x1] }
 0x2e5   :  { %s1388_s17 = scalar_lea.hbm %s5554_s3, %s3269_s6  ;;  %s3271_s30 = sshll.u32 %s5131_s1, 4 }
 0x2e6   :  { %s4039_s14 = scalar_lea.hbm %s1388_s17, 16  ;;  %p4042_p3 = scmp.lt.u32.totalorder %s1388_s17, %s5554_s3 }
 0x2e7   :  { %p4040_p2 = scmp.ne.s32.totalorder %s1388_s17, %s4039_s14  ;;  %p4043_p4 = scmp.lt.u32.totalorder %s4750_s29, %s4039_s14 }
 0x2e8   :  { %p4045_p6 = scmp.lt.u32.totalorder %s4039_s14, %s1388_s17 }
 0x2e9   :  { %p4044_p5 = por %p4043_p4, %p4042_p3 }
 0x2eb   :  { %p4046_p7 = por %p4045_p6, %p4044_p5 }
 0x2ed   :  { %p4047_p8 = pnand %p4046_p7, %p4040_p2 }
 0x2ef   :  { %4050 = shalt.err (!%p4047_p8)  }
 0x2f0   :  { %s4051_s22 = scalar_lea.vmem %s5133_s0, 16  ;;  %p4056_p10 = scmp.lt.s32.totalorder %s5133_s0, %s4733_s15 }
 0x2f1   :  { %p4052_p9 = scmp.ne.s32.totalorder %s5133_s0, %s4051_s22  ;;  %p4057_p11 = scmp.lt.s32.totalorder %s4759_s7, %s4051_s22 }
 0x2f3   :  { %p4058_p12 = por %p4057_p11, %p4056_p10 }
 0x2f5   :  { %p4059_p13 = pnand %p4058_p12, %p4052_p9 }
 0x2f7   :  { %4062 = shalt.err (!%p4059_p13)  }
 0x2f8   :  { %1400 = dma.hbm_to_vmem [thread:$0]  %s1388_s17, 16, %s5133_s0, [#allocation4 + $0x1] }
 0x2f9   :  { %s1404_s12 = scalar_lea.hbm %s5554_s3, %s3271_s30  ;;  %s3273_s1 = sshll.u32 %s5135_s8, 4 }
 0x2fa   :  { %s4063_s25 = scalar_lea.hbm %s1404_s12, 16  ;;  %p4066_p1 = scmp.lt.u32.totalorder %s1404_s12, %s5554_s3 }
 0x2fb   :  { %p4064_p0 = scmp.ne.s32.totalorder %s1404_s12, %s4063_s25  ;;  %p4067_p2 = scmp.lt.u32.totalorder %s4750_s29, %s4063_s25 }
 0x2fc   :  { %p4069_p4 = scmp.lt.u32.totalorder %s4063_s25, %s1404_s12 }
 0x2fd   :  { %p4068_p3 = por %p4067_p2, %p4066_p1 }
 0x2ff   :  { %p4070_p5 = por %p4069_p4, %p4068_p3 }
 0x301   :  { %p4071_p6 = pnand %p4070_p5, %p4064_p0 }
 0x303   :  { %4074 = shalt.err (!%p4071_p6)  }
 0x304   :  { %s4075_s0 = scalar_lea.vmem %s5137_s27, 16  ;;  %p4080_p8 = scmp.lt.s32.totalorder %s5137_s27, %s4733_s15 }
 0x305   :  { %p4076_p7 = scmp.ne.s32.totalorder %s5137_s27, %s4075_s0  ;;  %p4081_p9 = scmp.lt.s32.totalorder %s4759_s7, %s4075_s0 }
 0x307   :  { %p4082_p10 = por %p4081_p9, %p4080_p8 }
 0x309   :  { %p4083_p11 = pnand %p4082_p10, %p4076_p7 }
 0x30b   :  { %4086 = shalt.err (!%p4083_p11)  }
 0x30c   :  { %1416 = dma.hbm_to_vmem [thread:$0]  %s1404_s12, 16, %s5137_s27, [#allocation4 + $0x1] }
 0x30d   :  { %s1420_s28 = scalar_lea.hbm %s5554_s3, %s3273_s1  ;;  %s4666_s6 = smov [#allocation3 + $0x1c]  }
 0x30e   :  { %s1429_s21 = sshll.u32 %s4666_s6, 4  ;;  %s3274_s10 = sld [smem:[#allocation8 + $0x1c]]  ;;  %s1430_s21 = int_to_ptr.vmem [resolvable:$true] %s1429_s21 }
 0x30f   :  { %s4087_s19 = scalar_lea.hbm %s1420_s28, 16  ;;  %p4090_p13 = scmp.lt.u32.totalorder %s1420_s28, %s5554_s3 }
 0x310   :  { %p4088_p12 = scmp.ne.s32.totalorder %s1420_s28, %s4087_s19  ;;  %p4091_p0 = scmp.lt.u32.totalorder %s4750_s29, %s4087_s19 }
 0x311   :  { %p4093_p2 = scmp.lt.u32.totalorder %s4087_s19, %s1420_s28 }
 0x312   :  { %p4092_p1 = por %p4091_p0, %p4090_p13 }
 0x314   :  { %p4094_p3 = por %p4093_p2, %p4092_p1 }
 0x316   :  { %p4095_p4 = pnand %p4094_p3, %p4088_p12 }
 0x318   :  { %4098 = shalt.err (!%p4095_p4)  }
 0x319   :  { %s4099_s27 = scalar_lea.vmem %s1430_s21, 16  ;;  %p4104_p6 = scmp.lt.s32.totalorder %s1430_s21, %s4733_s15 }
 0x31a   :  { %p4100_p5 = scmp.ne.s32.totalorder %s1430_s21, %s4099_s27  ;;  %p4105_p7 = scmp.lt.s32.totalorder %s4759_s7, %s4099_s27 }
 0x31c   :  { %p4106_p8 = por %p4105_p7, %p4104_p6 }
 0x31e   :  { %p4107_p9 = pnand %p4106_p8, %p4100_p5 }
 0x320   :  { %4110 = shalt.err (!%p4107_p9)  }
 0x321   :  { %1432 = dma.hbm_to_vmem [thread:$0]  %s1420_s28, 16, %s1430_s21, [#allocation4 + $0x1] }
 0x322   :  { %s4667_s11 = smov [#allocation3 + $0x24]   ;;  %s3276_s30 = sld [smem:[#allocation8 + $0x1d]] }
 0x323   :  { %s1445_s17 = sshll.u32 %s4667_s11, 4  ;;  %s4668_s14 = smov [#allocation3 + $0x2c]   ;;  %s1446_s17 = int_to_ptr.vmem [resolvable:$true] %s1445_s17 }
 0x324   :  { %s1461_s20 = sshll.u32 %s4668_s14, 4  ;;  %s5186_s18 = sld [smem:[#allocation7 + $0x14]]  ;;  %s5191_s20 = int_to_ptr.vmem [resolvable:$true] %s1461_s20 }
 0x325   :  { %s3275_s22 = sshll.u32 %s3274_s10, 4 }
 0x326   :  { %s1436_s12 = scalar_lea.hbm %s5554_s3, %s3275_s22 }
 0x327   :  { %s4111_s1 = scalar_lea.hbm %s1436_s12, 16  ;;  %p4114_p11 = scmp.lt.u32.totalorder %s1436_s12, %s5554_s3 }
 0x328   :  { %p4112_p10 = scmp.ne.s32.totalorder %s1436_s12, %s4111_s1  ;;  %p4115_p12 = scmp.lt.u32.totalorder %s4750_s29, %s4111_s1 }
 0x329   :  { %p4117_p0 = scmp.lt.u32.totalorder %s4111_s1, %s1436_s12 }
 0x32a   :  { %p4116_p13 = por %p4115_p12, %p4114_p11 }
 0x32c   :  { %p4118_p1 = por %p4117_p0, %p4116_p13 }
 0x32e   :  { %p4119_p2 = pnand %p4118_p1, %p4112_p10 }
 0x330   :  { %4122 = shalt.err (!%p4119_p2)  }
 0x331   :  { %s4123_s5 = scalar_lea.vmem %s1446_s17, 16  ;;  %p4128_p4 = scmp.lt.s32.totalorder %s1446_s17, %s4733_s15 }
 0x332   :  { %p4124_p3 = scmp.ne.s32.totalorder %s1446_s17, %s4123_s5  ;;  %p4129_p5 = scmp.lt.s32.totalorder %s4759_s7, %s4123_s5 }
 0x334   :  { %p4130_p6 = por %p4129_p5, %p4128_p4 }
 0x336   :  { %p4131_p7 = pnand %p4130_p6, %p4124_p3 }
 0x338   :  { %4134 = shalt.err (!%p4131_p7)  }
 0x339   :  { %1448 = dma.hbm_to_vmem [thread:$0]  %s1436_s12, 16, %s1446_s17, [#allocation4 + $0x1] }
 0x33a   :  { %s3277_s0 = sshll.u32 %s3276_s30, 4 }
 0x33b   :  { %s1452_s28 = scalar_lea.hbm %s5554_s3, %s3277_s0 }
 0x33c   :  { %s4135_s6 = scalar_lea.hbm %s1452_s28, 16  ;;  %p4138_p9 = scmp.lt.u32.totalorder %s1452_s28, %s5554_s3 }
 0x33d   :  { %p4136_p8 = scmp.ne.s32.totalorder %s1452_s28, %s4135_s6  ;;  %p4139_p10 = scmp.lt.u32.totalorder %s4750_s29, %s4135_s6 }
 0x33e   :  { %p4141_p12 = scmp.lt.u32.totalorder %s4135_s6, %s1452_s28 }
 0x33f   :  { %p4140_p11 = por %p4139_p10, %p4138_p9 }
 0x341   :  { %p4142_p13 = por %p4141_p12, %p4140_p11 }
 0x343   :  { %p4143_p0 = pnand %p4142_p13, %p4136_p8 }
 0x345   :  { %4146 = shalt.err (!%p4143_p0)  }
 0x346   :  { %s4147_s19 = scalar_lea.vmem %s5191_s20, 16  ;;  %p4152_p2 = scmp.lt.s32.totalorder %s5191_s20, %s4733_s15 }
 0x347   :  { %p4148_p1 = scmp.ne.s32.totalorder %s5191_s20, %s4147_s19  ;;  %p4153_p3 = scmp.lt.s32.totalorder %s4759_s7, %s4147_s19 }
 0x349   :  { %p4154_p4 = por %p4153_p3, %p4152_p2 }
 0x34b   :  { %p4155_p5 = pnand %p4154_p4, %p4148_p1 }
 0x34d   :  { %4158 = shalt.err (!%p4155_p5)  }
 0x34e   :  { %1464 = dma.hbm_to_vmem [thread:$0]  %s1452_s28, 16, %s5191_s20, [#allocation4 + $0x1] }
 0x34f   :  { %s1467_s27 = scalar_lea.vmem %s5553_s2, %s5186_s18 }
 0x350   :  { %v1486_v20 = vld [vmem:[%s1467_s27] sm:$0x1] }
 0x351   :  { %1487 = vst [vmem:[#allocation2 + $0x5] sm:$0x1] %v1486_v20 }
 0x352   :  { %1512 = vsyncadd [#allocation4], 16  ;;  %s3279_s11 = sld [smem:[#allocation7 + $0x15]] }
 0x358   :  { %s1515_s14 = scalar_lea.vmem %s5553_s2, %s3279_s11 }
 0x359   :  { %v1534_v21 = vld [vmem:[%s1515_s14] sm:$0x1] }
 0x35a   :  { %1535 = vst [vmem:[#allocation2 + $0xd] sm:$0x1] %v1534_v21 }
 0x35b   :  { %1560 = vsyncadd [#allocation4], 16  ;;  %s3280_s22 = sld [smem:[#allocation7 + $0x16]] }
 0x361   :  { %s1563_s20 = scalar_lea.vmem %s5553_s2, %s3280_s22 }
 0x362   :  { %v1582_v22 = vld [vmem:[%s1563_s20] sm:$0x1] }
 0x363   :  { %1583 = vst [vmem:[#allocation2 + $0x15] sm:$0x1] %v1582_v22 }
 0x364   :  { %1608 = vsyncadd [#allocation4], 16  ;;  %s3281_s18 = sld [smem:[#allocation7 + $0x17]] }
 0x36a   :  { %s1611_s25 = scalar_lea.vmem %s5553_s2, %s3281_s18 }
 0x36b   :  { %v1630_v23 = vld [vmem:[%s1611_s25] sm:$0x1] }
 0x36c   :  { %1631 = vst [vmem:[#allocation2 + $0x1d] sm:$0x1] %v1630_v23 }
 0x36d   :  { %1656 = vsyncadd [#allocation4], 16  ;;  %s3282_s26 = sld [smem:[#allocation8 + $0x1e]]  ;;  %s4669_s5 = smov [#allocation3 + $0x5]  }
 0x36e   :  { %s1669_s0 = sshll.u32 %s4669_s5, 4  ;;  %s5225_s8 = sld [smem:[#allocation8 + $0x1f]]  ;;  %s1670_s0 = int_to_ptr.vmem [resolvable:$true] %s1669_s0 }
 0x36f   :  { %s4670_s23 = smov [#allocation3 + $0xd]   ;;  %s5227_s6 = sld [smem:[#allocation8 + $0x20]] }
 0x370   :  { %s1685_s28 = sshll.u32 %s4670_s23, 4  ;;  %s4671_s21 = smov [#allocation3 + $0x15]   ;;  %s5229_s28 = int_to_ptr.vmem [resolvable:$true] %s1685_s28 }
 0x371   :  { %s1701_s10 = sshll.u32 %s4671_s21, 4  ;;  %s5231_s19 = sld [smem:[#allocation8 + $0x21]]  ;;  %s5233_s10 = int_to_ptr.vmem [resolvable:$true] %s1701_s10 }
 0x373   :  { %s3283_s9 = sshll.u32 %s3282_s26, 4 }
 0x374   :  { %s1660_s11 = scalar_lea.hbm %s5554_s3, %s3283_s9  ;;  %s3285_s17 = sshll.u32 %s5225_s8, 4 }
 0x375   :  { %s4159_s30 = scalar_lea.hbm %s1660_s11, 16  ;;  %p4162_p7 = scmp.lt.u32.totalorder %s1660_s11, %s5554_s3 }
 0x376   :  { %p4160_p6 = scmp.ne.s32.totalorder %s1660_s11, %s4159_s30  ;;  %p4163_p8 = scmp.lt.u32.totalorder %s4750_s29, %s4159_s30 }
 0x377   :  { %p4165_p10 = scmp.lt.u32.totalorder %s4159_s30, %s1660_s11 }
 0x378   :  { %p4164_p9 = por %p4163_p8, %p4162_p7 }
 0x37a   :  { %p4166_p11 = por %p4165_p10, %p4164_p9 }
 0x37c   :  { %p4167_p12 = pnand %p4166_p11, %p4160_p6 }
 0x37e   :  { %4170 = shalt.err (!%p4167_p12)  }
 0x37f   :  { %s4171_s13 = scalar_lea.vmem %s1670_s0, 16  ;;  %p4176_p0 = scmp.lt.s32.totalorder %s1670_s0, %s4733_s15 }
 0x380   :  { %p4172_p13 = scmp.ne.s32.totalorder %s1670_s0, %s4171_s13  ;;  %p4177_p1 = scmp.lt.s32.totalorder %s4759_s7, %s4171_s13 }
 0x382   :  { %p4178_p2 = por %p4177_p1, %p4176_p0 }
 0x384   :  { %p4179_p3 = pnand %p4178_p2, %p4172_p13 }
 0x386   :  { %4182 = shalt.err (!%p4179_p3)  }
 0x387   :  { %1672 = dma.hbm_to_vmem [thread:$0]  %s1660_s11, 16, %s1670_s0, [#allocation4 + $0x1] }
 0x388   :  { %s1676_s18 = scalar_lea.hbm %s5554_s3, %s3285_s17  ;;  %s3287_s12 = sshll.u32 %s5227_s6, 4 }
 0x389   :  { %s4183_s1 = scalar_lea.hbm %s1676_s18, 16  ;;  %p4186_p5 = scmp.lt.u32.totalorder %s1676_s18, %s5554_s3 }
 0x38a   :  { %p4184_p4 = scmp.ne.s32.totalorder %s1676_s18, %s4183_s1  ;;  %p4187_p6 = scmp.lt.u32.totalorder %s4750_s29, %s4183_s1 }
 0x38b   :  { %p4189_p8 = scmp.lt.u32.totalorder %s4183_s1, %s1676_s18 }
 0x38c   :  { %p4188_p7 = por %p4187_p6, %p4186_p5 }
 0x38e   :  { %p4190_p9 = por %p4189_p8, %p4188_p7 }
 0x390   :  { %p4191_p10 = pnand %p4190_p9, %p4184_p4 }
 0x392   :  { %4194 = shalt.err (!%p4191_p10)  }
 0x393   :  { %s4195_s5 = scalar_lea.vmem %s5229_s28, 16  ;;  %p4200_p12 = scmp.lt.s32.totalorder %s5229_s28, %s4733_s15 }
 0x394   :  { %p4196_p11 = scmp.ne.s32.totalorder %s5229_s28, %s4195_s5  ;;  %p4201_p13 = scmp.lt.s32.totalorder %s4759_s7, %s4195_s5 }
 0x396   :  { %p4202_p0 = por %p4201_p13, %p4200_p12 }
 0x398   :  { %p4203_p1 = pnand %p4202_p0, %p4196_p11 }
 0x39a   :  { %4206 = shalt.err (!%p4203_p1)  }
 0x39b   :  { %1688 = dma.hbm_to_vmem [thread:$0]  %s1676_s18, 16, %s5229_s28, [#allocation4 + $0x1] }
 0x39c   :  { %s1692_s23 = scalar_lea.hbm %s5554_s3, %s3287_s12  ;;  %s3289_s6 = sshll.u32 %s5231_s19, 4 }
 0x39d   :  { %s4207_s21 = scalar_lea.hbm %s1692_s23, 16  ;;  %p4210_p3 = scmp.lt.u32.totalorder %s1692_s23, %s5554_s3 }
 0x39e   :  { %p4208_p2 = scmp.ne.s32.totalorder %s1692_s23, %s4207_s21  ;;  %p4211_p4 = scmp.lt.u32.totalorder %s4750_s29, %s4207_s21 }
 0x39f   :  { %p4213_p6 = scmp.lt.u32.totalorder %s4207_s21, %s1692_s23 }
 0x3a0   :  { %p4212_p5 = por %p4211_p4, %p4210_p3 }
 0x3a2   :  { %p4214_p7 = por %p4213_p6, %p4212_p5 }
 0x3a4   :  { %p4215_p8 = pnand %p4214_p7, %p4208_p2 }
 0x3a6   :  { %4218 = shalt.err (!%p4215_p8)  }
 0x3a7   :  { %s4219_s28 = scalar_lea.vmem %s5233_s10, 16  ;;  %p4224_p10 = scmp.lt.s32.totalorder %s5233_s10, %s4733_s15 }
 0x3a8   :  { %p4220_p9 = scmp.ne.s32.totalorder %s5233_s10, %s4219_s28  ;;  %p4225_p11 = scmp.lt.s32.totalorder %s4759_s7, %s4219_s28 }
 0x3aa   :  { %p4226_p12 = por %p4225_p11, %p4224_p10 }
 0x3ac   :  { %p4227_p13 = pnand %p4226_p12, %p4220_p9 }
 0x3ae   :  { %4230 = shalt.err (!%p4227_p13)  }
 0x3af   :  { %1704 = dma.hbm_to_vmem [thread:$0]  %s1692_s23, 16, %s5233_s10, [#allocation4 + $0x1] }
 0x3b0   :  { %s1708_s11 = scalar_lea.hbm %s5554_s3, %s3289_s6  ;;  %s4672_s17 = smov [#allocation3 + $0x1d]  }
 0x3b1   :  { %s1717_s30 = sshll.u32 %s4672_s17, 4  ;;  %s3290_s14 = sld [smem:[#allocation8 + $0x22]]  ;;  %s1718_s30 = int_to_ptr.vmem [resolvable:$true] %s1717_s30 }
 0x3b2   :  { %s4231_s22 = scalar_lea.hbm %s1708_s11, 16  ;;  %p4234_p1 = scmp.lt.u32.totalorder %s1708_s11, %s5554_s3 }
 0x3b3   :  { %p4232_p0 = scmp.ne.s32.totalorder %s1708_s11, %s4231_s22  ;;  %p4235_p2 = scmp.lt.u32.totalorder %s4750_s29, %s4231_s22 }
 0x3b4   :  { %p4237_p4 = scmp.lt.u32.totalorder %s4231_s22, %s1708_s11 }
 0x3b5   :  { %p4236_p3 = por %p4235_p2, %p4234_p1 }
 0x3b7   :  { %p4238_p5 = por %p4237_p4, %p4236_p3 }
 0x3b9   :  { %p4239_p6 = pnand %p4238_p5, %p4232_p0 }
 0x3bb   :  { %4242 = shalt.err (!%p4239_p6)  }
 0x3bc   :  { %s4243_s10 = scalar_lea.vmem %s1718_s30, 16  ;;  %p4248_p8 = scmp.lt.s32.totalorder %s1718_s30, %s4733_s15 }
 0x3bd   :  { %p4244_p7 = scmp.ne.s32.totalorder %s1718_s30, %s4243_s10  ;;  %p4249_p9 = scmp.lt.s32.totalorder %s4759_s7, %s4243_s10 }
 0x3bf   :  { %p4250_p10 = por %p4249_p9, %p4248_p8 }
 0x3c1   :  { %p4251_p11 = pnand %p4250_p10, %p4244_p7 }
 0x3c3   :  { %4254 = shalt.err (!%p4251_p11)  }
 0x3c4   :  { %1720 = dma.hbm_to_vmem [thread:$0]  %s1708_s11, 16, %s1718_s30, [#allocation4 + $0x1] }
 0x3c5   :  { %s4673_s20 = smov [#allocation3 + $0x25]   ;;  %s3292_s12 = sld [smem:[#allocation8 + $0x23]] }
 0x3c6   :  { %s1733_s18 = sshll.u32 %s4673_s20, 4  ;;  %s4674_s1 = smov [#allocation3 + $0x2d]   ;;  %s1734_s18 = int_to_ptr.vmem [resolvable:$true] %s1733_s18 }
 0x3c7   :  { %s1749_s25 = sshll.u32 %s4674_s1, 4  ;;  %s5282_s26 = sld [smem:[#allocation7 + $0x18]]  ;;  %s5287_s25 = int_to_ptr.vmem [resolvable:$true] %s1749_s25 }
 0x3c8   :  { %s3291_s5 = sshll.u32 %s3290_s14, 4 }
 0x3c9   :  { %s1724_s23 = scalar_lea.hbm %s5554_s3, %s3291_s5 }
 0x3ca   :  { %s4255_s6 = scalar_lea.hbm %s1724_s23, 16  ;;  %p4258_p13 = scmp.lt.u32.totalorder %s1724_s23, %s5554_s3 }
 0x3cb   :  { %p4256_p12 = scmp.ne.s32.totalorder %s1724_s23, %s4255_s6  ;;  %p4259_p0 = scmp.lt.u32.totalorder %s4750_s29, %s4255_s6 }
 0x3cc   :  { %p4261_p2 = scmp.lt.u32.totalorder %s4255_s6, %s1724_s23 }
 0x3cd   :  { %p4260_p1 = por %p4259_p0, %p4258_p13 }
 0x3cf   :  { %p4262_p3 = por %p4261_p2, %p4260_p1 }
 0x3d1   :  { %p4263_p4 = pnand %p4262_p3, %p4256_p12 }
 0x3d3   :  { %4266 = shalt.err (!%p4263_p4)  }
 0x3d4   :  { %s4267_s16 = scalar_lea.vmem %s1734_s18, 16  ;;  %p4272_p6 = scmp.lt.s32.totalorder %s1734_s18, %s4733_s15 }
 0x3d5   :  { %p4268_p5 = scmp.ne.s32.totalorder %s1734_s18, %s4267_s16  ;;  %p4273_p7 = scmp.lt.s32.totalorder %s4759_s7, %s4267_s16 }
 0x3d7   :  { %p4274_p8 = por %p4273_p7, %p4272_p6 }
 0x3d9   :  { %p4275_p9 = pnand %p4274_p8, %p4268_p5 }
 0x3db   :  { %4278 = shalt.err (!%p4275_p9)  }
 0x3dc   :  { %1736 = dma.hbm_to_vmem [thread:$0]  %s1724_s23, 16, %s1734_s18, [#allocation4 + $0x1] }
 0x3dd   :  { %s3293_s28 = sshll.u32 %s3292_s12, 4 }
 0x3de   :  { %s1740_s11 = scalar_lea.hbm %s5554_s3, %s3293_s28 }
 0x3df   :  { %s4279_s17 = scalar_lea.hbm %s1740_s11, 16  ;;  %p4282_p11 = scmp.lt.u32.totalorder %s1740_s11, %s5554_s3 }
 0x3e0   :  { %p4280_p10 = scmp.ne.s32.totalorder %s1740_s11, %s4279_s17  ;;  %p4283_p12 = scmp.lt.u32.totalorder %s4750_s29, %s4279_s17 }
 0x3e1   :  { %p4285_p0 = scmp.lt.u32.totalorder %s4279_s17, %s1740_s11 }
 0x3e2   :  { %p4284_p13 = por %p4283_p12, %p4282_p11 }
 0x3e4   :  { %p4286_p1 = por %p4285_p0, %p4284_p13 }
 0x3e6   :  { %p4287_p2 = pnand %p4286_p1, %p4280_p10 }
 0x3e8   :  { %4290 = shalt.err (!%p4287_p2)  }
 0x3e9   :  { %s4291_s22 = scalar_lea.vmem %s5287_s25, 16  ;;  %p4296_p4 = scmp.lt.s32.totalorder %s5287_s25, %s4733_s15 }
 0x3ea   :  { %p4292_p3 = scmp.ne.s32.totalorder %s5287_s25, %s4291_s22  ;;  %p4297_p5 = scmp.lt.s32.totalorder %s4759_s7, %s4291_s22 }
 0x3ec   :  { %p4298_p6 = por %p4297_p5, %p4296_p4 }
 0x3ee   :  { %p4299_p7 = pnand %p4298_p6, %p4292_p3 }
 0x3f0   :  { %4302 = shalt.err (!%p4299_p7)  }
 0x3f1   :  { %1752 = dma.hbm_to_vmem [thread:$0]  %s1740_s11, 16, %s5287_s25, [#allocation4 + $0x1] }
 0x3f2   :  { %s1755_s10 = scalar_lea.vmem %s5553_s2, %s5282_s26 }
 0x3f3   :  { %v1774_v24 = vld [vmem:[%s1755_s10] sm:$0x1] }
 0x3f4   :  { %1775 = vst [vmem:[#allocation2 + $0x6] sm:$0x1] %v1774_v24 }
 0x3f5   :  { %1800 = vsyncadd [#allocation4], 16  ;;  %s3295_s20 = sld [smem:[#allocation7 + $0x19]] }
 0x3fb   :  { %s1803_s1 = scalar_lea.vmem %s5553_s2, %s3295_s20 }
 0x3fc   :  { %v1822_v25 = vld [vmem:[%s1803_s1] sm:$0x1] }
 0x3fd   :  { %1823 = vst [vmem:[#allocation2 + $0xe] sm:$0x1] %v1822_v25 }
 0x3fe   :  { %1848 = vsyncadd [#allocation4], 16  ;;  %s3296_s5 = sld [smem:[#allocation7 + $0x1a]] }
 0x404   :  { %s1851_s25 = scalar_lea.vmem %s5553_s2, %s3296_s5 }
 0x405   :  { %v1870_v26 = vld [vmem:[%s1851_s25] sm:$0x1] }
 0x406   :  { %1871 = vst [vmem:[#allocation2 + $0x16] sm:$0x1] %v1870_v26 }
 0x407   :  { %1896 = vsyncadd [#allocation4], 16  ;;  %s3297_s26 = sld [smem:[#allocation7 + $0x1b]] }
 0x40d   :  { %s1899_s21 = scalar_lea.vmem %s5553_s2, %s3297_s26 }
 0x40e   :  { %v1918_v27 = vld [vmem:[%s1899_s21] sm:$0x1] }
 0x40f   :  { %1919 = vst [vmem:[#allocation2 + $0x1e] sm:$0x1] %v1918_v27 }
 0x410   :  { %1944 = vsyncadd [#allocation4], 16  ;;  %s3298_s9 = sld [smem:[#allocation8 + $0x24]]  ;;  %s4675_s16 = smov [#allocation3 + $0x6]  }
 0x411   :  { %s1957_s28 = sshll.u32 %s4675_s16, 4  ;;  %s5321_s19 = sld [smem:[#allocation8 + $0x25]]  ;;  %s1958_s28 = int_to_ptr.vmem [resolvable:$true] %s1957_s28 }
 0x412   :  { %s4676_s27 = smov [#allocation3 + $0xe]   ;;  %s5323_s17 = sld [smem:[#allocation8 + $0x26]] }
 0x413   :  { %s1973_s11 = sshll.u32 %s4676_s27, 4  ;;  %s4677_s30 = smov [#allocation3 + $0x16]   ;;  %s5325_s11 = int_to_ptr.vmem [resolvable:$true] %s1973_s11 }
 0x414   :  { %s1989_s14 = sshll.u32 %s4677_s30, 4  ;;  %s5327_s22 = sld [smem:[#allocation8 + $0x27]]  ;;  %s5329_s14 = int_to_ptr.vmem [resolvable:$true] %s1989_s14 }
 0x416   :  { %s3299_s13 = sshll.u32 %s3298_s9, 4 }
 0x417   :  { %s1948_s20 = scalar_lea.hbm %s5554_s3, %s3299_s13  ;;  %s3301_s18 = sshll.u32 %s5321_s19, 4 }
 0x418   :  { %s4303_s12 = scalar_lea.hbm %s1948_s20, 16  ;;  %p4306_p9 = scmp.lt.u32.totalorder %s1948_s20, %s5554_s3 }
 0x419   :  { %p4304_p8 = scmp.ne.s32.totalorder %s1948_s20, %s4303_s12  ;;  %p4307_p10 = scmp.lt.u32.totalorder %s4750_s29, %s4303_s12 }
 0x41a   :  { %p4309_p12 = scmp.lt.u32.totalorder %s4303_s12, %s1948_s20 }
 0x41b   :  { %p4308_p11 = por %p4307_p10, %p4306_p9 }
 0x41d   :  { %p4310_p13 = por %p4309_p12, %p4308_p11 }
 0x41f   :  { %p4311_p0 = pnand %p4310_p13, %p4304_p8 }
 0x421   :  { %4314 = shalt.err (!%p4311_p0)  }
 0x422   :  { %s4315_s0 = scalar_lea.vmem %s1958_s28, 16  ;;  %p4320_p2 = scmp.lt.s32.totalorder %s1958_s28, %s4733_s15 }
 0x423   :  { %p4316_p1 = scmp.ne.s32.totalorder %s1958_s28, %s4315_s0  ;;  %p4321_p3 = scmp.lt.s32.totalorder %s4759_s7, %s4315_s0 }
 0x425   :  { %p4322_p4 = por %p4321_p3, %p4320_p2 }
 0x427   :  { %p4323_p5 = pnand %p4322_p4, %p4316_p1 }
 0x429   :  { %4326 = shalt.err (!%p4323_p5)  }
 0x42a   :  { %1960 = dma.hbm_to_vmem [thread:$0]  %s1948_s20, 16, %s1958_s28, [#allocation4 + $0x1] }
 0x42b   :  { %s1964_s26 = scalar_lea.hbm %s5554_s3, %s3301_s18  ;;  %s3303_s23 = sshll.u32 %s5323_s17, 4 }
 0x42c   :  { %s4327_s6 = scalar_lea.hbm %s1964_s26, 16  ;;  %p4330_p7 = scmp.lt.u32.totalorder %s1964_s26, %s5554_s3 }
 0x42d   :  { %p4328_p6 = scmp.ne.s32.totalorder %s1964_s26, %s4327_s6  ;;  %p4331_p8 = scmp.lt.u32.totalorder %s4750_s29, %s4327_s6 }
 0x42e   :  { %p4333_p10 = scmp.lt.u32.totalorder %s4327_s6, %s1964_s26 }
 0x42f   :  { %p4332_p9 = por %p4331_p8, %p4330_p7 }
 0x431   :  { %p4334_p11 = por %p4333_p10, %p4332_p9 }
 0x433   :  { %p4335_p12 = pnand %p4334_p11, %p4328_p6 }
 0x435   :  { %4338 = shalt.err (!%p4335_p12)  }
 0x436   :  { %s4339_s16 = scalar_lea.vmem %s5325_s11, 16  ;;  %p4344_p0 = scmp.lt.s32.totalorder %s5325_s11, %s4733_s15 }
 0x437   :  { %p4340_p13 = scmp.ne.s32.totalorder %s5325_s11, %s4339_s16  ;;  %p4345_p1 = scmp.lt.s32.totalorder %s4759_s7, %s4339_s16 }
 0x439   :  { %p4346_p2 = por %p4345_p1, %p4344_p0 }
 0x43b   :  { %p4347_p3 = pnand %p4346_p2, %p4340_p13 }
 0x43d   :  { %4350 = shalt.err (!%p4347_p3)  }
 0x43e   :  { %1976 = dma.hbm_to_vmem [thread:$0]  %s1964_s26, 16, %s5325_s11, [#allocation4 + $0x1] }
 0x43f   :  { %s1980_s27 = scalar_lea.hbm %s5554_s3, %s3303_s23  ;;  %s3305_s17 = sshll.u32 %s5327_s22, 4 }
 0x440   :  { %s4351_s30 = scalar_lea.hbm %s1980_s27, 16  ;;  %p4354_p5 = scmp.lt.u32.totalorder %s1980_s27, %s5554_s3 }
 0x441   :  { %p4352_p4 = scmp.ne.s32.totalorder %s1980_s27, %s4351_s30  ;;  %p4355_p6 = scmp.lt.u32.totalorder %s4750_s29, %s4351_s30 }
 0x442   :  { %p4357_p8 = scmp.lt.u32.totalorder %s4351_s30, %s1980_s27 }
 0x443   :  { %p4356_p7 = por %p4355_p6, %p4354_p5 }
 0x445   :  { %p4358_p9 = por %p4357_p8, %p4356_p7 }
 0x447   :  { %p4359_p10 = pnand %p4358_p9, %p4352_p4 }
 0x449   :  { %4362 = shalt.err (!%p4359_p10)  }
 0x44a   :  { %s4363_s11 = scalar_lea.vmem %s5329_s14, 16  ;;  %p4368_p12 = scmp.lt.s32.totalorder %s5329_s14, %s4733_s15 }
 0x44b   :  { %p4364_p11 = scmp.ne.s32.totalorder %s5329_s14, %s4363_s11  ;;  %p4369_p13 = scmp.lt.s32.totalorder %s4759_s7, %s4363_s11 }
 0x44d   :  { %p4370_p0 = por %p4369_p13, %p4368_p12 }
 0x44f   :  { %p4371_p1 = pnand %p4370_p0, %p4364_p11 }
 0x451   :  { %4374 = shalt.err (!%p4371_p1)  }
 0x452   :  { %1992 = dma.hbm_to_vmem [thread:$0]  %s1980_s27, 16, %s5329_s14, [#allocation4 + $0x1] }
 0x453   :  { %s1996_s20 = scalar_lea.hbm %s5554_s3, %s3305_s17  ;;  %s4678_s18 = smov [#allocation3 + $0x1e]  }
 0x454   :  { %s2005_s12 = sshll.u32 %s4678_s18, 4  ;;  %s3306_s1 = sld [smem:[#allocation8 + $0x28]]  ;;  %s2006_s12 = int_to_ptr.vmem [resolvable:$true] %s2005_s12 }
 0x455   :  { %s4375_s5 = scalar_lea.hbm %s1996_s20, 16  ;;  %p4378_p3 = scmp.lt.u32.totalorder %s1996_s20, %s5554_s3 }
 0x456   :  { %p4376_p2 = scmp.ne.s32.totalorder %s1996_s20, %s4375_s5  ;;  %p4379_p4 = scmp.lt.u32.totalorder %s4750_s29, %s4375_s5 }
 0x457   :  { %p4381_p6 = scmp.lt.u32.totalorder %s4375_s5, %s1996_s20 }
 0x458   :  { %p4380_p5 = por %p4379_p4, %p4378_p3 }
 0x45a   :  { %p4382_p7 = por %p4381_p6, %p4380_p5 }
 0x45c   :  { %p4383_p8 = pnand %p4382_p7, %p4376_p2 }
 0x45e   :  { %4386 = shalt.err (!%p4383_p8)  }
 0x45f   :  { %s4387_s14 = scalar_lea.vmem %s2006_s12, 16  ;;  %p4392_p10 = scmp.lt.s32.totalorder %s2006_s12, %s4733_s15 }
 0x460   :  { %p4388_p9 = scmp.ne.s32.totalorder %s2006_s12, %s4387_s14  ;;  %p4393_p11 = scmp.lt.s32.totalorder %s4759_s7, %s4387_s14 }
 0x462   :  { %p4394_p12 = por %p4393_p11, %p4392_p10 }
 0x464   :  { %p4395_p13 = pnand %p4394_p12, %p4388_p9 }
 0x466   :  { %4398 = shalt.err (!%p4395_p13)  }
 0x467   :  { %2008 = dma.hbm_to_vmem [thread:$0]  %s1996_s20, 16, %s2006_s12, [#allocation4 + $0x1] }
 0x468   :  { %s4679_s25 = smov [#allocation3 + $0x26]   ;;  %s3308_s23 = sld [smem:[#allocation8 + $0x29]] }
 0x469   :  { %s2021_s26 = sshll.u32 %s4679_s25, 4  ;;  %s4680_s6 = smov [#allocation3 + $0x2e]   ;;  %s2022_s26 = int_to_ptr.vmem [resolvable:$true] %s2021_s26 }
 0x46a   :  { %s2037_s21 = sshll.u32 %s4680_s6, 4  ;;  %s5378_s9 = sld [smem:[#allocation7 + $0x1c]]  ;;  %s5383_s21 = int_to_ptr.vmem [resolvable:$true] %s2037_s21 }
 0x46b   :  { %s3307_s16 = sshll.u32 %s3306_s1, 4 }
 0x46c   :  { %s2012_s27 = scalar_lea.hbm %s5554_s3, %s3307_s16 }
 0x46d   :  { %s4399_s17 = scalar_lea.hbm %s2012_s27, 16  ;;  %p4402_p1 = scmp.lt.u32.totalorder %s2012_s27, %s5554_s3 }
 0x46e   :  { %p4400_p0 = scmp.ne.s32.totalorder %s2012_s27, %s4399_s17  ;;  %p4403_p2 = scmp.lt.u32.totalorder %s4750_s29, %s4399_s17 }
 0x46f   :  { %p4405_p4 = scmp.lt.u32.totalorder %s4399_s17, %s2012_s27 }
 0x470   :  { %p4404_p3 = por %p4403_p2, %p4402_p1 }
 0x472   :  { %p4406_p5 = por %p4405_p4, %p4404_p3 }
 0x474   :  { %p4407_p6 = pnand %p4406_p5, %p4400_p0 }
 0x476   :  { %4410 = shalt.err (!%p4407_p6)  }
 0x477   :  { %s4411_s24 = scalar_lea.vmem %s2022_s26, 16  ;;  %p4416_p8 = scmp.lt.s32.totalorder %s2022_s26, %s4733_s15 }
 0x478   :  { %p4412_p7 = scmp.ne.s32.totalorder %s2022_s26, %s4411_s24  ;;  %p4417_p9 = scmp.lt.s32.totalorder %s4759_s7, %s4411_s24 }
 0x47a   :  { %p4418_p10 = por %p4417_p9, %p4416_p8 }
 0x47c   :  { %p4419_p11 = pnand %p4418_p10, %p4412_p7 }
 0x47e   :  { %4422 = shalt.err (!%p4419_p11)  }
 0x47f   :  { %2024 = dma.hbm_to_vmem [thread:$0]  %s2012_s27, 16, %s2022_s26, [#allocation4 + $0x1] }
 0x480   :  { %s3309_s11 = sshll.u32 %s3308_s23, 4 }
 0x481   :  { %s2028_s20 = scalar_lea.hbm %s5554_s3, %s3309_s11 }
 0x482   :  { %s4423_s18 = scalar_lea.hbm %s2028_s20, 16  ;;  %p4426_p13 = scmp.lt.u32.totalorder %s2028_s20, %s5554_s3 }
 0x483   :  { %p4424_p12 = scmp.ne.s32.totalorder %s2028_s20, %s4423_s18  ;;  %p4427_p0 = scmp.lt.u32.totalorder %s4750_s29, %s4423_s18 }
 0x484   :  { %p4429_p2 = scmp.lt.u32.totalorder %s4423_s18, %s2028_s20 }
 0x485   :  { %p4428_p1 = por %p4427_p0, %p4426_p13 }
 0x487   :  { %p4430_p3 = por %p4429_p2, %p4428_p1 }
 0x489   :  { %p4431_p4 = pnand %p4430_p3, %p4424_p12 }
 0x48b   :  { %4434 = shalt.err (!%p4431_p4)  }
 0x48c   :  { %s4435_s5 = scalar_lea.vmem %s5383_s21, 16  ;;  %p4440_p6 = scmp.lt.s32.totalorder %s5383_s21, %s4733_s15 }
 0x48d   :  { %p4436_p5 = scmp.ne.s32.totalorder %s5383_s21, %s4435_s5  ;;  %p4441_p7 = scmp.lt.s32.totalorder %s4759_s7, %s4435_s5 }
 0x48f   :  { %p4442_p8 = por %p4441_p7, %p4440_p6 }
 0x491   :  { %p4443_p9 = pnand %p4442_p8, %p4436_p5 }
 0x493   :  { %4446 = shalt.err (!%p4443_p9)  }
 0x494   :  { %2040 = dma.hbm_to_vmem [thread:$0]  %s2028_s20, 16, %s5383_s21, [#allocation4 + $0x1] }
 0x495   :  { %s2043_s14 = scalar_lea.vmem %s5553_s2, %s5378_s9 }
 0x496   :  { %v2062_v28 = vld [vmem:[%s2043_s14] sm:$0x1] }
 0x497   :  { %2063 = vst [vmem:[#allocation2 + $0x7] sm:$0x1] %v2062_v28 }
 0x498   :  { %2088 = vsyncadd [#allocation4], 16  ;;  %s3311_s25 = sld [smem:[#allocation7 + $0x1d]] }
 0x49e   :  { %s2091_s6 = scalar_lea.vmem %s5553_s2, %s3311_s25 }
 0x49f   :  { %v2110_v29 = vld [vmem:[%s2091_s6] sm:$0x1] }
 0x4a0   :  { %2111 = vst [vmem:[#allocation2 + $0xf] sm:$0x1] %v2110_v29 }
 0x4a1   :  { %2136 = vsyncadd [#allocation4], 16  ;;  %s3312_s16 = sld [smem:[#allocation7 + $0x1e]] }
 0x4a7   :  { %s2139_s21 = scalar_lea.vmem %s5553_s2, %s3312_s16 }
 0x4a8   :  { %v2158_v30 = vld [vmem:[%s2139_s21] sm:$0x1] }
 0x4a9   :  { %2159 = vst [vmem:[#allocation2 + $0x17] sm:$0x1] %v2158_v30 }
 0x4aa   :  { %2184 = vsyncadd [#allocation4], 16  ;;  %s3313_s9 = sld [smem:[#allocation7 + $0x1f]] }
 0x4b0   :  { %s2187_s30 = scalar_lea.vmem %s5553_s2, %s3313_s9 }
 0x4b1   :  { %v2206_v31 = vld [vmem:[%s2187_s30] sm:$0x1] }
 0x4b2   :  { %2207 = vst [vmem:[#allocation2 + $0x1f] sm:$0x1] %v2206_v31 }
 0x4b3   :  { %2232 = vsyncadd [#allocation4], 16  ;;  %s3314_s13 = sld [smem:[#allocation8 + $0x2a]]  ;;  %s4681_s24 = smov [#allocation3 + $0x7]  }
 0x4b4   :  { %s2245_s11 = sshll.u32 %s4681_s24, 4  ;;  %s5417_s22 = sld [smem:[#allocation8 + $0x2b]]  ;;  %s2246_s11 = int_to_ptr.vmem [resolvable:$true] %s2245_s11 }
 0x4b5   :  { %s4682_s10 = smov [#allocation3 + $0xf]   ;;  %s5419_s18 = sld [smem:[#allocation8 + $0x2c]] }
 0x4b6   :  { %s2261_s20 = sshll.u32 %s4682_s10, 4  ;;  %s4683_s12 = smov [#allocation3 + $0x17]   ;;  %s5421_s20 = int_to_ptr.vmem [resolvable:$true] %s2261_s20 }
 0x4b7   :  { %s2277_s1 = sshll.u32 %s4683_s12, 4  ;;  %s5423_s2 = sld [smem:[#allocation8 + $0x2d]]  ;;  %s5425_s1 = int_to_ptr.vmem [resolvable:$true] %s2277_s1 }
 0x4b9   :  { %s3315_s5 = sshll.u32 %s3314_s13, 4 }
 0x4ba   :  { %s2236_s14 = scalar_lea.hbm %s5554_s3, %s3315_s5  ;;  %s3317_s25 = sshll.u32 %s5417_s22, 4 }
 0x4bb   :  { %s4447_s26 = scalar_lea.hbm %s2236_s14, 16  ;;  %p4450_p11 = scmp.lt.u32.totalorder %s2236_s14, %s5554_s3 }
 0x4bc   :  { %p4448_p10 = scmp.ne.s32.totalorder %s2236_s14, %s4447_s26  ;;  %p4451_p12 = scmp.lt.u32.totalorder %s4750_s29, %s4447_s26 }
 0x4bd   :  { %p4453_p0 = scmp.lt.u32.totalorder %s4447_s26, %s2236_s14 }
 0x4be   :  { %p4452_p13 = por %p4451_p12, %p4450_p11 }
 0x4c0   :  { %p4454_p1 = por %p4453_p0, %p4452_p13 }
 0x4c2   :  { %p4455_p2 = pnand %p4454_p1, %p4448_p10 }
 0x4c4   :  { %4458 = shalt.err (!%p4455_p2)  }
 0x4c5   :  { %s4459_s16 = scalar_lea.vmem %s2246_s11, 16  ;;  %p4464_p4 = scmp.lt.s32.totalorder %s2246_s11, %s4733_s15 }
 0x4c6   :  { %p4460_p3 = scmp.ne.s32.totalorder %s2246_s11, %s4459_s16  ;;  %p4465_p5 = scmp.lt.s32.totalorder %s4759_s7, %s4459_s16 }
 0x4c8   :  { %p4466_p6 = por %p4465_p5, %p4464_p4 }
 0x4ca   :  { %p4467_p7 = pnand %p4466_p6, %p4460_p3 }
 0x4cc   :  { %4470 = shalt.err (!%p4467_p7)  }
 0x4cd   :  { %2248 = dma.hbm_to_vmem [thread:$0]  %s2236_s14, 16, %s2246_s11, [#allocation4 + $0x1] }
 0x4ce   :  { %s2252_s21 = scalar_lea.hbm %s5554_s3, %s3317_s25  ;;  %s3319_s9 = sshll.u32 %s5419_s18, 4 }
 0x4cf   :  { %s4471_s27 = scalar_lea.hbm %s2252_s21, 16  ;;  %p4474_p9 = scmp.lt.u32.totalorder %s2252_s21, %s5554_s3 }
 0x4d0   :  { %p4472_p8 = scmp.ne.s32.totalorder %s2252_s21, %s4471_s27  ;;  %p4475_p10 = scmp.lt.u32.totalorder %s4750_s29, %s4471_s27 }
 0x4d1   :  { %p4477_p12 = scmp.lt.u32.totalorder %s4471_s27, %s2252_s21 }
 0x4d2   :  { %p4476_p11 = por %p4475_p10, %p4474_p9 }
 0x4d4   :  { %p4478_p13 = por %p4477_p12, %p4476_p11 }
 0x4d6   :  { %p4479_p0 = pnand %p4478_p13, %p4472_p8 }
 0x4d8   :  { %4482 = shalt.err (!%p4479_p0)  }
 0x4d9   :  { %s4483_s13 = scalar_lea.vmem %s5421_s20, 16  ;;  %p4488_p2 = scmp.lt.s32.totalorder %s5421_s20, %s4733_s15 }
 0x4da   :  { %p4484_p1 = scmp.ne.s32.totalorder %s5421_s20, %s4483_s13  ;;  %p4489_p3 = scmp.lt.s32.totalorder %s4759_s7, %s4483_s13 }
 0x4dc   :  { %p4490_p4 = por %p4489_p3, %p4488_p2 }
 0x4de   :  { %p4491_p5 = pnand %p4490_p4, %p4484_p1 }
 0x4e0   :  { %4494 = shalt.err (!%p4491_p5)  }
 0x4e1   :  { %2264 = dma.hbm_to_vmem [thread:$0]  %s2252_s21, 16, %s5421_s20, [#allocation4 + $0x1] }
 0x4e2   :  { %s2268_s22 = scalar_lea.hbm %s5554_s3, %s3319_s9  ;;  %s3321_s10 = sshll.u32 %s5423_s2, 4 }
 0x4e3   :  { %s4495_s18 = scalar_lea.hbm %s2268_s22, 16  ;;  %p4498_p7 = scmp.lt.u32.totalorder %s2268_s22, %s5554_s3 }
 0x4e4   :  { %p4496_p6 = scmp.ne.s32.totalorder %s2268_s22, %s4495_s18  ;;  %p4499_p8 = scmp.lt.u32.totalorder %s4750_s29, %s4495_s18 }
 0x4e5   :  { %p4501_p10 = scmp.lt.u32.totalorder %s4495_s18, %s2268_s22 }
 0x4e6   :  { %p4500_p9 = por %p4499_p8, %p4498_p7 }
 0x4e8   :  { %p4502_p11 = por %p4501_p10, %p4500_p9 }
 0x4ea   :  { %p4503_p12 = pnand %p4502_p11, %p4496_p6 }
 0x4ec   :  { %4506 = shalt.err (!%p4503_p12)  }
 0x4ed   :  { %s4507_s20 = scalar_lea.vmem %s5425_s1, 16  ;;  %p4512_p0 = scmp.lt.s32.totalorder %s5425_s1, %s4733_s15 }
 0x4ee   :  { %p4508_p13 = scmp.ne.s32.totalorder %s5425_s1, %s4507_s20  ;;  %p4513_p1 = scmp.lt.s32.totalorder %s4759_s7, %s4507_s20 }
 0x4f0   :  { %p4514_p2 = por %p4513_p1, %p4512_p0 }
 0x4f2   :  { %p4515_p3 = pnand %p4514_p2, %p4508_p13 }
 0x4f4   :  { %4518 = shalt.err (!%p4515_p3)  }
 0x4f5   :  { %2280 = dma.hbm_to_vmem [thread:$0]  %s2268_s22, 16, %s5425_s1, [#allocation4 + $0x1] }
 0x4f6   :  { %s2284_s8 = scalar_lea.hbm %s5554_s3, %s3321_s10  ;;  %s4684_s14 = smov [#allocation3 + $0x1f]  }
 0x4f7   :  { %s2293_s25 = sshll.u32 %s4684_s14, 4  ;;  %s3322_s26 = sld [smem:[#allocation8 + $0x2e]]  ;;  %s2294_s25 = int_to_ptr.vmem [resolvable:$true] %s2293_s25 }
 0x4f8   :  { %s4519_s23 = scalar_lea.hbm %s2284_s8, 16  ;;  %p4522_p5 = scmp.lt.u32.totalorder %s2284_s8, %s5554_s3 }
 0x4f9   :  { %p4520_p4 = scmp.ne.s32.totalorder %s2284_s8, %s4519_s23  ;;  %p4523_p6 = scmp.lt.u32.totalorder %s4750_s29, %s4519_s23 }
 0x4fa   :  { %p4525_p8 = scmp.lt.u32.totalorder %s4519_s23, %s2284_s8 }
 0x4fb   :  { %p4524_p7 = por %p4523_p6, %p4522_p5 }
 0x4fd   :  { %p4526_p9 = por %p4525_p8, %p4524_p7 }
 0x4ff   :  { %p4527_p10 = pnand %p4526_p9, %p4520_p4 }
 0x501   :  { %4530 = shalt.err (!%p4527_p10)  }
 0x502   :  { %s4531_s1 = scalar_lea.vmem %s2294_s25, 16  ;;  %p4536_p12 = scmp.lt.s32.totalorder %s2294_s25, %s4733_s15 }
 0x503   :  { %p4532_p11 = scmp.ne.s32.totalorder %s2294_s25, %s4531_s1  ;;  %p4537_p13 = scmp.lt.s32.totalorder %s4759_s7, %s4531_s1 }
 0x505   :  { %p4538_p0 = por %p4537_p13, %p4536_p12 }
 0x507   :  { %p4539_p1 = pnand %p4538_p0, %p4532_p11 }
 0x509   :  { %4542 = shalt.err (!%p4539_p1)  }
 0x50a   :  { %2296 = dma.hbm_to_vmem [thread:$0]  %s2284_s8, 16, %s2294_s25, [#allocation4 + $0x1] }
 0x50b   :  { %s4685_s28 = smov [#allocation3 + $0x27]   ;;  %s3324_s21 = sld [smem:[#allocation8 + $0x2f]] }
 0x50c   :  { %s2309_s19 = sshll.u32 %s4685_s28, 4  ;;  %s4686_s9 = smov [#allocation3 + $0x2f]   ;;  %s2310_s19 = int_to_ptr.vmem [resolvable:$true] %s2309_s19 }
 0x50d   :  { %s2325_s27 = sshll.u32 %s4686_s9, 4  ;;  %s3323_s17 = sshll.u32 %s3322_s26, 4  ;;  %s5477_s27 = int_to_ptr.vmem [resolvable:$true] %s2325_s27 }
 0x50e   :  { %s2300_s24 = scalar_lea.hbm %s5554_s3, %s3323_s17 }
 0x50f   :  { %s4543_s11 = scalar_lea.hbm %s2300_s24, 16  ;;  %p4546_p3 = scmp.lt.u32.totalorder %s2300_s24, %s5554_s3 }
 0x510   :  { %p4544_p2 = scmp.ne.s32.totalorder %s2300_s24, %s4543_s11  ;;  %p4547_p4 = scmp.lt.u32.totalorder %s4750_s29, %s4543_s11 }
 0x511   :  { %p4549_p6 = scmp.lt.u32.totalorder %s4543_s11, %s2300_s24 }
 0x512   :  { %p4548_p5 = por %p4547_p4, %p4546_p3 }
 0x514   :  { %p4550_p7 = por %p4549_p6, %p4548_p5 }
 0x516   :  { %p4551_p8 = pnand %p4550_p7, %p4544_p2 }
 0x518   :  { %4554 = shalt.err (!%p4551_p8)  }
 0x519   :  { %s4555_s18 = scalar_lea.vmem %s2310_s19, 16  ;;  %p4560_p10 = scmp.lt.s32.totalorder %s2310_s19, %s4733_s15 }
 0x51a   :  { %p4556_p9 = scmp.ne.s32.totalorder %s2310_s19, %s4555_s18  ;;  %p4561_p11 = scmp.lt.s32.totalorder %s4759_s7, %s4555_s18 }
 0x51c   :  { %p4562_p12 = por %p4561_p11, %p4560_p10 }
 0x51e   :  { %p4563_p13 = pnand %p4562_p12, %p4556_p9 }
 0x520   :  { %4566 = shalt.err (!%p4563_p13)  }
 0x521   :  { %2312 = dma.hbm_to_vmem [thread:$0]  %s2300_s24, 16, %s2310_s19, [#allocation4 + $0x1] }
 0x522   :  { %s3325_s12 = sshll.u32 %s3324_s21, 4 }
 0x523   :  { %s2316_s2 = scalar_lea.hbm %s5554_s3, %s3325_s12 }
 0x524   :  { %s4567_s0 = scalar_lea.hbm %s2316_s2, 16  ;;  %p4570_p1 = scmp.lt.u32.totalorder %s2316_s2, %s5554_s3 }
 0x525   :  { %p4568_p0 = scmp.ne.s32.totalorder %s2316_s2, %s4567_s0  ;;  %p4571_p2 = scmp.lt.u32.totalorder %s4750_s29, %s4567_s0 }
 0x526   :  { %p4573_p4 = scmp.lt.u32.totalorder %s4567_s0, %s2316_s2 }
 0x527   :  { %p4572_p3 = por %p4571_p2, %p4570_p1 }
 0x529   :  { %p4574_p5 = por %p4573_p4, %p4572_p3 }
 0x52b   :  { %p4575_p6 = pnand %p4574_p5, %p4568_p0 }
 0x52d   :  { %4578 = shalt.err (!%p4575_p6)  }
 0x52e   :  { %s4579_s25 = scalar_lea.vmem %s5477_s27, 16  ;;  %p4584_p8 = scmp.lt.s32.totalorder %s5477_s27, %s4733_s15 }
 0x52f   :  { %p4580_p7 = scmp.ne.s32.totalorder %s5477_s27, %s4579_s25  ;;  %p4585_p9 = scmp.lt.s32.totalorder %s4759_s7, %s4579_s25 }
 0x531   :  { %p4586_p10 = por %p4585_p9, %p4584_p8 }
 0x533   :  { %p4587_p11 = pnand %p4586_p10, %p4580_p7 }
 0x535   :  { %4590 = shalt.err (!%p4587_p11)  }
 0x536   :  { %2328 = dma.hbm_to_vmem [thread:$0]  %s2316_s2, 16, %s5477_s27, [#allocation4 + $0x1] }
 0x537   :  { %4603 = dma.done.wait [#allocation4], 64 }
 0x538   :  { %4604 = vsyncadd [#allocation4], 4294967232 }
 0x539   :  { %4605 = dma.done.wait [#allocation4 + $0x1], 96 }
 0x53a   :  { %4606 = vsyncadd [#allocation4 + $0x1], 4294967200 }
 0x53b   :  { %4607 = dma.done.wait [#allocation4], 64 }
 0x53c   :  { %4608 = vsyncadd [#allocation4], 4294967232 }
 0x53d   :  { %4609 = dma.done.wait [#allocation4 + $0x1], 96 }
 0x53e   :  { %4610 = vsyncadd [#allocation4 + $0x1], 4294967200 }
 0x53f   :  { %4611 = dma.done.wait [#allocation4], 64 }
 0x540   :  { %4612 = vsyncadd [#allocation4], 4294967232 }
 0x541   :  { %4613 = dma.done.wait [#allocation4 + $0x1], 96 }
 0x542   :  { %4614 = vsyncadd [#allocation4 + $0x1], 4294967200 }
 0x543   :  { %4615 = dma.done.wait [#allocation4], 64 }
 0x544   :  { %4616 = vsyncadd [#allocation4], 4294967232 }
 0x545   :  { %4617 = dma.done.wait [#allocation4 + $0x1], 96 }
 0x546   :  { %4618 = vsyncadd [#allocation4 + $0x1], 4294967200 }
 0x547   :  { %4619 = dma.done.wait [#allocation4], 64 }
 0x548   :  { %4620 = vsyncadd [#allocation4], 4294967232 }
 0x549   :  { %4621 = dma.done.wait [#allocation4 + $0x1], 96 }
 0x54a   :  { %4622 = vsyncadd [#allocation4 + $0x1], 4294967200 }
 0x54b   :  { %4623 = dma.done.wait [#allocation4], 64 }
 0x54c   :  { %4624 = vsyncadd [#allocation4], 4294967232 }
 0x54d   :  { %4625 = dma.done.wait [#allocation4 + $0x1], 96 }
 0x54e   :  { %4626 = vsyncadd [#allocation4 + $0x1], 4294967200 }
 0x54f   :  { %4627 = dma.done.wait [#allocation4], 64 }
 0x550   :  { %4628 = vsyncadd [#allocation4], 4294967232 }
 0x551   :  { %4629 = dma.done.wait [#allocation4 + $0x1], 96 }
 0x552   :  { %4630 = vsyncadd [#allocation4 + $0x1], 4294967200 }
 0x553   :  { %4631 = dma.done.wait [#allocation4], 64 }
 0x554   :  { %4632 = vsyncadd [#allocation4], 4294967232 }
 0x555   :  { %4633 = dma.done.wait [#allocation4 + $0x1], 96 }
 0x556   :  { %4634 = vsyncadd [#allocation4 + $0x1], 4294967200  ;;  %v2490_v32 = vld [vmem:[#allocation2] sm:$0xff]  ;;  %v2491_v33 = vld [vmem:[#allocation2 + $0x8] sm:$0xff]  ;;  %vm2517_vm0 = vcmask 7168   ;;  %s4591_s17 = scalar_lea.hbm %s5555_s4, 16 }
 0x557   :  { %v2493_v34 = vld [vmem:[#allocation2 + $0x10] sm:$0xff]  ;;  %v2492_v35 = vadd.f32 %v2491_v33, %v2490_v32  ;;  %v2495_v36 = vld [vmem:[#allocation2 + $0x18] sm:$0xff]  ;;  %v2529_v40 = vld [vmem:[#allocation3 + $0x8] sm:$0xff]  ;;  %p4592_p12 = scmp.ne.s32.totalorder %s5555_s4, %s4591_s17  ;;  %p4595_p13 = scmp.lt.u32.totalorder %s4591_s17, %s5555_s4 }
 0x558   :  { %v2560_v39 = vld [vmem:[#allocation3 + $0x10] sm:$0xff]  ;;  %v2591_v42 = vld [vmem:[#allocation3 + $0x18] sm:$0xff]  ;;  %v2498_v43 = vld [vmem:[#allocation3] sm:$0xff] }
 0x559   :  { %v2494_v37 = vadd.f32 %v2493_v34, %v2492_v35  ;;  %v2653_v48 = vld [vmem:[#allocation3 + $0x28] sm:$0xff]  ;;  %v2622_v49 = vld [vmem:[#allocation3 + $0x20] sm:$0xff]  ;;  %p4597_p0 = pnand %p4595_p13, %p4592_p12 }
 0x55b   :  { %v2496_v38 = vadd.f32 %v2495_v36, %v2494_v37 }
 0x55d   :  { %v2497_v41 = vmul.f32 0.25, %v2496_v38 }
 0x55f   :  { %v2561_v44 = vmul.f32 %v2560_v39, %v2497_v41  ;;  %v2530_v45 = vmul.f32 %v2529_v40, %v2497_v41  ;;  %v2592_v46 = vmul.f32 %v2591_v42, %v2497_v41  ;;  %v2499_v47 = vmul.f32 %v2498_v43, %v2497_v41 }
 0x560   :  { %v2654_v50 = vmul.f32 %v2653_v48, %v2497_v41  ;;  %v2623_v51 = vmul.f32 %v2622_v49, %v2497_v41 }
 0x561   :  { %2562 = vadd.xlane.f32.xlu1 %v2561_v44  ;;  %2531 = vadd.xlane.f32.xlu0 %v2530_v45 }
 0x565   :  { %2593 = vadd.xlane.f32.xlu1 %v2592_v46  ;;  %2500 = vadd.xlane.f32.xlu0 %v2499_v47 }
 0x569   :  { %2655 = vadd.xlane.f32.xlu1 %v2654_v50  ;;  %2624 = vadd.xlane.f32.xlu0 %v2623_v51 }
 0x5ee   :  { %v5498_v52 = vpop.xlane.xlu1 %2562  ;;  %v5500_v53 = vpop.xlane.xlu0 %2531 }
 0x5ef   :  { %v2564_v54 = vsub.f32 0.0, %v5498_v52  ;;  %v2533_v55 = vsub.f32 0.0, %v5500_v53 }
 0x5f1   :  { %v2566_v56 = vand.u32 2147483647, %v2564_v54  ;;  %v2535_v57 = vand.u32 2147483647, %v2533_v55  ;;  %v2565_v38 = vmin.f32 %v2564_v54, 0.0  ;;  %v2534_v39 = vmin.f32 %v2533_v55, 0.0 }
 0x5f2   :  { %v2594_v58 = vpop.xlane.xlu1 %2593  ;;  %v5504_v59 = vpop.xlane.xlu0 %2500 }
 0x5f3   :  { %v2567_v60 = vsub.f32 0.0, %v2566_v56  ;;  %v2536_v61 = vsub.f32 0.0, %v2535_v57  ;;  %v2595_v62 = vsub.f32 0.0, %v2594_v58  ;;  %v2503_v63 = vand.u32 2147483647, %v5504_v59 }
 0x5f4   :  { %v2502_v44 = vmin.f32 %v5504_v59, 0.0 }
 0x5f5   :  { %v2568_v0 = vmul.f32 1.442695, %v2567_v60  ;;  %v2537_v1 = vmul.f32 1.442695, %v2536_v61  ;;  %v2597_v2 = vand.u32 2147483647, %v2595_v62 }
 0x5f6   :  { %v2504_v3 = vsub.f32 0.0, %v2503_v63  ;;  %v5507_v4 = vpop.xlane.xlu1 %2655  ;;  %v5509_v5 = vpop.xlane.xlu0 %2624  ;;  %v2596_v43 = vmin.f32 %v2595_v62, 0.0 }
 0x5f7   :  { %3391 = vpow2.f32 %v2568_v0  ;;  %v2657_v6 = vsub.f32 0.0, %v5507_v4  ;;  %v2626_v7 = vsub.f32 0.0, %v5509_v5  ;;  %v2598_v8 = vsub.f32 0.0, %v2597_v2 }
 0x5f8   :  { %3393 = vpow2.f32 %v2537_v1  ;;  %v2505_v9 = vmul.f32 1.442695, %v2504_v3 }
 0x5f9   :  { %v2659_v10 = vand.u32 2147483647, %v2657_v6  ;;  %v2628_v11 = vand.u32 2147483647, %v2626_v7  ;;  %v2599_v12 = vmul.f32 1.442695, %v2598_v8 }
 0x5fa   :  { %3395 = vpow2.f32 %v2505_v9 }
 0x5fb   :  { %v2660_v13 = vsub.f32 0.0, %v2659_v10  ;;  %v2629_v14 = vsub.f32 0.0, %v2628_v11  ;;  %3397 = vpow2.f32 %v2599_v12 }
 0x5fd   :  { %v2661_v15 = vmul.f32 1.442695, %v2660_v13  ;;  %v2630_v16 = vmul.f32 1.442695, %v2629_v14 }
 0x5ff   :  { %3399 = vpow2.f32 %v2661_v15 }
 0x600   :  { %3401 = vpow2.f32 %v2630_v16 }
 0x601   :  { %v3392_v17 = vpop.eup %3391 }
 0x602   :  { %v3394_v18 = vpop.eup %3393  ;;  %v2570_v19 = vadd.f32 1.0, %v3392_v17  ;;  %v2573_v27 = vmul.f32 -0.5, %v3392_v17  ;;  %v2576_v36 = vand.u32 2147483647, %v3392_v17 }
 0x603   :  { %v2539_v20 = vadd.f32 1.0, %v3394_v18  ;;  %v2542_v25 = vmul.f32 -0.5, %v3394_v18  ;;  %v2545_v34 = vand.u32 2147483647, %v3394_v18 }
 0x604   :  { %v3396_v21 = vpop.eup %3395  ;;  %3403 = vlog2.f32 %v2570_v19  ;;  %v2574_v35 = vadd.f32 1.0, %v2573_v27  ;;  %vm5522_vm2 = vcmp.lt.f32.partialorder %v2576_v36, 0.0004427343 }
 0x605   :  { %3405 = vlog2.f32 %v2539_v20  ;;  %v2507_v22 = vadd.f32 1.0, %v3396_v21  ;;  %v3398_v23 = vpop.eup %3397  ;;  %v2510_v29 = vmul.f32 -0.5, %v3396_v21  ;;  %v2543_v33 = vadd.f32 1.0, %v2542_v25 }
 0x606   :  { %v2601_v24 = vadd.f32 1.0, %v3398_v23  ;;  %v2604_v31 = vmul.f32 -0.5, %v3398_v23  ;;  %v2513_v45 = vand.u32 2147483647, %v3396_v21  ;;  %vm2546_vm1 = vcmp.lt.f32.partialorder %v2545_v34, 0.0004427343 }
 0x607   :  { %3407 = vlog2.f32 %v2507_v22  ;;  %v2511_v40 = vadd.f32 1.0, %v2510_v29  ;;  %v2544_v48 = vmul.f32 %v3394_v18, %v2543_v33  ;;  %v2607_v52 = vand.u32 2147483647, %v3398_v23 }
 0x608   :  { %3409 = vlog2.f32 %v2601_v24  ;;  %v2605_v46 = vadd.f32 1.0, %v2604_v31  ;;  %v2575_v53 = vmul.f32 %v3392_v17, %v2574_v35  ;;  %vm2514_vm3 = vcmp.lt.f32.partialorder %v2513_v45, 0.0004427343 }
 0x609   :  { %v3400_v26 = vpop.eup %3399  ;;  %v2512_v57 = vmul.f32 %v3396_v21, %v2511_v40  ;;  %vm2608_vm4 = vcmp.lt.f32.partialorder %v2607_v52, 0.0004427343  ;;  %v2658_v18 = vmin.f32 %v2657_v6, 0.0  ;;  %v2627_v21 = vmin.f32 %v2626_v7, 0.0 }
 0x60a   :  { %v5517_v28 = vpop.eup %3401  ;;  %v2663_v30 = vadd.f32 1.0, %v3400_v26  ;;  %v2666_v41 = vmul.f32 -0.5, %v3400_v26  ;;  %v2606_v61 = vmul.f32 %v3398_v23, %v2605_v46  ;;  %v2669_v62 = vand.u32 2147483647, %v3400_v26 }
 0x60b   :  { %v2632_v32 = vadd.f32 1.0, %v5517_v28  ;;  %v2635_v50 = vmul.f32 -0.5, %v5517_v28  ;;  %v2638_v9 = vand.u32 2147483647, %v5517_v28 }
 0x60c   :  { %3411 = vlog2.f32 %v2663_v30  ;;  %v2667_v58 = vadd.f32 1.0, %v2666_v41  ;;  %vm2670_vm5 = vcmp.lt.f32.partialorder %v2669_v62, 0.0004427343 }
 0x60d   :  { %3413 = vlog2.f32 %v2632_v32  ;;  %v2636_v2 = vadd.f32 1.0, %v2635_v50  ;;  %vm2639_vm6 = vcmp.lt.f32.partialorder %v2638_v9, 0.0004427343 }
 0x60e   :  { %v3404_v37 = vpop.eup %3403  ;;  %v2668_v12 = vmul.f32 %v3400_v26, %v2667_v58 }
 0x60f   :  { %v3406_v42 = vpop.eup %3405  ;;  %v2572_v49 = vmul.f32 0.6931472, %v3404_v37  ;;  %v2637_v20 = vmul.f32 %v5517_v28, %v2636_v2 }
 0x610   :  { %v2541_v47 = vmul.f32 0.6931472, %v3406_v42 }
 0x611   :  { %v3408_v51 = vpop.eup %3407  ;;  %v2578_v1 = vsel %vm5522_vm2, %v2575_v53, %v2572_v49 }
 0x612   :  { %v2547_v55 = vsel %vm2546_vm1, %v2544_v48, %v2541_v47  ;;  %v2509_v56 = vmul.f32 0.6931472, %v3408_v51  ;;  %v3410_v59 = vpop.eup %3409  ;;  %v2579_v16 = vsub.f32 %v2565_v38, %v2578_v1 }
 0x613   :  { %v2548_v60 = vsub.f32 %v2534_v39, %v2547_v55  ;;  %v2603_v0 = vmul.f32 0.6931472, %v3410_v59 }
 0x614   :  { %v2515_v63 = vsel %vm2514_vm3, %v2512_v57, %v2509_v56  ;;  %v2580_v26 = vsel %vm2517_vm0, %v2579_v16, 0.0 }
 0x615   :  { %v2549_v3 = vsel %vm2517_vm0, %v2548_v60, 0.0  ;;  %v2516_v8 = vsub.f32 %v2502_v44, %v2515_v63  ;;  %v2609_v11 = vsel %vm2608_vm4, %v2606_v61, %v2603_v0 }
 0x616   :  { %v3412_v10 = vpop.eup %3411  ;;  %2550 = vadd.xlane.f32.xlu1 %v2549_v3  ;;  %v2610_v15 = vsub.f32 %v2596_v43, %v2609_v11 }
 0x617   :  { %v3414_v13 = vpop.eup %3413  ;;  %v2518_v14 = vsel %vm2517_vm0, %v2516_v8, 0.0  ;;  %v2665_v17 = vmul.f32 0.6931472, %v3412_v10 }
 0x618   :  { %2519 = vadd.xlane.f32.xlu0 %v2518_v14  ;;  %v2634_v19 = vmul.f32 0.6931472, %v3414_v13  ;;  %v2611_v22 = vsel %vm2517_vm0, %v2610_v15, 0.0 }
 0x619   :  { %v2671_v23 = vsel %vm2670_vm5, %v2668_v12, %v2665_v17 }
 0x61a   :  { %2612 = vadd.xlane.f32.xlu1 %v2611_v22  ;;  %v2672_v24 = vsub.f32 %v2658_v18, %v2671_v23  ;;  %v2640_v25 = vsel %vm2639_vm6, %v2637_v20, %v2634_v19 }
 0x61b   :  { %v2641_v27 = vsub.f32 %v2627_v21, %v2640_v25 }
 0x61c   :  { %2581 = vadd.xlane.f32.xlu0 %v2580_v26  ;;  %v2673_v4 = vsel %vm2517_vm0, %v2672_v24, 0.0 }
 0x61d   :  { %v2642_v6 = vsel %vm2517_vm0, %v2641_v27, 0.0 }
 0x61e   :  { %2674 = vadd.xlane.f32.xlu1 %v2673_v4 }
 0x620   :  { %2643 = vadd.xlane.f32.xlu0 %v2642_v6 }
 0x6a3   :  { %v2551_v28 = vpop.xlane.xlu1 %2550 }
 0x6a4   :  { %v2552_v5 = vrot.slane %v2551_v28, 4 }
 0x6a5   :  { %v2520_v7 = vpop.xlane.xlu0 %2519 }
 0x6a6   :  { %v2553_v29 = vadd.f32 %v2552_v5, %v2551_v28  ;;  %v2521_v30 = vrot.slane %v2520_v7, 4 }
 0x6a7   :  { %v2613_v31 = vpop.xlane.xlu1 %2612 }
 0x6a8   :  { %v2554_v32 = vrot.slane %v2553_v29, 2  ;;  %v2522_v33 = vadd.f32 %v2521_v30, %v2520_v7  ;;  %v2614_v34 = vrot.slane %v2613_v31, 4 }
 0x6a9   :  { %v2582_v35 = vpop.xlane.xlu0 %2581 }
 0x6aa   :  { %v2523_v36 = vrot.slane %v2522_v33, 2  ;;  %v2615_v37 = vadd.f32 %v2614_v34, %v2613_v31  ;;  %v2583_v38 = vrot.slane %v2582_v35, 4  ;;  %v2555_v39 = vadd.f32 %v2554_v32, %v2553_v29 }
 0x6ab   :  { %v2675_v40 = vpop.xlane.xlu1 %2674 }
 0x6ac   :  { %v2616_v41 = vrot.slane %v2615_v37, 2  ;;  %v2584_v42 = vadd.f32 %v2583_v38, %v2582_v35  ;;  %v2676_v43 = vrot.slane %v2675_v40, 4  ;;  %v2524_v44 = vadd.f32 %v2523_v36, %v2522_v33 }
 0x6ad   :  { %v2644_v45 = vpop.xlane.xlu0 %2643  ;;  %v2556_v46 = vrot.slane %v2555_v39, 1 }
 0x6ae   :  { %v2585_v47 = vrot.slane %v2584_v42, 2  ;;  %v2677_v48 = vadd.f32 %v2676_v43, %v2675_v40  ;;  %v2645_v49 = vrot.slane %v2644_v45, 4  ;;  %v2525_v50 = vrot.slane %v2524_v44, 1 }
 0x6af   :  { %v2617_v51 = vadd.f32 %v2616_v41, %v2615_v37  ;;  %v2557_v56 = vadd.f32 %v2556_v46, %v2555_v39 }
 0x6b0   :  { %v2678_v52 = vrot.slane %v2677_v48, 2  ;;  %v2646_v53 = vadd.f32 %v2645_v49, %v2644_v45  ;;  %v2526_v54 = vadd.f32 %v2525_v50, %v2524_v44  ;;  %v2586_v55 = vadd.f32 %v2585_v47, %v2584_v42 }
 0x6b1   :  { %v2618_v57 = vrot.slane %v2617_v51, 1 }
 0x6b2   :  { %v2679_v58 = vadd.f32 %v2678_v52, %v2677_v48  ;;  %v2647_v59 = vrot.slane %v2646_v53, 2  ;;  %3328 = vpush %v2526_v54  ;;  %v2587_v60 = vrot.slane %v2586_v55, 1 }
 0x6b3   :  { %3330 = vpush %v2557_v56  ;;  %v2619_v63 = vadd.f32 %v2618_v57, %v2617_v51 }
 0x6b4   :  { %v2648_v61 = vadd.f32 %v2647_v59, %v2646_v53  ;;  %v2588_v62 = vadd.f32 %v2587_v60, %v2586_v55  ;;  %v2680_v0 = vrot.slane %v2679_v58, 1 }
 0x6b6   :  { %3332 = vpush %v2588_v62  ;;  %v2649_v1 = vrot.slane %v2648_v61, 1  ;;  %v2681_v3 = vadd.f32 %v2680_v0, %v2679_v58 }
 0x6b7   :  { %3334 = vpush %v2619_v63 }
 0x6b8   :  { %v2650_v2 = vadd.f32 %v2649_v1, %v2648_v61 }
 0x6ba   :  { %3336 = vpush %v2650_v2 }
 0x6bb   :  { %3338 = vpush %v2681_v3 }
 0x6e3   :  { %s3329_s3 = spop %3328 }
 0x6e4   :  { %s3331_s15 = spop %3330 }
 0x6e5   :  { %s2559_s29 = sadd.f32 %s3331_s15, %s3329_s3 }
 0x6e7   :  { %s3333_s7 = spop %3332 }
 0x6e8   :  { %s2590_s26 = sadd.f32 %s3333_s7, %s2559_s29  ;;  %s3335_s23 = spop %3334 }
 0x6ea   :  { %s2621_s6 = sadd.f32 %s3335_s23, %s2590_s26 }
 0x6eb   :  { %s3337_s16 = spop %3336 }
 0x6ec   :  { %s2652_s1 = sadd.f32 %s3337_s16, %s2621_s6  ;;  %s3339_s28 = spop %3338 }
 0x6ee   :  { %s2683_s19 = sadd.f32 %s3339_s28, %s2652_s1 }
 0x6f0   :  { %s2692_s21 = smul.f32 -0.125, %s2683_s19 }
 0x6f2   :  { %2694 = sst [smem:[#allocation9]] %s2692_s21 }
 0x6f3   :  { %4600 = shalt.err (!%p4597_p0)
}
 0x6f4   :  { %s4687_s22 = smov [#allocation9]  }
 0x6f5   :  { %2702 = dma.smem_to_hbm %s4687_s22, 16, %s5555_s4, [#allocation10]  }
 0x6f6   :  { %4635 = dma.done.wait [#allocation10], 16  }
 0x6f7   :  { %4636 = vsyncadd [#allocation10], 4294967280 }
 0x6f8   :  { %2706 = sfence }
 0x6f9   :  { %2707 = vsyncpa [#allocation10], 1 }
 0x6fa   :  { %2708 = vsyncmov [#allocation4] }
 0x6fd   :  { %s2709_s12 = vpop.sfrf %2708 }
 0x6fe   :  { %p3326_p1 = scmp.ne.s32.totalorder %s2709_s12, 0 }
 0x700   :  { %2713 = shalt.err (%p3326_p1)  }
 0x701   :  { %2715 = vsyncmov [#allocation4 + $0x1] }
 0x704   :  { %s2716_s5 = vpop.sfrf %2715 }
 0x705   :  { %p3327_p2 = scmp.ne.s32.totalorder %s2716_s5, 0 }
 0x707   :  { %2720 = shalt.err (%p3327_p2)  }

</bundles_post_ra>
